<compile_context>
chip_gen: v5e
topology: v5e:2x2
jax: 0.10.0
libtpu: 0.0.40
codegen_flags: <defaults>
</compile_context>

<pallas_src>
import functools

import jax
import jax.numpy as jnp
from jax import lax
from jax.experimental import pallas as pl
from jax.experimental.pallas import tpu as pltpu

EPS = 1e-5


# --------------------------------------------------------------------------- #
# VMEM budgeting (generation aware, (8,128)-padding aware)
# --------------------------------------------------------------------------- #

@functools.lru_cache(maxsize=None)
def _vmem_config():
    """Returns (vmem_limit_bytes, per-grid-step tile budget), generation aware."""
    cap = 64 * 1024 * 1024                       # conservative default (v7x-class)
    try:
        cap = int(pltpu.get_tpu_info().vmem_capacity_bytes)
    except Exception:
        pass
    if cap >= 96 * 1024 * 1024:                  # v5e / v6e: 128 MiB physical VMEM
        return 100 * 1024 * 1024, 14 * 1024 * 1024
    # v7x: 64 MiB physical VMEM per TensorCore -- keep headroom for the
    # compiler's own scratch and the double-buffered pipeline.
    return 52 * 1024 * 1024, 7 * 1024 * 1024


def _round_up(x, m):
    return (x + m - 1) // m * m


def _padded_bytes(shape, dtype):
    """(8,128)-tile-padded VMEM bytes of a block (sub-32-bit packs along sublanes)."""
    item = jnp.dtype(dtype).itemsize
    sub = 8 * max(1, 4 // item)                  # f32: 8, bf16: 16 sublanes / tile
    shape = tuple(int(d) for d in shape)
    if len(shape) < 2:
        shape = (1,) * (2 - len(shape)) + shape
    lead = 1
    for d in shape[:-2]:
        lead *= d
    return lead * _round_up(shape[-2], sub) * _round_up(shape[-1], 128) * item


def _conv_step_bytes(th, W, Cin, Cout):
    """Per-grid-step VMEM footprint of the conv kernel (incl. double buffering,
    the padded-window scratch and the main in-kernel temporaries)."""
    bf, f32 = jnp.bfloat16, jnp.float32
    db = 2                                        # BlockSpec double buffering
    need = 0
    need += db * _padded_bytes((th, W, Cin), bf)          # mid row tile
    need += db * 2 * _padded_bytes((1, W, Cin), bf)       # top / bottom halo rows
    need += db * 2 * _padded_bytes((1, Cin), f32)         # fused BN scale / shift
    need += db * _padded_bytes((9, Cin, Cout), bf)        # weights
    need += db * _padded_bytes((1, Cout), f32)            # bias
    need += db * _padded_bytes((th, W, Cout), bf)         # y tile (bf16 out)
    need += db * 2 * _padded_bytes((1, Cout), f32)        # psum / psumsq
    need += _padded_bytes((th + 2, W + 2, Cin), bf)       # padded-window scratch
    # live in-kernel temporaries: f32 accumulator, prepped rows, a few tap views
    need += _padded_bytes((th * W, Cout), f32)
    need += _padded_bytes((th, W, Cin), f32)
    need += 3 * _padded_bytes((th * W, Cin), bf)
    return need


def _pick_row_tile(H, W, Cin, Cout, budget):
    """Largest row tile TH dividing H whose padded per-step footprint fits budget.
    Mild preference for TH*W that is a multiple of the 256-wide MXU M granule."""
    # TODO(synk): a prime / awkward H degrades to TH=1 (perf cliff, not a wrong
    # answer); ragged last tiles are not implemented.
    divs = [th for th in range(1, H + 1) if H % th == 0]
    fits = [th for th in divs if _conv_step_bytes(th, W, Cin, Cout) <= budget]
    if not fits:
        return 1
    best = max(fits)
    gran = [th for th in fits if (th * W) % 256 == 0]
    if gran and 2 * max(gran) >= best:
        best = max(gran)
    return best


def _pick_flat_rows(rows, cols, budget):
    """Row tile for the flattened lane-dense elementwise pass (bf16 in, f32 out)."""
    cands = [r for r in range(1, rows + 1)
             if rows % r == 0 and (r % 16 == 0 or r == rows)]

    def need(r):
        return (2 * _padded_bytes((r, cols), jnp.bfloat16)     # input, double buffered
                + 2 * _padded_bytes((r, cols), jnp.float32)    # output, double buffered
                + 4 * _padded_bytes((1, cols), jnp.float32)    # scale / shift
                + 2 * _padded_bytes((r, cols), jnp.float32))   # in-kernel f32 temps

    fits = [r for r in cands if need(r) <= budget]
    if not fits:
        return min(cands)
    best = max(fits)
    two = [r for r in fits if rows // r >= 2]    # keep both v7x TCs / pipeline busy
    if two:
        best = max(two)
    return best


# --------------------------------------------------------------------------- #
# Conv3x3(+fused previous BN/ReLU) kernel with streamed BN statistics
# --------------------------------------------------------------------------- #

def _conv_block_kernel(*refs, TH, W, Cin, Cout, pre_affine):
    """[optional fused BN+ReLU of previous block] -> Conv3x3(pad=1)+bias, plus
    streamed per-tile BatchNorm partial statistics of the conv output.

    Refs (in order):
      top, mid, bot : activation row tile + 1-row halos        (1|TH, W, Cin) bf16
      [scale,shift] : BN+ReLU affine of the previous block     (1, Cin) f32 (pre_affine)
      w             : conv weights, one (Cin,Cout) mat per tap (9, Cin, Cout) bf16
      b             : conv bias                                (1, Cout) f32
      y             : conv output tile, pre-BN                 (TH, W, Cout) bf16
      psum, psumsq  : per-tile partial BN statistics           (1, Cout) f32
      xpad          : persistent padded-window VMEM scratch    (TH+2, W+2, Cin) bf16
    """
    if pre_affine:
        (top_ref, mid_ref, bot_ref, scale_ref, shift_ref, w_ref, b_ref,
         y_ref, psum_ref, psumsq_ref, xpad_ref) = refs
    else:
        (top_ref, mid_ref, bot_ref, w_ref, b_ref,
         y_ref, psum_ref, psumsq_ref, xpad_ref) = refs
        scale_ref = shift_ref = None

    i = pl.program_id(1)
    last = pl.num_programs(1) - 1

    def prep(v):
        # BatchNorm (affine form) + ReLU of the previous conv, applied on the
        # fly to each loaded tile: the normalized activation never makes an
        # extra HBM round trip.  BN math in f32, MXU operands in bf16.
        if pre_affine:
            v = jnp.maximum(v.astype(jnp.float32) * scale_ref[...] + shift_ref[...], 0.0)
        return v.astype(jnp.bfloat16)

    zero_col = jnp.zeros((TH + 2, 1, Cin), jnp.bfloat16)
    zero_row = jnp.zeros((1, W, Cin), jnp.bfloat16)

    # Build the zero-padded (TH+2, W+2, Cin) conv window directly in the VMEM
    # scratch (no jnp.concatenate materializations).  Border columns are always
    # zero; the halo rows are zero only at the image top/bottom edge, exactly
    # like padding the post-BN/ReLU activation in the PyTorch module.
    xpad_ref[:, 0:1, :] = zero_col
    xpad_ref[:, W + 1:W + 2, :] = zero_col
    xpad_ref[1:TH + 1, 1:W + 1, :] = prep(mid_ref[...])

    @pl.when(i == 0)
    def _():                                    # image top edge -> zero padding
        xpad_ref[0:1, 1:W + 1, :] = zero_row

    @pl.when(i > 0)
    def _():                                    # interior: halo row from tile above
        xpad_ref[0:1, 1:W + 1, :] = prep(top_ref[...])

    @pl.when(i == last)
    def _():                                    # image bottom edge -> zero padding
        xpad_ref[TH + 1:TH + 2, 1:W + 1, :] = zero_row

    @pl.when(i < last)
    def _():                                    # interior: halo row from tile below
        xpad_ref[TH + 1:TH + 2, 1:W + 1, :] = prep(bot_ref[...])

    # 3x3 conv as nine accumulated (TH*W, Cin) @ (Cin, Cout) bf16 MXU matmuls
    # into a single f32 accumulator -- no materialized im2col patch.
    acc = jnp.zeros((TH * W, Cout), jnp.float32)
    t = 0
    for ky in range(3):
        for kx in range(3):
            tap = xpad_ref[ky:ky + TH, kx:kx + W, :].reshape(TH * W, Cin)
            acc = acc + jnp.dot(tap, w_ref[t], preferred_element_type=jnp.float32)
            t += 1
    acc = acc + b_ref[...]                                   # (TH*W, Cout) f32

    y_ref[...] = acc.reshape(TH, W, Cout).astype(y_ref.dtype)

    # Streamed training-mode BatchNorm statistics (finalized in O(C) JAX glue).
    # Note: E[x^2]-E[x]^2 in f32 can cancel for very large images; fine at
    # DoubleConv scales and clamped in the finalize step.
    psum_ref[...] = jnp.sum(acc, axis=0, keepdims=True)
    psumsq_ref[...] = jnp.sum(acc * acc, axis=0, keepdims=True)


def _conv_pass(x, w, b, pre_scale=None, pre_shift=None):
    """Conv3x3(pad=1)+bias over NHWC bf16 `x`, optionally fusing the previous
    block's BN+ReLU into the input path.  Returns (y_bf16, psum, psumsq)."""
    N, H, W, Cin = x.shape
    Cout = w.shape[-1]
    vmem_limit, tile_budget = _vmem_config()

    TH = _pick_row_tile(H, W, Cin, Cout, tile_budget)
    nT = H // TH
    if N * nT < 2:
        # Guarantee >= 2 grid steps so the software pipeline overlaps and both
        # v7x TensorCores get work even at batch 1.
        for th in range(H // 2, 0, -1):
            if H % th == 0:
                TH, nT = th, H // th
                break
    pre = pre_scale is not None

    kernel = functools.partial(_conv_block_kernel, TH=TH, W=W, Cin=Cin,
                               Cout=Cout, pre_affine=pre)

    # Activation row tile + two clamped 1-row halo views of the same array
    # (tiny extra DMA; avoids a padded HBM copy of the whole tensor).
    act_top = pl.BlockSpec((None, 1, W, Cin),
                           lambda n, i: (n, jnp.maximum(i * TH - 1, 0), 0, 0))
    act_mid = pl.BlockSpec((None, TH, W, Cin), lambda n, i: (n, i, 0, 0))
    act_bot = pl.BlockSpec((None, 1, W, Cin),
                           lambda n, i: (n, jnp.minimum(i * TH + TH, H - 1), 0, 0))

    in_specs = [act_top, act_mid, act_bot]
    args = [x, x, x]
    if pre:
        in_specs += [pl.BlockSpec((1, Cin), lambda n, i: (0, 0)),
                     pl.BlockSpec((1, Cin), lambda n, i: (0, 0))]
        args += [pre_scale, pre_shift]
    # Weights/bias stay VMEM-resident across the whole grid (constant block).
    in_specs += [pl.BlockSpec((9, Cin, Cout), lambda n, i: (0, 0, 0)),
                 pl.BlockSpec((1, Cout), lambda n, i: (0, 0))]
    args += [w.reshape(9, Cin, Cout).astype(jnp.bfloat16),
             b.reshape(1, Cout).astype(jnp.float32)]

    out_shape = [jax.ShapeDtypeStruct((N, H, W, Cout), jnp.bfloat16),   # bf16 intermediate
                 jax.ShapeDtypeStruct((N, nT, 1, Cout), jnp.float32),
                 jax.ShapeDtypeStruct((N, nT, 1, Cout), jnp.float32)]
    out_specs = [pl.BlockSpec((None, TH, W, Cout), lambda n, i: (n, i, 0, 0)),
                 pl.BlockSpec((None, None, 1, Cout), lambda n, i: (n, i, 0, 0)),
                 pl.BlockSpec((None, None, 1, Cout), lambda n, i: (n, i, 0, 0))]

    y, psum, psumsq = pl.pallas_call(
        kernel,
        grid=(N, nT),
        in_specs=in_specs,
        out_specs=out_specs,
        out_shape=out_shape,
        scratch_shapes=[pltpu.VMEM((TH + 2, W + 2, Cin), jnp.bfloat16)],
        compiler_params=pltpu.CompilerParams(
            dimension_semantics=("parallel", "parallel"),
            vmem_limit_bytes=vmem_limit),
    )(*args)
    return y, psum, psumsq


# --------------------------------------------------------------------------- #
# BatchNorm finalize (O(C) glue) + lane-dense BN/ReLU tail pass
# --------------------------------------------------------------------------- #

def _bn_affine(psum, psumsq, count, gamma, beta):
    """Finalize streamed BN stats into a fused per-channel scale/shift."""
    s = jnp.sum(psum, axis=(0, 1, 2))
    ss = jnp.sum(psumsq, axis=(0, 1, 2))
    mean = s / count
    var = jnp.maximum(ss / count - mean * mean, 0.0)   # biased (training-mode) variance
    inv_std = lax.rsqrt(var + EPS)
    scale = gamma * inv_std
    shift = beta - mean * scale
    return (scale.reshape(1, -1).astype(jnp.float32),
            shift.reshape(1, -1).astype(jnp.float32))


def _bn_relu_kernel(y_ref, scale_ref, shift_ref, o_ref):
    y = y_ref[...].astype(jnp.float32)
    o_ref[...] = jnp.maximum(y * scale_ref[...] + shift_ref[...], 0.0).astype(o_ref.dtype)


def _bn_relu(y, scale, shift):
    """Final BatchNorm (affine form) + ReLU over the bf16 conv2 output.

    Runs on a lane-dense flattened (N*H, W*C) view: the last dim is W*C (a large
    multiple of 128 at realistic sizes, exactly 128 in the toy test), so stores
    are full-width vst instead of masked partial stores even when C << 128."""
    N, H, W, C = y.shape
    rows, cols = N * H, W * C
    vmem_limit, tile_budget = _vmem_config()

    y_flat = y.reshape(rows, cols)
    # Per-lane affine matching the flattened (w, c) order: scale repeated W times.
    scale_f = jnp.tile(scale.reshape(1, C), (1, W))
    shift_f = jnp.tile(shift.reshape(1, C), (1, W))

    TR = _pick_flat_rows(rows, cols, tile_budget)
    nR = rows // TR

    out = pl.pallas_call(
        _bn_relu_kernel,
        grid=(nR,),
        in_specs=[pl.BlockSpec((TR, cols), lambda r: (r, 0)),
                  pl.BlockSpec((1, cols), lambda r: (0, 0)),
                  pl.BlockSpec((1, cols), lambda r: (0, 0))],
        out_specs=pl.BlockSpec((TR, cols), lambda r: (r, 0)),
        out_shape=jax.ShapeDtypeStruct((rows, cols), jnp.float32),
        compiler_params=pltpu.CompilerParams(
            dimension_semantics=("parallel",),
            vmem_limit_bytes=vmem_limit),
    )(y_flat, scale_f, shift_f)
    return out.reshape(N, H, W, C)


# --------------------------------------------------------------------------- #
# Public forward + reference
# --------------------------------------------------------------------------- #

def double_conv(x_nchw, params):
    """DoubleConv forward: (N, Cin, H, W) -> (N, Cout, H, W), training-mode BN."""
    # NCHW -> NHWC; bf16 activations on the HBM-bound path (BN math stays f32).
    x = jnp.transpose(x_nchw, (0, 2, 3, 1)).astype(jnp.bfloat16)
    N, H, W, _ = x.shape
    count = N * H * W

    # Conv1 (+bias) with streamed BN1 statistics.
    y1, s1, ss1 = _conv_pass(x, params["w1"], params["b1"])
    scale1, shift1 = _bn_affine(s1, ss1, count, params["gamma1"], params["beta1"])

    # BN1+ReLU1 fused into Conv2's input path; streamed BN2 statistics.
    y2, s2, ss2 = _conv_pass(y1, params["w2"], params["b2"],
                             pre_scale=scale1, pre_shift=shift1)
    scale2, shift2 = _bn_affine(s2, ss2, count, params["gamma2"], params["beta2"])

    # Final BN2 + ReLU2 (lane-dense flat pass), then NHWC -> NCHW.
    out = _bn_relu(y2, scale2, shift2)
    # TODO(synk): nn.BatchNorm2d also updates running_mean/running_var in
    # training mode; those buffers do not affect this forward output and are
    # not materialized here.
    return jnp.transpose(out, (0, 3, 1, 2))


def init_params(key, in_channels, out_channels):
    ks = jax.random.split(key, 8)
    return {
        "w1": 0.1 * jax.random.normal(ks[0], (3, 3, in_channels, out_channels), jnp.float32),
        "b1": 0.05 * jax.random.normal(ks[1], (out_channels,), jnp.float32),
        "gamma1": 1.0 + 0.1 * jax.random.normal(ks[2], (out_channels,), jnp.float32),
        "beta1": 0.05 * jax.random.normal(ks[3], (out_channels,), jnp.float32),
        "w2": 0.1 * jax.random.normal(ks[4], (3, 3, out_channels, out_channels), jnp.float32),
        "b2": 0.05 * jax.random.normal(ks[5], (out_channels,), jnp.float32),
        "gamma2": 1.0 + 0.1 * jax.random.normal(ks[6], (out_channels,), jnp.float32),
        "beta2": 0.05 * jax.random.normal(ks[7], (out_channels,), jnp.float32),
    }


def _reference(x_nchw, params):
    """Pure-JAX f32 reference matching the PyTorch module (training-mode BN)."""
    x = jnp.transpose(x_nchw, (0, 2, 3, 1)).astype(jnp.float32)

    def block(h, w, b, gamma, beta):
        y = lax.conv_general_dilated(h, w, (1, 1), "SAME",
                                     dimension_numbers=("NHWC", "HWIO", "NHWC")) + b
        mean = jnp.mean(y, axis=(0, 1, 2))
        var = jnp.mean(jnp.square(y - mean), axis=(0, 1, 2))
        return jnp.maximum((y - mean) * lax.rsqrt(var + EPS) * gamma + beta, 0.0)

    h = block(x, params["w1"], params["b1"], params["gamma1"], params["beta1"])
    h = block(h, params["w2"], params["b2"], params["gamma2"], params["beta2"])
    return jnp.transpose(h, (0, 3, 1, 2))


if __name__ == "__main__":
    key = jax.random.PRNGKey(0)
    kx, kp = jax.random.split(key)

    N, Cin, H, W = 2, 4, 16, 16
    Cout = 8

    x = jax.random.normal(kx, (N, Cin, H, W), jnp.float32)
    params = init_params(kp, Cin, Cout)

    out = jax.block_until_ready(jax.jit(double_conv)(x, params))
    ref = jax.block_until_ready(jax.jit(_reference)(x, params))

    assert out.shape == (N, Cout, H, W), out.shape
    assert out.dtype == jnp.float32, out.dtype
    assert bool(jnp.all(jnp.isfinite(out)))
    assert bool(jnp.all(out >= 0.0))          # final ReLU
    max_err = float(jnp.max(jnp.abs(out - ref)))
    mean_err = float(jnp.mean(jnp.abs(out - ref)))
    # Loose tolerance: the input and inter-block intermediates are bf16 on the
    # HBM path and matmuls run on the MXU in bf16 (f32 accumulation); all
    # BatchNorm statistics / affine math stays f32.
    assert max_err < 2.5e-1 and mean_err < 4e-2, (max_err, mean_err)

    print("KERNEL_OK")
</pallas_src>

<mosaic_0001>
module attributes {stable_mosaic.version = 11 : i64} {
  func.func @_conv_block_kernel(%arg0: i32, %arg1: i32, %arg2: memref<1x1x16x4xbf16, #tpu.memory_space<vmem>>, %arg3: memref<1x16x16x4xbf16, #tpu.memory_space<vmem>>, %arg4: memref<1x1x16x4xbf16, #tpu.memory_space<vmem>>, %arg5: memref<9x4x8xbf16, #tpu.memory_space<vmem>>, %arg6: memref<1x8xf32, #tpu.memory_space<vmem>>, %arg7: memref<1x16x16x8xbf16, #tpu.memory_space<vmem>>, %arg8: memref<1x1x1x8xf32, #tpu.memory_space<vmem>>, %arg9: memref<1x1x1x8xf32, #tpu.memory_space<vmem>>, %arg10: memref<18x18x4xbf16, #tpu.memory_space<vmem>>) attributes {dimension_semantics = [#tpu.dimension_semantics<parallel>, #tpu.dimension_semantics<parallel>], iteration_bounds = array<i64: 2, 1>, scalar_prefetch = 0 : i64, scratch_operands = 1 : i64, tpu.core_type = #tpu.core_type<tc>, window_params = [{transform_indices = @transform_0, window_bounds = array<i64: 1, 1, 16, 4>}, {transform_indices = @transform_1, window_bounds = array<i64: 1, 16, 16, 4>}, {transform_indices = @transform_2, window_bounds = array<i64: 1, 1, 16, 4>}, {pipeline_mode = #tpu.pipeline_mode<synchronous>, transform_indices = @transform_3, window_bounds = array<i64: 9, 4, 8>}, {pipeline_mode = #tpu.pipeline_mode<synchronous>, transform_indices = @transform_4, window_bounds = array<i64: 1, 8>}, {transform_indices = @transform_5, window_bounds = array<i64: 1, 16, 16, 8>}, {transform_indices = @transform_6, window_bounds = array<i64: 1, 1, 1, 8>}, {transform_indices = @transform_7, window_bounds = array<i64: 1, 1, 1, 8>}]} {
    %cst = arith.constant 0.000000e+00 : bf16
    %0 = vector.broadcast %cst : bf16 to vector<18x1x4xbf16>
    %cst_0 = arith.constant 0.000000e+00 : bf16
    %1 = vector.broadcast %cst_0 : bf16 to vector<1x16x4xbf16>
    %c0 = arith.constant 0 : index
    %c0_1 = arith.constant 0 : index
    %c0_2 = arith.constant 0 : index
    %2 = vector.load %arg10[%c0, %c0_1, %c0_2] : memref<18x18x4xbf16, #tpu.memory_space<vmem>>, vector<18x1x4xbf16>
    tpu.vector_store %arg10[%c0, %c0_1, %c0_2], %0 {strides = array<i32>} : memref<18x18x4xbf16, #tpu.memory_space<vmem>>, vector<18x1x4xbf16>,
    %c0_3 = arith.constant 0 : index
    %c17 = arith.constant 17 : index
    %c0_4 = arith.constant 0 : index
    %3 = vector.load %arg10[%c0_3, %c17, %c0_4] : memref<18x18x4xbf16, #tpu.memory_space<vmem>>, vector<18x1x4xbf16>
    tpu.vector_store %arg10[%c0_3, %c17, %c0_4], %0 {strides = array<i32>} : memref<18x18x4xbf16, #tpu.memory_space<vmem>>, vector<18x1x4xbf16>,
    %c0_5 = arith.constant 0 : index
    %c0_6 = arith.constant 0 : index
    %c0_7 = arith.constant 0 : index
    %c0_8 = arith.constant 0 : index
    %4 = vector.load %arg3[%c0_5, %c0_6, %c0_7, %c0_8] : memref<1x16x16x4xbf16, #tpu.memory_space<vmem>>, vector<1x16x16x4xbf16>
    %5 = vector.shape_cast %4 : vector<1x16x16x4xbf16> to vector<16x16x4xbf16>
    %c1 = arith.constant 1 : index
    %c1_9 = arith.constant 1 : index
    %c0_10 = arith.constant 0 : index
    %6 = vector.load %arg10[%c1, %c1_9, %c0_10] : memref<18x18x4xbf16, #tpu.memory_space<vmem>>, vector<16x16x4xbf16>
    tpu.vector_store %arg10[%c1, %c1_9, %c0_10], %5 {strides = array<i32>} : memref<18x18x4xbf16, #tpu.memory_space<vmem>>, vector<16x16x4xbf16>,
    %c0_i32 = arith.constant 0 : i32
    %7 = arith.cmpi eq, %arg1, %c0_i32 : i32
    %8 = arith.extui %7 : i1 to i32
    %c0_i32_11 = arith.constant 0 : i32
    %9 = arith.cmpi ne, %8, %c0_i32_11 : i32
    scf.if %9 {
      %c0_91 = arith.constant 0 : index
      %c1_92 = arith.constant 1 : index
      %c0_93 = arith.constant 0 : index
      %93 = vector.load %arg10[%c0_91, %c1_92, %c0_93] : memref<18x18x4xbf16, #tpu.memory_space<vmem>>, vector<1x16x4xbf16>
      tpu.vector_store %arg10[%c0_91, %c1_92, %c0_93], %1 {strides = array<i32>} : memref<18x18x4xbf16, #tpu.memory_space<vmem>>, vector<1x16x4xbf16>,
    } else {
    }
    %c0_i32_12 = arith.constant 0 : i32
    %10 = arith.cmpi sgt, %arg1, %c0_i32_12 : i32
    %11 = arith.extui %10 : i1 to i32
    %c0_i32_13 = arith.constant 0 : i32
    %12 = arith.cmpi ne, %11, %c0_i32_13 : i32
    scf.if %12 {
      %c0_91 = arith.constant 0 : index
      %c0_92 = arith.constant 0 : index
      %c0_93 = arith.constant 0 : index
      %c0_94 = arith.constant 0 : index
      %93 = vector.load %arg2[%c0_91, %c0_92, %c0_93, %c0_94] : memref<1x1x16x4xbf16, #tpu.memory_space<vmem>>, vector<1x1x16x4xbf16>
      %94 = vector.shape_cast %93 : vector<1x1x16x4xbf16> to vector<1x16x4xbf16>
      %c0_95 = arith.constant 0 : index
      %c1_96 = arith.constant 1 : index
      %c0_97 = arith.constant 0 : index
      %95 = vector.load %arg10[%c0_95, %c1_96, %c0_97] : memref<18x18x4xbf16, #tpu.memory_space<vmem>>, vector<1x16x4xbf16>
      tpu.vector_store %arg10[%c0_95, %c1_96, %c0_97], %94 {strides = array<i32>} : memref<18x18x4xbf16, #tpu.memory_space<vmem>>, vector<1x16x4xbf16>,
    } else {
    }
    %c0_i32_14 = arith.constant 0 : i32
    %13 = arith.cmpi eq, %arg1, %c0_i32_14 : i32
    %14 = arith.extui %13 : i1 to i32
    %c0_i32_15 = arith.constant 0 : i32
    %15 = arith.cmpi ne, %14, %c0_i32_15 : i32
    scf.if %15 {
      %c17_91 = arith.constant 17 : index
      %c1_92 = arith.constant 1 : index
      %c0_93 = arith.constant 0 : index
      %93 = vector.load %arg10[%c17_91, %c1_92, %c0_93] : memref<18x18x4xbf16, #tpu.memory_space<vmem>>, vector<1x16x4xbf16>
      tpu.vector_store %arg10[%c17_91, %c1_92, %c0_93], %1 {strides = array<i32>} : memref<18x18x4xbf16, #tpu.memory_space<vmem>>, vector<1x16x4xbf16>,
    } else {
    }
    %c0_i32_16 = arith.constant 0 : i32
    %16 = arith.cmpi slt, %arg1, %c0_i32_16 : i32
    %17 = arith.extui %16 : i1 to i32
    %c0_i32_17 = arith.constant 0 : i32
    %18 = arith.cmpi ne, %17, %c0_i32_17 : i32
    scf.if %18 {
      %c0_91 = arith.constant 0 : index
      %c0_92 = arith.constant 0 : index
      %c0_93 = arith.constant 0 : index
      %c0_94 = arith.constant 0 : index
      %93 = vector.load %arg4[%c0_91, %c0_92, %c0_93, %c0_94] : memref<1x1x16x4xbf16, #tpu.memory_space<vmem>>, vector<1x1x16x4xbf16>
      %94 = vector.shape_cast %93 : vector<1x1x16x4xbf16> to vector<1x16x4xbf16>
      %c17_95 = arith.constant 17 : index
      %c1_96 = arith.constant 1 : index
      %c0_97 = arith.constant 0 : index
      %95 = vector.load %arg10[%c17_95, %c1_96, %c0_97] : memref<18x18x4xbf16, #tpu.memory_space<vmem>>, vector<1x16x4xbf16>
      tpu.vector_store %arg10[%c17_95, %c1_96, %c0_97], %94 {strides = array<i32>} : memref<18x18x4xbf16, #tpu.memory_space<vmem>>, vector<1x16x4xbf16>,
    } else {
    }
    %cst_18 = arith.constant 0.000000e+00 : f32
    %19 = vector.broadcast %cst_18 : f32 to vector<256x8xf32>
    %c0_19 = arith.constant 0 : index
    %c0_20 = arith.constant 0 : index
    %c0_21 = arith.constant 0 : index
    %20 = vector.load %arg10[%c0_19, %c0_20, %c0_21] : memref<18x18x4xbf16, #tpu.memory_space<vmem>>, vector<16x16x4xbf16>
    %21 = vector.shape_cast %20 : vector<16x16x4xbf16> to vector<256x4xbf16>
    %c0_22 = arith.constant 0 : index
    %c0_23 = arith.constant 0 : index
    %c0_24 = arith.constant 0 : index
    %22 = vector.load %arg5[%c0_22, %c0_23, %c0_24] : memref<9x4x8xbf16, #tpu.memory_space<vmem>>, vector<1x4x8xbf16>
    %23 = vector.shape_cast %22 : vector<1x4x8xbf16> to vector<4x8xbf16>
    %cst_25 = arith.constant dense<0.000000e+00> : vector<256x8xf32>
    %24 = tpu.matmul %21, %23, %cst_25 {dimension_numbers = #tpu.dot_dimension_numbers<[1], [0], [0], [1], [0, 0, 1, 1], [], []>} : vector<256x4xbf16>, vector<4x8xbf16>, vector<256x8xf32> -> vector<256x8xf32>
    %25 = arith.addf %19, %24 : vector<256x8xf32>
    %c0_26 = arith.constant 0 : index
    %c1_27 = arith.constant 1 : index
    %c0_28 = arith.constant 0 : index
    %26 = vector.load %arg10[%c0_26, %c1_27, %c0_28] : memref<18x18x4xbf16, #tpu.memory_space<vmem>>, vector<16x16x4xbf16>
    %27 = vector.shape_cast %26 : vector<16x16x4xbf16> to vector<256x4xbf16>
    %c1_29 = arith.constant 1 : index
    %c0_30 = arith.constant 0 : index
    %c0_31 = arith.constant 0 : index
    %28 = vector.load %arg5[%c1_29, %c0_30, %c0_31] : memref<9x4x8xbf16, #tpu.memory_space<vmem>>, vector<1x4x8xbf16>
    %29 = vector.shape_cast %28 : vector<1x4x8xbf16> to vector<4x8xbf16>
    %cst_32 = arith.constant dense<0.000000e+00> : vector<256x8xf32>
    %30 = tpu.matmul %27, %29, %cst_32 {dimension_numbers = #tpu.dot_dimension_numbers<[1], [0], [0], [1], [0, 0, 1, 1], [], []>} : vector<256x4xbf16>, vector<4x8xbf16>, vector<256x8xf32> -> vector<256x8xf32>
    %31 = arith.addf %25, %30 : vector<256x8xf32>
    %c0_33 = arith.constant 0 : index
    %c2 = arith.constant 2 : index
    %c0_34 = arith.constant 0 : index
    %32 = vector.load %arg10[%c0_33, %c2, %c0_34] : memref<18x18x4xbf16, #tpu.memory_space<vmem>>, vector<16x16x4xbf16>
    %33 = vector.shape_cast %32 : vector<16x16x4xbf16> to vector<256x4xbf16>
    %c2_35 = arith.constant 2 : index
    %c0_36 = arith.constant 0 : index
    %c0_37 = arith.constant 0 : index
    %34 = vector.load %arg5[%c2_35, %c0_36, %c0_37] : memref<9x4x8xbf16, #tpu.memory_space<vmem>>, vector<1x4x8xbf16>
    %35 = vector.shape_cast %34 : vector<1x4x8xbf16> to vector<4x8xbf16>
    %cst_38 = arith.constant dense<0.000000e+00> : vector<256x8xf32>
    %36 = tpu.matmul %33, %35, %cst_38 {dimension_numbers = #tpu.dot_dimension_numbers<[1], [0], [0], [1], [0, 0, 1, 1], [], []>} : vector<256x4xbf16>, vector<4x8xbf16>, vector<256x8xf32> -> vector<256x8xf32>
    %37 = arith.addf %31, %36 : vector<256x8xf32>
    %c1_39 = arith.constant 1 : index
    %c0_40 = arith.constant 0 : index
    %c0_41 = arith.constant 0 : index
    %38 = vector.load %arg10[%c1_39, %c0_40, %c0_41] : memref<18x18x4xbf16, #tpu.memory_space<vmem>>, vector<16x16x4xbf16>
    %39 = vector.shape_cast %38 : vector<16x16x4xbf16> to vector<256x4xbf16>
    %c3 = arith.constant 3 : index
    %c0_42 = arith.constant 0 : index
    %c0_43 = arith.constant 0 : index
    %40 = vector.load %arg5[%c3, %c0_42, %c0_43] : memref<9x4x8xbf16, #tpu.memory_space<vmem>>, vector<1x4x8xbf16>
    %41 = vector.shape_cast %40 : vector<1x4x8xbf16> to vector<4x8xbf16>
    %cst_44 = arith.constant dense<0.000000e+00> : vector<256x8xf32>
    %42 = tpu.matmul %39, %41, %cst_44 {dimension_numbers = #tpu.dot_dimension_numbers<[1], [0], [0], [1], [0, 0, 1, 1], [], []>} : vector<256x4xbf16>, vector<4x8xbf16>, vector<256x8xf32> -> vector<256x8xf32>
    %43 = arith.addf %37, %42 : vector<256x8xf32>
    %c1_45 = arith.constant 1 : index
    %c1_46 = arith.constant 1 : index
    %c0_47 = arith.constant 0 : index
    %44 = vector.load %arg10[%c1_45, %c1_46, %c0_47] : memref<18x18x4xbf16, #tpu.memory_space<vmem>>, vector<16x16x4xbf16>
    %45 = vector.shape_cast %44 : vector<16x16x4xbf16> to vector<256x4xbf16>
    %c4 = arith.constant 4 : index
    %c0_48 = arith.constant 0 : index
    %c0_49 = arith.constant 0 : index
    %46 = vector.load %arg5[%c4, %c0_48, %c0_49] : memref<9x4x8xbf16, #tpu.memory_space<vmem>>, vector<1x4x8xbf16>
    %47 = vector.shape_cast %46 : vector<1x4x8xbf16> to vector<4x8xbf16>
    %cst_50 = arith.constant dense<0.000000e+00> : vector<256x8xf32>
    %48 = tpu.matmul %45, %47, %cst_50 {dimension_numbers = #tpu.dot_dimension_numbers<[1], [0], [0], [1], [0, 0, 1, 1], [], []>} : vector<256x4xbf16>, vector<4x8xbf16>, vector<256x8xf32> -> vector<256x8xf32>
    %49 = arith.addf %43, %48 : vector<256x8xf32>
    %c1_51 = arith.constant 1 : index
    %c2_52 = arith.constant 2 : index
    %c0_53 = arith.constant 0 : index
    %50 = vector.load %arg10[%c1_51, %c2_52, %c0_53] : memref<18x18x4xbf16, #tpu.memory_space<vmem>>, vector<16x16x4xbf16>
    %51 = vector.shape_cast %50 : vector<16x16x4xbf16> to vector<256x4xbf16>
    %c5 = arith.constant 5 : index
    %c0_54 = arith.constant 0 : index
    %c0_55 = arith.constant 0 : index
    %52 = vector.load %arg5[%c5, %c0_54, %c0_55] : memref<9x4x8xbf16, #tpu.memory_space<vmem>>, vector<1x4x8xbf16>
    %53 = vector.shape_cast %52 : vector<1x4x8xbf16> to vector<4x8xbf16>
    %cst_56 = arith.constant dense<0.000000e+00> : vector<256x8xf32>
    %54 = tpu.matmul %51, %53, %cst_56 {dimension_numbers = #tpu.dot_dimension_numbers<[1], [0], [0], [1], [0, 0, 1, 1], [], []>} : vector<256x4xbf16>, vector<4x8xbf16>, vector<256x8xf32> -> vector<256x8xf32>
    %55 = arith.addf %49, %54 : vector<256x8xf32>
    %c2_57 = arith.constant 2 : index
    %c0_58 = arith.constant 0 : index
    %c0_59 = arith.constant 0 : index
    %56 = vector.load %arg10[%c2_57, %c0_58, %c0_59] : memref<18x18x4xbf16, #tpu.memory_space<vmem>>, vector<16x16x4xbf16>
    %57 = vector.shape_cast %56 : vector<16x16x4xbf16> to vector<256x4xbf16>
    %c6 = arith.constant 6 : index
    %c0_60 = arith.constant 0 : index
    %c0_61 = arith.constant 0 : index
    %58 = vector.load %arg5[%c6, %c0_60, %c0_61] : memref<9x4x8xbf16, #tpu.memory_space<vmem>>, vector<1x4x8xbf16>
    %59 = vector.shape_cast %58 : vector<1x4x8xbf16> to vector<4x8xbf16>
    %cst_62 = arith.constant dense<0.000000e+00> : vector<256x8xf32>
    %60 = tpu.matmul %57, %59, %cst_62 {dimension_numbers = #tpu.dot_dimension_numbers<[1], [0], [0], [1], [0, 0, 1, 1], [], []>} : vector<256x4xbf16>, vector<4x8xbf16>, vector<256x8xf32> -> vector<256x8xf32>
    %61 = arith.addf %55, %60 : vector<256x8xf32>
    %c2_63 = arith.constant 2 : index
    %c1_64 = arith.constant 1 : index
    %c0_65 = arith.constant 0 : index
    %62 = vector.load %arg10[%c2_63, %c1_64, %c0_65] : memref<18x18x4xbf16, #tpu.memory_space<vmem>>, vector<16x16x4xbf16>
    %63 = vector.shape_cast %62 : vector<16x16x4xbf16> to vector<256x4xbf16>
    %c7 = arith.constant 7 : index
    %c0_66 = arith.constant 0 : index
    %c0_67 = arith.constant 0 : index
    %64 = vector.load %arg5[%c7, %c0_66, %c0_67] : memref<9x4x8xbf16, #tpu.memory_space<vmem>>, vector<1x4x8xbf16>
    %65 = vector.shape_cast %64 : vector<1x4x8xbf16> to vector<4x8xbf16>
    %cst_68 = arith.constant dense<0.000000e+00> : vector<256x8xf32>
    %66 = tpu.matmul %63, %65, %cst_68 {dimension_numbers = #tpu.dot_dimension_numbers<[1], [0], [0], [1], [0, 0, 1, 1], [], []>} : vector<256x4xbf16>, vector<4x8xbf16>, vector<256x8xf32> -> vector<256x8xf32>
    %67 = arith.addf %61, %66 : vector<256x8xf32>
    %c2_69 = arith.constant 2 : index
    %c2_70 = arith.constant 2 : index
    %c0_71 = arith.constant 0 : index
    %68 = vector.load %arg10[%c2_69, %c2_70, %c0_71] : memref<18x18x4xbf16, #tpu.memory_space<vmem>>, vector<16x16x4xbf16>
    %69 = vector.shape_cast %68 : vector<16x16x4xbf16> to vector<256x4xbf16>
    %c8 = arith.constant 8 : index
    %c0_72 = arith.constant 0 : index
    %c0_73 = arith.constant 0 : index
    %70 = vector.load %arg5[%c8, %c0_72, %c0_73] : memref<9x4x8xbf16, #tpu.memory_space<vmem>>, vector<1x4x8xbf16>
    %71 = vector.shape_cast %70 : vector<1x4x8xbf16> to vector<4x8xbf16>
    %cst_74 = arith.constant dense<0.000000e+00> : vector<256x8xf32>
    %72 = tpu.matmul %69, %71, %cst_74 {dimension_numbers = #tpu.dot_dimension_numbers<[1], [0], [0], [1], [0, 0, 1, 1], [], []>} : vector<256x4xbf16>, vector<4x8xbf16>, vector<256x8xf32> -> vector<256x8xf32>
    %73 = arith.addf %67, %72 : vector<256x8xf32>
    %c0_75 = arith.constant 0 : index
    %c0_76 = arith.constant 0 : index
    %74 = vector.load %arg6[%c0_75, %c0_76] : memref<1x8xf32, #tpu.memory_space<vmem>>, vector<1x8xf32>
    %75 = vector.broadcast %74 : vector<1x8xf32> to vector<256x8xf32>
    %76 = arith.addf %73, %75 : vector<256x8xf32>
    %77 = vector.shape_cast %76 : vector<256x8xf32> to vector<16x16x8xf32>
    %78 = arith.truncf %77 : vector<16x16x8xf32> to vector<16x16x8xbf16>
    %c0_77 = arith.constant 0 : index
    %c0_78 = arith.constant 0 : index
    %c0_79 = arith.constant 0 : index
    %c0_80 = arith.constant 0 : index
    %79 = vector.load %arg7[%c0_77, %c0_78, %c0_79, %c0_80] : memref<1x16x16x8xbf16, #tpu.memory_space<vmem>>, vector<1x16x16x8xbf16>
    %80 = vector.shape_cast %79 : vector<1x16x16x8xbf16> to vector<16x16x8xbf16>
    %81 = vector.shape_cast %78 : vector<16x16x8xbf16> to vector<1x16x16x8xbf16>
    tpu.vector_store %arg7[%c0_77, %c0_78, %c0_79, %c0_80], %81 {strides = array<i32>} : memref<1x16x16x8xbf16, #tpu.memory_space<vmem>>, vector<1x16x16x8xbf16>,
    %cst_81 = arith.constant dense<0.000000e+00> : vector<8xf32>
    %82 = vector.multi_reduction <add>, %76, %cst_81 [0] : vector<256x8xf32> to vector<8xf32>
    %83 = vector.shape_cast %82 : vector<8xf32> to vector<1x8xf32>
    %c0_82 = arith.constant 0 : index
    %c0_83 = arith.constant 0 : index
    %c0_84 = arith.constant 0 : index
    %c0_85 = arith.constant 0 : index
    %84 = vector.load %arg8[%c0_82, %c0_83, %c0_84, %c0_85] : memref<1x1x1x8xf32, #tpu.memory_space<vmem>>, vector<1x1x1x8xf32>
    %85 = vector.shape_cast %84 : vector<1x1x1x8xf32> to vector<1x8xf32>
    %86 = vector.shape_cast %83 : vector<1x8xf32> to vector<1x1x1x8xf32>
    tpu.vector_store %arg8[%c0_82, %c0_83, %c0_84, %c0_85], %86 {strides = array<i32>} : memref<1x1x1x8xf32, #tpu.memory_space<vmem>>, vector<1x1x1x8xf32>,
    %87 = arith.mulf %76, %76 : vector<256x8xf32>
    %cst_86 = arith.constant dense<0.000000e+00> : vector<8xf32>
    %88 = vector.multi_reduction <add>, %87, %cst_86 [0] : vector<256x8xf32> to vector<8xf32>
    %89 = vector.shape_cast %88 : vector<8xf32> to vector<1x8xf32>
    %c0_87 = arith.constant 0 : index
    %c0_88 = arith.constant 0 : index
    %c0_89 = arith.constant 0 : index
    %c0_90 = arith.constant 0 : index
    %90 = vector.load %arg9[%c0_87, %c0_88, %c0_89, %c0_90] : memref<1x1x1x8xf32, #tpu.memory_space<vmem>>, vector<1x1x1x8xf32>
    %91 = vector.shape_cast %90 : vector<1x1x1x8xf32> to vector<1x8xf32>
    %92 = vector.shape_cast %89 : vector<1x8xf32> to vector<1x1x1x8xf32>
    tpu.vector_store %arg9[%c0_87, %c0_88, %c0_89, %c0_90], %92 {strides = array<i32>} : memref<1x1x1x8xf32, #tpu.memory_space<vmem>>, vector<1x1x1x8xf32>,
    return
  }
  func.func @transform_0(%arg0: i32, %arg1: i32) -> (i32, i32, i32, i32) {
    %c16_i32 = arith.constant 16 : i32
    %0 = arith.muli %arg1, %c16_i32 : i32
    %c1_i32 = arith.constant 1 : i32
    %1 = arith.subi %0, %c1_i32 : i32
    %c0_i32 = arith.constant 0 : i32
    %2 = arith.maxsi %1, %c0_i32 : i32
    %c0_i32_0 = arith.constant 0 : i32
    %c0_i32_1 = arith.constant 0 : i32
    %c0_i32_2 = arith.constant 0 : i32
    return %arg0, %2, %c0_i32_0, %c0_i32_1 : i32, i32, i32, i32
  }
  func.func @transform_1(%arg0: i32, %arg1: i32) -> (i32, i32, i32, i32) {
    %c0_i32 = arith.constant 0 : i32
    %c0_i32_0 = arith.constant 0 : i32
    %c0_i32_1 = arith.constant 0 : i32
    return %arg0, %arg1, %c0_i32, %c0_i32_0 : i32, i32, i32, i32
  }
  func.func @transform_2(%arg0: i32, %arg1: i32) -> (i32, i32, i32, i32) {
    %c16_i32 = arith.constant 16 : i32
    %0 = arith.muli %arg1, %c16_i32 : i32
    %c16_i32_0 = arith.constant 16 : i32
    %1 = arith.addi %0, %c16_i32_0 : i32
    %c15_i32 = arith.constant 15 : i32
    %2 = arith.minsi %1, %c15_i32 : i32
    %c0_i32 = arith.constant 0 : i32
    %c0_i32_1 = arith.constant 0 : i32
    %c0_i32_2 = arith.constant 0 : i32
    return %arg0, %2, %c0_i32, %c0_i32_1 : i32, i32, i32, i32
  }
  func.func @transform_3(%arg0: i32, %arg1: i32) -> (i32, i32, i32) {
    %c0_i32 = arith.constant 0 : i32
    %c0_i32_0 = arith.constant 0 : i32
    %c0_i32_1 = arith.constant 0 : i32
    %c0_i32_2 = arith.constant 0 : i32
    return %c0_i32, %c0_i32_0, %c0_i32_1 : i32, i32, i32
  }
  func.func @transform_4(%arg0: i32, %arg1: i32) -> (i32, i32) {
    %c0_i32 = arith.constant 0 : i32
    %c0_i32_0 = arith.constant 0 : i32
    %c0_i32_1 = arith.constant 0 : i32
    return %c0_i32, %c0_i32_0 : i32, i32
  }
  func.func @transform_5(%arg0: i32, %arg1: i32) -> (i32, i32, i32, i32) {
    %c0_i32 = arith.constant 0 : i32
    %c0_i32_0 = arith.constant 0 : i32
    %c0_i32_1 = arith.constant 0 : i32
    return %arg0, %arg1, %c0_i32, %c0_i32_0 : i32, i32, i32, i32
  }
  func.func @transform_6(%arg0: i32, %arg1: i32) -> (i32, i32, i32, i32) {
    %c0_i32 = arith.constant 0 : i32
    %c0_i32_0 = arith.constant 0 : i32
    %c0_i32_1 = arith.constant 0 : i32
    return %arg0, %arg1, %c0_i32, %c0_i32_0 : i32, i32, i32, i32
  }
  func.func @transform_7(%arg0: i32, %arg1: i32) -> (i32, i32, i32, i32) {
    %c0_i32 = arith.constant 0 : i32
    %c0_i32_0 = arith.constant 0 : i32
    %c0_i32_1 = arith.constant 0 : i32
    return %arg0, %arg1, %c0_i32, %c0_i32_0 : i32, i32, i32, i32
  }
}

module attributes {stable_mosaic.version = 11 : i64} {
  func.func @_conv_block_kernel(%arg0: i32, %arg1: i32, %arg2: memref<1x1x16x8xbf16, #tpu.memory_space<vmem>>, %arg3: memref<1x16x16x8xbf16, #tpu.memory_space<vmem>>, %arg4: memref<1x1x16x8xbf16, #tpu.memory_space<vmem>>, %arg5: memref<1x8xf32, #tpu.memory_space<vmem>>, %arg6: memref<1x8xf32, #tpu.memory_space<vmem>>, %arg7: memref<9x8x8xbf16, #tpu.memory_space<vmem>>, %arg8: memref<1x8xf32, #tpu.memory_space<vmem>>, %arg9: memref<1x16x16x8xbf16, #tpu.memory_space<vmem>>, %arg10: memref<1x1x1x8xf32, #tpu.memory_space<vmem>>, %arg11: memref<1x1x1x8xf32, #tpu.memory_space<vmem>>, %arg12: memref<18x18x8xbf16, #tpu.memory_space<vmem>>) attributes {dimension_semantics = [#tpu.dimension_semantics<parallel>, #tpu.dimension_semantics<parallel>], iteration_bounds = array<i64: 2, 1>, scalar_prefetch = 0 : i64, scratch_operands = 1 : i64, tpu.core_type = #tpu.core_type<tc>, window_params = [{transform_indices = @transform_0, window_bounds = array<i64: 1, 1, 16, 8>}, {transform_indices = @transform_1, window_bounds = array<i64: 1, 16, 16, 8>}, {transform_indices = @transform_2, window_bounds = array<i64: 1, 1, 16, 8>}, {pipeline_mode = #tpu.pipeline_mode<synchronous>, transform_indices = @transform_3, window_bounds = array<i64: 1, 8>}, {pipeline_mode = #tpu.pipeline_mode<synchronous>, transform_indices = @transform_4, window_bounds = array<i64: 1, 8>}, {pipeline_mode = #tpu.pipeline_mode<synchronous>, transform_indices = @transform_5, window_bounds = array<i64: 9, 8, 8>}, {pipeline_mode = #tpu.pipeline_mode<synchronous>, transform_indices = @transform_6, window_bounds = array<i64: 1, 8>}, {transform_indices = @transform_7, window_bounds = array<i64: 1, 16, 16, 8>}, {transform_indices = @transform_8, window_bounds = array<i64: 1, 1, 1, 8>}, {transform_indices = @transform_9, window_bounds = array<i64: 1, 1, 1, 8>}]} {
    %cst = arith.constant 0.000000e+00 : bf16
    %0 = vector.broadcast %cst : bf16 to vector<18x1x8xbf16>
    %cst_0 = arith.constant 0.000000e+00 : bf16
    %1 = vector.broadcast %cst_0 : bf16 to vector<1x16x8xbf16>
    %c0 = arith.constant 0 : index
    %c0_1 = arith.constant 0 : index
    %c0_2 = arith.constant 0 : index
    %2 = vector.load %arg12[%c0, %c0_1, %c0_2] : memref<18x18x8xbf16, #tpu.memory_space<vmem>>, vector<18x1x8xbf16>
    tpu.vector_store %arg12[%c0, %c0_1, %c0_2], %0 {strides = array<i32>} : memref<18x18x8xbf16, #tpu.memory_space<vmem>>, vector<18x1x8xbf16>,
    %c0_3 = arith.constant 0 : index
    %c17 = arith.constant 17 : index
    %c0_4 = arith.constant 0 : index
    %3 = vector.load %arg12[%c0_3, %c17, %c0_4] : memref<18x18x8xbf16, #tpu.memory_space<vmem>>, vector<18x1x8xbf16>
    tpu.vector_store %arg12[%c0_3, %c17, %c0_4], %0 {strides = array<i32>} : memref<18x18x8xbf16, #tpu.memory_space<vmem>>, vector<18x1x8xbf16>,
    %c0_5 = arith.constant 0 : index
    %c0_6 = arith.constant 0 : index
    %c0_7 = arith.constant 0 : index
    %c0_8 = arith.constant 0 : index
    %4 = vector.load %arg3[%c0_5, %c0_6, %c0_7, %c0_8] : memref<1x16x16x8xbf16, #tpu.memory_space<vmem>>, vector<1x16x16x8xbf16>
    %5 = vector.shape_cast %4 : vector<1x16x16x8xbf16> to vector<16x16x8xbf16>
    %6 = arith.extf %5 : vector<16x16x8xbf16> to vector<16x16x8xf32>
    %c0_9 = arith.constant 0 : index
    %c0_10 = arith.constant 0 : index
    %7 = vector.load %arg5[%c0_9, %c0_10] : memref<1x8xf32, #tpu.memory_space<vmem>>, vector<1x8xf32>
    %8 = vector.shape_cast %7 : vector<1x8xf32> to vector<1x1x8xf32>
    %9 = vector.broadcast %8 : vector<1x1x8xf32> to vector<16x16x8xf32>
    %10 = arith.mulf %6, %9 : vector<16x16x8xf32>
    %c0_11 = arith.constant 0 : index
    %c0_12 = arith.constant 0 : index
    %11 = vector.load %arg6[%c0_11, %c0_12] : memref<1x8xf32, #tpu.memory_space<vmem>>, vector<1x8xf32>
    %12 = vector.shape_cast %11 : vector<1x8xf32> to vector<1x1x8xf32>
    %13 = vector.broadcast %12 : vector<1x1x8xf32> to vector<16x16x8xf32>
    %14 = arith.addf %10, %13 : vector<16x16x8xf32>
    %cst_13 = arith.constant 0.000000e+00 : f32
    %15 = vector.broadcast %cst_13 : f32 to vector<16x16x8xf32>
    %16 = arith.maximumf %14, %15 : vector<16x16x8xf32>
    %17 = arith.truncf %16 : vector<16x16x8xf32> to vector<16x16x8xbf16>
    %c1 = arith.constant 1 : index
    %c1_14 = arith.constant 1 : index
    %c0_15 = arith.constant 0 : index
    %18 = vector.load %arg12[%c1, %c1_14, %c0_15] : memref<18x18x8xbf16, #tpu.memory_space<vmem>>, vector<16x16x8xbf16>
    tpu.vector_store %arg12[%c1, %c1_14, %c0_15], %17 {strides = array<i32>} : memref<18x18x8xbf16, #tpu.memory_space<vmem>>, vector<16x16x8xbf16>,
    %c0_i32 = arith.constant 0 : i32
    %19 = arith.cmpi eq, %arg1, %c0_i32 : i32
    %20 = arith.extui %19 : i1 to i32
    %c0_i32_16 = arith.constant 0 : i32
    %21 = arith.cmpi ne, %20, %c0_i32_16 : i32
    scf.if %21 {
      %c0_96 = arith.constant 0 : index
      %c1_97 = arith.constant 1 : index
      %c0_98 = arith.constant 0 : index
      %105 = vector.load %arg12[%c0_96, %c1_97, %c0_98] : memref<18x18x8xbf16, #tpu.memory_space<vmem>>, vector<1x16x8xbf16>
      tpu.vector_store %arg12[%c0_96, %c1_97, %c0_98], %1 {strides = array<i32>} : memref<18x18x8xbf16, #tpu.memory_space<vmem>>, vector<1x16x8xbf16>,
    } else {
    }
    %c0_i32_17 = arith.constant 0 : i32
    %22 = arith.cmpi sgt, %arg1, %c0_i32_17 : i32
    %23 = arith.extui %22 : i1 to i32
    %c0_i32_18 = arith.constant 0 : i32
    %24 = arith.cmpi ne, %23, %c0_i32_18 : i32
    scf.if %24 {
      %c0_96 = arith.constant 0 : index
      %c0_97 = arith.constant 0 : index
      %c0_98 = arith.constant 0 : index
      %c0_99 = arith.constant 0 : index
      %105 = vector.load %arg2[%c0_96, %c0_97, %c0_98, %c0_99] : memref<1x1x16x8xbf16, #tpu.memory_space<vmem>>, vector<1x1x16x8xbf16>
      %106 = vector.shape_cast %105 : vector<1x1x16x8xbf16> to vector<1x16x8xbf16>
      %107 = arith.extf %106 : vector<1x16x8xbf16> to vector<1x16x8xf32>
      %c0_100 = arith.constant 0 : index
      %c0_101 = arith.constant 0 : index
      %108 = vector.load %arg5[%c0_100, %c0_101] : memref<1x8xf32, #tpu.memory_space<vmem>>, vector<1x8xf32>
      %109 = vector.shape_cast %108 : vector<1x8xf32> to vector<1x1x8xf32>
      %110 = vector.broadcast %109 : vector<1x1x8xf32> to vector<1x16x8xf32>
      %111 = arith.mulf %107, %110 : vector<1x16x8xf32>
      %c0_102 = arith.constant 0 : index
      %c0_103 = arith.constant 0 : index
      %112 = vector.load %arg6[%c0_102, %c0_103] : memref<1x8xf32, #tpu.memory_space<vmem>>, vector<1x8xf32>
      %113 = vector.shape_cast %112 : vector<1x8xf32> to vector<1x1x8xf32>
      %114 = vector.broadcast %113 : vector<1x1x8xf32> to vector<1x16x8xf32>
      %115 = arith.addf %111, %114 : vector<1x16x8xf32>
      %cst_104 = arith.constant 0.000000e+00 : f32
      %116 = vector.broadcast %cst_104 : f32 to vector<1x16x8xf32>
      %117 = arith.maximumf %115, %116 : vector<1x16x8xf32>
      %118 = arith.truncf %117 : vector<1x16x8xf32> to vector<1x16x8xbf16>
      %c0_105 = arith.constant 0 : index
      %c1_106 = arith.constant 1 : index
      %c0_107 = arith.constant 0 : index
      %119 = vector.load %arg12[%c0_105, %c1_106, %c0_107] : memref<18x18x8xbf16, #tpu.memory_space<vmem>>, vector<1x16x8xbf16>
      tpu.vector_store %arg12[%c0_105, %c1_106, %c0_107], %118 {strides = array<i32>} : memref<18x18x8xbf16, #tpu.memory_space<vmem>>, vector<1x16x8xbf16>,
    } else {
    }
    %c0_i32_19 = arith.constant 0 : i32
    %25 = arith.cmpi eq, %arg1, %c0_i32_19 : i32
    %26 = arith.extui %25 : i1 to i32
    %c0_i32_20 = arith.constant 0 : i32
    %27 = arith.cmpi ne, %26, %c0_i32_20 : i32
    scf.if %27 {
      %c17_96 = arith.constant 17 : index
      %c1_97 = arith.constant 1 : index
      %c0_98 = arith.constant 0 : index
      %105 = vector.load %arg12[%c17_96, %c1_97, %c0_98] : memref<18x18x8xbf16, #tpu.memory_space<vmem>>, vector<1x16x8xbf16>
      tpu.vector_store %arg12[%c17_96, %c1_97, %c0_98], %1 {strides = array<i32>} : memref<18x18x8xbf16, #tpu.memory_space<vmem>>, vector<1x16x8xbf16>,
    } else {
    }
    %c0_i32_21 = arith.constant 0 : i32
    %28 = arith.cmpi slt, %arg1, %c0_i32_21 : i32
    %29 = arith.extui %28 : i1 to i32
    %c0_i32_22 = arith.constant 0 : i32
    %30 = arith.cmpi ne, %29, %c0_i32_22 : i32
    scf.if %30 {
      %c0_96 = arith.constant 0 : index
      %c0_97 = arith.constant 0 : index
      %c0_98 = arith.constant 0 : index
      %c0_99 = arith.constant 0 : index
      %105 = vector.load %arg4[%c0_96, %c0_97, %c0_98, %c0_99] : memref<1x1x16x8xbf16, #tpu.memory_space<vmem>>, vector<1x1x16x8xbf16>
      %106 = vector.shape_cast %105 : vector<1x1x16x8xbf16> to vector<1x16x8xbf16>
      %107 = arith.extf %106 : vector<1x16x8xbf16> to vector<1x16x8xf32>
      %c0_100 = arith.constant 0 : index
      %c0_101 = arith.constant 0 : index
      %108 = vector.load %arg5[%c0_100, %c0_101] : memref<1x8xf32, #tpu.memory_space<vmem>>, vector<1x8xf32>
      %109 = vector.shape_cast %108 : vector<1x8xf32> to vector<1x1x8xf32>
      %110 = vector.broadcast %109 : vector<1x1x8xf32> to vector<1x16x8xf32>
      %111 = arith.mulf %107, %110 : vector<1x16x8xf32>
      %c0_102 = arith.constant 0 : index
      %c0_103 = arith.constant 0 : index
      %112 = vector.load %arg6[%c0_102, %c0_103] : memref<1x8xf32, #tpu.memory_space<vmem>>, vector<1x8xf32>
      %113 = vector.shape_cast %112 : vector<1x8xf32> to vector<1x1x8xf32>
      %114 = vector.broadcast %113 : vector<1x1x8xf32> to vector<1x16x8xf32>
      %115 = arith.addf %111, %114 : vector<1x16x8xf32>
      %cst_104 = arith.constant 0.000000e+00 : f32
      %116 = vector.broadcast %cst_104 : f32 to vector<1x16x8xf32>
      %117 = arith.maximumf %115, %116 : vector<1x16x8xf32>
      %118 = arith.truncf %117 : vector<1x16x8xf32> to vector<1x16x8xbf16>
      %c17_105 = arith.constant 17 : index
      %c1_106 = arith.constant 1 : index
      %c0_107 = arith.constant 0 : index
      %119 = vector.load %arg12[%c17_105, %c1_106, %c0_107] : memref<18x18x8xbf16, #tpu.memory_space<vmem>>, vector<1x16x8xbf16>
      tpu.vector_store %arg12[%c17_105, %c1_106, %c0_107], %118 {strides = array<i32>} : memref<18x18x8xbf16, #tpu.memory_space<vmem>>, vector<1x16x8xbf16>,
    } else {
    }
    %cst_23 = arith.constant 0.000000e+00 : f32
    %31 = vector.broadcast %cst_23 : f32 to vector<256x8xf32>
    %c0_24 = arith.constant 0 : index
    %c0_25 = arith.constant 0 : index
    %c0_26 = arith.constant 0 : index
    %32 = vector.load %arg12[%c0_24, %c0_25, %c0_26] : memref<18x18x8xbf16, #tpu.memory_space<vmem>>, vector<16x16x8xbf16>
    %33 = vector.shape_cast %32 : vector<16x16x8xbf16> to vector<256x8xbf16>
    %c0_27 = arith.constant 0 : index
    %c0_28 = arith.constant 0 : index
    %c0_29 = arith.constant 0 : index
    %34 = vector.load %arg7[%c0_27, %c0_28, %c0_29] : memref<9x8x8xbf16, #tpu.memory_space<vmem>>, vector<1x8x8xbf16>
    %35 = vector.shape_cast %34 : vector<1x8x8xbf16> to vector<8x8xbf16>
    %cst_30 = arith.constant dense<0.000000e+00> : vector<256x8xf32>
    %36 = tpu.matmul %33, %35, %cst_30 {dimension_numbers = #tpu.dot_dimension_numbers<[1], [0], [0], [1], [0, 0, 1, 1], [], []>} : vector<256x8xbf16>, vector<8x8xbf16>, vector<256x8xf32> -> vector<256x8xf32>
    %37 = arith.addf %31, %36 : vector<256x8xf32>
    %c0_31 = arith.constant 0 : index
    %c1_32 = arith.constant 1 : index
    %c0_33 = arith.constant 0 : index
    %38 = vector.load %arg12[%c0_31, %c1_32, %c0_33] : memref<18x18x8xbf16, #tpu.memory_space<vmem>>, vector<16x16x8xbf16>
    %39 = vector.shape_cast %38 : vector<16x16x8xbf16> to vector<256x8xbf16>
    %c1_34 = arith.constant 1 : index
    %c0_35 = arith.constant 0 : index
    %c0_36 = arith.constant 0 : index
    %40 = vector.load %arg7[%c1_34, %c0_35, %c0_36] : memref<9x8x8xbf16, #tpu.memory_space<vmem>>, vector<1x8x8xbf16>
    %41 = vector.shape_cast %40 : vector<1x8x8xbf16> to vector<8x8xbf16>
    %cst_37 = arith.constant dense<0.000000e+00> : vector<256x8xf32>
    %42 = tpu.matmul %39, %41, %cst_37 {dimension_numbers = #tpu.dot_dimension_numbers<[1], [0], [0], [1], [0, 0, 1, 1], [], []>} : vector<256x8xbf16>, vector<8x8xbf16>, vector<256x8xf32> -> vector<256x8xf32>
    %43 = arith.addf %37, %42 : vector<256x8xf32>
    %c0_38 = arith.constant 0 : index
    %c2 = arith.constant 2 : index
    %c0_39 = arith.constant 0 : index
    %44 = vector.load %arg12[%c0_38, %c2, %c0_39] : memref<18x18x8xbf16, #tpu.memory_space<vmem>>, vector<16x16x8xbf16>
    %45 = vector.shape_cast %44 : vector<16x16x8xbf16> to vector<256x8xbf16>
    %c2_40 = arith.constant 2 : index
    %c0_41 = arith.constant 0 : index
    %c0_42 = arith.constant 0 : index
    %46 = vector.load %arg7[%c2_40, %c0_41, %c0_42] : memref<9x8x8xbf16, #tpu.memory_space<vmem>>, vector<1x8x8xbf16>
    %47 = vector.shape_cast %46 : vector<1x8x8xbf16> to vector<8x8xbf16>
    %cst_43 = arith.constant dense<0.000000e+00> : vector<256x8xf32>
    %48 = tpu.matmul %45, %47, %cst_43 {dimension_numbers = #tpu.dot_dimension_numbers<[1], [0], [0], [1], [0, 0, 1, 1], [], []>} : vector<256x8xbf16>, vector<8x8xbf16>, vector<256x8xf32> -> vector<256x8xf32>
    %49 = arith.addf %43, %48 : vector<256x8xf32>
    %c1_44 = arith.constant 1 : index
    %c0_45 = arith.constant 0 : index
    %c0_46 = arith.constant 0 : index
    %50 = vector.load %arg12[%c1_44, %c0_45, %c0_46] : memref<18x18x8xbf16, #tpu.memory_space<vmem>>, vector<16x16x8xbf16>
    %51 = vector.shape_cast %50 : vector<16x16x8xbf16> to vector<256x8xbf16>
    %c3 = arith.constant 3 : index
    %c0_47 = arith.constant 0 : index
    %c0_48 = arith.constant 0 : index
    %52 = vector.load %arg7[%c3, %c0_47, %c0_48] : memref<9x8x8xbf16, #tpu.memory_space<vmem>>, vector<1x8x8xbf16>
    %53 = vector.shape_cast %52 : vector<1x8x8xbf16> to vector<8x8xbf16>
    %cst_49 = arith.constant dense<0.000000e+00> : vector<256x8xf32>
    %54 = tpu.matmul %51, %53, %cst_49 {dimension_numbers = #tpu.dot_dimension_numbers<[1], [0], [0], [1], [0, 0, 1, 1], [], []>} : vector<256x8xbf16>, vector<8x8xbf16>, vector<256x8xf32> -> vector<256x8xf32>
    %55 = arith.addf %49, %54 : vector<256x8xf32>
    %c1_50 = arith.constant 1 : index
    %c1_51 = arith.constant 1 : index
    %c0_52 = arith.constant 0 : index
    %56 = vector.load %arg12[%c1_50, %c1_51, %c0_52] : memref<18x18x8xbf16, #tpu.memory_space<vmem>>, vector<16x16x8xbf16>
    %57 = vector.shape_cast %56 : vector<16x16x8xbf16> to vector<256x8xbf16>
    %c4 = arith.constant 4 : index
    %c0_53 = arith.constant 0 : index
    %c0_54 = arith.constant 0 : index
    %58 = vector.load %arg7[%c4, %c0_53, %c0_54] : memref<9x8x8xbf16, #tpu.memory_space<vmem>>, vector<1x8x8xbf16>
    %59 = vector.shape_cast %58 : vector<1x8x8xbf16> to vector<8x8xbf16>
    %cst_55 = arith.constant dense<0.000000e+00> : vector<256x8xf32>
    %60 = tpu.matmul %57, %59, %cst_55 {dimension_numbers = #tpu.dot_dimension_numbers<[1], [0], [0], [1], [0, 0, 1, 1], [], []>} : vector<256x8xbf16>, vector<8x8xbf16>, vector<256x8xf32> -> vector<256x8xf32>
    %61 = arith.addf %55, %60 : vector<256x8xf32>
    %c1_56 = arith.constant 1 : index
    %c2_57 = arith.constant 2 : index
    %c0_58 = arith.constant 0 : index
    %62 = vector.load %arg12[%c1_56, %c2_57, %c0_58] : memref<18x18x8xbf16, #tpu.memory_space<vmem>>, vector<16x16x8xbf16>
    %63 = vector.shape_cast %62 : vector<16x16x8xbf16> to vector<256x8xbf16>
    %c5 = arith.constant 5 : index
    %c0_59 = arith.constant 0 : index
    %c0_60 = arith.constant 0 : index
    %64 = vector.load %arg7[%c5, %c0_59, %c0_60] : memref<9x8x8xbf16, #tpu.memory_space<vmem>>, vector<1x8x8xbf16>
    %65 = vector.shape_cast %64 : vector<1x8x8xbf16> to vector<8x8xbf16>
    %cst_61 = arith.constant dense<0.000000e+00> : vector<256x8xf32>
    %66 = tpu.matmul %63, %65, %cst_61 {dimension_numbers = #tpu.dot_dimension_numbers<[1], [0], [0], [1], [0, 0, 1, 1], [], []>} : vector<256x8xbf16>, vector<8x8xbf16>, vector<256x8xf32> -> vector<256x8xf32>
    %67 = arith.addf %61, %66 : vector<256x8xf32>
    %c2_62 = arith.constant 2 : index
    %c0_63 = arith.constant 0 : index
    %c0_64 = arith.constant 0 : index
    %68 = vector.load %arg12[%c2_62, %c0_63, %c0_64] : memref<18x18x8xbf16, #tpu.memory_space<vmem>>, vector<16x16x8xbf16>
    %69 = vector.shape_cast %68 : vector<16x16x8xbf16> to vector<256x8xbf16>
    %c6 = arith.constant 6 : index
    %c0_65 = arith.constant 0 : index
    %c0_66 = arith.constant 0 : index
    %70 = vector.load %arg7[%c6, %c0_65, %c0_66] : memref<9x8x8xbf16, #tpu.memory_space<vmem>>, vector<1x8x8xbf16>
    %71 = vector.shape_cast %70 : vector<1x8x8xbf16> to vector<8x8xbf16>
    %cst_67 = arith.constant dense<0.000000e+00> : vector<256x8xf32>
    %72 = tpu.matmul %69, %71, %cst_67 {dimension_numbers = #tpu.dot_dimension_numbers<[1], [0], [0], [1], [0, 0, 1, 1], [], []>} : vector<256x8xbf16>, vector<8x8xbf16>, vector<256x8xf32> -> vector<256x8xf32>
    %73 = arith.addf %67, %72 : vector<256x8xf32>
    %c2_68 = arith.constant 2 : index
    %c1_69 = arith.constant 1 : index
    %c0_70 = arith.constant 0 : index
    %74 = vector.load %arg12[%c2_68, %c1_69, %c0_70] : memref<18x18x8xbf16, #tpu.memory_space<vmem>>, vector<16x16x8xbf16>
    %75 = vector.shape_cast %74 : vector<16x16x8xbf16> to vector<256x8xbf16>
    %c7 = arith.constant 7 : index
    %c0_71 = arith.constant 0 : index
    %c0_72 = arith.constant 0 : index
    %76 = vector.load %arg7[%c7, %c0_71, %c0_72] : memref<9x8x8xbf16, #tpu.memory_space<vmem>>, vector<1x8x8xbf16>
    %77 = vector.shape_cast %76 : vector<1x8x8xbf16> to vector<8x8xbf16>
    %cst_73 = arith.constant dense<0.000000e+00> : vector<256x8xf32>
    %78 = tpu.matmul %75, %77, %cst_73 {dimension_numbers = #tpu.dot_dimension_numbers<[1], [0], [0], [1], [0, 0, 1, 1], [], []>} : vector<256x8xbf16>, vector<8x8xbf16>, vector<256x8xf32> -> vector<256x8xf32>
    %79 = arith.addf %73, %78 : vector<256x8xf32>
    %c2_74 = arith.constant 2 : index
    %c2_75 = arith.constant 2 : index
    %c0_76 = arith.constant 0 : index
    %80 = vector.load %arg12[%c2_74, %c2_75, %c0_76] : memref<18x18x8xbf16, #tpu.memory_space<vmem>>, vector<16x16x8xbf16>
    %81 = vector.shape_cast %80 : vector<16x16x8xbf16> to vector<256x8xbf16>
    %c8 = arith.constant 8 : index
    %c0_77 = arith.constant 0 : index
    %c0_78 = arith.constant 0 : index
    %82 = vector.load %arg7[%c8, %c0_77, %c0_78] : memref<9x8x8xbf16, #tpu.memory_space<vmem>>, vector<1x8x8xbf16>
    %83 = vector.shape_cast %82 : vector<1x8x8xbf16> to vector<8x8xbf16>
    %cst_79 = arith.constant dense<0.000000e+00> : vector<256x8xf32>
    %84 = tpu.matmul %81, %83, %cst_79 {dimension_numbers = #tpu.dot_dimension_numbers<[1], [0], [0], [1], [0, 0, 1, 1], [], []>} : vector<256x8xbf16>, vector<8x8xbf16>, vector<256x8xf32> -> vector<256x8xf32>
    %85 = arith.addf %79, %84 : vector<256x8xf32>
    %c0_80 = arith.constant 0 : index
    %c0_81 = arith.constant 0 : index
    %86 = vector.load %arg8[%c0_80, %c0_81] : memref<1x8xf32, #tpu.memory_space<vmem>>, vector<1x8xf32>
    %87 = vector.broadcast %86 : vector<1x8xf32> to vector<256x8xf32>
    %88 = arith.addf %85, %87 : vector<256x8xf32>
    %89 = vector.shape_cast %88 : vector<256x8xf32> to vector<16x16x8xf32>
    %90 = arith.truncf %89 : vector<16x16x8xf32> to vector<16x16x8xbf16>
    %c0_82 = arith.constant 0 : index
    %c0_83 = arith.constant 0 : index
    %c0_84 = arith.constant 0 : index
    %c0_85 = arith.constant 0 : index
    %91 = vector.load %arg9[%c0_82, %c0_83, %c0_84, %c0_85] : memref<1x16x16x8xbf16, #tpu.memory_space<vmem>>, vector<1x16x16x8xbf16>
    %92 = vector.shape_cast %91 : vector<1x16x16x8xbf16> to vector<16x16x8xbf16>
    %93 = vector.shape_cast %90 : vector<16x16x8xbf16> to vector<1x16x16x8xbf16>
    tpu.vector_store %arg9[%c0_82, %c0_83, %c0_84, %c0_85], %93 {strides = array<i32>} : memref<1x16x16x8xbf16, #tpu.memory_space<vmem>>, vector<1x16x16x8xbf16>,
    %cst_86 = arith.constant dense<0.000000e+00> : vector<8xf32>
    %94 = vector.multi_reduction <add>, %88, %cst_86 [0] : vector<256x8xf32> to vector<8xf32>
    %95 = vector.shape_cast %94 : vector<8xf32> to vector<1x8xf32>
    %c0_87 = arith.constant 0 : index
    %c0_88 = arith.constant 0 : index
    %c0_89 = arith.constant 0 : index
    %c0_90 = arith.constant 0 : index
    %96 = vector.load %arg10[%c0_87, %c0_88, %c0_89, %c0_90] : memref<1x1x1x8xf32, #tpu.memory_space<vmem>>, vector<1x1x1x8xf32>
    %97 = vector.shape_cast %96 : vector<1x1x1x8xf32> to vector<1x8xf32>
    %98 = vector.shape_cast %95 : vector<1x8xf32> to vector<1x1x1x8xf32>
    tpu.vector_store %arg10[%c0_87, %c0_88, %c0_89, %c0_90], %98 {strides = array<i32>} : memref<1x1x1x8xf32, #tpu.memory_space<vmem>>, vector<1x1x1x8xf32>,
    %99 = arith.mulf %88, %88 : vector<256x8xf32>
    %cst_91 = arith.constant dense<0.000000e+00> : vector<8xf32>
    %100 = vector.multi_reduction <add>, %99, %cst_91 [0] : vector<256x8xf32> to vector<8xf32>
    %101 = vector.shape_cast %100 : vector<8xf32> to vector<1x8xf32>
    %c0_92 = arith.constant 0 : index
    %c0_93 = arith.constant 0 : index
    %c0_94 = arith.constant 0 : index
    %c0_95 = arith.constant 0 : index
    %102 = vector.load %arg11[%c0_92, %c0_93, %c0_94, %c0_95] : memref<1x1x1x8xf32, #tpu.memory_space<vmem>>, vector<1x1x1x8xf32>
    %103 = vector.shape_cast %102 : vector<1x1x1x8xf32> to vector<1x8xf32>
    %104 = vector.shape_cast %101 : vector<1x8xf32> to vector<1x1x1x8xf32>
    tpu.vector_store %arg11[%c0_92, %c0_93, %c0_94, %c0_95], %104 {strides = array<i32>} : memref<1x1x1x8xf32, #tpu.memory_space<vmem>>, vector<1x1x1x8xf32>,
    return
  }
  func.func @transform_0(%arg0: i32, %arg1: i32) -> (i32, i32, i32, i32) {
    %c16_i32 = arith.constant 16 : i32
    %0 = arith.muli %arg1, %c16_i32 : i32
    %c1_i32 = arith.constant 1 : i32
    %1 = arith.subi %0, %c1_i32 : i32
    %c0_i32 = arith.constant 0 : i32
    %2 = arith.maxsi %1, %c0_i32 : i32
    %c0_i32_0 = arith.constant 0 : i32
    %c0_i32_1 = arith.constant 0 : i32
    %c0_i32_2 = arith.constant 0 : i32
    return %arg0, %2, %c0_i32_0, %c0_i32_1 : i32, i32, i32, i32
  }
  func.func @transform_1(%arg0: i32, %arg1: i32) -> (i32, i32, i32, i32) {
    %c0_i32 = arith.constant 0 : i32
    %c0_i32_0 = arith.constant 0 : i32
    %c0_i32_1 = arith.constant 0 : i32
    return %arg0, %arg1, %c0_i32, %c0_i32_0 : i32, i32, i32, i32
  }
  func.func @transform_2(%arg0: i32, %arg1: i32) -> (i32, i32, i32, i32) {
    %c16_i32 = arith.constant 16 : i32
    %0 = arith.muli %arg1, %c16_i32 : i32
    %c16_i32_0 = arith.constant 16 : i32
    %1 = arith.addi %0, %c16_i32_0 : i32
    %c15_i32 = arith.constant 15 : i32
    %2 = arith.minsi %1, %c15_i32 : i32
    %c0_i32 = arith.constant 0 : i32
    %c0_i32_1 = arith.constant 0 : i32
    %c0_i32_2 = arith.constant 0 : i32
    return %arg0, %2, %c0_i32, %c0_i32_1 : i32, i32, i32, i32
  }
  func.func @transform_3(%arg0: i32, %arg1: i32) -> (i32, i32) {
    %c0_i32 = arith.constant 0 : i32
    %c0_i32_0 = arith.constant 0 : i32
    %c0_i32_1 = arith.constant 0 : i32
    return %c0_i32, %c0_i32_0 : i32, i32
  }
  func.func @transform_4(%arg0: i32, %arg1: i32) -> (i32, i32) {
    %c0_i32 = arith.constant 0 : i32
    %c0_i32_0 = arith.constant 0 : i32
    %c0_i32_1 = arith.constant 0 : i32
    return %c0_i32, %c0_i32_0 : i32, i32
  }
  func.func @transform_5(%arg0: i32, %arg1: i32) -> (i32, i32, i32) {
    %c0_i32 = arith.constant 0 : i32
    %c0_i32_0 = arith.constant 0 : i32
    %c0_i32_1 = arith.constant 0 : i32
    %c0_i32_2 = arith.constant 0 : i32
    return %c0_i32, %c0_i32_0, %c0_i32_1 : i32, i32, i32
  }
  func.func @transform_6(%arg0: i32, %arg1: i32) -> (i32, i32) {
    %c0_i32 = arith.constant 0 : i32
    %c0_i32_0 = arith.constant 0 : i32
    %c0_i32_1 = arith.constant 0 : i32
    return %c0_i32, %c0_i32_0 : i32, i32
  }
  func.func @transform_7(%arg0: i32, %arg1: i32) -> (i32, i32, i32, i32) {
    %c0_i32 = arith.constant 0 : i32
    %c0_i32_0 = arith.constant 0 : i32
    %c0_i32_1 = arith.constant 0 : i32
    return %arg0, %arg1, %c0_i32, %c0_i32_0 : i32, i32, i32, i32
  }
  func.func @transform_8(%arg0: i32, %arg1: i32) -> (i32, i32, i32, i32) {
    %c0_i32 = arith.constant 0 : i32
    %c0_i32_0 = arith.constant 0 : i32
    %c0_i32_1 = arith.constant 0 : i32
    return %arg0, %arg1, %c0_i32, %c0_i32_0 : i32, i32, i32, i32
  }
  func.func @transform_9(%arg0: i32, %arg1: i32) -> (i32, i32, i32, i32) {
    %c0_i32 = arith.constant 0 : i32
    %c0_i32_0 = arith.constant 0 : i32
    %c0_i32_1 = arith.constant 0 : i32
    return %arg0, %arg1, %c0_i32, %c0_i32_0 : i32, i32, i32, i32
  }
}

module attributes {stable_mosaic.version = 11 : i64} {
  func.func @_bn_relu_kernel(%arg0: i32, %arg1: memref<16x128xbf16, #tpu.memory_space<vmem>>, %arg2: memref<1x128xf32, #tpu.memory_space<vmem>>, %arg3: memref<1x128xf32, #tpu.memory_space<vmem>>, %arg4: memref<16x128xf32, #tpu.memory_space<vmem>>) attributes {dimension_semantics = [#tpu.dimension_semantics<parallel>], iteration_bounds = array<i64: 2>, scalar_prefetch = 0 : i64, scratch_operands = 0 : i64, tpu.core_type = #tpu.core_type<tc>, window_params = [{transform_indices = @transform_0, window_bounds = array<i64: 16, 128>}, {pipeline_mode = #tpu.pipeline_mode<synchronous>, transform_indices = @transform_1, window_bounds = array<i64: 1, 128>}, {pipeline_mode = #tpu.pipeline_mode<synchronous>, transform_indices = @transform_2, window_bounds = array<i64: 1, 128>}, {transform_indices = @transform_3, window_bounds = array<i64: 16, 128>}]} {
    %c0 = arith.constant 0 : index
    %c0_0 = arith.constant 0 : index
    %0 = vector.load %arg1[%c0, %c0_0] : memref<16x128xbf16, #tpu.memory_space<vmem>>, vector<16x128xbf16>
    %1 = arith.extf %0 : vector<16x128xbf16> to vector<16x128xf32>
    %c0_1 = arith.constant 0 : index
    %c0_2 = arith.constant 0 : index
    %2 = vector.load %arg2[%c0_1, %c0_2] : memref<1x128xf32, #tpu.memory_space<vmem>>, vector<1x128xf32>
    %3 = vector.broadcast %2 : vector<1x128xf32> to vector<16x128xf32>
    %4 = arith.mulf %1, %3 : vector<16x128xf32>
    %c0_3 = arith.constant 0 : index
    %c0_4 = arith.constant 0 : index
    %5 = vector.load %arg3[%c0_3, %c0_4] : memref<1x128xf32, #tpu.memory_space<vmem>>, vector<1x128xf32>
    %6 = vector.broadcast %5 : vector<1x128xf32> to vector<16x128xf32>
    %7 = arith.addf %4, %6 : vector<16x128xf32>
    %cst = arith.constant 0.000000e+00 : f32
    %8 = vector.broadcast %cst : f32 to vector<16x128xf32>
    %9 = arith.maximumf %7, %8 : vector<16x128xf32>
    %c0_5 = arith.constant 0 : index
    %c0_6 = arith.constant 0 : index
    %10 = vector.load %arg4[%c0_5, %c0_6] : memref<16x128xf32, #tpu.memory_space<vmem>>, vector<16x128xf32>
    tpu.vector_store %arg4[%c0_5, %c0_6], %9 {strides = array<i32>} : memref<16x128xf32, #tpu.memory_space<vmem>>, vector<16x128xf32>,
    return
  }
  func.func @transform_0(%arg0: i32) -> (i32, i32) {
    %c0_i32 = arith.constant 0 : i32
    %c0_i32_0 = arith.constant 0 : i32
    return %arg0, %c0_i32 : i32, i32
  }
  func.func @transform_1(%arg0: i32) -> (i32, i32) {
    %c0_i32 = arith.constant 0 : i32
    %c0_i32_0 = arith.constant 0 : i32
    %c0_i32_1 = arith.constant 0 : i32
    return %c0_i32, %c0_i32_0 : i32, i32
  }
  func.func @transform_2(%arg0: i32) -> (i32, i32) {
    %c0_i32 = arith.constant 0 : i32
    %c0_i32_0 = arith.constant 0 : i32
    %c0_i32_1 = arith.constant 0 : i32
    return %c0_i32, %c0_i32_0 : i32, i32
  }
  func.func @transform_3(%arg0: i32) -> (i32, i32) {
    %c0_i32 = arith.constant 0 : i32
    %c0_i32_0 = arith.constant 0 : i32
    return %arg0, %c0_i32 : i32, i32
  }
}

</mosaic_0001>

<bundles_post_ra>
// kernel: double_conv.5
= control target key start
LH: loop header
LB: loop body
LE: loop exit
PB: predicated region body
PF: predicated region fallthrough
CT: control target
= control target key end

     0   :  { %s303_s12 = smov 0   ;;  %s326_s0 = inlined_call_operand.vmem [shape: bf16[32,128], index: 0, kind: input, shape index: {}]   ;;  %s327_s1 = inlined_call_operand.vmem [shape: f32[1,128], index: 1, kind: input, shape index: {}]   ;;  %s328_s2 = inlined_call_operand.vmem [shape: f32[1,128], index: 2, kind: input, shape index: {}]   ;;  %s329_s3 = inlined_call_operand.vmem [shape: f32[32,128], index: 3, kind: output, shape index: {}]  }
   0x1 LB: > { %s250_s13 = sadd.s32 4294967295, %s281_s12   ;;  %p254_p0 = scmp.ge.s32.totalorder %s281_s12, 1  ;;  %s281_s12 = sphi %s303_s12, %s13_s12  }
   0x2   : > { %p138_p1 = scmp.lt.s32.totalorder %s281_s12, 3 }
   0x4   : > { %p139_p2 = pnand %p254_p0, %p138_p1 }
   0x5   : > { %s255_s14 = sshll.u32 (!%p139_p2), %s250_s13, 1 }
   0x6   : > { %142 = sbr.rel (%p139_p2) target bundleno = 25 (0x19), region = 32  ;;  %p163_p3 = scmp.lt.s32.totalorder (!%p139_p2), %s255_s14, 3 }
   0xb   : > { %s331_s14 = smov (!%p163_p3, %s255_s14), 3  ;;  %v273_v0 = vld [vmem:[%s327_s1] ss:$0 sm:$0xff] }
   0xc   : > { %s256_s15 = sshll.u32 %s331_s14, 2  ;;  %v274_v4 = vld [vmem:[%s328_s2] ss:$0 sm:$0xff]  ;;  %s258_s23 = sshll.u32 %s331_s14, 3 }
   0xd   : > { %s166_s18 = scalar_lea.vmem %s326_s0, %s256_s15  ;;  %s172_s26 = scalar_lea.vmem %s329_s3, %s258_s23 }
   0xe   : > { %v262_v1 = vld [vmem:[%s166_s18] sm:$0xff]  }
   0xf   : > { %v263_v2 = vunpack.c.l.bf16 %v262_v1  ;;  %v264_v3 = vunpack.c.h.bf16 %v262_v1 }
  0x11   : > { %v182_v5 = vmul.f32 %v273_v0, %v263_v2  ;;  %v183_v6 = vmul.f32 %v273_v0, %v264_v3 }
  0x13   : > { %v188_v7 = vadd.f32 %v274_v4, %v182_v5  ;;  %v189_v8 = vadd.f32 %v274_v4, %v183_v6 }
  0x15   : > { %v190_v9 = vmax.f32 %v188_v7, 0.0  ;;  %v191_v10 = vmax.f32 %v189_v8, 0.0 }
  0x17   : > { %192 = vst [vmem:[%s172_s26] sm:$0xff] %v190_v9 }
  0x18   : > { %193 = vst [vmem:[%s172_s26 + $0x8] sm:$0xff] %v191_v10 }
  0x19 PF: > { %s13_s12 = sadd.s32 1, %s281_s12  }
  0x1a   : > { %p10_p4 = scmp.ge.s32.totalorder %s13_s12, 4  }
  0x1c   :  { %12 = sbr.rel (!%p10_p4) target bundleno = 1 (0x1), region = 62 }

// kernel: double_conv.3
= control target key start
LH: loop header
LB: loop body
LE: loop exit
PB: predicated region body
PF: predicated region fallthrough
CT: control target
= control target key end

     0   :  { %s6157_s23 = smov 0   ;;  %s6159_s24 = smov 0   ;;  %s7687_s0 = inlined_call_operand.vmem [shape: bf16[2,16,16,4], index: 0, kind: input, shape index: {}, may-alias: {0,1,2}]   ;;  %s7688_s1 = inlined_call_operand.vmem [shape: bf16[2,16,16,4], index: 1, kind: input, shape index: {}, may-alias: {0,1,2}]   ;;  %s7689_s2 = inlined_call_operand.vmem [shape: bf16[2,16,16,4], index: 2, kind: input, shape index: {}, may-alias: {0,1,2}]   ;;  %s7690_s3 = inlined_call_operand.vmem [shape: bf16[9,4,8], index: 3, kind: input, shape index: {}]   ;;  %s7691_s4 = inlined_call_operand.vmem [shape: f32[1,8], index: 4, kind: input, shape index: {}]   ;;  %s7692_s5 = inlined_call_operand.vmem [shape: bf16[2,16,16,8], index: 5, kind: output, shape index: {0}]   ;;  %s7693_s6 = inlined_call_operand.vmem [shape: f32[2,1,1,8], index: 6, kind: output, shape index: {1}]   ;;  %s7694_s7 = inlined_call_operand.vmem [shape: f32[2,1,1,8], index: 7, kind: output, shape index: {2}]  }
   0x1   :  { %s6161_s2 = smov 0  }
   0x2 LB: > { %s30_s25 = sadd.s32 1, %s6110_s24  ;;  %p5550_p0 = scmp.ge.s32.totalorder %s6114_s2, 1  ;;  %s6114_s2 = sphi %s6161_s2, %s18_s2   ;;  %s6110_s24 = sphi %s6159_s24, %s7736_s24   ;;  %s6106_s23 = sphi %s6157_s23, %s7735_s23  }
   0x3   : > { %p32_p1 = scmp.ge.s32.totalorder %s30_s25, 2  ;;  %p332_p2 = scmp.lt.s32.totalorder %s6114_s2, 3 }
   0x5   : > { %s7738_s25 = smov (%p32_p1, %s30_s25), 0  ;;  %p333_p3 = pnand %p5550_p0, %p332_p2 }
   0x7   : > { %336 = sbr.rel (%p333_p3) target bundleno = 845 (0x34d), region = 40 }
   0xc   : > { %v5559_v0 = vld [vmem:[%s7690_s3 + $0x2] sm:$0x3]  ;;  %vm1688_vm0 = vcmask 1041408   ;;  %p430_p4 = scmp.lt.s32.totalorder %s6106_s23, 1  ;;  %vm481_vm1 = vcmask 24576   ;;  %vm949_vm6 = vcmask 27648  }
   0xd   : > { %v1690_v1 = vsel %vm1688_vm0, %v5559_v0, 0  ;;  %vm482_vm2 = vsmask.f32 256  ;;  %v496_v2 = vld [vmem:[#allocation2 + $0x30] sm:$0x1]  ;;  %vm1639_vm13 = vcmask 31744  }
   0xe   : > { %6006 = vmatpush.bf16.msra.mxu1 %v1690_v1  ;;  %6007 = vmatpush.bf16.msra.mxu2 %v1690_v1  ;;  %s7740_s23 = smov (!%p430_p4, %s6106_s23), 1  ;;  %vm6182_vm3 = vmand %vm481_vm1, %vm482_vm2  ;;  %vm538_vm4 = vsmask.f32 7938  ;;  %v552_v4 = vld [vmem:[#allocation2 + $0x38] sm:$0x1]  ;;  %vm2049_vm14 = vcmask 1042432  }
   0xf   : > { %6008 = vmatpush.bf16.msra.mxu3 %v1690_v1  ;;  %1699 = vmatpush.bf16.msra.mxu0 %v1690_v1  ;;  %v497_v5 = vsel %vm6182_vm3, 0, %v496_v2  ;;  %vm6189_vm5 = vmand %vm481_vm1, %vm538_vm4  ;;  %s5954_s28 = sshll.u32 %s7740_s23, 7  ;;  %vm626_vm7 = vsmask.f32 4368  ;;  %v508_v8 = vld [vmem:[#allocation2 + $0x60] sm:$0x1]  ;;  %s473_s13 = scalar_lea.vmem %s7693_s6, %s7740_s23 }
  0x10   : > { %498 = vst [vmem:[#allocation2 + $0x30] sm:$0x1] %v497_v5  ;;  %v553_v7 = vsel %vm6189_vm5, 0, %v552_v4  ;;  %s6201_s8 = scalar_lea.vmem %s7688_s1, %s5954_s28  ;;  %v564_v9 = vld [vmem:[#allocation2 + $0x68] sm:$0x1]  ;;  %v509_v12 = vsel %vm6182_vm3, 0, %v508_v8  ;;  %vm6213_vm8 = vmor %vm482_vm2, %vm626_vm7  ;;  %s7261_s9 = scalar_lea.vmem %s7692_s5, %s5954_s28 }
  0x11   : > { %554 = vst [vmem:[#allocation2 + $0x38] sm:$0x1] %v553_v7  ;;  %v600_v10 = vld [vmem:[%s6201_s8 + $0x18] sm:$0xf]  ;;  %v601_v11 = vld [vmem:[%s6201_s8 + $0x1c] sm:$0xf]  ;;  %vm6219_vm9 = vmand %vm949_vm6, %vm538_vm4  ;;  %s479_s16 = scalar_lea.vmem %s7694_s7, %s7740_s23 }
  0x12   : > { %v565_v13 = vsel %vm6189_vm5, 0, %v564_v9  ;;  %v680_v14 = vshrl.u32 %v600_v10, 16  ;;  %v683_v15 = vshll.u32 %v600_v10, 16  ;;  %v688_v16 = vshrl.u32 %v601_v11, 16  ;;  %510 = vst [vmem:[#allocation2 + $0x60] sm:$0x1] %v509_v12 }
  0x13   : > { %v691_v17 = vshll.u32 %v601_v11, 16  ;;  %566 = vst [vmem:[#allocation2 + $0x68] sm:$0x1] %v565_v13  ;;  %v608_v18 = vld [vmem:[%s6201_s8 + $0x38] sm:$0xf]  ;;  %vm2050_vm15 = vcmask 1046532  }
  0x14   : > { %v609_v19 = vld [vmem:[%s6201_s8 + $0x3c] sm:$0xf]  ;;  %v682_v21 = vrot.slane %v680_v14, 7  ;;  %v690_v22 = vrot.slane %v688_v16, 7  ;;  %v748_v23 = vshrl.u32 %v608_v18, 16  ;;  %v751_v26 = vshll.u32 %v608_v18, 16  ;;  %vm6535_vm1 = vmor %vm2049_vm14, %vm2050_vm15 }
  0x15   : > { %v520_v24 = vld [vmem:[#allocation2 + $0x90] sm:$0x1]  ;;  %v756_v27 = vshrl.u32 %v609_v19, 16  ;;  %v759_v28 = vshll.u32 %v609_v19, 16  ;;  %v576_v30 = vld [vmem:[#allocation2 + $0x98] sm:$0x1] }
  0x16   : > { %v521_v29 = vsel %vm6182_vm3, 0, %v520_v24  ;;  %v685_v31 = vor.u32 %v683_v15, %v682_v21  ;;  %v686_v32 = vrot.slane %v682_v21, 4  ;;  %v693_v33 = vor.u32 %v691_v17, %v690_v22  ;;  %v616_v43 = vld [vmem:[%s6201_s8 + $0x58] sm:$0xf]  ;;  %v617_v44 = vld [vmem:[%s6201_s8 + $0x5c] sm:$0xf] }
  0x17   : > { %v695_v34 = vrot.slane %v690_v22, 4  ;;  %v973_v35 = vld [vmem:[#allocation2 + $0x30] sm:$0xf]  ;;  %522 = vst [vmem:[#allocation2 + $0x90] sm:$0x1] %v521_v29  ;;  %v750_v37 = vrot.slane %v748_v23, 7 }
  0x18   : > { %v977_v36 = vld [vmem:[#allocation2 + $0x38] sm:$0x1]  ;;  %v758_v38 = vrot.slane %v756_v27, 7  ;;  %v577_v39 = vsel %vm6189_vm5, 0, %v576_v30  ;;  %v694_v40 = vsel %vm6213_vm8, %v686_v32, %v693_v33  ;;  %v974_v41 = vsel %vm6219_vm9, %v685_v31, %v973_v35  ;;  %v5672_v57 = vld [vmem:[%s7690_s3 + $0x4] sm:$0x3] }
  0x19   : > { %v978_v42 = vsel %vm6182_vm3, %v695_v34, %v977_v36  ;;  %578 = vst [vmem:[#allocation2 + $0x98] sm:$0x1] %v577_v39  ;;  %v753_v45 = vor.u32 %v751_v26, %v750_v37  ;;  %v754_v46 = vrot.slane %v750_v37, 4  ;;  %v1001_v49 = vld [vmem:[#allocation2 + $0x60] sm:$0xf]  ;;  %v816_v51 = vshrl.u32 %v616_v43, 16 }
  0x1a   : > { %975 = vst [vmem:[#allocation2 + $0x30] sm:$0xf] %v974_v41  ;;  %v761_v47 = vor.u32 %v759_v28, %v758_v38  ;;  %v763_v48 = vrot.slane %v758_v38, 4  ;;  %v1005_v50 = vld [vmem:[#allocation2 + $0x68] sm:$0x1]  ;;  %v819_v52 = vshll.u32 %v616_v43, 16 }
  0x1b   : > { %976 = vst.msk [vmem:[#allocation2 + $0x34] sm:$0xf] %vm949_vm6, %v694_v40  ;;  %vm1202_vm10 = vsmask.f32 3328  ;;  %vm1203_vm11 = vsmask.f32 7440  ;;  %v1002_v54 = vsel %vm6219_vm9, %v753_v45, %v1001_v49 }
  0x1c   : > { %979 = vst [vmem:[#allocation2 + $0x38] sm:$0x1] %v978_v42  ;;  %v762_v53 = vsel %vm6213_vm8, %v754_v46, %v761_v47  ;;  %v1006_v55 = vsel %vm6182_vm3, %v763_v48, %v1005_v50  ;;  %v824_v56 = vshrl.u32 %v617_v44, 16  ;;  %v818_v58 = vrot.slane %v816_v51, 7  ;;  %v484_v1 = vld [vmem:[#allocation2] sm:$0x1]  ;;  %vm6260_vm12 = vmor %vm1202_vm10, %vm1203_vm11 }
  0x1d   : > { %1003 = vst [vmem:[#allocation2 + $0x60] sm:$0xf] %v1002_v54  ;;  %v827_v59 = vshll.u32 %v617_v44, 16  ;;  %v2263_v60 = vsel %vm1688_vm0, %v5672_v57, 0  ;;  %v485_v7 = vsel %vm6182_vm3, 0, %v484_v1  ;;  %v6116_v54 = vmov 0  }
  0x1e   : > { %1004 = vst.msk [vmem:[#allocation2 + $0x64] sm:$0xf] %vm949_vm6, %v762_v53  ;;  %v826_v61 = vrot.slane %v824_v56, 7  ;;  %v1029_v62 = vld [vmem:[#allocation2 + $0x90] sm:$0xf]  ;;  %2272 = vmatpush.bf16.msrb.mxu2 %v2263_v60  ;;  %v821_v63 = vor.u32 %v819_v52, %v818_v58  ;;  %v822_v0 = vrot.slane %v818_v58, 4 }
  0x1f   : > { %1007 = vst [vmem:[#allocation2 + $0x68] sm:$0x1] %v1006_v55  ;;  %v540_v8 = vld [vmem:[#allocation2 + $0x8] sm:$0x1]  ;;  %vm5164_vm2 = vcmask 64512  }
  0x20   : > { %v829_v2 = vor.u32 %v827_v59, %v826_v61  ;;  %v831_v4 = vrot.slane %v826_v61, 4  ;;  %v1033_v5 = vld [vmem:[#allocation2 + $0x98] sm:$0x1]  ;;  %v1030_v10 = vsel %vm6219_vm9, %v821_v63, %v1029_v62  ;;  %486 = vst [vmem:[#allocation2] sm:$0x1] %v485_v7  ;;  %v541_v11 = vsel %vm6189_vm5, 0, %v540_v8 }
  0x21   : > { %v1161_v9 = vld [vmem:[#allocation2 + $0x30] sm:$0xf]  ;;  %1031 = vst [vmem:[#allocation2 + $0x90] sm:$0xf] %v1030_v10  ;;  %v5689_v63 = vld [vmem:[%s7690_s3 + $0x6] sm:$0x3] }
  0x22   : > { %v1162_v12 = vld [vmem:[#allocation2 + $0x34] sm:$0xf]  ;;  %v1302_v13 = vshrl.u32 %v1161_v9, 16  ;;  %v1305_v14 = vshll.u32 %v1161_v9, 16  ;;  %v830_v15 = vsel %vm6213_vm8, %v822_v0, %v829_v2  ;;  %v1034_v24 = vsel %vm6182_vm3, %v831_v4, %v1033_v5  ;;  %542 = vst [vmem:[#allocation2 + $0x8] sm:$0x1] %v541_v11 }
  0x23   : > { %v1190_v16 = vld [vmem:[#allocation2 + $0x38] sm:$0x1]  ;;  %v1311_v17 = vshll.u32 %v1162_v12, 16  ;;  %v1315_v18 = vshrl.u32 %v1162_v12, 16  ;;  %1032 = vst.msk [vmem:[#allocation2 + $0x94] sm:$0xf] %vm949_vm6, %v830_v15 }
  0x24   : > { %v1304_v19 = vrot.slane %v1302_v13, 4  ;;  %v1307_v21 = vrot.slane %v1305_v14, 5  ;;  %v1321_v22 = vshll.u32 %v1190_v16, 16  ;;  %v1169_v23 = vld [vmem:[#allocation2 + $0x60] sm:$0xf] }
  0x25   : > { %v1313_v26 = vrot.slane %v1311_v17, 5  ;;  %v1317_v27 = vrot.slane %v1315_v18, 4  ;;  %v1170_v28 = vld [vmem:[#allocation2 + $0x64] sm:$0xf]  ;;  %v1398_v29 = vshrl.u32 %v1169_v23, 16  ;;  %v1401_v30 = vshll.u32 %v1169_v23, 16 }
  0x26   : > { %v1308_v31 = vor.u32 %v1307_v21, %v1304_v19  ;;  %v1323_v32 = vrot.slane %v1321_v22, 5  ;;  %v1194_v33 = vld [vmem:[#allocation2 + $0x68] sm:$0x1]  ;;  %v1407_v34 = vshll.u32 %v1170_v28, 16  ;;  %v1411_v35 = vshrl.u32 %v1170_v28, 16 }
  0x27   : > { %v1318_v37 = vor.u32 %v1317_v27, %v1313_v26  ;;  %v1400_v38 = vrot.slane %v1398_v29, 4  ;;  %v1403_v39 = vrot.slane %v1401_v30, 5  ;;  %v1417_v40 = vshll.u32 %v1194_v33, 16  ;;  %1035 = vst [vmem:[#allocation2 + $0x98] sm:$0x1] %v1034_v24 }
  0x28   : > { %v1309_v41 = vrot.slane %v1308_v31, 4  ;;  %v1409_v42 = vrot.slane %v1407_v34, 5  ;;  %v1413_v43 = vrot.slane %v1411_v35, 4  ;;  %v1177_v47 = vld [vmem:[#allocation2 + $0x90] sm:$0xf]  ;;  %v2549_v21 = vsel %vm1688_vm0, %v5689_v63, 0 }
  0x29   : > { %v1319_v44 = vrot.slane %v1318_v37, 4  ;;  %v1404_v45 = vor.u32 %v1403_v39, %v1400_v38  ;;  %v1419_v46 = vrot.slane %v1417_v40, 5  ;;  %v1068_v48 = vld [vmem:[#allocation2] sm:$0xf]  ;;  %v1494_v52 = vshrl.u32 %v1177_v47, 16  ;;  %2558 = vmatpush.bf16.msrb.mxu3 %v2549_v21 }
  0x2a   : > { %v1314_v49 = vsel %vm6260_vm12, %v1309_v41, %v1313_v26  ;;  %v1414_v50 = vor.u32 %v1413_v43, %v1409_v42  ;;  %v1178_v51 = vld [vmem:[#allocation2 + $0x94] sm:$0xf]  ;;  %v1497_v53 = vshll.u32 %v1177_v47, 16  ;;  %1071 = vst.msk [vmem:[#allocation2 + $0x4] sm:$0xf] %vm949_vm6, %v6116_v54  ;;  %v1069_v4 = vsel %vm6219_vm9, 0, %v1068_v48 }
  0x2b   : > { %v1324_v55 = vsel %vm6260_vm12, %v1319_v44, %v1323_v32  ;;  %v1599_v56 = vunpack.c.l.b16 %v1314_v49  ;;  %v1405_v57 = vrot.slane %v1404_v45, 4  ;;  %v1503_v58 = vshll.u32 %v1178_v51, 16  ;;  %1115 = vst.msk [vmem:[#allocation2 + $0xd0] sm:$0xf] %vm949_vm6, %v6116_v54  ;;  %v1185_v5 = vld [vmem:[%s7690_s3] sm:$0x3] }
  0x2c   : > { %v1600_v59 = vunpack.c.l.b16 %v1324_v55  ;;  %v1415_v60 = vrot.slane %v1414_v50, 4  ;;  %v1496_v61 = vrot.slane %v1494_v52, 4  ;;  %v1499_v62 = vrot.slane %v1497_v53, 5  ;;  %1070 = vst [vmem:[#allocation2] sm:$0xf] %v1069_v4 }
  0x2d   : > { %v1410_v0 = vsel %vm6260_vm12, %v1405_v57, %v1409_v42  ;;  %v1505_v1 = vrot.slane %v1503_v58, 5  ;;  %v1507_v2 = vshrl.u32 %v1178_v51, 16  ;;  %v5770_v12 = vld [vmem:[%s7690_s3 + $0x8] sm:$0x3]  ;;  %v499_v17 = vld [vmem:[#allocation2 + $0x3c] sm:$0x1] }
  0x2e   : > { %v1627_v7 = vpack.c.b16 %v1600_v59, %v1599_v56  ;;  %v1420_v8 = vsel %vm6260_vm12, %v1415_v60, %v1419_v46  ;;  %v1607_v9 = vunpack.c.l.b16 %v1410_v0  ;;  %v1198_v10 = vld [vmem:[#allocation2 + $0x98] sm:$0x1]  ;;  %v1500_v11 = vor.u32 %v1499_v62, %v1496_v61  ;;  %v1072_v16 = vld [vmem:[#allocation2 + $0x8] sm:$0x1]  ;;  %v555_v23 = vld [vmem:[#allocation2 + $0x44] sm:$0x1] }
  0x2f   : > { %v1608_v13 = vunpack.c.l.b16 %v1420_v8  ;;  %v1509_v14 = vrot.slane %v1507_v2, 4  ;;  %v1513_v15 = vshll.u32 %v1198_v10, 16  ;;  %v1073_v19 = vsel %vm6182_vm3, 0, %v1072_v16  ;;  %v602_v34 = vld [vmem:[%s6201_s8 + $0x20] sm:$0xf] }
  0x30   : > { %5564 = vmatmul.msk.bf16.vlgmr.msra.gmra.mxu1 %vm1639_vm13, %v1627_v7  ;;  %v1501_v18 = vrot.slane %v1500_v11, 4  ;;  %v1910_v22 = vsel %vm1688_vm0, %v1185_v5, 0  ;;  %1074 = vst [vmem:[#allocation2 + $0x8] sm:$0x1] %v1073_v19  ;;  %v3203_v29 = vsel %vm1688_vm0, %v5770_v12, 0  ;;  %v500_v33 = vsel %vm6182_vm3, 0, %v499_v17 }
  0x31   : > { %v1631_v24 = vpack.c.b16 %v1608_v13, %v1607_v9  ;;  %v1510_v26 = vor.u32 %v1509_v14, %v1505_v1  ;;  %v1515_v27 = vrot.slane %v1513_v15, 5  ;;  %v1154_v28 = vld [vmem:[#allocation2 + $0x4] sm:$0xf]  ;;  %1919 = vmatpush.bf16.msrb.mxu1 %v1910_v22  ;;  %3212 = vmatpush.bf16.msrb.mxu0 %v3203_v29  ;;  %501 = vst [vmem:[#allocation2 + $0x3c] sm:$0x1] %v500_v33  ;;  %v556_v38 = vsel %vm6189_vm5, 0, %v555_v23 }
  0x32   : > { %v1506_v30 = vsel %vm6260_vm12, %v1501_v18, %v1505_v1  ;;  %v1215_v31 = vshll.u32 %v1154_v28, 16  ;;  %v1219_v32 = vshrl.u32 %v1154_v28, 16  ;;  %v603_v39 = vld [vmem:[%s6201_s8 + $0x24] sm:$0xf]  ;;  %557 = vst [vmem:[#allocation2 + $0x44] sm:$0x1] %v556_v38 }
  0x33   : > { %5568 = vmatmul.msk.bf16.vlgmr.msra.gmra.mxu2 %vm1639_vm13, %v1631_v24  ;;  %v1511_v35 = vrot.slane %v1510_v26, 4  ;;  %v1615_v37 = vunpack.c.l.b16 %v1506_v30  ;;  %v697_v42 = vshrl.u32 %v602_v34, 16  ;;  %v700_v43 = vshll.u32 %v602_v34, 16  ;;  %v1153_v45 = vld [vmem:[#allocation2] sm:$0xf] }
  0x34   : > { %v1217_v40 = vrot.slane %v1215_v31, 5  ;;  %v1221_v41 = vrot.slane %v1219_v32, 4  ;;  %v705_v46 = vshrl.u32 %v603_v39, 16  ;;  %v708_v47 = vshll.u32 %v603_v39, 16  ;;  %v511_v48 = vld [vmem:[#allocation2 + $0x6c] sm:$0x1] }
  0x35   : > { %v1516_v44 = vsel %vm6260_vm12, %v1511_v35, %v1515_v27  ;;  %v1206_v50 = vshrl.u32 %v1153_v45, 16  ;;  %v1209_v51 = vshll.u32 %v1153_v45, 16  ;;  %v567_v53 = vld [vmem:[#allocation2 + $0x74] sm:$0x1]  ;;  %v699_v54 = vrot.slane %v697_v42, 7 }
  0x36   : > { %v1616_v49 = vunpack.c.l.b16 %v1516_v44  ;;  %v1222_v52 = vor.u32 %v1221_v41, %v1217_v40  ;;  %v707_v55 = vrot.slane %v705_v46, 7  ;;  %v512_v56 = vsel %vm6182_vm3, 0, %v511_v48  ;;  %v610_v58 = vld [vmem:[%s6201_s8 + $0x40] sm:$0xf]  ;;  %v611_v63 = vld [vmem:[%s6201_s8 + $0x44] sm:$0xf] }
  0x37   : > { %v568_v57 = vsel %vm6189_vm5, 0, %v567_v53  ;;  %v1186_v60 = vld [vmem:[#allocation2 + $0x8] sm:$0x1]  ;;  %v1208_v61 = vrot.slane %v1206_v50, 4  ;;  %v1211_v62 = vrot.slane %v1209_v51, 5  ;;  %v702_v2 = vor.u32 %v700_v43, %v699_v54 }
  0x38   : > { %v1635_v59 = vpack.c.b16 %v1616_v49, %v1615_v37  ;;  %v1223_v0 = vrot.slane %v1222_v52, 4  ;;  %v1225_v1 = vshll.u32 %v1186_v60, 16  ;;  %v703_v4 = vrot.slane %v699_v54, 4  ;;  %513 = vst [vmem:[#allocation2 + $0x6c] sm:$0x1] %v512_v56 }
  0x39   : > { %v1212_v5 = vor.u32 %v1211_v62, %v1208_v61  ;;  %v710_v7 = vor.u32 %v708_v47, %v707_v55  ;;  %v712_v8 = vrot.slane %v707_v55, 4  ;;  %v980_v9 = vld [vmem:[#allocation2 + $0x3c] sm:$0xf]  ;;  %569 = vst [vmem:[#allocation2 + $0x74] sm:$0x1] %v568_v57  ;;  %v765_v10 = vshrl.u32 %v610_v58, 16 }
  0x3a   : > { %5572 = vmatmul.msk.bf16.vlgmr.msra.gmra.mxu3 %vm1639_vm13, %v1635_v59  ;;  %v1227_v11 = vrot.slane %v1225_v1, 5  ;;  %v981_v12 = vsel %vm6219_vm9, %v702_v2, %v980_v9  ;;  %v984_v13 = vld [vmem:[#allocation2 + $0x44] sm:$0x1]  ;;  %v768_v14 = vshll.u32 %v610_v58, 16  ;;  %v773_v15 = vshrl.u32 %v611_v63, 16 }
  0x3b   : > { %v1213_v16 = vrot.slane %v1212_v5, 4  ;;  %v711_v17 = vsel %vm6213_vm8, %v703_v4, %v710_v7  ;;  %982 = vst [vmem:[#allocation2 + $0x3c] sm:$0xf] %v981_v12  ;;  %v985_v18 = vsel %vm6182_vm3, %v712_v8, %v984_v13  ;;  %v767_v19 = vrot.slane %v765_v10, 7  ;;  %v523_v21 = vld [vmem:[#allocation2 + $0x9c] sm:$0x1] }
  0x3c   : > { %v1228_v22 = vsel %vm6260_vm12, %v1223_v0, %v1227_v11  ;;  %983 = vst.msk [vmem:[#allocation2 + $0x40] sm:$0xf] %vm949_vm6, %v711_v17  ;;  %v775_v23 = vrot.slane %v773_v15, 7  ;;  %v776_v24 = vshll.u32 %v611_v63, 16  ;;  %v524_v26 = vsel %vm6182_vm3, 0, %v523_v21 }
  0x3d   : > { %v1218_v27 = vsel %vm6260_vm12, %v1213_v16, %v1217_v40  ;;  %v1592_v28 = vunpack.c.l.b16 %v1228_v22  ;;  %986 = vst [vmem:[#allocation2 + $0x44] sm:$0x1] %v985_v18  ;;  %v770_v29 = vor.u32 %v768_v14, %v767_v19  ;;  %v771_v30 = vrot.slane %v767_v19, 4  ;;  %v579_v31 = vld [vmem:[#allocation2 + $0xa4] sm:$0x1] }
  0x3e   : > { %v1591_v32 = vunpack.c.l.b16 %v1218_v27  ;;  %v778_v33 = vor.u32 %v776_v24, %v775_v23  ;;  %v780_v34 = vrot.slane %v775_v23, 4  ;;  %525 = vst [vmem:[#allocation2 + $0x9c] sm:$0x1] %v524_v26  ;;  %v580_v35 = vsel %vm6189_vm5, 0, %v579_v31  ;;  %v618_v37 = vld [vmem:[%s6201_s8 + $0x60] sm:$0xf] }
  0x3f   : > { %v1008_v38 = vld [vmem:[#allocation2 + $0x6c] sm:$0xf]  ;;  %581 = vst [vmem:[#allocation2 + $0xa4] sm:$0x1] %v580_v35  ;;  %v619_v39 = vld [vmem:[%s6201_s8 + $0x64] sm:$0xf] }
  0x40   : > { %v1623_v41 = vpack.c.b16 %v1592_v28, %v1591_v32  ;;  %v779_v40 = vsel %vm6213_vm8, %v771_v30, %v778_v33  ;;  %v1009_v42 = vsel %vm6219_vm9, %v770_v29, %v1008_v38  ;;  %v1012_v43 = vld [vmem:[#allocation2 + $0x74] sm:$0x1]  ;;  %v833_v44 = vshrl.u32 %v618_v37, 16  ;;  %v487_v45 = vld [vmem:[#allocation2 + $0xc] sm:$0x1] }
  0x41   : > { %1010 = vst [vmem:[#allocation2 + $0x6c] sm:$0xf] %v1009_v42  ;;  %v1013_v46 = vsel %vm6182_vm3, %v780_v34, %v1012_v43  ;;  %v836_v47 = vshll.u32 %v618_v37, 16  ;;  %v841_v48 = vshrl.u32 %v619_v39, 16  ;;  %v844_v49 = vshll.u32 %v619_v39, 16 }
  0x42   : > { %5560 = vmatmul.msk.bf16.vlgmr.msra.gmra.mxu0 %vm1639_vm13, %v1623_v41  ;;  %v1163_v50 = vld [vmem:[#allocation2 + $0x3c] sm:$0xf]  ;;  %1011 = vst.msk [vmem:[#allocation2 + $0x70] sm:$0xf] %vm949_vm6, %v779_v40  ;;  %v835_v51 = vrot.slane %v833_v44, 7  ;;  %v488_v52 = vsel %vm6182_vm3, 0, %v487_v45 }
  0x43   : > { %v1164_v53 = vld [vmem:[#allocation2 + $0x40] sm:$0xf]  ;;  %v1326_v54 = vshrl.u32 %v1163_v50, 16  ;;  %v1329_v55 = vshll.u32 %v1163_v50, 16  ;;  %1014 = vst [vmem:[#allocation2 + $0x74] sm:$0x1] %v1013_v46 }
  0x44   : > { %v1191_v56 = vld [vmem:[#allocation2 + $0x44] sm:$0x1]  ;;  %v1335_v57 = vshll.u32 %v1164_v53, 16  ;;  %v1339_v58 = vshrl.u32 %v1164_v53, 16  ;;  %v838_v59 = vor.u32 %v836_v47, %v835_v51  ;;  %v839_v60 = vrot.slane %v835_v51, 4 }
  0x45   : > { %v1328_v61 = vrot.slane %v1326_v54, 4  ;;  %v1331_v62 = vrot.slane %v1329_v55, 5  ;;  %v1345_v63 = vshll.u32 %v1191_v56, 16  ;;  %v843_v0 = vrot.slane %v841_v48, 7  ;;  %v1036_v1 = vld [vmem:[#allocation2 + $0x9c] sm:$0xf] }
  0x46   : > { %v1337_v2 = vrot.slane %v1335_v57, 5  ;;  %v1341_v4 = vrot.slane %v1339_v58, 4  ;;  %v1037_v5 = vsel %vm6219_vm9, %v838_v59, %v1036_v1  ;;  %v1040_v7 = vld [vmem:[#allocation2 + $0xa4] sm:$0x1]  ;;  %489 = vst [vmem:[#allocation2 + $0xc] sm:$0x1] %v488_v52 }
  0x47   : > { %v1332_v8 = vor.u32 %v1331_v62, %v1328_v61  ;;  %v846_v9 = vor.u32 %v844_v49, %v843_v0  ;;  %v848_v10 = vrot.slane %v843_v0, 4  ;;  %1038 = vst [vmem:[#allocation2 + $0x9c] sm:$0xf] %v1037_v5  ;;  %v543_v11 = vld [vmem:[#allocation2 + $0x14] sm:$0x1]  ;;  %v1347_v13 = vrot.slane %v1345_v63, 5 }
  0x48   : > { %v1342_v12 = vor.u32 %v1341_v4, %v1337_v2  ;;  %v1171_v14 = vld [vmem:[#allocation2 + $0x6c] sm:$0xf]  ;;  %v544_v15 = vsel %vm6189_vm5, 0, %v543_v11  ;;  %v594_v22 = vld [vmem:[%s6201_s8] sm:$0xf] }
  0x49   : > { %v1333_v16 = vrot.slane %v1332_v8, 4  ;;  %v1172_v17 = vld [vmem:[#allocation2 + $0x70] sm:$0xf]  ;;  %v1422_v18 = vshrl.u32 %v1171_v14, 16  ;;  %v1425_v19 = vshll.u32 %v1171_v14, 16  ;;  %v847_v21 = vsel %vm6213_vm8, %v839_v60, %v846_v9 }
  0x4a   : > { %v1343_v23 = vrot.slane %v1342_v12, 4  ;;  %v1195_v24 = vld [vmem:[#allocation2 + $0x74] sm:$0x1]  ;;  %v1431_v26 = vshll.u32 %v1172_v17, 16  ;;  %v1435_v27 = vshrl.u32 %v1172_v17, 16  ;;  %v1041_v28 = vsel %vm6182_vm3, %v848_v10, %v1040_v7 }
  0x4b   : > { %v1338_v29 = vsel %vm6260_vm12, %v1333_v16, %v1337_v2  ;;  %v1424_v30 = vrot.slane %v1422_v18, 4  ;;  %v1427_v31 = vrot.slane %v1425_v19, 5  ;;  %v1441_v32 = vshll.u32 %v1195_v24, 16  ;;  %1039 = vst.msk [vmem:[#allocation2 + $0xa0] sm:$0xf] %vm949_vm6, %v847_v21 }
  0x4c   : > { %v1348_v33 = vsel %vm6260_vm12, %v1343_v23, %v1347_v13  ;;  %v1601_v34 = vunpack.c.l.b16 %v1338_v29  ;;  %v1433_v35 = vrot.slane %v1431_v26, 5  ;;  %v1437_v37 = vrot.slane %v1435_v27, 4  ;;  %1042 = vst [vmem:[#allocation2 + $0xa4] sm:$0x1] %v1041_v28  ;;  %v595_v38 = vld [vmem:[%s6201_s8 + $0x4] sm:$0xf] }
  0x4d   : > { %v1602_v39 = vunpack.c.l.b16 %v1348_v33  ;;  %v1428_v41 = vor.u32 %v1427_v31, %v1424_v30  ;;  %v1443_v40 = vrot.slane %v1441_v32, 5  ;;  %545 = vst [vmem:[#allocation2 + $0x14] sm:$0x1] %v544_v15  ;;  %v629_v44 = vshrl.u32 %v594_v22, 16  ;;  %v502_v51 = vld [vmem:[#allocation2 + $0x48] sm:$0x1] }
  0x4e   : > { %v1438_v42 = vor.u32 %v1437_v37, %v1433_v35  ;;  %v1179_v43 = vld [vmem:[#allocation2 + $0x9c] sm:$0xf]  ;;  %v632_v45 = vshll.u32 %v594_v22, 16  ;;  %v637_v46 = vshrl.u32 %v595_v38, 16  ;;  %v640_v55 = vshll.u32 %v595_v38, 16 }
  0x4f   : > { %v1628_v47 = vpack.c.b16 %v1602_v39, %v1601_v34  ;;  %v1429_v48 = vrot.slane %v1428_v41, 4  ;;  %v1518_v49 = vshrl.u32 %v1179_v43, 16  ;;  %v1521_v50 = vshll.u32 %v1179_v43, 16  ;;  %v951_v59 = vld [vmem:[#allocation2 + $0xc] sm:$0xf] }
  0x50   : > { %v1439_v52 = vrot.slane %v1438_v42, 4  ;;  %v631_v53 = vrot.slane %v629_v44, 7  ;;  %v639_v54 = vrot.slane %v637_v46, 7  ;;  %v503_v60 = vsel %vm6182_vm3, 0, %v502_v51  ;;  %v558_v9 = vld [vmem:[#allocation2 + $0x50] sm:$0x1] }
  0x51   : > { %5565 = vmatmul.msk.bf16.gmra.mxu1 %vm1639_vm13, %v1628_v47  ;;  %v1434_v56 = vsel %vm6260_vm12, %v1429_v48, %v1433_v35  ;;  %v1520_v57 = vrot.slane %v1518_v49, 4  ;;  %v1523_v58 = vrot.slane %v1521_v50, 5  ;;  %504 = vst [vmem:[#allocation2 + $0x48] sm:$0x1] %v503_v60  ;;  %v604_v14 = vld [vmem:[%s6201_s8 + $0x28] sm:$0xf] }
  0x52   : > { %v1444_v61 = vsel %vm6260_vm12, %v1439_v52, %v1443_v40  ;;  %v1609_v62 = vunpack.c.l.b16 %v1434_v56  ;;  %v1180_v63 = vld [vmem:[#allocation2 + $0xa0] sm:$0xf]  ;;  %v634_v0 = vor.u32 %v632_v45, %v631_v53  ;;  %v635_v1 = vrot.slane %v631_v53, 4  ;;  %v605_v19 = vld [vmem:[%s6201_s8 + $0x2c] sm:$0xf] }
  0x53   : > { %v1610_v2 = vunpack.c.l.b16 %v1444_v61  ;;  %v1199_v4 = vld [vmem:[#allocation2 + $0xa4] sm:$0x1]  ;;  %v1524_v5 = vor.u32 %v1523_v58, %v1520_v57  ;;  %v1527_v7 = vshll.u32 %v1180_v63, 16  ;;  %v1531_v8 = vshrl.u32 %v1180_v63, 16  ;;  %v514_v26 = vld [vmem:[#allocation2 + $0x78] sm:$0x1] }
  0x54   : > { %v1537_v10 = vshll.u32 %v1199_v4, 16  ;;  %v642_v11 = vor.u32 %v640_v55, %v639_v54  ;;  %v644_v12 = vrot.slane %v639_v54, 4  ;;  %v956_v13 = vld [vmem:[#allocation2 + $0x14] sm:$0x1]  ;;  %v952_v23 = vsel %vm6219_vm9, %v634_v0, %v951_v59  ;;  %v570_v27 = vld [vmem:[#allocation2 + $0x80] sm:$0x1] }
  0x55   : > { %v1632_v15 = vpack.c.b16 %v1610_v2, %v1609_v62  ;;  %v1525_v16 = vrot.slane %v1524_v5, 4  ;;  %v1529_v17 = vrot.slane %v1527_v7, 5  ;;  %v1533_v18 = vrot.slane %v1531_v8, 4  ;;  %953 = vst [vmem:[#allocation2 + $0xc] sm:$0xf] %v952_v23 }
  0x56   : > { %v1539_v21 = vrot.slane %v1537_v10, 5  ;;  %v643_v22 = vsel %vm6213_vm8, %v635_v1, %v642_v11  ;;  %v957_v24 = vsel %vm6182_vm3, %v644_v12, %v956_v13  ;;  %v559_v30 = vsel %vm6189_vm5, 0, %v558_v9  ;;  %v612_v32 = vld [vmem:[%s6201_s8 + $0x48] sm:$0xf]  ;;  %v613_v37 = vld [vmem:[%s6201_s8 + $0x4c] sm:$0xf] }
  0x57   : > { %5569 = vmatmul.msk.bf16.gmra.mxu2 %vm1639_vm13, %v1632_v15  ;;  %v1530_v28 = vsel %vm6260_vm12, %v1525_v16, %v1529_v17  ;;  %v1534_v29 = vor.u32 %v1533_v18, %v1529_v17  ;;  %v714_v31 = vshrl.u32 %v604_v14, 16  ;;  %955 = vst.msk [vmem:[#allocation2 + $0x10] sm:$0xf] %vm949_vm6, %v643_v22  ;;  %v717_v33 = vshll.u32 %v604_v14, 16  ;;  %v526_v50 = vld [vmem:[#allocation2 + $0xa8] sm:$0x1] }
  0x58   : > { %v722_v34 = vshrl.u32 %v605_v19, 16  ;;  %v725_v35 = vshll.u32 %v605_v19, 16  ;;  %v1617_v39 = vunpack.c.l.b16 %v1530_v28  ;;  %958 = vst [vmem:[#allocation2 + $0x14] sm:$0x1] %v957_v24  ;;  %v987_v40 = vld [vmem:[#allocation2 + $0x48] sm:$0xf] }
  0x59   : > { %v1535_v38 = vrot.slane %v1534_v29, 4  ;;  %v716_v41 = vrot.slane %v714_v31, 7  ;;  %560 = vst [vmem:[#allocation2 + $0x50] sm:$0x1] %v559_v30  ;;  %v515_v43 = vsel %vm6182_vm3, 0, %v514_v26  ;;  %v571_v44 = vsel %vm6189_vm5, 0, %v570_v27 }
  0x5a   : > { %v724_v42 = vrot.slane %v722_v34, 7  ;;  %v782_v45 = vshrl.u32 %v612_v32, 16  ;;  %516 = vst [vmem:[#allocation2 + $0x78] sm:$0x1] %v515_v43  ;;  %v785_v49 = vshll.u32 %v612_v32, 16  ;;  %v790_v56 = vshrl.u32 %v613_v37, 16 }
  0x5b   : > { %v1540_v46 = vsel %vm6260_vm12, %v1535_v38, %v1539_v21  ;;  %v719_v47 = vor.u32 %v717_v33, %v716_v41  ;;  %v720_v48 = vrot.slane %v716_v41, 4  ;;  %572 = vst [vmem:[#allocation2 + $0x80] sm:$0x1] %v571_v44  ;;  %v793_v57 = vshll.u32 %v613_v37, 16  ;;  %v582_v58 = vld [vmem:[#allocation2 + $0xb0] sm:$0x1] }
  0x5c   : > { %v1618_v51 = vunpack.c.l.b16 %v1540_v46  ;;  %v727_v52 = vor.u32 %v725_v35, %v724_v42  ;;  %v729_v53 = vrot.slane %v724_v42, 4  ;;  %v784_v54 = vrot.slane %v782_v45, 7  ;;  %v620_v59 = vld [vmem:[%s6201_s8 + $0x68] sm:$0xf]  ;;  %v1155_v61 = vld [vmem:[#allocation2 + $0xc] sm:$0xf] }
  0x5d   : > { %v988_v55 = vsel %vm6219_vm9, %v719_v47, %v987_v40  ;;  %v527_v0 = vsel %vm6182_vm3, 0, %v526_v50  ;;  %v1230_v2 = vshrl.u32 %v1155_v61, 16  ;;  %v1233_v4 = vshll.u32 %v1155_v61, 16  ;;  %v621_v31 = vld [vmem:[%s6201_s8 + $0x6c] sm:$0xf] }
  0x5e   : > { %v1636_v60 = vpack.c.b16 %v1618_v51, %v1617_v39  ;;  %v728_v62 = vsel %vm6213_vm8, %v720_v48, %v727_v52  ;;  %989 = vst [vmem:[#allocation2 + $0x48] sm:$0xf] %v988_v55  ;;  %v788_v63 = vrot.slane %v784_v54, 4  ;;  %v6387_v1 = vld [vmem:[#allocation2 + $0x10] sm:$0xf]  ;;  %v787_v5 = vor.u32 %v785_v49, %v784_v54 }
  0x5f   : > { %990 = vst.msk [vmem:[#allocation2 + $0x4c] sm:$0xf] %vm949_vm6, %v728_v62  ;;  %v6391_v7 = vld [vmem:[#allocation2 + $0x14] sm:$0x1]  ;;  %v1239_v8 = vshll.u32 %v6387_v1, 16  ;;  %v1243_v9 = vshrl.u32 %v6387_v1, 16 }
  0x60   : > { %5573 = vmatmul.msk.bf16.gmra.mxu3 %vm1639_vm13, %v1636_v60  ;;  %v792_v10 = vrot.slane %v790_v56, 7  ;;  %v583_v11 = vsel %vm6189_vm5, 0, %v582_v58  ;;  %v1232_v12 = vrot.slane %v1230_v2, 4  ;;  %v1235_v13 = vrot.slane %v1233_v4, 5  ;;  %v991_v15 = vld [vmem:[#allocation2 + $0x50] sm:$0x1] }
  0x61   : > { %v1249_v14 = vshll.u32 %v6391_v7, 16  ;;  %v850_v16 = vshrl.u32 %v620_v59, 16  ;;  %v1241_v17 = vrot.slane %v1239_v8, 5  ;;  %v1245_v18 = vrot.slane %v1243_v9, 4  ;;  %v1015_v22 = vld [vmem:[#allocation2 + $0x78] sm:$0xf] }
  0x62   : > { %v992_v19 = vsel %vm6182_vm3, %v729_v53, %v991_v15  ;;  %v795_v21 = vor.u32 %v793_v57, %v792_v10  ;;  %528 = vst [vmem:[#allocation2 + $0xa8] sm:$0x1] %v527_v0  ;;  %v1236_v23 = vor.u32 %v1235_v13, %v1232_v12  ;;  %v797_v26 = vrot.slane %v792_v10, 4  ;;  %v1019_v28 = vld [vmem:[#allocation2 + $0x80] sm:$0x1] }
  0x63   : > { %v1251_v24 = vrot.slane %v1249_v14, 5  ;;  %993 = vst [vmem:[#allocation2 + $0x50] sm:$0x1] %v992_v19  ;;  %v1016_v27 = vsel %vm6219_vm9, %v787_v5, %v1015_v22  ;;  %v1246_v29 = vor.u32 %v1245_v18, %v1241_v17  ;;  %v852_v32 = vrot.slane %v850_v16, 7  ;;  %v490_v52 = vld [vmem:[#allocation2 + $0x18] sm:$0x1] }
  0x64   : > { %v796_v30 = vsel %vm6213_vm8, %v788_v63, %v795_v21  ;;  %1017 = vst [vmem:[#allocation2 + $0x78] sm:$0xf] %v1016_v27  ;;  %v853_v33 = vshll.u32 %v620_v59, 16  ;;  %v1237_v34 = vrot.slane %v1236_v23, 4  ;;  %v1020_v37 = vsel %vm6182_vm3, %v797_v26, %v1019_v28  ;;  %v546_v13 = vld [vmem:[#allocation2 + $0x20] sm:$0x1] }
  0x65   : > { %v1165_v35 = vld [vmem:[#allocation2 + $0x48] sm:$0xf]  ;;  %1018 = vst.msk [vmem:[#allocation2 + $0x7c] sm:$0xf] %vm949_vm6, %v796_v30  ;;  %v858_v38 = vshrl.u32 %v621_v31, 16  ;;  %v1247_v39 = vrot.slane %v1246_v29, 4 }
  0x66   : > { %v1166_v41 = vld [vmem:[#allocation2 + $0x4c] sm:$0xf]  ;;  %v1350_v40 = vshrl.u32 %v1165_v35, 16  ;;  %v1353_v42 = vshll.u32 %v1165_v35, 16  ;;  %v855_v43 = vor.u32 %v853_v33, %v852_v32  ;;  %v1242_v44 = vsel %vm6260_vm12, %v1237_v34, %v1241_v17  ;;  %1021 = vst [vmem:[#allocation2 + $0x80] sm:$0x1] %v1020_v37 }
  0x67   : > { %v1359_v45 = vshll.u32 %v1166_v41, 16  ;;  %v1363_v46 = vshrl.u32 %v1166_v41, 16  ;;  %v856_v47 = vrot.slane %v852_v32, 4  ;;  %v1252_v48 = vsel %vm6260_vm12, %v1247_v39, %v1251_v24  ;;  %584 = vst [vmem:[#allocation2 + $0xb0] sm:$0x1] %v583_v11 }
  0x68   : > { %v1593_v49 = vunpack.c.l.b16 %v1242_v44  ;;  %v1352_v50 = vrot.slane %v1350_v40, 4  ;;  %v1355_v51 = vrot.slane %v1353_v42, 5  ;;  %v1594_v53 = vunpack.c.l.b16 %v1252_v48  ;;  %v596_v24 = vld [vmem:[%s6201_s8 + $0x8] sm:$0xf] }
  0x69   : > { %v1361_v54 = vrot.slane %v1359_v45, 5  ;;  %v1365_v55 = vrot.slane %v1363_v46, 4  ;;  %v860_v56 = vrot.slane %v858_v38, 7  ;;  %v1043_v57 = vld [vmem:[#allocation2 + $0xa8] sm:$0xf]  ;;  %v861_v60 = vshll.u32 %v621_v31, 16 }
  0x6a   : > { %v1192_v58 = vld [vmem:[#allocation2 + $0x50] sm:$0x1]  ;;  %v1356_v59 = vor.u32 %v1355_v51, %v1352_v50  ;;  %v1044_v61 = vsel %vm6219_vm9, %v855_v43, %v1043_v57  ;;  %v491_v62 = vsel %vm6182_vm3, 0, %v490_v52  ;;  %v1624_v63 = vpack.c.b16 %v1594_v53, %v1593_v49  ;;  %v597_v38 = vld [vmem:[%s6201_s8 + $0xc] sm:$0xf] }
  0x6b   : > { %v1366_v0 = vor.u32 %v1365_v55, %v1361_v54  ;;  %v1369_v2 = vshll.u32 %v1192_v58, 16  ;;  %v1173_v4 = vld [vmem:[#allocation2 + $0x78] sm:$0xf]  ;;  %v865_v5 = vrot.slane %v860_v56, 4  ;;  %1045 = vst [vmem:[#allocation2 + $0xa8] sm:$0xf] %v1044_v61  ;;  %v863_v12 = vor.u32 %v861_v60, %v860_v56 }
  0x6c   : > { %v1357_v8 = vrot.slane %v1356_v59, 4  ;;  %v1174_v9 = vld [vmem:[#allocation2 + $0x7c] sm:$0xf]  ;;  %v1446_v10 = vshrl.u32 %v1173_v4, 16  ;;  %v1449_v11 = vshll.u32 %v1173_v4, 16  ;;  %5561 = vmatmul.msk.bf16.gmra.mxu0 %vm1639_vm13, %v1624_v63  ;;  %v547_v37 = vsel %vm6189_vm5, 0, %v546_v13 }
  0x6d   : > { %v1367_v14 = vrot.slane %v1366_v0, 4  ;;  %v1371_v15 = vrot.slane %v1369_v2, 5  ;;  %v1455_v16 = vshll.u32 %v1174_v9, 16  ;;  %v1459_v17 = vshrl.u32 %v1174_v9, 16  ;;  %492 = vst [vmem:[#allocation2 + $0x18] sm:$0x1] %v491_v62 }
  0x6e   : > { %v1362_v18 = vsel %vm6260_vm12, %v1357_v8, %v1361_v54  ;;  %v1196_v19 = vld [vmem:[#allocation2 + $0x80] sm:$0x1]  ;;  %v1448_v21 = vrot.slane %v1446_v10, 4  ;;  %v1451_v22 = vrot.slane %v1449_v11, 5  ;;  %v864_v23 = vsel %vm6213_vm8, %v856_v47, %v863_v12  ;;  %v1047_v30 = vld [vmem:[#allocation2 + $0xb0] sm:$0x1] }
  0x6f   : > { %v1372_v26 = vsel %vm6260_vm12, %v1367_v14, %v1371_v15  ;;  %v1603_v27 = vunpack.c.l.b16 %v1362_v18  ;;  %v1457_v28 = vrot.slane %v1455_v16, 5  ;;  %v1461_v29 = vrot.slane %v1459_v17, 4  ;;  %1046 = vst.msk [vmem:[#allocation2 + $0xac] sm:$0xf] %vm949_vm6, %v864_v23  ;;  %v505_v52 = vld [vmem:[#allocation2 + $0x54] sm:$0x1] }
  0x70   : > { %v1604_v31 = vunpack.c.l.b16 %v1372_v26  ;;  %v1452_v32 = vor.u32 %v1451_v22, %v1448_v21  ;;  %v1465_v33 = vshll.u32 %v1196_v19, 16  ;;  %v1048_v35 = vsel %vm6182_vm3, %v865_v5, %v1047_v30  ;;  %548 = vst [vmem:[#allocation2 + $0x20] sm:$0x1] %v547_v37  ;;  %v561_v58 = vld [vmem:[#allocation2 + $0x5c] sm:$0x1] }
  0x71   : > { %v1462_v34 = vor.u32 %v1461_v29, %v1457_v28  ;;  %v646_v39 = vshrl.u32 %v596_v24, 16  ;;  %1049 = vst [vmem:[#allocation2 + $0xb0] sm:$0x1] %v1048_v35  ;;  %v649_v49 = vshll.u32 %v596_v24, 16  ;;  %v654_v50 = vshrl.u32 %v597_v38, 16 }
  0x72   : > { %v1629_v41 = vpack.c.b16 %v1604_v31, %v1603_v27  ;;  %v1453_v40 = vrot.slane %v1452_v32, 4  ;;  %v1467_v42 = vrot.slane %v1465_v33, 5  ;;  %v1181_v43 = vld [vmem:[#allocation2 + $0xa8] sm:$0xf]  ;;  %v657_v51 = vshll.u32 %v597_v38, 16 }
  0x73   : > { %v1463_v44 = vrot.slane %v1462_v34, 4  ;;  %v1542_v45 = vshrl.u32 %v1181_v43, 16  ;;  %v1545_v46 = vshll.u32 %v1181_v43, 16  ;;  %v648_v47 = vrot.slane %v646_v39, 7  ;;  %v606_v0 = vld [vmem:[%s6201_s8 + $0x30] sm:$0xf] }
  0x74   : > { %5566 = vmatmul.msk.bf16.gmra.mxu1 %vm1639_vm13, %v1629_v41  ;;  %v1458_v48 = vsel %vm6260_vm12, %v1453_v40, %v1457_v28  ;;  %v959_v57 = vld [vmem:[#allocation2 + $0x18] sm:$0xf]  ;;  %v656_v63 = vrot.slane %v654_v50, 7  ;;  %v506_v8 = vsel %vm6182_vm3, 0, %v505_v52  ;;  %v607_v9 = vld [vmem:[%s6201_s8 + $0x34] sm:$0xf] }
  0x75   : > { %v1468_v53 = vsel %vm6260_vm12, %v1463_v44, %v1467_v42  ;;  %v1611_v54 = vunpack.c.l.b16 %v1458_v48  ;;  %v1544_v55 = vrot.slane %v1542_v45, 4  ;;  %v1547_v56 = vrot.slane %v1545_v46, 5  ;;  %507 = vst [vmem:[#allocation2 + $0x54] sm:$0x1] %v506_v8  ;;  %v517_v14 = vld [vmem:[#allocation2 + $0x84] sm:$0x1] }
  0x76   : > { %v1612_v59 = vunpack.c.l.b16 %v1468_v53  ;;  %v1182_v60 = vld [vmem:[#allocation2 + $0xac] sm:$0xf]  ;;  %v651_v61 = vor.u32 %v649_v49, %v648_v47  ;;  %v652_v62 = vrot.slane %v648_v47, 4  ;;  %v659_v11 = vor.u32 %v657_v51, %v656_v63  ;;  %v614_v21 = vld [vmem:[%s6201_s8 + $0x50] sm:$0xf] }
  0x77   : > { %v1548_v2 = vor.u32 %v1547_v56, %v1544_v55  ;;  %v1551_v4 = vshll.u32 %v1182_v60, 16  ;;  %v1555_v5 = vshrl.u32 %v1182_v60, 16  ;;  %v661_v12 = vrot.slane %v656_v63, 4  ;;  %v573_v19 = vld [vmem:[#allocation2 + $0x8c] sm:$0x1] }
  0x78   : > { %v1633_v10 = vpack.c.b16 %v1612_v59, %v1611_v54  ;;  %v960_v13 = vsel %vm6219_vm9, %v651_v61, %v959_v57  ;;  %v1200_v15 = vld [vmem:[#allocation2 + $0xb0] sm:$0x1]  ;;  %v660_v23 = vsel %vm6213_vm8, %v652_v62, %v659_v11  ;;  %v963_v24 = vld [vmem:[#allocation2 + $0x20] sm:$0x1]  ;;  %v562_v26 = vsel %vm6189_vm5, 0, %v561_v58 }
  0x79   : > { %v1549_v16 = vrot.slane %v1548_v2, 4  ;;  %v1553_v17 = vrot.slane %v1551_v4, 5  ;;  %v1557_v18 = vrot.slane %v1555_v5, 4  ;;  %v1561_v22 = vshll.u32 %v1200_v15, 16  ;;  %961 = vst [vmem:[#allocation2 + $0x18] sm:$0xf] %v960_v13 }
  0x7a   : > { %5570 = vmatmul.msk.bf16.gmra.mxu2 %vm1639_vm13, %v1633_v10  ;;  %962 = vst.msk [vmem:[#allocation2 + $0x1c] sm:$0xf] %vm949_vm6, %v660_v23  ;;  %v964_v29 = vsel %vm6182_vm3, %v661_v12, %v963_v24  ;;  %v731_v30 = vshrl.u32 %v606_v0, 16  ;;  %v615_v31 = vld [vmem:[%s6201_s8 + $0x54] sm:$0xf]  ;;  %v734_v34 = vshll.u32 %v606_v0, 16 }
  0x7b   : > { %v1554_v27 = vsel %vm6260_vm12, %v1549_v16, %v1553_v17  ;;  %v1558_v28 = vor.u32 %v1557_v18, %v1553_v17  ;;  %v1563_v32 = vrot.slane %v1561_v22, 5  ;;  %965 = vst [vmem:[#allocation2 + $0x20] sm:$0x1] %v964_v29  ;;  %v739_v35 = vshrl.u32 %v607_v9, 16  ;;  %v6453_v37 = vld [vmem:[#allocation2 + $0xb4] sm:$0x1] }
  0x7c   : > { %v1619_v33 = vunpack.c.l.b16 %v1554_v27  ;;  %563 = vst [vmem:[#allocation2 + $0x5c] sm:$0x1] %v562_v26  ;;  %v733_v39 = vrot.slane %v731_v30, 7  ;;  %v742_v41 = vshll.u32 %v607_v9, 16  ;;  %v518_v40 = vsel %vm6182_vm3, 0, %v517_v14 }
  0x7d   : > { %v1559_v38 = vrot.slane %v1558_v28, 4  ;;  %v741_v42 = vrot.slane %v739_v35, 7  ;;  %519 = vst [vmem:[#allocation2 + $0x84] sm:$0x1] %v518_v40  ;;  %v574_v43 = vsel %vm6189_vm5, 0, %v573_v19  ;;  %v799_v44 = vshrl.u32 %v614_v21, 16 }
  0x7e   : > { %v802_v45 = vshll.u32 %v614_v21, 16  ;;  %v736_v47 = vor.u32 %v734_v34, %v733_v39  ;;  %v737_v48 = vrot.slane %v733_v39, 4  ;;  %v994_v49 = vld [vmem:[#allocation2 + $0x54] sm:$0xf]  ;;  %575 = vst [vmem:[#allocation2 + $0x8c] sm:$0x1] %v574_v43 }
  0x7f   : > { %v1564_v46 = vsel %vm6260_vm12, %v1559_v38, %v1563_v32  ;;  %v807_v50 = vshrl.u32 %v615_v31, 16  ;;  %v744_v52 = vor.u32 %v742_v41, %v741_v42  ;;  %v746_v53 = vrot.slane %v741_v42, 4  ;;  %v585_v2 = vld [vmem:[#allocation2 + $0xbc] sm:$0x1]  ;;  %v622_v4 = vld [vmem:[%s6201_s8 + $0x70] sm:$0xf] }
  0x80   : > { %v1620_v51 = vunpack.c.l.b16 %v1564_v46  ;;  %v801_v54 = vrot.slane %v799_v44, 7  ;;  %v1157_v55 = vld [vmem:[#allocation2 + $0x18] sm:$0xf]  ;;  %v995_v56 = vsel %vm6219_vm9, %v736_v47, %v994_v49  ;;  %v810_v58 = vshll.u32 %v615_v31, 16  ;;  %v623_v32 = vld [vmem:[%s6201_s8 + $0x74] sm:$0xf] }
  0x81   : > { %v809_v57 = vrot.slane %v807_v50, 7  ;;  %v530_v59 = vsel %vm6182_vm3, 0, %v6453_v37  ;;  %v6466_v61 = vld [vmem:[#allocation2 + $0x1c] sm:$0xf]  ;;  %v1254_v62 = vshrl.u32 %v1157_v55, 16  ;;  %v1257_v63 = vshll.u32 %v1157_v55, 16 }
  0x82   : > { %v1637_v60 = vpack.c.b16 %v1620_v51, %v1619_v33  ;;  %v745_v0 = vsel %vm6213_vm8, %v737_v48, %v744_v52  ;;  %996 = vst [vmem:[#allocation2 + $0x54] sm:$0xf] %v995_v56  ;;  %v6471_v5 = vld [vmem:[#allocation2 + $0x20] sm:$0x1]  ;;  %v1263_v8 = vshll.u32 %v6466_v61, 16  ;;  %v1267_v9 = vshrl.u32 %v6466_v61, 16 }
  0x83   : > { %997 = vst.msk [vmem:[#allocation2 + $0x58] sm:$0xf] %vm949_vm6, %v745_v0  ;;  %v804_v10 = vor.u32 %v802_v45, %v801_v54  ;;  %v812_v11 = vor.u32 %v810_v58, %v809_v57  ;;  %v1256_v12 = vrot.slane %v1254_v62, 4  ;;  %v1259_v13 = vrot.slane %v1257_v63, 5  ;;  %v998_v15 = vld [vmem:[#allocation2 + $0x5c] sm:$0x1] }
  0x84   : > { %5574 = vmatmul.msk.bf16.gmra.mxu3 %vm1639_vm13, %v1637_v60  ;;  %v1273_v14 = vshll.u32 %v6471_v5, 16  ;;  %v805_v16 = vrot.slane %v801_v54, 4  ;;  %v1265_v17 = vrot.slane %v1263_v8, 5  ;;  %v1269_v18 = vrot.slane %v1267_v9, 4  ;;  %v1022_v22 = vld [vmem:[#allocation2 + $0x84] sm:$0xf] }
  0x85   : > { %v999_v19 = vsel %vm6182_vm3, %v746_v53, %v998_v15  ;;  %v814_v21 = vrot.slane %v809_v57, 4  ;;  %v1260_v23 = vor.u32 %v1259_v13, %v1256_v12  ;;  %v1023_v27 = vsel %vm6219_vm9, %v804_v10, %v1022_v22  ;;  %v1026_v28 = vld [vmem:[#allocation2 + $0x8c] sm:$0x1]  ;;  %531 = vst [vmem:[#allocation2 + $0xb4] sm:$0x1] %v530_v59 }
  0x86   : > { %v1275_v24 = vrot.slane %v1273_v14, 5  ;;  %1000 = vst [vmem:[#allocation2 + $0x5c] sm:$0x1] %v999_v19  ;;  %v813_v26 = vsel %vm6213_vm8, %v805_v16, %v812_v11  ;;  %v1270_v29 = vor.u32 %v1269_v18, %v1265_v17  ;;  %v586_v31 = vsel %vm6189_vm5, 0, %v585_v2  ;;  %v493_v50 = vld [vmem:[#allocation2 + $0x24] sm:$0x1] }
  0x87   : > { %1024 = vst [vmem:[#allocation2 + $0x84] sm:$0xf] %v1023_v27  ;;  %v1027_v30 = vsel %vm6182_vm3, %v814_v21, %v1026_v28  ;;  %v867_v33 = vshrl.u32 %v622_v4, 16  ;;  %v1261_v34 = vrot.slane %v1260_v23, 4  ;;  %v870_v35 = vshll.u32 %v622_v4, 16 }
  0x88   : > { %1025 = vst.msk [vmem:[#allocation2 + $0x88] sm:$0xf] %vm949_vm6, %v813_v26  ;;  %v875_v37 = vshrl.u32 %v623_v32, 16  ;;  %v878_v38 = vshll.u32 %v623_v32, 16  ;;  %v1271_v39 = vrot.slane %v1270_v29, 4  ;;  %v494_v2 = vsel %vm6182_vm3, 0, %v493_v50 }
  0x89   : > { %v1167_v41 = vld [vmem:[#allocation2 + $0x54] sm:$0xf]  ;;  %1028 = vst [vmem:[#allocation2 + $0x8c] sm:$0x1] %v1027_v30  ;;  %v869_v40 = vrot.slane %v867_v33, 7  ;;  %v1266_v42 = vsel %vm6260_vm12, %v1261_v34, %v1265_v17 }
  0x8a   : > { %v6492_v43 = vld [vmem:[#allocation2 + $0x58] sm:$0xf]  ;;  %v1374_v44 = vshrl.u32 %v1167_v41, 16  ;;  %v1377_v45 = vshll.u32 %v1167_v41, 16  ;;  %v1276_v46 = vsel %vm6260_vm12, %v1271_v39, %v1275_v24  ;;  %v1595_v47 = vunpack.c.l.b16 %v1266_v42  ;;  %587 = vst [vmem:[#allocation2 + $0xbc] sm:$0x1] %v586_v31 }
  0x8b   : > { %v1383_v48 = vshll.u32 %v6492_v43, 16  ;;  %v1387_v49 = vshrl.u32 %v6492_v43, 16  ;;  %v1596_v51 = vunpack.c.l.b16 %v1276_v46  ;;  %v872_v54 = vor.u32 %v870_v35, %v869_v40  ;;  %495 = vst [vmem:[#allocation2 + $0x24] sm:$0x1] %v494_v2  ;;  %v549_v22 = vld [vmem:[#allocation2 + $0x2c] sm:$0x1] }
  0x8c   : > { %v1376_v52 = vrot.slane %v1374_v44, 4  ;;  %v1379_v53 = vrot.slane %v1377_v45, 5  ;;  %v873_v58 = vrot.slane %v869_v40, 4  ;;  %v877_v59 = vrot.slane %v875_v37, 7  ;;  %v1050_v27 = vld [vmem:[#allocation2 + $0xb4] sm:$0xf] }
  0x8d   : > { %v6498_v55 = vld [vmem:[#allocation2 + $0x5c] sm:$0x1]  ;;  %v1385_v56 = vrot.slane %v1383_v48, 5  ;;  %v1389_v57 = vrot.slane %v1387_v49, 4  ;;  %v1625_v60 = vpack.c.b16 %v1596_v51, %v1595_v47  ;;  %v598_v28 = vld [vmem:[%s6201_s8 + $0x10] sm:$0xf]  ;;  %v1051_v40 = vsel %vm6219_vm9, %v872_v54, %v1050_v27 }
  0x8e   : > { %v1380_v62 = vor.u32 %v1379_v53, %v1376_v52  ;;  %v1393_v63 = vshll.u32 %v6498_v55, 16  ;;  %v1175_v0 = vld [vmem:[#allocation2 + $0x84] sm:$0xf]  ;;  %v880_v11 = vor.u32 %v878_v38, %v877_v59  ;;  %v882_v38 = vrot.slane %v877_v59, 4  ;;  %v599_v39 = vld [vmem:[%s6201_s8 + $0x14] sm:$0xf] }
  0x8f   : > { %v1390_v4 = vor.u32 %v1389_v57, %v1385_v56  ;;  %v1176_v8 = vld [vmem:[#allocation2 + $0x88] sm:$0xf]  ;;  %v1470_v9 = vshrl.u32 %v1175_v0, 16  ;;  %v1473_v10 = vshll.u32 %v1175_v0, 16  ;;  %5562 = vmatmul.msk.bf16.gmra.mxu0 %vm1639_vm13, %v1625_v60  ;;  %v550_v42 = vsel %vm6189_vm5, 0, %v549_v22 }
  0x90   : > { %v1381_v12 = vrot.slane %v1380_v62, 4  ;;  %v1395_v13 = vrot.slane %v1393_v63, 5  ;;  %v1197_v14 = vld [vmem:[#allocation2 + $0x8c] sm:$0x1]  ;;  %v1479_v15 = vshll.u32 %v1176_v8, 16  ;;  %v1483_v16 = vshrl.u32 %v1176_v8, 16 }
  0x91   : > { %v1391_v17 = vrot.slane %v1390_v4, 4  ;;  %v1472_v18 = vrot.slane %v1470_v9, 4  ;;  %v1475_v19 = vrot.slane %v1473_v10, 5  ;;  %v1489_v21 = vshll.u32 %v1197_v14, 16  ;;  %v1054_v33 = vld [vmem:[#allocation2 + $0xbc] sm:$0x1] }
  0x92   : > { %v1386_v23 = vsel %vm6260_vm12, %v1381_v12, %v1385_v56  ;;  %v1481_v24 = vrot.slane %v1479_v15, 5  ;;  %v1485_v26 = vrot.slane %v1483_v16, 4  ;;  %v881_v37 = vsel %vm6213_vm8, %v873_v58, %v880_v11  ;;  %1052 = vst [vmem:[#allocation2 + $0xb4] sm:$0xf] %v1051_v40  ;;  %v966_v56 = vld [vmem:[#allocation2 + $0x24] sm:$0xf] }
  0x93   : > { %v1396_v29 = vsel %vm6260_vm12, %v1391_v17, %v1395_v13  ;;  %v1605_v30 = vunpack.c.l.b16 %v1386_v23  ;;  %v1476_v31 = vor.u32 %v1475_v19, %v1472_v18  ;;  %v1491_v32 = vrot.slane %v1489_v21, 5  ;;  %1053 = vst.msk [vmem:[#allocation2 + $0xb8] sm:$0xf] %vm949_vm6, %v881_v37  ;;  %v2001_v57 = vld [vmem:[#allocation2] sm:$0xe] }
  0x94   : > { %v1606_v34 = vunpack.c.l.b16 %v1396_v29  ;;  %v1486_v35 = vor.u32 %v1485_v26, %v1481_v24  ;;  %v663_v44 = vshrl.u32 %v598_v28, 16  ;;  %v1055_v47 = vsel %vm6182_vm3, %v882_v38, %v1054_v33  ;;  %551 = vst [vmem:[#allocation2 + $0x2c] sm:$0x1] %v550_v42  ;;  %v6035_v63 = vld [vmem:[#allocation2 + $0x8] sm:$0x1] }
  0x95   : > { %v1477_v41 = vrot.slane %v1476_v31, 4  ;;  %v666_v48 = vshll.u32 %v598_v28, 16  ;;  %1056 = vst [vmem:[#allocation2 + $0xbc] sm:$0x1] %v1055_v47  ;;  %v671_v51 = vshrl.u32 %v599_v39, 16  ;;  %v674_v52 = vshll.u32 %v599_v39, 16 }
  0x96   : > { %v1630_v45 = vpack.c.b16 %v1606_v34, %v1605_v30  ;;  %v1487_v46 = vrot.slane %v1486_v35, 4  ;;  %v665_v50 = vrot.slane %v663_v44, 7  ;;  %v2057_v0 = vrot.slane %v6035_v63, 5  ;;  %v6036_v2 = vld [vmem:[#allocation2 + $0x4] sm:$0xf] }
  0x97   : > { %v1482_v49 = vsel %vm6260_vm12, %v1477_v41, %v1481_v24  ;;  %v673_v62 = vrot.slane %v671_v51, 7  ;;  %v2054_v4 = vrot.slane %v6036_v2, 5  ;;  %v5656_v11 = vrot.slane %v2001_v57, 9  ;;  %v5820_v12 = vld [vmem:[%s7690_s3 + $0xc] sm:$0x3] }
  0x98   : > { %5567 = vmatmul.msk.bf16.gmra.mxu1 %vm1639_vm13, %v1630_v45  ;;  %v1492_v53 = vsel %vm6260_vm12, %v1487_v46, %v1491_v32  ;;  %v1613_v54 = vunpack.c.l.b16 %v1482_v49  ;;  %v668_v59 = vor.u32 %v666_v48, %v665_v50  ;;  %v669_v60 = vrot.slane %v665_v50, 4  ;;  %v2672_v41 = vld [vmem:[#allocation2 + $0xc] sm:$0xf]  ;;  %v2673_v40 = vld [vmem:[#allocation2 + $0x10] sm:$0xf]  ;;  %v5958_v49 = vld [vmem:[#allocation2] sm:$0xff] }
  0x99   : > { %v1614_v58 = vunpack.c.l.b16 %v1492_v53  ;;  %v676_v9 = vor.u32 %v674_v52, %v673_v62  ;;  %v678_v14 = vrot.slane %v673_v62, 4  ;;  %v3888_v15 = vsel %vm1688_vm0, %v5820_v12, 0  ;;  %v1183_v16 = vld [vmem:[#allocation2 + $0xb4] sm:$0xf] }
  0x9a   : > { %v967_v10 = vsel %vm6219_vm9, %v668_v59, %v966_v56  ;;  %v1184_v13 = vld [vmem:[#allocation2 + $0xb8] sm:$0xf]  ;;  %v2056_v22 = vrot.slane %v2054_v4, 4  ;;  %v1566_v24 = vshrl.u32 %v1183_v16, 16  ;;  %v1569_v26 = vshll.u32 %v1183_v16, 16  ;;  %3897 = vmatpush.bf16.msra.mxu2 %v3888_v15 }
  0x9b   : > { %v1634_v8 = vpack.c.b16 %v1614_v58, %v1613_v54  ;;  %968 = vst [vmem:[#allocation2 + $0x24] sm:$0xf] %v967_v10  ;;  %v1575_v17 = vshll.u32 %v1184_v13, 16  ;;  %v1579_v18 = vshrl.u32 %v1184_v13, 16  ;;  %v677_v19 = vsel %vm6213_vm8, %v669_v60, %v676_v9  ;;  %v970_v30 = vld [vmem:[#allocation2 + $0x2c] sm:$0x1] }
  0x9c   : > { %v1201_v23 = vld [vmem:[#allocation2 + $0xbc] sm:$0x1]  ;;  %969 = vst.msk [vmem:[#allocation2 + $0x28] sm:$0xf] %vm949_vm6, %v677_v19  ;;  %v1568_v31 = vrot.slane %v1566_v24, 4  ;;  %v1571_v32 = vrot.slane %v1569_v26, 5  ;;  %v971_v33 = vsel %vm6182_vm3, %v678_v14, %v970_v30  ;;  %v2055_v34 = vsel %vm6535_vm1, %v5656_v11, %v2054_v4 }
  0x9d   : > { %5571 = vmatmul.msk.bf16.gmra.mxu2 %vm1639_vm13, %v1634_v8  ;;  %v1577_v27 = vrot.slane %v1575_v17, 5  ;;  %v1581_v28 = vrot.slane %v1579_v18, 4  ;;  %v1585_v29 = vshll.u32 %v1201_v23, 16  ;;  %972 = vst [vmem:[#allocation2 + $0x2c] sm:$0x1] %v971_v33  ;;  %v2058_v38 = vsel %vm6535_vm1, %v2056_v22, %v2057_v0 }
  0x9e   : > { %v1572_v39 = vor.u32 %v1571_v32, %v1568_v31  ;;  %v2166_v45 = vunpack.c.l.b16 %v2055_v34  ;;  %v2167_v50 = vunpack.c.l.b16 %v2058_v38  ;;  %v2721_v53 = vshrl.u32 %v2672_v41, 16  ;;  %v5901_v10 = vld [vmem:[%s7690_s3 + $0xe] sm:$0x3]  ;;  %v5803_v11 = vld [vmem:[%s7690_s3 + $0xa] sm:$0x3] }
  0x9f   : > { %v1582_v35 = vor.u32 %v1581_v28, %v1577_v27  ;;  %v1587_v37 = vrot.slane %v1585_v29, 5  ;;  %v2724_v54 = vshll.u32 %v2672_v41, 16  ;;  %v2730_v56 = vshll.u32 %v2673_v40, 16  ;;  %v5934_v16 = vld [vmem:[%s7690_s3 + $0x10] sm:$0x3] }
  0xa0   : > { %v1573_v46 = vrot.slane %v1572_v39, 4  ;;  %v2734_v2 = vshrl.u32 %v2673_v40, 16  ;;  %v2198_v9 = vpack.c.b16 %v2167_v50, %v2166_v45  ;;  %v4542_v22 = vsel %vm1688_vm0, %v5901_v10, 0  ;;  %v2002_v24 = vld [vmem:[#allocation2 + $0xc] sm:$0xe] }
  0xa1   : > { %v1583_v42 = vrot.slane %v1582_v35, 4  ;;  %v3601_v23 = vsel %vm1688_vm0, %v5803_v11, 0  ;;  %v2726_v28 = vrot.slane %v2724_v54, 5  ;;  %4551 = vmatpush.bf16.msra.mxu3 %v4542_v22  ;;  %v4940_v29 = vsel %vm1688_vm0, %v5934_v16, 0  ;;  %v2674_v35 = vld [vmem:[#allocation2 + $0x14] sm:$0x1] }
  0xa2   : > { %v1159_v44 = vld [vmem:[#allocation2 + $0x24] sm:$0xf]  ;;  %v1578_v57 = vsel %vm6260_vm12, %v1573_v46, %v1577_v27  ;;  %v2723_v27 = vrot.slane %v2721_v53, 4  ;;  %3610 = vmatpush.bf16.msra.mxu1 %v3601_v23  ;;  %v2732_v31 = vrot.slane %v2730_v56, 5  ;;  %v2736_v32 = vrot.slane %v2734_v2, 4  ;;  %4949 = vmatpush.bf16.msra.mxu0 %v4940_v29  ;;  %v5960_v29 = vld [vmem:[#allocation2 + $0x18] sm:$0xff] }
  0xa3   : > { %v1278_v47 = vshrl.u32 %v1159_v44, 16  ;;  %v1281_v48 = vshll.u32 %v1159_v44, 16  ;;  %v1588_v51 = vsel %vm6260_vm12, %v1583_v42, %v1587_v37  ;;  %v6548_v52 = vld [vmem:[#allocation2 + $0x28] sm:$0xf]  ;;  %v1621_v62 = vunpack.c.l.b16 %v1578_v57  ;;  %v2675_v54 = vld [vmem:[#allocation2 + $0x18] sm:$0xf] }
  0xa4   : > { %v1622_v58 = vunpack.c.l.b16 %v1588_v51  ;;  %v1287_v63 = vshll.u32 %v6548_v52, 16  ;;  %v1291_v0 = vshrl.u32 %v6548_v52, 16  ;;  %v6554_v4 = vld [vmem:[#allocation2 + $0x2c] sm:$0x1]  ;;  %v2061_v33 = vrot.slane %v6387_v1, 5 }
  0xa5   : > { %v1280_v59 = vrot.slane %v1278_v47, 4  ;;  %v1283_v60 = vrot.slane %v1281_v48, 5  ;;  %v1297_v15 = vshll.u32 %v6554_v4, 16  ;;  %v5657_v37 = vrot.slane %v2002_v24, 9  ;;  %v2676_v56 = vld [vmem:[#allocation2 + $0x1c] sm:$0xf] }
  0xa6   : > { %v1638_v12 = vpack.c.b16 %v1622_v58, %v1621_v62  ;;  %v1289_v13 = vrot.slane %v1287_v63, 5  ;;  %v1293_v14 = vrot.slane %v1291_v0, 4  ;;  %v2064_v38 = vrot.slane %v6391_v7, 5  ;;  %v5974_v57 = vld [vmem:[#allocation2 + $0xc] sm:$0xff]  ;;  %v2677_v16 = vld [vmem:[#allocation2 + $0x20] sm:$0x1] }
  0xa7   : > { %v1284_v8 = vor.u32 %v1283_v60, %v1280_v59  ;;  %v1299_v19 = vrot.slane %v1297_v15, 5  ;;  %v2063_v41 = vrot.slane %v2061_v33, 4  ;;  %v2727_v42 = vor.u32 %v2726_v28, %v2723_v27 }
  0xa8   : > { %5640 = vmatmul.msk.bf16.vlgmr.msrb.gmra.mxu1 %vm1639_vm13, %v5958_v49  ;;  %5575 = vmatmul.msk.bf16.gmra.mxu3 %vm1639_vm13, %v1638_v12  ;;  %v1294_v18 = vor.u32 %v1293_v14, %v1289_v13  ;;  %v2737_v44 = vor.u32 %v2736_v32, %v2732_v31  ;;  %v2740_v45 = vshll.u32 %v2674_v35, 16  ;;  %v2062_v47 = vsel %vm6535_vm1, %v5657_v37, %v2061_v33  ;;  %v5959_v49 = vld [vmem:[#allocation2 + $0xc] sm:$0xff]  ;;  %v5975_v35 = vld [vmem:[#allocation2 + $0x18] sm:$0xff] }
  0xa9   : > { %v1285_v17 = vrot.slane %v1284_v8, 4  ;;  %v2065_v1 = vsel %vm6535_vm1, %v2063_v41, %v2064_v38  ;;  %v2728_v48 = vrot.slane %v2727_v42, 4  ;;  %v2168_v51 = vunpack.c.l.b16 %v2062_v47 }
  0xaa   : > { %v1295_v30 = vrot.slane %v1294_v18, 4  ;;  %v2738_v7 = vrot.slane %v2737_v44, 4  ;;  %v2742_v50 = vrot.slane %v2740_v45, 5  ;;  %v2169_v53 = vunpack.c.l.b16 %v2065_v1 }
  0xab   : > { %v1290_v26 = vsel %vm6260_vm12, %v1285_v17, %v1289_v13  ;;  %v2733_v58 = vsel %vm6260_vm12, %v2728_v48, %v2732_v31  ;;  %v2745_v59 = vshrl.u32 %v2675_v54, 16  ;;  %v2748_v60 = vshll.u32 %v2675_v54, 16 }
  0xac   : > { %v1597_v34 = vunpack.c.l.b16 %v1290_v26  ;;  %v1300_v39 = vsel %vm6260_vm12, %v1295_v30, %v1299_v19  ;;  %v2743_v62 = vsel %vm6260_vm12, %v2738_v7, %v2742_v50  ;;  %v2199_v63 = vpack.c.b16 %v2169_v53, %v2168_v51  ;;  %v2680_v51 = vld [vmem:[#allocation2 + $0x2c] sm:$0x1] }
  0xad   : > { %5673 = vmatmul.msk.bf16.vlgmr.msrb.gmra.mxu2 %vm1639_vm13, %v2198_v9  ;;  %v1598_v40 = vunpack.c.l.b16 %v1300_v39  ;;  %v2754_v0 = vshll.u32 %v2676_v56, 16  ;;  %v2758_v2 = vshrl.u32 %v2676_v56, 16  ;;  %v2068_v8 = vrot.slane %v6466_v61, 5  ;;  %v2003_v9 = vld [vmem:[#allocation2 + $0x18] sm:$0xe] }
  0xae   : > { %v3106_v10 = vunpack.c.l.b16 %v2733_v58  ;;  %v3107_v11 = vunpack.c.l.b16 %v2743_v62  ;;  %v2747_v12 = vrot.slane %v2745_v59, 4  ;;  %v2750_v13 = vrot.slane %v2748_v60, 5 }
  0xaf   : > { %v1626_v46 = vpack.c.b16 %v1598_v40, %v1597_v34  ;;  %v2756_v14 = vrot.slane %v2754_v0, 5  ;;  %v2760_v15 = vrot.slane %v2758_v2, 4  ;;  %v5658_v17 = vrot.slane %v2003_v9, 9  ;;  %v2678_v34 = vld [vmem:[#allocation2 + $0x24] sm:$0xf] }
  0xb0   : > { %v2070_v18 = vrot.slane %v2068_v8, 4  ;;  %v2071_v19 = vrot.slane %v6471_v5, 5  ;;  %v3138_v22 = vpack.c.b16 %v3107_v11, %v3106_v10  ;;  %v2751_v23 = vor.u32 %v2750_v13, %v2747_v12  ;;  %v2679_v5 = vld [vmem:[#allocation2 + $0x28] sm:$0xf]  ;;  %v2681_v11 = vld [vmem:[#allocation2 + $0x30] sm:$0xf] }
  0xb1   : > { %5563 = vmatmul.msk.bf16.gmra.mxu0 %vm1639_vm13, %v1626_v46  ;;  %v2761_v24 = vor.u32 %v2760_v15, %v2756_v14  ;;  %v2764_v61 = vshll.u32 %v2677_v16, 16  ;;  %v2069_v26 = vsel %vm6535_vm1, %v5658_v17, %v2068_v8  ;;  %v2769_v38 = vshrl.u32 %v2678_v34, 16  ;;  %v2004_v46 = vld [vmem:[#allocation2 + $0x24] sm:$0xe] }
  0xb2   : > { %v2072_v27 = vsel %vm6535_vm1, %v2070_v18, %v2071_v19  ;;  %v2752_v28 = vrot.slane %v2751_v23, 4  ;;  %v2170_v32 = vunpack.c.l.b16 %v2069_v26  ;;  %v2772_v39 = vshll.u32 %v2678_v34, 16  ;;  %v5961_v0 = vld [vmem:[#allocation2 + $0x24] sm:$0xff] }
  0xb3   : > { %v2762_v30 = vrot.slane %v2761_v24, 4  ;;  %v2766_v31 = vrot.slane %v2764_v61, 5  ;;  %v2171_v33 = vunpack.c.l.b16 %v2072_v27  ;;  %v2778_v42 = vshll.u32 %v2679_v5, 16  ;;  %v5976_v12 = vld [vmem:[#allocation2 + $0x24] sm:$0xff]  ;;  %v6617_v24 = vpop.f32.mrf.mxu1  ;;  %v2005_v61 = vld [vmem:[#allocation2 + $0x30] sm:$0xe] }
  0xb4   : > { %v2757_v37 = vsel %vm6260_vm12, %v2752_v28, %v2756_v14  ;;  %v2782_v44 = vshrl.u32 %v2679_v5, 16  ;;  %v2075_v45 = vrot.slane %v6548_v52, 5  ;;  %v2771_v48 = vrot.slane %v2769_v38, 4  ;;  %v6038_v5 = vld [vmem:[#allocation2 + $0x38] sm:$0x1] }
  0xb5   : > { %v2767_v41 = vsel %vm6260_vm12, %v2762_v30, %v2766_v31  ;;  %v2200_v40 = vpack.c.b16 %v2171_v33, %v2170_v32  ;;  %v3108_v47 = vunpack.c.l.b16 %v2757_v37  ;;  %v2780_v7 = vrot.slane %v2778_v42, 5  ;;  %v2683_v32 = vld [vmem:[#allocation2 + $0x38] sm:$0x1] }
  0xb6   : > { %v3109_v1 = vunpack.c.l.b16 %v2767_v41  ;;  %v2784_v50 = vrot.slane %v2782_v44, 4  ;;  %v5659_v53 = vrot.slane %v2004_v46, 9  ;;  %v2077_v54 = vrot.slane %v2075_v45, 4  ;;  %v6625_v46 = vpop.f32.mrf.mxu2 }
  0xb7   : > { %v2078_v56 = vrot.slane %v6554_v4, 5  ;;  %v2788_v52 = vshll.u32 %v2680_v51, 16  ;;  %v2682_v4 = vld [vmem:[#allocation2 + $0x34] sm:$0xf]  ;;  %v2793_v14 = vshrl.u32 %v2681_v11, 16  ;;  %v2796_v15 = vshll.u32 %v2681_v11, 16 }
  0xb8   : > { %5641 = vmatmul.msk.bf16.gmra.mxu1 %vm1639_vm13, %v5959_v49  ;;  %5754 = vmatmul.msk.bf16.vlgmr.msrb.gmra.mxu3 %vm1639_vm13, %v5974_v57  ;;  %v2774_v49 = vrot.slane %v2772_v39, 5  ;;  %v3139_v57 = vpack.c.b16 %v3109_v1, %v3108_v47  ;;  %v2785_v59 = vor.u32 %v2784_v50, %v2780_v7  ;;  %v2076_v60 = vsel %vm6535_vm1, %v5659_v53, %v2075_v45  ;;  %v5962_v45 = vld [vmem:[#allocation2 + $0x30] sm:$0xff]  ;;  %v2685_v51 = vld [vmem:[#allocation2 + $0x40] sm:$0xf] }
  0xb9   : > { %v2079_v62 = vsel %vm6535_vm1, %v2077_v54, %v2078_v56  ;;  %v2790_v8 = vrot.slane %v2788_v52, 5  ;;  %v2172_v9 = vunpack.c.l.b16 %v2076_v60  ;;  %v2802_v18 = vshll.u32 %v2682_v4, 16  ;;  %v5977_v53 = vld [vmem:[#allocation2 + $0x30] sm:$0xff] }
  0xba   : > { %v2775_v58 = vor.u32 %v2774_v49, %v2771_v48  ;;  %v2786_v2 = vrot.slane %v2785_v59, 4  ;;  %v2173_v10 = vunpack.c.l.b16 %v2079_v62  ;;  %v2806_v19 = vshrl.u32 %v2682_v4, 16  ;;  %v6039_v62 = vld [vmem:[#allocation2 + $0x40] sm:$0xf] }
  0xbb   : > { %v2795_v28 = vrot.slane %v2793_v14, 4  ;;  %v2804_v30 = vrot.slane %v2802_v18, 5  ;;  %v5660_v33 = vrot.slane %v2005_v61, 9  ;;  %v2812_v41 = vshll.u32 %v2683_v32, 16  ;;  %v6627_v50 = vpop.f32.mrf.mxu1 }
  0xbc   : > { %v2791_v16 = vsel %vm6260_vm12, %v2786_v2, %v2790_v8  ;;  %v2201_v17 = vpack.c.b16 %v2173_v10, %v2172_v9  ;;  %v2808_v31 = vrot.slane %v2806_v19, 4  ;;  %v2826_v52 = vshll.u32 %v2685_v51, 16 }
  0xbd   : > { %5674 = vmatmul.msk.bf16.gmra.mxu2 %vm1639_vm13, %v2199_v63  ;;  %v2776_v63 = vrot.slane %v2775_v58, 4  ;;  %v3111_v27 = vunpack.c.l.b16 %v2791_v16  ;;  %v2814_v1 = vrot.slane %v2812_v41, 5  ;;  %v2830_v60 = vshrl.u32 %v2685_v51, 16  ;;  %v2007_v51 = vld [vmem:[#allocation2 + $0x48] sm:$0xe] }
  0xbe   : > { %v2809_v39 = vor.u32 %v2808_v31, %v2804_v30  ;;  %v2828_v11 = vrot.slane %v2826_v52, 5  ;;  %v6638_v14 = vpop.f32.mrf.mxu2  ;;  %vm5131_vm0 = vcmask 60416  }
  0xbf   : > { %v2781_v13 = vsel %vm6260_vm12, %v2776_v63, %v2780_v7  ;;  %v2684_v7 = vld [vmem:[#allocation2 + $0x3c] sm:$0xf]  ;;  %v2089_v63 = vrot.slane %v6039_v62, 5  ;;  %v2832_v4 = vrot.slane %v2830_v60, 4  ;;  %v6647_v31 = vpop.f32.mrf.mxu0  ;;  %v2689_v60 = vld [vmem:[#allocation2 + $0x50] sm:$0x1] }
  0xc0   : > { %v3110_v26 = vunpack.c.l.b16 %v2781_v13  ;;  %v2810_v47 = vrot.slane %v2809_v39, 4  ;;  %v2817_v56 = vshrl.u32 %v2684_v7, 16  ;;  %v2686_v13 = vld [vmem:[#allocation2 + $0x44] sm:$0x1]  ;;  %v5662_v62 = vrot.slane %v2007_v51, 9 }
  0xc1   : > { %5771 = vmatmul.msk.bf16.vlgmr.msrb.gmra.mxu0 %vm1639_vm13, %v3138_v22  ;;  %v6037_v22 = vld [vmem:[#allocation2 + $0x34] sm:$0xf]  ;;  %v2091_v16 = vrot.slane %v2089_v63, 4  ;;  %v2836_v61 = vshll.u32 %v2686_v13, 16 }
  0xc2   : > { %v2082_v23 = vrot.slane %v6037_v22, 5  ;;  %v3140_v37 = vpack.c.b16 %v3111_v27, %v3110_v26  ;;  %v2815_v58 = vsel %vm6260_vm12, %v2810_v47, %v2814_v1  ;;  %v2819_v9 = vrot.slane %v2817_v56, 4  ;;  %v6640_v26 = vpop.f32.mrf.mxu3 }
  0xc3   : > { %v3113_v8 = vunpack.c.l.b16 %v2815_v58 }
  0xc4   : > { %v2084_v34 = vrot.slane %v2082_v23, 4 }
  0xc8   : > { %5642 = vmatmul.msk.bf16.gmra.mxu1 %vm1639_vm13, %v5960_v29  ;;  %5755 = vmatmul.msk.bf16.gmra.mxu3 %vm1639_vm13, %v5975_v35  ;;  %v2798_v29 = vrot.slane %v2796_v15, 5  ;;  %v2085_v35 = vrot.slane %v6038_v5, 5 }
  0xca   : > { %v2799_v38 = vor.u32 %v2798_v29, %v2795_v28  ;;  %v2086_v42 = vsel %vm6535_vm1, %v2084_v34, %v2085_v35  ;;  %v2687_v35 = vld [vmem:[#allocation2 + $0x48] sm:$0xf]  ;;  %v6659_v56 = vpop.f32.mrf.mxu3 }
  0xcb   : > { %v2175_v49 = vunpack.c.l.b16 %v2086_v42  ;;  %v2844_v42 = vshll.u32 %v2687_v35, 16 }
  0xcc   : > { %v2800_v44 = vrot.slane %v2799_v38, 4  ;;  %v5978_v38 = vld [vmem:[#allocation2 + $0x3c] sm:$0xff] }
  0xcd   : > { %5675 = vmatmul.msk.bf16.gmra.mxu2 %vm1639_vm13, %v2200_v40  ;;  %v2083_v40 = vsel %vm6535_vm1, %v5660_v33, %v2082_v23  ;;  %v2833_v23 = vor.u32 %v2832_v4, %v2828_v11  ;;  %v2838_v33 = vrot.slane %v2836_v61, 5  ;;  %v2846_v58 = vrot.slane %v2844_v42, 5 }
  0xce   : > { %v2174_v48 = vunpack.c.l.b16 %v2083_v40  ;;  %v2805_v54 = vsel %vm6260_vm12, %v2800_v44, %v2804_v30  ;;  %v5963_v30 = vld [vmem:[#allocation2 + $0x3c] sm:$0xff]  ;;  %v2841_v40 = vshrl.u32 %v2687_v35, 16  ;;  %v2860_v4 = vshll.u32 %v2689_v60, 16 }
  0xcf   : > { %v3112_v2 = vunpack.c.l.b16 %v2805_v54  ;;  %v2834_v32 = vrot.slane %v2833_v23, 4  ;;  %v2103_v42 = vrot.slane %v6492_v43, 5  ;;  %v2106_v43 = vrot.slane %v6498_v55, 5 }
  0xd0   : > { %v2202_v59 = vpack.c.b16 %v2175_v49, %v2174_v48  ;;  %v6041_v49 = vld [vmem:[#allocation2 + $0x4c] sm:$0xf]  ;;  %v2862_v23 = vrot.slane %v2860_v4, 5  ;;  %v5965_v4 = vld [vmem:[#allocation2 + $0x54] sm:$0xff] }
  0xd1   : > { %5772 = vmatmul.msk.bf16.gmra.mxu0 %vm1639_vm13, %v3139_v57  ;;  %v2820_v57 = vshll.u32 %v2684_v7, 16  ;;  %v3141_v19 = vpack.c.b16 %v3113_v8, %v3112_v2  ;;  %v2096_v7 = vrot.slane %v6041_v49, 5  ;;  %v6662_v8 = vpop.f32.mrf.mxu0 }
  0xd3   : > { %v2822_v10 = vrot.slane %v2820_v57, 5  ;;  %v2843_v57 = vrot.slane %v2841_v40, 4 }
  0xd5   : > { %v2823_v22 = vor.u32 %v2822_v10, %v2819_v9  ;;  %v2847_v10 = vor.u32 %v2846_v58, %v2843_v57  ;;  %v2692_v57 = vld [vmem:[#allocation2 + $0x5c] sm:$0x1] }
  0xd7   : > { %v2824_v29 = vrot.slane %v2823_v22, 4 }
  0xd8   : > { %5643 = vmatmul.msk.bf16.gmra.mxu1 %vm1639_vm13, %v5961_v0  ;;  %5756 = vmatmul.msk.bf16.gmra.mxu3 %vm1639_vm13, %v5976_v12  ;;  %v2006_v0 = vld [vmem:[#allocation2 + $0x3c] sm:$0xe]  ;;  %v6636_v12 = vpop.f32.mrf.mxu1 }
  0xd9   : > { %v5661_v15 = vrot.slane %v2006_v0, 9  ;;  %v2829_v41 = vsel %vm6260_vm12, %v2824_v29, %v2828_v11  ;;  %v6042_v0 = vld [vmem:[#allocation2 + $0x50] sm:$0x1] }
  0xda   : > { %v6654_v44 = vpop.f32.mrf.mxu2  ;;  %v2099_v2 = vrot.slane %v6042_v0, 5  ;;  %v2884_v0 = vshll.u32 %v2692_v57, 16 }
  0xdb   : > { %v2090_v27 = vsel %vm6535_vm1, %v5661_v15, %v2089_v63  ;;  %v2098_v63 = vrot.slane %v2096_v7, 4 }
  0xdc   : > { %v2176_v34 = vunpack.c.l.b16 %v2090_v27  ;;  %v2886_v55 = vrot.slane %v2884_v0, 5 }
  0xdd   : > { %5676 = vmatmul.msk.bf16.gmra.mxu2 %vm1639_vm13, %v2201_v17  ;;  %v6040_v17 = vld [vmem:[#allocation2 + $0x44] sm:$0x1] }
  0xde   : > { %v2092_v18 = vrot.slane %v6040_v17, 5  ;;  %v2100_v17 = vsel %vm6535_vm1, %v2098_v63, %v2099_v2 }
  0xdf   : > { %v2179_v27 = vunpack.c.l.b16 %v2100_v17 }
  0xe0   : > { %v2093_v28 = vsel %vm6535_vm1, %v2091_v16, %v2092_v18  ;;  %v6649_v39 = vpop.f32.mrf.mxu1  ;;  %v2097_v16 = vsel %vm6535_vm1, %v5662_v62, %v2096_v7  ;;  %v2848_v18 = vrot.slane %v2847_v10, 4 }
  0xe1   : > { %5773 = vmatmul.msk.bf16.gmra.mxu0 %vm1639_vm13, %v3140_v37  ;;  %v2177_v5 = vunpack.c.l.b16 %v2093_v28  ;;  %v2688_v37 = vld [vmem:[#allocation2 + $0x4c] sm:$0xf]  ;;  %v2178_v61 = vunpack.c.l.b16 %v2097_v16  ;;  %v2690_v28 = vld [vmem:[#allocation2 + $0x54] sm:$0xf] }
  0xe2   : > { %v2850_v1 = vshll.u32 %v2688_v37, 16  ;;  %v2854_v48 = vshrl.u32 %v2688_v37, 16  ;;  %v6666_v15 = vpop.f32.mrf.mxu2 }
  0xe3   : > { %v2203_v47 = vpack.c.b16 %v2177_v5, %v2176_v34  ;;  %v6673_v29 = vpop.f32.mrf.mxu3  ;;  %v2865_v34 = vshrl.u32 %v2690_v28, 16  ;;  %v2868_v5 = vshll.u32 %v2690_v28, 16 }
  0xe4   : > { %v2856_v52 = vrot.slane %v2854_v48, 4 }
  0xe5   : > { %v2867_v49 = vrot.slane %v2865_v34, 4  ;;  %v2870_v7 = vrot.slane %v2868_v5, 5 }
  0xe7   : > { %v2871_v62 = vor.u32 %v2870_v7, %v2867_v49 }
  0xe8   : > { %5644 = vmatmul.msk.bf16.gmra.mxu1 %vm1639_vm13, %v5962_v45  ;;  %5757 = vmatmul.msk.bf16.gmra.mxu3 %vm1639_vm13, %v5977_v53  ;;  %v2839_v45 = vsel %vm6260_vm12, %v2834_v32, %v2838_v33  ;;  %v3114_v53 = vunpack.c.l.b16 %v2829_v41  ;;  %v5979_v32 = vld [vmem:[#allocation2 + $0x48] sm:$0xff] }
  0xe9   : > { %v3115_v54 = vunpack.c.l.b16 %v2839_v45  ;;  %v6678_v35 = vpop.f32.mrf.mxu0 }
  0xeb   : > { %v3142_v9 = vpack.c.b16 %v3115_v54, %v3114_v53  ;;  %v6690_v60 = vpop.f32.mrf.mxu3 }
  0xed   : > { %5677 = vmatmul.msk.bf16.gmra.mxu2 %vm1639_vm13, %v2202_v59  ;;  %v2852_v59 = vrot.slane %v2850_v1, 5 }
  0xef   : > { %v2857_v11 = vor.u32 %v2856_v52, %v2852_v59  ;;  %v2853_v33 = vsel %vm6260_vm12, %v2848_v18, %v2852_v59  ;;  %v2105_v59 = vrot.slane %v2103_v42, 4 }
  0xf0   : > { %v3116_v1 = vunpack.c.l.b16 %v2853_v33 }
  0xf1   : > { %5774 = vmatmul.msk.bf16.gmra.mxu0 %vm1639_vm13, %v3141_v19  ;;  %v6664_v13 = vpop.f32.mrf.mxu1  ;;  %v5964_v19 = vld [vmem:[#allocation2 + $0x48] sm:$0xff]  ;;  %v2858_v22 = vrot.slane %v2857_v11, 4  ;;  %v6696_v10 = vpop.f32.mrf.mxu0  ;;  %v2872_v11 = vrot.slane %v2871_v62, 4 }
  0xf3   : > { %v2863_v37 = vsel %vm6260_vm12, %v2858_v22, %v2862_v23  ;;  %v2693_v22 = vld [vmem:[#allocation2 + $0x60] sm:$0xf] }
  0xf4   : > { %v3117_v48 = vunpack.c.l.b16 %v2863_v37 }
  0xf6   : > { %v3143_v52 = vpack.c.b16 %v3117_v48, %v3116_v1 }
  0xf8   : > { %5645 = vmatmul.msk.bf16.gmra.mxu1 %vm1639_vm13, %v5963_v30  ;;  %5758 = vmatmul.msk.bf16.gmra.mxu3 %vm1639_vm13, %v5978_v38  ;;  %v2691_v30 = vld [vmem:[#allocation2 + $0x58] sm:$0xf]  ;;  %v2204_v38 = vpack.c.b16 %v2179_v27, %v2178_v61  ;;  %v2694_v61 = vld [vmem:[#allocation2 + $0x64] sm:$0xf] }
  0xf9   : > { %v2874_v41 = vshll.u32 %v2691_v30, 16  ;;  %v2878_v40 = vshrl.u32 %v2691_v30, 16  ;;  %v6684_v45 = vpop.f32.mrf.mxu1  ;;  %v5980_v27 = vld [vmem:[#allocation2 + $0x54] sm:$0xff]  ;;  %v2889_v30 = vshrl.u32 %v2693_v22, 16  ;;  %v2898_v5 = vshll.u32 %v2694_v61, 16 }
  0xfa   : > { %v2902_v37 = vshrl.u32 %v2694_v61, 16 }
  0xfb   : > { %v2876_v53 = vrot.slane %v2874_v41, 5  ;;  %v2880_v54 = vrot.slane %v2878_v40, 4  ;;  %v6043_v41 = vld [vmem:[#allocation2 + $0x64] sm:$0xf]  ;;  %v2891_v48 = vrot.slane %v2889_v30, 4 }
  0xfc   : > { %v2110_v40 = vrot.slane %v6043_v41, 5 }
  0xfd   : > { %5678 = vmatmul.msk.bf16.gmra.mxu2 %vm1639_vm13, %v2203_v47  ;;  %v2008_v47 = vld [vmem:[#allocation2 + $0x54] sm:$0xe]  ;;  %v6686_v51 = vpop.f32.mrf.mxu2  ;;  %v2881_v63 = vor.u32 %v2880_v54, %v2876_v53  ;;  %v2877_v28 = vsel %vm6260_vm12, %v2872_v11, %v2876_v53  ;;  %v2900_v53 = vrot.slane %v2898_v5, 5  ;;  %v2904_v54 = vrot.slane %v2902_v37, 4  ;;  %v5981_v5 = vld [vmem:[#allocation2 + $0x60] sm:$0xff] }
  0xfe   : > { %v5663_v58 = vrot.slane %v2008_v47, 9  ;;  %v3118_v47 = vunpack.c.l.b16 %v2877_v28  ;;  %v2112_v62 = vrot.slane %v2110_v40, 4 }
  0xff   : > { %v2882_v16 = vrot.slane %v2881_v63, 4 }
 0x100   : > { %v2104_v2 = vsel %vm6535_vm1, %v5663_v58, %v2103_v42  ;;  %v2009_v42 = vld [vmem:[#allocation2 + $0x60] sm:$0xe]  ;;  %v6044_v58 = vld [vmem:[#allocation2 + $0x68] sm:$0x1] }
 0x101   : > { %5775 = vmatmul.msk.bf16.gmra.mxu0 %vm1639_vm13, %v3142_v9  ;;  %v2107_v9 = vsel %vm6535_vm1, %v2105_v59, %v2106_v43  ;;  %v2180_v18 = vunpack.c.l.b16 %v2104_v2  ;;  %v2887_v33 = vsel %vm6260_vm12, %v2882_v16, %v2886_v55  ;;  %v2113_v59 = vrot.slane %v6044_v58, 5  ;;  %v2695_v43 = vld [vmem:[#allocation2 + $0x68] sm:$0x1] }
 0x102   : > { %v3119_v1 = vunpack.c.l.b16 %v2887_v33  ;;  %v2908_v11 = vshll.u32 %v2695_v43, 16  ;;  %v2697_v33 = vld [vmem:[#allocation2 + $0x70] sm:$0xf] }
 0x103   : > { %v2114_v16 = vsel %vm6535_vm1, %v2112_v62, %v2113_v59  ;;  %v2010_v59 = vld [vmem:[#allocation2 + $0x6c] sm:$0xe] }
 0x104   : > { %v3144_v63 = vpack.c.b16 %v3119_v1, %v3118_v47  ;;  %v2910_v61 = vrot.slane %v2908_v11, 5  ;;  %v2183_v30 = vunpack.c.l.b16 %v2114_v16  ;;  %v6046_v11 = vld [vmem:[#allocation2 + $0x74] sm:$0x1] }
 0x105   : > { %v6701_v23 = vpop.f32.mrf.mxu2 }
 0x108   : > { %5646 = vmatmul.msk.bf16.gmra.mxu1 %vm1639_vm13, %v5964_v19  ;;  %5759 = vmatmul.msk.bf16.gmra.mxu3 %vm1639_vm13, %v5979_v32  ;;  %v2181_v19 = vunpack.c.l.b16 %v2107_v9  ;;  %v2892_v32 = vshll.u32 %v2693_v22, 16  ;;  %v2905_v9 = vor.u32 %v2904_v54, %v2900_v53  ;;  %v6045_v54 = vld [vmem:[#allocation2 + $0x70] sm:$0xf] }
 0x109   : > { %v2117_v58 = vrot.slane %v6045_v54, 5 }
 0x10a   : > { %v2205_v34 = vpack.c.b16 %v2181_v19, %v2180_v18  ;;  %v2894_v49 = vrot.slane %v2892_v32, 5  ;;  %v5966_v19 = vld [vmem:[#allocation2 + $0x60] sm:$0xff]  ;;  %v2906_v22 = vrot.slane %v2905_v9, 4  ;;  %v2696_v32 = vld [vmem:[#allocation2 + $0x6c] sm:$0xf] }
 0x10c   : > { %v6711_v7 = vpop.f32.mrf.mxu0  ;;  %v2895_v0 = vor.u32 %v2894_v49, %v2891_v48  ;;  %v2911_v47 = vsel %vm6260_vm12, %v2906_v22, %v2910_v61  ;;  %v2922_v48 = vshll.u32 %v2697_v33, 16  ;;  %v2926_v49 = vshrl.u32 %v2697_v33, 16 }
 0x10d   : > { %5679 = vmatmul.msk.bf16.gmra.mxu2 %vm1639_vm13, %v2204_v38  ;;  %v6708_v38 = vpop.f32.mrf.mxu3  ;;  %v2119_v22 = vrot.slane %v2117_v58, 4 }
 0x10e   : > { %v2896_v18 = vrot.slane %v2895_v0, 4  ;;  %v2928_v0 = vrot.slane %v2926_v49, 4  ;;  %v5967_v49 = vld [vmem:[#allocation2 + $0x6c] sm:$0xff] }
 0x110   : > { %v2901_v37 = vsel %vm6260_vm12, %v2896_v18, %v2900_v53  ;;  %v2698_v18 = vld [vmem:[#allocation2 + $0x74] sm:$0x1] }
 0x111   : > { %5776 = vmatmul.msk.bf16.gmra.mxu0 %vm1639_vm13, %v3143_v52  ;;  %v5664_v52 = vrot.slane %v2009_v42, 9  ;;  %v2916_v42 = vshll.u32 %v2696_v32, 16  ;;  %v3120_v43 = vunpack.c.l.b16 %v2901_v37  ;;  %v2932_v37 = vshll.u32 %v2698_v18, 16 }
 0x113   : > { %v2918_v62 = vrot.slane %v2916_v42, 5  ;;  %v2934_v54 = vrot.slane %v2932_v37, 5 }
 0x115   : > { %v6699_v17 = vpop.f32.mrf.mxu1  ;;  %v6723_v55 = vpop.f32.mrf.mxu3 }
 0x118   : > { %5647 = vmatmul.msk.bf16.gmra.mxu1 %vm1639_vm13, %v5965_v4  ;;  %5760 = vmatmul.msk.bf16.gmra.mxu3 %vm1639_vm13, %v5980_v27  ;;  %v2111_v4 = vsel %vm6535_vm1, %v5664_v52, %v2110_v40  ;;  %v2913_v40 = vshrl.u32 %v2696_v32, 16  ;;  %v3121_v52 = vunpack.c.l.b16 %v2911_v47 }
 0x119   : > { %v2182_v28 = vunpack.c.l.b16 %v2111_v4  ;;  %v2120_v4 = vrot.slane %v6046_v11, 5  ;;  %v5982_v11 = vld [vmem:[#allocation2 + $0x6c] sm:$0xff] }
 0x11a   : > { %v2915_v53 = vrot.slane %v2913_v40, 4 }
 0x11b   : > { %v2206_v1 = vpack.c.b16 %v2183_v30, %v2182_v28  ;;  %v3145_v28 = vpack.c.b16 %v3121_v52, %v3120_v43  ;;  %v2121_v47 = vsel %vm6535_vm1, %v2119_v22, %v2120_v4 }
 0x11c   : > { %v2919_v30 = vor.u32 %v2918_v62, %v2915_v53  ;;  %v2185_v52 = vunpack.c.l.b16 %v2121_v47 }
 0x11d   : > { %5680 = vmatmul.msk.bf16.gmra.mxu2 %vm1639_vm13, %v2205_v34  ;;  %v6714_v57 = vpop.f32.mrf.mxu1  ;;  %v6725_v34 = vpop.f32.mrf.mxu0 }
 0x120   : > { %v6716_v2 = vpop.f32.mrf.mxu2 }
 0x121   : > { %5777 = vmatmul.msk.bf16.gmra.mxu0 %vm1639_vm13, %v3144_v63  ;;  %v2924_v63 = vrot.slane %v2922_v48, 5  ;;  %v2920_v48 = vrot.slane %v2919_v30, 4 }
 0x125   : > { %v1921_v27 = vpop.f32.mrf.mxu1 }
 0x126   : > { %v1922_v61 = vadd.f32 %v1921_v27, %v6647_v31  ;;  %v2700_v31 = vld [vmem:[#allocation2 + $0x7c] sm:$0xf] }
 0x127   : > { %v2946_v18 = vshll.u32 %v2700_v31, 16  ;;  %v2950_v4 = vshrl.u32 %v2700_v31, 16 }
 0x128   : > { %v6729_v41 = vpop.f32.mrf.mxu2  ;;  %5648 = vmatmul.msk.bf16.gmra.mxu1 %vm1639_vm13, %v5966_v19  ;;  %5761 = vmatmul.msk.bf16.gmra.mxu3 %vm1639_vm13, %v5981_v5  ;;  %v5665_v19 = vrot.slane %v2010_v59, 9  ;;  %v2929_v5 = vor.u32 %v2928_v0, %v2924_v63 }
 0x12a   : > { %v2118_v42 = vsel %vm6535_vm1, %v5665_v19, %v2117_v58  ;;  %v2930_v27 = vrot.slane %v2929_v5, 4 }
 0x12b   : > { %v6736_v16 = vpop.f32.mrf.mxu3  ;;  %v2184_v43 = vunpack.c.l.b16 %v2118_v42  ;;  %v6047_v42 = vld [vmem:[#allocation2 + $0x7c] sm:$0xf] }
 0x12c   : > { %7707 = vst [vmem:[#allocation3_spill] sm:$0xff] %v6736_v16  ;;  %v2124_v47 = vrot.slane %v6047_v42, 5 }
 0x12d   : > { %5681 = vmatmul.msk.bf16.gmra.mxu2 %vm1639_vm13, %v2206_v1  ;;  %v1923_v9 = vpop.f32.mrf.mxu1  ;;  %v2699_v1 = vld [vmem:[#allocation2 + $0x78] sm:$0xf] }
 0x12e   : > { %v6739_v33 = vpop.f32.mrf.mxu0  ;;  %v2937_v62 = vshrl.u32 %v2699_v1, 16  ;;  %v2940_v0 = vshll.u32 %v2699_v1, 16  ;;  %v1924_v58 = vadd.f32 %v1923_v9, %v6662_v8  ;;  %v2948_v8 = vrot.slane %v2946_v18, 5  ;;  %v2011_v1 = vld [vmem:[#allocation2 + $0x78] sm:$0xe] }
 0x12f   : > { %v2952_v9 = vrot.slane %v2950_v4, 4 }
 0x130   : > { %v2274_v32 = vpop.f32.mrf.mxu2  ;;  %v2939_v5 = vrot.slane %v2937_v62, 4  ;;  %v2942_v37 = vrot.slane %v2940_v0, 5 }
 0x131   : > { %v2354_v40 = vadd.f32 %v2274_v32, %v1922_v61  ;;  %5778 = vmatmul.msk.bf16.gmra.mxu0 %vm1639_vm13, %v3145_v28  ;;  %v2925_v61 = vsel %vm6260_vm12, %v2920_v48, %v2924_v63  ;;  %v2935_v28 = vsel %vm6260_vm12, %v2930_v27, %v2934_v54  ;;  %v2207_v32 = vpack.c.b16 %v2185_v52, %v2184_v43  ;;  %v6048_v48 = vld [vmem:[#allocation2 + $0x80] sm:$0x1] }
 0x132   : > { %v3123_v31 = vunpack.c.l.b16 %v2935_v28  ;;  %v2127_v16 = vrot.slane %v6048_v48, 5  ;;  %v2943_v54 = vor.u32 %v2942_v37, %v2939_v5  ;;  %v5666_v43 = vrot.slane %v2011_v1, 9 }
 0x133   : > { %v6746_v53 = vpop.f32.mrf.mxu3  ;;  %v2126_v52 = vrot.slane %v2124_v47, 4 }
 0x134   : > { %7708 = vst [vmem:[#allocation4_spill] sm:$0xff] %v6746_v53  ;;  %v2701_v53 = vld [vmem:[#allocation2 + $0x80] sm:$0x1]  ;;  %v2125_v28 = vsel %vm6535_vm1, %v5666_v43, %v2124_v47  ;;  %v2944_v5 = vrot.slane %v2943_v54, 4 }
 0x135   : > { %v1926_v59 = vpop.f32.mrf.mxu1 }
 0x136   : > { %v6750_v22 = vpop.f32.mrf.mxu0  ;;  %v1927_v0 = vadd.f32 %v1926_v59, %v6678_v35  ;;  %v5968_v35 = vld [vmem:[#allocation2 + $0x78] sm:$0xff]  ;;  %v2186_v59 = vunpack.c.l.b16 %v2125_v28 }
 0x138   : > { %v2276_v19 = vpop.f32.mrf.mxu2  ;;  %5649 = vmatmul.msk.bf16.gmra.mxu1 %vm1639_vm13, %v5967_v49  ;;  %5762 = vmatmul.msk.bf16.gmra.mxu3 %vm1639_vm13, %v5982_v11  ;;  %v3122_v49 = vunpack.c.l.b16 %v2925_v61  ;;  %v2956_v11 = vshll.u32 %v2701_v53, 16 }
 0x139   : > { %v2355_v30 = vadd.f32 %v2276_v19, %v1924_v58  ;;  %v2953_v58 = vor.u32 %v2952_v9, %v2948_v8  ;;  %v2702_v9 = vld [vmem:[#allocation2 + $0x84] sm:$0xf] }
 0x13a   : > { %v3146_v18 = vpack.c.b16 %v3123_v31, %v3122_v49  ;;  %v2958_v1 = vrot.slane %v2956_v11, 5  ;;  %v2703_v49 = vld [vmem:[#allocation2 + $0x88] sm:$0xf] }
 0x13b   : > { %v2560_v27 = vpop.f32.mrf.mxu3  ;;  %v2954_v37 = vrot.slane %v2953_v58, 4  ;;  %v2970_v58 = vshll.u32 %v2703_v49, 16  ;;  %v2974_v11 = vshrl.u32 %v2703_v49, 16 }
 0x13c   : > { %v2640_v62 = vadd.f32 %v2560_v27, %v2354_v40  ;;  %v5983_v27 = vld [vmem:[#allocation2 + $0x78] sm:$0xff] }
 0x13d   : > { %5682 = vmatmul.msk.bf16.gmra.mxu2 %vm1639_vm13, %v2207_v32  ;;  %v1928_v63 = vpop.f32.mrf.mxu1  ;;  %v2128_v32 = vsel %vm6535_vm1, %v2126_v52, %v2127_v16  ;;  %v2949_v16 = vsel %vm6260_vm12, %v2944_v5, %v2948_v8  ;;  %v2959_v54 = vsel %vm6260_vm12, %v2954_v37, %v2958_v1  ;;  %v2012_v5 = vld [vmem:[#allocation2 + $0x84] sm:$0xe]  ;;  %v2972_v37 = vrot.slane %v2970_v58, 5 }
 0x13e   : > { %v3214_v19 = vpop.f32.mrf.mxu0  ;;  %v2187_v53 = vunpack.c.l.b16 %v2128_v32  ;;  %v1929_v43 = vadd.f32 %v1928_v63, %v6696_v10  ;;  %v3124_v8 = vunpack.c.l.b16 %v2949_v16  ;;  %v3125_v32 = vunpack.c.l.b16 %v2959_v54 }
 0x13f   : > { %v6763_v42 = vadd.f32 %v3214_v19, %v2640_v62  ;;  %v2961_v62 = vshrl.u32 %v2702_v9, 16  ;;  %v2976_v1 = vrot.slane %v2974_v11, 4 }
 0x140   : > { %v2279_v4 = vpop.f32.mrf.mxu2 }
 0x141   : > { %v2356_v61 = vadd.f32 %v2279_v4, %v1927_v0  ;;  %5779 = vmatmul.msk.bf16.gmra.mxu0 %vm1639_vm13, %v3146_v18  ;;  %v2964_v0 = vshll.u32 %v2702_v9, 16  ;;  %v2963_v10 = vrot.slane %v2961_v62, 4  ;;  %v6050_v9 = vld [vmem:[#allocation2 + $0x8c] sm:$0x1]  ;;  %v2977_v54 = vor.u32 %v2976_v1, %v2972_v37 }
 0x142   : > { %v2134_v49 = vrot.slane %v6050_v9, 5 }
 0x143   : > { %v2562_v31 = vpop.f32.mrf.mxu3  ;;  %v2966_v63 = vrot.slane %v2964_v0, 5 }
 0x144   : > { %v2641_v47 = vadd.f32 %v2562_v31, %v2355_v30  ;;  %v6049_v30 = vld [vmem:[#allocation2 + $0x88] sm:$0xf]  ;;  %v5667_v31 = vrot.slane %v2012_v5, 9 }
 0x145   : > { %v1931_v40 = vpop.f32.mrf.mxu1  ;;  %v2131_v19 = vrot.slane %v6049_v30, 5  ;;  %v2967_v16 = vor.u32 %v2966_v63, %v2963_v10  ;;  %v2978_v30 = vrot.slane %v2977_v54, 4  ;;  %v2705_v63 = vld [vmem:[#allocation2 + $0x90] sm:$0xf] }
 0x146   : > { %v1932_v48 = vadd.f32 %v1931_v40, %v6711_v7  ;;  %v3216_v18 = vpop.f32.mrf.mxu0  ;;  %v2208_v7 = vpack.c.b16 %v2187_v53, %v2186_v59 }
 0x147   : > { %v6773_v28 = vadd.f32 %v3216_v18, %v2641_v47  ;;  %v2133_v47 = vrot.slane %v2131_v19, 4  ;;  %v2132_v11 = vsel %vm6535_vm1, %v5667_v31, %v2131_v19  ;;  %v2985_v31 = vshrl.u32 %v2705_v63, 16 }
 0x148   : > { %v2281_v52 = vpop.f32.mrf.mxu2  ;;  %5650 = vmatmul.msk.bf16.gmra.mxu1 %vm1639_vm13, %v5968_v35  ;;  %5763 = vmatmul.msk.bf16.gmra.mxu3 %vm1639_vm13, %v5983_v27  ;;  %v2704_v35 = vld [vmem:[#allocation2 + $0x8c] sm:$0x1]  ;;  %v3147_v27 = vpack.c.b16 %v3125_v32, %v3124_v8  ;;  %v5969_v8 = vld [vmem:[#allocation2 + $0x84] sm:$0xff]  ;;  %v2188_v5 = vunpack.c.l.b16 %v2132_v11 }
 0x149   : > { %v2357_v4 = vadd.f32 %v2281_v52, %v1929_v43  ;;  %v2980_v52 = vshll.u32 %v2704_v35, 16  ;;  %v2135_v18 = vsel %vm6535_vm1, %v2133_v47, %v2134_v49  ;;  %v2706_v35 = vld [vmem:[#allocation2 + $0x94] sm:$0xf]  ;;  %v2988_v47 = vshll.u32 %v2705_v63, 16 }
 0x14a   : > { %v2189_v10 = vunpack.c.l.b16 %v2135_v18  ;;  %v2994_v54 = vshll.u32 %v2706_v35, 16  ;;  %v2987_v18 = vrot.slane %v2985_v31, 4 }
 0x14b   : > { %v2565_v59 = vpop.f32.mrf.mxu3 }
 0x14c   : > { %v2642_v43 = vadd.f32 %v2565_v59, %v2356_v61  ;;  %v2982_v61 = vrot.slane %v2980_v52, 5  ;;  %v2998_v52 = vshrl.u32 %v2706_v35, 16 }
 0x14d   : > { %5683 = vmatmul.msk.bf16.gmra.mxu2 %vm1639_vm13, %v2208_v7  ;;  %v1933_v40 = vpop.f32.mrf.mxu1 }
 0x14e   : > { %v1934_v53 = vadd.f32 %v1933_v40, %v6725_v34  ;;  %v3219_v0 = vpop.f32.mrf.mxu0  ;;  %v2968_v34 = vrot.slane %v2967_v16, 4  ;;  %v5984_v40 = vld [vmem:[#allocation2 + $0x84] sm:$0xff]  ;;  %v2983_v49 = vsel %vm6260_vm12, %v2978_v30, %v2982_v61  ;;  %v2209_v16 = vpack.c.b16 %v2189_v10, %v2188_v5  ;;  %v2707_v10 = vld [vmem:[#allocation2 + $0x98] sm:$0x1] }
 0x14f   : > { %v6782_v7 = vadd.f32 %v3219_v0, %v2642_v43  ;;  %v3127_v11 = vunpack.c.l.b16 %v2983_v49  ;;  %v2996_v30 = vrot.slane %v2994_v54, 5  ;;  %v3000_v61 = vrot.slane %v2998_v52, 4 }
 0x150   : > { %v2284_v62 = vpop.f32.mrf.mxu2  ;;  %v2973_v9 = vsel %vm6260_vm12, %v2968_v34, %v2972_v37  ;;  %v2013_v37 = vld [vmem:[#allocation2 + $0x90] sm:$0xe]  ;;  %v2990_v34 = vrot.slane %v2988_v47, 5  ;;  %v3004_v47 = vshll.u32 %v2707_v10, 16 }
 0x151   : > { %v2358_v58 = vadd.f32 %v2284_v62, %v1932_v48  ;;  %7709 = vst [vmem:[#allocation5_spill] sm:$0xff] %v6782_v7  ;;  %5780 = vmatmul.msk.bf16.gmra.mxu0 %vm1639_vm13, %v3147_v27  ;;  %v3126_v0 = vunpack.c.l.b16 %v2973_v9  ;;  %v3001_v31 = vor.u32 %v3000_v61, %v2996_v30  ;;  %v2709_v61 = vld [vmem:[#allocation2 + $0xa0] sm:$0xf] }
 0x153   : > { %v2567_v1 = vpop.f32.mrf.mxu3 }
 0x154   : > { %v2643_v19 = vadd.f32 %v2567_v1, %v2357_v4  ;;  %v5668_v1 = vrot.slane %v2013_v37, 9  ;;  %v3002_v37 = vrot.slane %v3001_v31, 4 }
 0x155   : > { %v1936_v32 = vpop.f32.mrf.mxu1 }
 0x156   : > { %v1937_v48 = vadd.f32 %v1936_v32, %v6739_v33  ;;  %v3221_v43 = vpop.f32.mrf.mxu0  ;;  %v6051_v33 = vld [vmem:[#allocation2 + $0x94] sm:$0xf] }
 0x157   : > { %v2138_v62 = vrot.slane %v6051_v33, 5  ;;  %v6791_v4 = vadd.f32 %v3221_v43, %v2643_v19  ;;  %v2708_v33 = vld [vmem:[#allocation2 + $0x9c] sm:$0xf] }
 0x158   : > { %v2286_v59 = vpop.f32.mrf.mxu2  ;;  %5651 = vmatmul.msk.bf16.gmra.mxu1 %vm1639_vm13, %v5969_v8  ;;  %5764 = vmatmul.msk.bf16.gmra.mxu3 %vm1639_vm13, %v5984_v40  ;;  %v3148_v40 = vpack.c.b16 %v3127_v11, %v3126_v0  ;;  %v3006_v0 = vrot.slane %v3004_v47, 5  ;;  %v6053_v47 = vld [vmem:[#allocation2 + $0xa0] sm:$0xf] }
 0x159   : > { %v2359_v27 = vadd.f32 %v2286_v59, %v1934_v53  ;;  %7710 = vst [vmem:[#allocation6_spill] sm:$0xff] %v6791_v4  ;;  %v6052_v53 = vld [vmem:[#allocation2 + $0x98] sm:$0x1]  ;;  %v2140_v35 = vrot.slane %v2138_v62, 4  ;;  %v2991_v59 = vor.u32 %v2990_v34, %v2987_v18 }
 0x15a   : > { %v2141_v32 = vrot.slane %v6052_v53, 5  ;;  %v3012_v53 = vshll.u32 %v2708_v33, 16 }
 0x15b   : > { %v2570_v5 = vpop.f32.mrf.mxu3 }
 0x15c   : > { %v2644_v19 = vadd.f32 %v2570_v5, %v2358_v58  ;;  %v2142_v54 = vsel %vm6535_vm1, %v2140_v35, %v2141_v32  ;;  %v5970_v58 = vld [vmem:[#allocation2 + $0x90] sm:$0xff]  ;;  %v3018_v32 = vshll.u32 %v2709_v61, 16  ;;  %v3014_v31 = vrot.slane %v3012_v53, 5 }
 0x15d   : > { %5684 = vmatmul.msk.bf16.gmra.mxu2 %vm1639_vm13, %v2209_v16  ;;  %v1938_v8 = vpop.f32.mrf.mxu1  ;;  %v2139_v16 = vsel %vm6535_vm1, %v5668_v1, %v2138_v62  ;;  %v2191_v34 = vunpack.c.l.b16 %v2142_v54  ;;  %v5985_v5 = vld [vmem:[#allocation2 + $0x90] sm:$0xff]  ;;  %v3022_v1 = vshrl.u32 %v2709_v61, 16  ;;  %v2014_v54 = vld [vmem:[#allocation2 + $0x9c] sm:$0xe]  ;;  %v2710_v61 = vld [vmem:[#allocation2 + $0xa4] sm:$0x1] }
 0x15e   : > { %v1939_v63 = vadd.f32 %v1938_v8, %v6750_v22  ;;  %v3224_v49 = vpop.f32.mrf.mxu0  ;;  %v2992_v22 = vrot.slane %v2991_v59, 4  ;;  %v2190_v18 = vunpack.c.l.b16 %v2139_v16  ;;  %v3009_v8 = vshrl.u32 %v2708_v33, 16 }
 0x15f   : > { %v6800_v52 = vadd.f32 %v3224_v49, %v2644_v19  ;;  %v2145_v16 = vrot.slane %v6053_v47, 5 }
 0x160   : > { %v2289_v9 = vpop.f32.mrf.mxu2  ;;  %v2997_v19 = vsel %vm6260_vm12, %v2992_v22, %v2996_v30  ;;  %v3011_v49 = vrot.slane %v3009_v8, 4  ;;  %v6054_v22 = vld [vmem:[#allocation2 + $0xa4] sm:$0x1] }
 0x161   : > { %v2360_v43 = vadd.f32 %v2289_v9, %v1937_v48  ;;  %7711 = vst [vmem:[#allocation7_spill] sm:$0xff] %v6800_v52  ;;  %5781 = vmatmul.msk.bf16.gmra.mxu0 %vm1639_vm13, %v3148_v40  ;;  %v3007_v40 = vsel %vm6260_vm12, %v3002_v37, %v3006_v0  ;;  %v2210_v9 = vpack.c.b16 %v2191_v34, %v2190_v18  ;;  %v3128_v33 = vunpack.c.l.b16 %v2997_v19 }
 0x162   : > { %v3024_v52 = vrot.slane %v3022_v1, 4  ;;  %v3015_v0 = vor.u32 %v3014_v31, %v3011_v49  ;;  %v5669_v18 = vrot.slane %v2014_v54, 9  ;;  %v2147_v34 = vrot.slane %v2145_v16, 4  ;;  %v2711_v31 = vld [vmem:[#allocation2 + $0xa8] sm:$0xf] }
 0x163   : > { %v2572_v48 = vpop.f32.mrf.mxu3 }
 0x164   : > { %v2645_v62 = vadd.f32 %v2572_v48, %v2359_v27  ;;  %v3020_v48 = vrot.slane %v3018_v32, 5  ;;  %v3016_v32 = vrot.slane %v3015_v0, 4  ;;  %v2146_v1 = vsel %vm6535_vm1, %v5669_v18, %v2145_v16  ;;  %v5986_v0 = vld [vmem:[#allocation2 + $0x9c] sm:$0xff] }
 0x165   : > { %v1941_v11 = vpop.f32.mrf.mxu1 }
 0x166   : > { %v3226_v35 = vpop.f32.mrf.mxu0  ;;  %v1942_v53 = vadd.f32 %v1941_v11, %v6617_v24  ;;  %v532_v11 = vld [vmem:[#allocation2 + $0xc0] sm:$0x1] }
 0x167   : > { %v6808_v27 = vadd.f32 %v3226_v35, %v2645_v62  ;;  %v3028_v62 = vshll.u32 %v2710_v61, 16  ;;  %v533_v16 = vsel %vm6182_vm3, 0, %v532_v11 }
 0x168   : > { %v2291_v10 = vpop.f32.mrf.mxu2  ;;  %5652 = vmatmul.msk.bf16.gmra.mxu1 %vm1639_vm13, %v5970_v58  ;;  %5765 = vmatmul.msk.bf16.gmra.mxu3 %vm1639_vm13, %v5985_v5  ;;  %v3129_v58 = vunpack.c.l.b16 %v3007_v40  ;;  %534 = vst [vmem:[#allocation2 + $0xc0] sm:$0x1] %v533_v16 }
 0x169   : > { %v2361_v59 = vadd.f32 %v2291_v10, %v1939_v63  ;;  %7712 = vst [vmem:[#allocation8_spill] sm:$0xff] %v6808_v27  ;;  %v2148_v63 = vrot.slane %v6054_v22, 5  ;;  %v3025_v10 = vor.u32 %v3024_v52, %v3020_v48  ;;  %v3030_v49 = vrot.slane %v3028_v62, 5  ;;  %v2712_v52 = vld [vmem:[#allocation2 + $0xac] sm:$0xf] }
 0x16a   : > { %v3149_v5 = vpack.c.b16 %v3129_v58, %v3128_v33  ;;  %v2192_v33 = vunpack.c.l.b16 %v2146_v1  ;;  %v3021_v22 = vsel %vm6260_vm12, %v3016_v32, %v3020_v48  ;;  %v625_v1 = vld [vmem:[%s6201_s8 + $0x7c] sm:$0xf] }
 0x16b   : > { %v2575_v37 = vpop.f32.mrf.mxu3  ;;  %v3026_v24 = vrot.slane %v3025_v10, 4  ;;  %v3046_v10 = vshrl.u32 %v2712_v52, 16 }
 0x16c   : > { %v2646_v8 = vadd.f32 %v2575_v37, %v2360_v43  ;;  %v5971_v43 = vld [vmem:[#allocation2 + $0x9c] sm:$0xff] }
 0x16d   : > { %5685 = vmatmul.msk.bf16.gmra.mxu2 %vm1639_vm13, %v2210_v9  ;;  %v1943_v30 = vpop.f32.mrf.mxu1  ;;  %v2149_v9 = vsel %vm6535_vm1, %v2147_v34, %v2148_v63  ;;  %v3033_v63 = vshrl.u32 %v2711_v31, 16  ;;  %v3036_v34 = vshll.u32 %v2711_v31, 16  ;;  %v3031_v62 = vsel %vm6260_vm12, %v3026_v24, %v3030_v49  ;;  %v2015_v24 = vld [vmem:[#allocation2 + $0xa8] sm:$0xe] }
 0x16e   : > { %v3229_v19 = vpop.f32.mrf.mxu0  ;;  %v2193_v58 = vunpack.c.l.b16 %v2149_v9  ;;  %v1944_v18 = vadd.f32 %v1943_v30, %v6627_v50  ;;  %v3130_v9 = vunpack.c.l.b16 %v3021_v22  ;;  %v3131_v50 = vunpack.c.l.b16 %v3031_v62  ;;  %v6056_v22 = vld [vmem:[#allocation2 + $0xb0] sm:$0x1] }
 0x16f   : > { %v6817_v47 = vadd.f32 %v3229_v19, %v2646_v8  ;;  %v3042_v8 = vshll.u32 %v2712_v52, 16  ;;  %v3035_v30 = vrot.slane %v3033_v63, 4  ;;  %v3038_v31 = vrot.slane %v3036_v34, 5 }
 0x170   : > { %v2294_v35 = vpop.f32.mrf.mxu2  ;;  %v2211_v32 = vpack.c.b16 %v2193_v58, %v2192_v33  ;;  %v2713_v33 = vld [vmem:[#allocation2 + $0xb0] sm:$0x1]  ;;  %v3150_v62 = vpack.c.b16 %v3131_v50, %v3130_v9 }
 0x171   : > { %v2362_v40 = vadd.f32 %v2294_v35, %v1942_v53  ;;  %7713 = vst [vmem:[#allocation9_spill] sm:$0xff] %v6817_v47  ;;  %5782 = vmatmul.msk.bf16.gmra.mxu0 %vm1639_vm13, %v3149_v5  ;;  %v624_v53 = vld [vmem:[%s6201_s8 + $0x78] sm:$0xf]  ;;  %v6833_v49 = vrot.slane %v3042_v8, 5  ;;  %v892_v47 = vshrl.u32 %v625_v1, 16 }
 0x172   : > { %v884_v35 = vshrl.u32 %v624_v53, 16 }
 0x173   : > { %v2577_v61 = vpop.f32.mrf.mxu3 }
 0x174   : > { %v2647_v37 = vadd.f32 %v2577_v61, %v2361_v59  ;;  %v6055_v59 = vld [vmem:[#allocation2 + $0xac] sm:$0xf]  ;;  %v886_v52 = vrot.slane %v884_v35, 7  ;;  %v887_v61 = vshll.u32 %v624_v53, 16  ;;  %v3052_v35 = vshll.u32 %v2713_v33, 16 }
 0x175   : > { %v1946_v54 = vpop.f32.mrf.mxu1  ;;  %v2152_v11 = vrot.slane %v6055_v59, 5  ;;  %v588_v59 = vld [vmem:[#allocation2 + $0xc8] sm:$0x1] }
 0x176   : > { %v3231_v19 = vpop.f32.mrf.mxu0  ;;  %v1947_v34 = vadd.f32 %v1946_v54, %v6636_v12  ;;  %v889_v8 = vor.u32 %v887_v61, %v886_v52  ;;  %v890_v7 = vrot.slane %v886_v52, 4  ;;  %v589_v54 = vsel %vm6189_vm5, 0, %v588_v59 }
 0x177   : > { %v6830_v16 = vadd.f32 %v3231_v19, %v2647_v37  ;;  %v2154_v19 = vrot.slane %v2152_v11, 4  ;;  %590 = vst [vmem:[#allocation2 + $0xc8] sm:$0x1] %v589_v54 }
 0x178   : > { %v2296_v5 = vpop.f32.mrf.mxu2  ;;  %5653 = vmatmul.msk.bf16.gmra.mxu1 %vm1639_vm13, %v5971_v43  ;;  %5766 = vmatmul.msk.bf16.gmra.mxu3 %vm1639_vm13, %v5986_v0  ;;  %v3048_v43 = vrot.slane %v3046_v10, 4  ;;  %v1057_v0 = vld [vmem:[#allocation2 + $0xc0] sm:$0xf]  ;;  %v3039_v10 = vor.u32 %v3038_v31, %v3035_v30  ;;  %v3054_v30 = vrot.slane %v3052_v35, 5  ;;  %v5972_v31 = vld [vmem:[#allocation2 + $0xa8] sm:$0xff] }
 0x179   : > { %v2363_v48 = vadd.f32 %v2296_v5, %v1944_v18  ;;  %7714 = vst [vmem:[#allocation10_spill] sm:$0xff] %v6830_v16  ;;  %v2155_v18 = vrot.slane %v6056_v22, 5  ;;  %v5670_v5 = vrot.slane %v2015_v24, 9  ;;  %v895_v22 = vshll.u32 %v625_v1, 16 }
 0x17a   : > { %v3049_v53 = vor.u32 %v3048_v43, %v6833_v49  ;;  %v1058_v24 = vsel %vm6219_vm9, %v889_v8, %v1057_v0  ;;  %v3040_v1 = vrot.slane %v3039_v10, 4 }
 0x17b   : > { %v2580_v37 = vpop.f32.mrf.mxu3  ;;  %v2156_v12 = vsel %vm6535_vm1, %v2154_v19, %v2155_v18  ;;  %1059 = vst [vmem:[#allocation2 + $0xc0] sm:$0xf] %v1058_v24  ;;  %v2715_v18 = vld [vmem:[#allocation2 + $0xb8] sm:$0xf] }
 0x17c   : > { %v2648_v63 = vadd.f32 %v2580_v37, %v2362_v40  ;;  %v2153_v40 = vsel %vm6535_vm1, %v5670_v5, %v2152_v11  ;;  %v2195_v52 = vunpack.c.l.b16 %v2156_v12  ;;  %v5987_v5 = vld [vmem:[#allocation2 + $0xa8] sm:$0xff]  ;;  %v3066_v10 = vshll.u32 %v2715_v18, 16 }
 0x17d   : > { %5686 = vmatmul.msk.bf16.gmra.mxu2 %vm1639_vm13, %v2211_v32  ;;  %v1948_v58 = vpop.f32.mrf.mxu1  ;;  %v894_v32 = vrot.slane %v892_v47, 7  ;;  %v2714_v47 = vld [vmem:[#allocation2 + $0xb4] sm:$0xf]  ;;  %v2194_v11 = vunpack.c.l.b16 %v2153_v40 }
 0x17e   : > { %v3234_v27 = vpop.f32.mrf.mxu0  ;;  %v3057_v37 = vshrl.u32 %v2714_v47, 16  ;;  %v1949_v19 = vadd.f32 %v1948_v58, %v6649_v39  ;;  %v3060_v0 = vshll.u32 %v2714_v47, 16  ;;  %v1061_v39 = vld [vmem:[#allocation2 + $0xc8] sm:$0x1]  ;;  %v3068_v54 = vrot.slane %v3066_v10, 5 }
 0x17f   : > { %v6846_v9 = vadd.f32 %v3234_v27, %v2648_v63  ;;  %v897_v50 = vor.u32 %v895_v22, %v894_v32  ;;  %v3045_v63 = vsel %vm6260_vm12, %v3040_v1, %v6833_v49  ;;  %v2212_v59 = vpack.c.b16 %v2195_v52, %v2194_v11  ;;  %v2016_v22 = vld [vmem:[#allocation2 + $0xb4] sm:$0xe]  ;;  %v6058_v1 = vld [vmem:[#allocation2 + $0xbc] sm:$0x1] }
 0x180   : > { %v2299_v16 = vpop.f32.mrf.mxu2  ;;  %v3062_v49 = vrot.slane %v3060_v0, 5  ;;  %v3132_v40 = vunpack.c.l.b16 %v3045_v63  ;;  %v5671_v11 = vrot.slane %v2016_v22, 9 }
 0x181   : > { %v2364_v4 = vadd.f32 %v2299_v16, %v1947_v34  ;;  %5783 = vmatmul.msk.bf16.gmra.mxu0 %vm1639_vm13, %v3150_v62  ;;  %v3050_v16 = vrot.slane %v3049_v53, 4  ;;  %v898_v61 = vsel %vm6213_vm8, %v890_v7, %v897_v50  ;;  %v899_v62 = vrot.slane %v894_v32, 4  ;;  %v6057_v53 = vld [vmem:[#allocation2 + $0xb8] sm:$0xf] }
 0x182   : > { %1060 = vst.msk [vmem:[#allocation2 + $0xc4] sm:$0xf] %vm949_vm6, %v898_v61  ;;  %v2159_v35 = vrot.slane %v6057_v53, 5  ;;  %v3059_v32 = vrot.slane %v3057_v37, 4  ;;  %v2717_v63 = vld [vmem:[#allocation2 + $0xc0] sm:$0xf] }
 0x183   : > { %v2582_v33 = vpop.f32.mrf.mxu3  ;;  %v3055_v34 = vsel %vm6260_vm12, %v3050_v16, %v3054_v30  ;;  %v1062_v24 = vsel %vm6182_vm3, %v899_v62, %v1061_v39  ;;  %v2162_v16 = vrot.slane %v6058_v1, 5  ;;  %v3084_v53 = vshll.u32 %v2717_v63, 16 }
 0x184   : > { %v2649_v27 = vadd.f32 %v2582_v33, %v2363_v48  ;;  %v3070_v48 = vshrl.u32 %v2715_v18, 16  ;;  %v3133_v12 = vunpack.c.l.b16 %v3055_v34  ;;  %1063 = vst [vmem:[#allocation2 + $0xc8] sm:$0x1] %v1062_v24  ;;  %v2161_v52 = vrot.slane %v2159_v35, 4 }
 0x185   : > { %v1951_v43 = vpop.f32.mrf.mxu1  ;;  %v3063_v18 = vor.u32 %v3062_v49, %v3059_v32 }
 0x186   : > { %v3236_v7 = vpop.f32.mrf.mxu0  ;;  %v3072_v47 = vrot.slane %v3070_v48, 4  ;;  %v1952_v33 = vadd.f32 %v1951_v43, %v6664_v13  ;;  %v3151_v37 = vpack.c.b16 %v3133_v12, %v3132_v40  ;;  %v5973_v43 = vld [vmem:[#allocation2 + $0xb4] sm:$0xff]  ;;  %v3081_v48 = vshrl.u32 %v2717_v63, 16 }
 0x187   : > { %v6859_v58 = vadd.f32 %v3236_v7, %v2649_v27  ;;  %v2163_v7 = vsel %vm6535_vm1, %v2161_v52, %v2162_v16  ;;  %v3064_v13 = vrot.slane %v3063_v18, 4  ;;  %v5988_v16 = vld [vmem:[#allocation2 + $0xb4] sm:$0xff] }
 0x188   : > { %v2301_v20 = vpop.f32.mrf.mxu2  ;;  %5654 = vmatmul.msk.bf16.gmra.mxu1 %vm1639_vm13, %v5972_v31  ;;  %5767 = vmatmul.msk.bf16.gmra.mxu3 %vm1639_vm13, %v5987_v5  ;;  %v2716_v31 = vld [vmem:[#allocation2 + $0xbc] sm:$0x1]  ;;  %v3083_v52 = vrot.slane %v3081_v48, 4 }
 0x189   : > { %v2365_v8 = vadd.f32 %v2301_v20, %v1949_v19  ;;  %v3073_v19 = vor.u32 %v3072_v47, %v3068_v54  ;;  %v3076_v0 = vshll.u32 %v2716_v31, 16  ;;  %v2718_v34 = vld [vmem:[#allocation2 + $0xc4] sm:$0xf]  ;;  %v2160_v20 = vsel %vm6535_vm1, %v5671_v11, %v2159_v35 }
 0x18a   : > { %v3090_v39 = vshll.u32 %v2718_v34, 16  ;;  %v3094_v32 = vshrl.u32 %v2718_v34, 16  ;;  %v2196_v40 = vunpack.c.l.b16 %v2160_v20  ;;  %v2197_v35 = vunpack.c.l.b16 %v2163_v7  ;;  %v4011_v34 = vld [vmem:[#allocation2 + $0x18] sm:$0xf]  ;;  %v6884_v7 = vld [vmem:[#allocation2 + $0x1c] sm:$0xf] }
 0x18b   : > { %v2585_v30 = vpop.f32.mrf.mxu3  ;;  %v3074_v49 = vrot.slane %v3073_v19, 4  ;;  %v3078_v22 = vrot.slane %v3076_v0, 5  ;;  %v2719_v63 = vld [vmem:[#allocation2 + $0xc8] sm:$0x1] }
 0x18c   : > { %v2650_v61 = vadd.f32 %v2585_v30, %v2364_v4  ;;  %v6059_v4 = vld [vmem:[#allocation2 + $0x10] sm:$0xf]  ;;  %v3069_v30 = vsel %vm6260_vm12, %v3064_v13, %v3068_v54  ;;  %v3096_v18 = vrot.slane %v3094_v32, 4  ;;  %v2213_v0 = vpack.c.b16 %v2197_v35, %v2196_v40  ;;  %v3326_v54 = vld [vmem:[#allocation2 + $0xc] sm:$0xe] }
 0x18d   : > { %5687 = vmatmul.msk.bf16.gmra.mxu2 %vm1639_vm13, %v2212_v59  ;;  %v1953_v50 = vpop.f32.mrf.mxu1  ;;  %v3392_v10 = vrot.slane %v6059_v4, 5  ;;  %v5787_v20 = vrot.slane %v3326_v54, 9  ;;  %v3100_v48 = vshll.u32 %v2719_v63, 16 }
 0x18e   : > { %v3239_v5 = vpop.f32.mrf.mxu0  ;;  %v1954_v31 = vadd.f32 %v1953_v50, %v6684_v45  ;;  %v3134_v50 = vunpack.c.l.b16 %v3069_v30 }
 0x18f   : > { %v6870_v59 = vadd.f32 %v3239_v5, %v2650_v61  ;;  %v3394_v47 = vrot.slane %v3392_v10, 4  ;;  %v3086_v61 = vrot.slane %v3084_v53, 5 }
 0x190   : > { %v2304_v27 = vpop.f32.mrf.mxu2 }
 0x191   : > { %v2366_v62 = vadd.f32 %v2304_v27, %v1952_v33  ;;  %5784 = vmatmul.msk.bf16.gmra.mxu0 %vm1639_vm13, %v3151_v37  ;;  %v6877_v33 = vrot.slane %v3090_v39, 5  ;;  %v6060_v37 = vld [vmem:[#allocation2 + $0x14] sm:$0x1]  ;;  %v3087_v13 = vor.u32 %v3086_v61, %v3083_v52  ;;  %v3393_v39 = vsel %vm6535_vm1, %v5787_v20, %v3392_v10 }
 0x192   : > { %v3395_v27 = vrot.slane %v6060_v37, 5  ;;  %v3504_v35 = vunpack.c.l.b16 %v3393_v39 }
 0x193   : > { %v2587_v12 = vpop.f32.mrf.mxu3  ;;  %v3088_v52 = vrot.slane %v3087_v13, 4 }
 0x194   : > { %v2651_v1 = vadd.f32 %v2587_v12, %v2365_v8  ;;  %v3079_v8 = vsel %vm6260_vm12, %v3074_v49, %v3078_v22  ;;  %v3396_v32 = vsel %vm6535_vm1, %v3394_v47, %v3395_v27  ;;  %v4060_v49 = vshrl.u32 %v4011_v34, 16 }
 0x195   : > { %v1956_v24 = vpop.f32.mrf.mxu1  ;;  %v3135_v4 = vunpack.c.l.b16 %v3079_v8  ;;  %v4063_v22 = vshll.u32 %v4011_v34, 16  ;;  %v3505_v12 = vunpack.c.l.b16 %v3396_v32  ;;  %v6897_v34 = vld [vmem:[#allocation2 + $0x20] sm:$0x1] }
 0x196   : > { %v3241_v5 = vpop.f32.mrf.mxu0  ;;  %v4062_v27 = vrot.slane %v4060_v49, 4  ;;  %v4079_v13 = vshll.u32 %v6897_v34, 16  ;;  %v6061_v32 = vld [vmem:[#allocation2 + $0x20] sm:$0x1] }
 0x197   : > { %v6881_v45 = vadd.f32 %v3241_v5, %v2651_v1  ;;  %v4069_v1 = vshll.u32 %v6884_v7, 16  ;;  %v3102_v5 = vrot.slane %v3100_v48, 5  ;;  %v4065_v8 = vrot.slane %v4063_v22, 5  ;;  %v5989_v48 = vld [vmem:[#allocation2 + $0xc0] sm:$0xff] }
 0x198   : > { %v2306_v11 = vpop.f32.mrf.mxu2  ;;  %5655 = vmatmul.msk.bf16.gmra.mxu1 %vm1639_vm13, %v5973_v43  ;;  %5768 = vmatmul.msk.bf16.gmra.mxu3 %vm1639_vm13, %v5988_v16  ;;  %v3097_v43 = vor.u32 %v3096_v18, %v6877_v33  ;;  %v4073_v16 = vshrl.u32 %v6884_v7, 16  ;;  %v3536_v18 = vpack.c.b16 %v3505_v12, %v3504_v35  ;;  %v3402_v49 = vrot.slane %v6061_v32, 5 }
 0x199   : > { %v2367_v19 = vadd.f32 %v2306_v11, %v1954_v31  ;;  %v1957_v31 = vadd.f32 %v1956_v24, %v6699_v17  ;;  %v3152_v11 = vpack.c.b16 %v3135_v4, %v3134_v50  ;;  %v3093_v17 = vsel %vm6260_vm12, %v3088_v52, %v6877_v33 }
 0x19a   : > { %v3098_v37 = vrot.slane %v3097_v43, 4  ;;  %v4075_v63 = vrot.slane %v4073_v16, 4  ;;  %v4066_v20 = vor.u32 %v4065_v8, %v4062_v27  ;;  %v3136_v33 = vunpack.c.l.b16 %v3093_v17  ;;  %v6062_v16 = vld [vmem:[#allocation2 + $0x1c] sm:$0xf]  ;;  %v6916_v27 = vld [vmem:[#allocation2 + $0x28] sm:$0xf] }
 0x19b   : > { %v2590_v40 = vpop.f32.mrf.mxu3  ;;  %v4081_v52 = vrot.slane %v4079_v13, 5  ;;  %v4665_v13 = vld [vmem:[#allocation2 + $0x18] sm:$0xe] }
 0x19c   : > { %v2652_v30 = vadd.f32 %v2590_v40, %v2366_v62  ;;  %v3103_v50 = vsel %vm6260_vm12, %v3098_v37, %v3102_v5 }
 0x19d   : > { %5688 = vmatmul.msk.bf16.gmra.mxu2 %vm1639_vm13, %v2213_v0  ;;  %v1958_v53 = vpop.f32.mrf.mxu1  ;;  %v4071_v0 = vrot.slane %v4069_v1, 5  ;;  %v3137_v35 = vunpack.c.l.b16 %v3103_v50  ;;  %v5990_v1 = vld [vmem:[#allocation2 + $0x18] sm:$0xff]  ;;  %v4731_v50 = vrot.slane %v6884_v7, 5 }
 0x19e   : > { %v3244_v10 = vpop.f32.mrf.mxu0  ;;  %v1959_v39 = vadd.f32 %v1958_v53, %v6714_v57 }
 0x19f   : > { %v6895_v54 = vadd.f32 %v3244_v10, %v2652_v30  ;;  %v4076_v4 = vor.u32 %v4075_v63, %v4071_v0  ;;  %v3399_v30 = vrot.slane %v6062_v16, 5  ;;  %v4014_v10 = vld [vmem:[#allocation2 + $0x24] sm:$0xf]  ;;  %v3153_v8 = vpack.c.b16 %v3137_v35, %v3136_v33 }
 0x1a0   : > { %v2309_v61 = vpop.f32.mrf.mxu2 }
 0x1a1   : > { %v2368_v47 = vadd.f32 %v2309_v61, %v1957_v31  ;;  %5785 = vmatmul.msk.bf16.gmra.mxu0 %vm1639_vm13, %v3152_v11  ;;  %v4067_v31 = vrot.slane %v4066_v20, 4  ;;  %v4077_v11 = vrot.slane %v4076_v4, 4  ;;  %v3327_v61 = vld [vmem:[#allocation2 + $0x18] sm:$0xe]  ;;  %v3401_v53 = vrot.slane %v3399_v30, 4 }
 0x1a2   : > { %v5788_v57 = vrot.slane %v3327_v61, 9 }
 0x1a3   : > { %v2592_v24 = vpop.f32.mrf.mxu3  ;;  %v3403_v5 = vsel %vm6535_vm1, %v3401_v53, %v3402_v49  ;;  %v4072_v17 = vsel %vm6260_vm12, %v4067_v31, %v4071_v0 }
 0x1a4   : > { %v2653_v43 = vadd.f32 %v2592_v24, %v2367_v19  ;;  %v3400_v37 = vsel %vm6535_vm1, %v5788_v57, %v3399_v30  ;;  %v4082_v24 = vsel %vm6260_vm12, %v4077_v11, %v4081_v52  ;;  %v3507_v49 = vunpack.c.l.b16 %v3403_v5  ;;  %v6932_v57 = vld [vmem:[#allocation2 + $0x2c] sm:$0x1] }
 0x1a5   : > { %v1961_v62 = vpop.f32.mrf.mxu1  ;;  %v3506_v32 = vunpack.c.l.b16 %v3400_v37  ;;  %v4445_v35 = vunpack.c.l.b16 %v4072_v17  ;;  %v4446_v7 = vunpack.c.l.b16 %v4082_v24 }
 0x1a6   : > { %v3246_v40 = vpop.f32.mrf.mxu0  ;;  %v1962_v4 = vadd.f32 %v1961_v62, %v6625_v46  ;;  %v4734_v62 = vrot.slane %v6897_v34, 5 }
 0x1a7   : > { %v6908_v19 = vadd.f32 %v3246_v40, %v2653_v43  ;;  %v4084_v43 = vshrl.u32 %v4014_v10, 16  ;;  %v4097_v40 = vshrl.u32 %v6916_v27, 16  ;;  %v3537_v31 = vpack.c.b16 %v3507_v49, %v3506_v32 }
 0x1a8   : > { %v2311_v22 = vpop.f32.mrf.mxu2  ;;  %5804 = vmatmul.msk.bf16.vlgmr.msra.gmra.mxu1 %vm1639_vm13, %v3536_v18  ;;  %5769 = vmatmul.msk.bf16.gmra.mxu3 %vm1639_vm13, %v5989_v48  ;;  %v4087_v48 = vshll.u32 %v4014_v10, 16  ;;  %v4477_v5 = vpack.c.b16 %v4446_v7, %v4445_v35 }
 0x1a9   : > { %v2369_v12 = vadd.f32 %v2311_v22, %v1959_v39  ;;  %v4093_v22 = vshll.u32 %v6916_v27, 16  ;;  %v4086_v30 = vrot.slane %v4084_v43, 4  ;;  %v4099_v52 = vrot.slane %v4097_v40, 4 }
 0x1aa   : > { %v4089_v46 = vrot.slane %v4087_v48, 5 }
 0x1ab   : > { %v2595_v63 = vpop.f32.mrf.mxu3  ;;  %v6930_v11 = vrot.slane %v4093_v22, 5 }
 0x1ac   : > { %v2654_v20 = vadd.f32 %v2595_v63, %v2368_v47  ;;  %v4733_v47 = vrot.slane %v4731_v50, 4  ;;  %v4090_v17 = vor.u32 %v4089_v46, %v4086_v30  ;;  %v4666_v30 = vld [vmem:[#allocation2 + $0x24] sm:$0xe]  ;;  %v4738_v46 = vrot.slane %v6916_v27, 5 }
 0x1ad   : > { %5885 = vmatmul.msk.bf16.vlgmr.msra.gmra.mxu2 %vm1639_vm13, %v5990_v1  ;;  %v1963_v18 = vpop.f32.mrf.mxu1  ;;  %v5918_v1 = vrot.slane %v4665_v13, 9  ;;  %v4100_v24 = vor.u32 %v4099_v52, %v6930_v11 }
 0x1ae   : > { %v3249_v33 = vpop.f32.mrf.mxu0  ;;  %v1964_v63 = vadd.f32 %v1963_v18, %v6638_v14  ;;  %v3328_v14 = vld [vmem:[#allocation2 + $0x24] sm:$0xe]  ;;  %v4017_v18 = vld [vmem:[#allocation2 + $0x30] sm:$0xf]  ;;  %v4091_v40 = vrot.slane %v4090_v17, 4 }
 0x1af   : > { %v6926_v16 = vadd.f32 %v3249_v33, %v2654_v20  ;;  %v4732_v10 = vsel %vm6535_vm1, %v5918_v1, %v4731_v50  ;;  %v4103_v20 = vshll.u32 %v6932_v57, 16  ;;  %v5991_v50 = vld [vmem:[#allocation2 + $0x24] sm:$0xff]  ;;  %v5789_v33 = vrot.slane %v3328_v14, 9  ;;  %v6945_v1 = vld [vmem:[#allocation2 + $0x34] sm:$0xf] }
 0x1b0   : > { %v2314_v39 = vpop.f32.mrf.mxu2  ;;  %v4843_v32 = vunpack.c.l.b16 %v4732_v10  ;;  %v4101_v7 = vrot.slane %v4100_v24, 4  ;;  %v4096_v27 = vsel %vm6260_vm12, %v4091_v40, %v6930_v11  ;;  %v6964_v40 = vld [vmem:[#allocation2 + $0x38] sm:$0x1] }
 0x1b1   : > { %v2370_v0 = vadd.f32 %v2314_v39, %v1962_v4  ;;  %5786 = vmatmul.msk.bf16.gmra.mxu0 %vm1639_vm13, %v3153_v8  ;;  %v4735_v8 = vsel %vm6535_vm1, %v4733_v47, %v4734_v62  ;;  %v6063_v4 = vld [vmem:[#allocation2 + $0x2c] sm:$0x1]  ;;  %v4105_v47 = vrot.slane %v4103_v20, 5  ;;  %v5919_v20 = vrot.slane %v4666_v30, 9 }
 0x1b2   : > { %v3409_v13 = vrot.slane %v6063_v4, 5  ;;  %v4844_v22 = vunpack.c.l.b16 %v4735_v8 }
 0x1b3   : > { %v2597_v53 = vpop.f32.mrf.mxu3  ;;  %v4106_v24 = vsel %vm6260_vm12, %v4101_v7, %v4105_v47 }
 0x1b4   : > { %v2655_v37 = vadd.f32 %v2597_v53, %v2369_v12  ;;  %v6064_v12 = vld [vmem:[#allocation2 + $0x28] sm:$0xf]  ;;  %v4108_v53 = vshrl.u32 %v4017_v18, 16  ;;  %v4875_v17 = vpack.c.b16 %v4844_v22, %v4843_v32  ;;  %v4447_v22 = vunpack.c.l.b16 %v4096_v27 }
 0x1b5   : > { %v1966_v61 = vpop.f32.mrf.mxu1  ;;  %v3406_v39 = vrot.slane %v6064_v12, 5  ;;  %v4740_v12 = vrot.slane %v4738_v46, 4  ;;  %v4448_v11 = vunpack.c.l.b16 %v4106_v24  ;;  %v5992_v24 = vld [vmem:[#allocation2 + $0x30] sm:$0xff] }
 0x1b6   : > { %v3251_v43 = vpop.f32.mrf.mxu0  ;;  %v4110_v32 = vrot.slane %v4108_v53, 4 }
 0x1b7   : > { %v6942_v49 = vadd.f32 %v3251_v43, %v2655_v37  ;;  %v3408_v35 = vrot.slane %v3406_v39, 4  ;;  %v4111_v37 = vshll.u32 %v4017_v18, 16 }
 0x1b8   : > { %v2316_v34 = vpop.f32.mrf.mxu2  ;;  %5805 = vmatmul.msk.bf16.gmra.mxu1 %vm1639_vm13, %v3537_v31  ;;  %5902 = vmatmul.msk.bf16.vlgmr.msra.gmra.mxu3 %vm1639_vm13, %v4477_v5  ;;  %v3407_v31 = vsel %vm6535_vm1, %v5789_v33, %v3406_v39  ;;  %v4117_v5 = vshll.u32 %v6945_v1, 16  ;;  %v4741_v39 = vrot.slane %v6932_v57, 5 }
 0x1b9   : > { %v2371_v48 = vadd.f32 %v2316_v34, %v1964_v63  ;;  %v3410_v52 = vsel %vm6535_vm1, %v3408_v35, %v3409_v13  ;;  %v4121_v63 = vshrl.u32 %v6945_v1, 16  ;;  %v1967_v34 = vadd.f32 %v1966_v61, %v6654_v44 }
 0x1ba   : > { %v3508_v13 = vunpack.c.l.b16 %v3407_v31  ;;  %v3509_v43 = vunpack.c.l.b16 %v3410_v52  ;;  %v4119_v18 = vrot.slane %v4117_v5, 5  ;;  %v4739_v35 = vsel %vm6535_vm1, %v5919_v20, %v4738_v46  ;;  %v6065_v5 = vld [vmem:[#allocation2 + $0x38] sm:$0x1]  ;;  %v6066_v20 = vld [vmem:[#allocation2 + $0x34] sm:$0xf] }
 0x1bb   : > { %v2600_v10 = vpop.f32.mrf.mxu3  ;;  %v4123_v44 = vrot.slane %v4121_v63, 4  ;;  %v4742_v57 = vsel %vm6535_vm1, %v4740_v12, %v4741_v39  ;;  %v4127_v52 = vshll.u32 %v6964_v40, 16  ;;  %v3416_v63 = vrot.slane %v6065_v5, 5  ;;  %v3329_v12 = vld [vmem:[#allocation2 + $0x30] sm:$0xe] }
 0x1bc   : > { %v2656_v8 = vadd.f32 %v2600_v10, %v2370_v0  ;;  %v4113_v0 = vrot.slane %v4111_v37, 5  ;;  %v3538_v33 = vpack.c.b16 %v3509_v43, %v3508_v13  ;;  %v4478_v10 = vpack.c.b16 %v4448_v11, %v4447_v22  ;;  %v4020_v39 = vld [vmem:[#allocation2 + $0x3c] sm:$0xf]  ;;  %v6982_v22 = vld [vmem:[#allocation2 + $0x40] sm:$0xf] }
 0x1bd   : > { %5886 = vmatmul.msk.bf16.gmra.mxu2 %vm1639_vm13, %v5991_v50  ;;  %v1968_v62 = vpop.f32.mrf.mxu1  ;;  %v4124_v31 = vor.u32 %v4123_v44, %v4119_v18  ;;  %v4845_v46 = vunpack.c.l.b16 %v4739_v35 }
 0x1be   : > { %v3254_v50 = vpop.f32.mrf.mxu0  ;;  %v4114_v30 = vor.u32 %v4113_v0, %v4110_v32  ;;  %v1969_v37 = vadd.f32 %v1968_v62, %v6666_v15  ;;  %v5790_v15 = vrot.slane %v3329_v12, 9 }
 0x1bf   : > { %v6962_v61 = vadd.f32 %v3254_v50, %v2656_v8  ;;  %v4125_v43 = vrot.slane %v4124_v31, 4  ;;  %v4129_v50 = vrot.slane %v4127_v52, 5  ;;  %v4667_v52 = vld [vmem:[#allocation2 + $0x30] sm:$0xe] }
 0x1c0   : > { %v2319_v4 = vpop.f32.mrf.mxu2  ;;  %v4115_v13 = vrot.slane %v4114_v30, 4 }
 0x1c1   : > { %v2372_v14 = vadd.f32 %v2319_v4, %v1967_v34  ;;  %5935 = vmatmul.msk.bf16.vlgmr.msra.gmra.mxu0 %vm1639_vm13, %v4875_v17  ;;  %v4846_v34 = vunpack.c.l.b16 %v4742_v57  ;;  %v3413_v4 = vrot.slane %v6066_v20, 5  ;;  %v4745_v57 = vrot.slane %v6945_v1, 5 }
 0x1c2   : > { %v4120_v35 = vsel %vm6260_vm12, %v4115_v13, %v4119_v18 }
 0x1c3   : > { %v2602_v47 = vpop.f32.mrf.mxu3  ;;  %v3415_v62 = vrot.slane %v3413_v4, 4  ;;  %v3414_v0 = vsel %vm6535_vm1, %v5790_v15, %v3413_v4  ;;  %v4876_v11 = vpack.c.b16 %v4846_v34, %v4845_v46  ;;  %v4449_v34 = vunpack.c.l.b16 %v4120_v35  ;;  %v6998_v15 = vld [vmem:[#allocation2 + $0x44] sm:$0x1] }
 0x1c4   : > { %v2657_v53 = vadd.f32 %v2602_v47, %v2371_v48  ;;  %v4130_v47 = vsel %vm6260_vm12, %v4125_v43, %v4129_v50  ;;  %v3510_v5 = vunpack.c.l.b16 %v3414_v0 }
 0x1c5   : > { %v1971_v7 = vpop.f32.mrf.mxu1  ;;  %v3417_v44 = vsel %vm6535_vm1, %v3415_v62, %v3416_v63  ;;  %v4450_v1 = vunpack.c.l.b16 %v4130_v47 }
 0x1c6   : > { %v3256_v8 = vpop.f32.mrf.mxu0  ;;  %v1972_v31 = vadd.f32 %v1971_v7, %v6686_v51  ;;  %v3511_v63 = vunpack.c.l.b16 %v3417_v44  ;;  %v4748_v7 = vrot.slane %v6964_v40, 5 }
 0x1c7   : > { %v6974_v48 = vadd.f32 %v3256_v8, %v2657_v53  ;;  %v4132_v53 = vshrl.u32 %v4020_v39, 16  ;;  %v4145_v8 = vshrl.u32 %v6982_v22, 16  ;;  %v4479_v44 = vpack.c.b16 %v4450_v1, %v4449_v34 }
 0x1c8   : > { %v2321_v17 = vpop.f32.mrf.mxu2  ;;  %5806 = vmatmul.msk.bf16.gmra.mxu1 %vm1639_vm13, %v3538_v33  ;;  %5903 = vmatmul.msk.bf16.gmra.mxu3 %vm1639_vm13, %v4478_v10  ;;  %v4135_v10 = vshll.u32 %v4020_v39, 16  ;;  %v3539_v13 = vpack.c.b16 %v3511_v63, %v3510_v5 }
 0x1c9   : > { %v2373_v27 = vadd.f32 %v2321_v17, %v1969_v37  ;;  %v4141_v17 = vshll.u32 %v6982_v22, 16  ;;  %v4134_v4 = vrot.slane %v4132_v53, 4  ;;  %v4147_v50 = vrot.slane %v4145_v8, 4 }
 0x1ca   : > { %v4137_v51 = vrot.slane %v4135_v10, 5 }
 0x1cb   : > { %v2605_v33 = vpop.f32.mrf.mxu3  ;;  %v6996_v43 = vrot.slane %v4141_v17, 5 }
 0x1cc   : > { %v2658_v30 = vadd.f32 %v2605_v33, %v2372_v14  ;;  %v4747_v14 = vrot.slane %v4745_v57, 4  ;;  %v4138_v35 = vor.u32 %v4137_v51, %v4134_v4  ;;  %v4668_v4 = vld [vmem:[#allocation2 + $0x3c] sm:$0xe]  ;;  %v4752_v51 = vrot.slane %v6982_v22, 5 }
 0x1cd   : > { %5887 = vmatmul.msk.bf16.gmra.mxu2 %vm1639_vm13, %v5992_v24  ;;  %v1973_v32 = vpop.f32.mrf.mxu1  ;;  %v5920_v24 = vrot.slane %v4667_v52, 9  ;;  %v4148_v47 = vor.u32 %v4147_v50, %v6996_v43 }
 0x1ce   : > { %v3259_v46 = vpop.f32.mrf.mxu0  ;;  %v1974_v33 = vadd.f32 %v1973_v32, %v6701_v23  ;;  %v3330_v23 = vld [vmem:[#allocation2 + $0x3c] sm:$0xe]  ;;  %v4023_v32 = vld [vmem:[#allocation2 + $0x48] sm:$0xf]  ;;  %v4139_v8 = vrot.slane %v4138_v35, 4 }
 0x1cf   : > { %v6992_v20 = vadd.f32 %v3259_v46, %v2658_v30  ;;  %v4746_v39 = vsel %vm6535_vm1, %v5920_v24, %v4745_v57  ;;  %v4151_v30 = vshll.u32 %v6998_v15, 16  ;;  %v5993_v57 = vld [vmem:[#allocation2 + $0x3c] sm:$0xff]  ;;  %v5791_v46 = vrot.slane %v3330_v23, 9  ;;  %v7011_v24 = vld [vmem:[#allocation2 + $0x4c] sm:$0xf] }
 0x1d0   : > { %v2324_v37 = vpop.f32.mrf.mxu2  ;;  %v4847_v5 = vunpack.c.l.b16 %v4746_v39  ;;  %v4149_v1 = vrot.slane %v4148_v47, 4  ;;  %v4144_v22 = vsel %vm6260_vm12, %v4139_v8, %v6996_v43  ;;  %v7030_v8 = vld [vmem:[#allocation2 + $0x50] sm:$0x1] }
 0x1d1   : > { %v2374_v18 = vadd.f32 %v2324_v37, %v1972_v31  ;;  %5936 = vmatmul.msk.bf16.gmra.mxu0 %vm1639_vm13, %v4876_v11  ;;  %v4749_v11 = vsel %vm6535_vm1, %v4747_v14, %v4748_v7  ;;  %v6067_v31 = vld [vmem:[#allocation2 + $0x44] sm:$0x1]  ;;  %v4153_v14 = vrot.slane %v4151_v30, 5  ;;  %v5921_v30 = vrot.slane %v4668_v4, 9 }
 0x1d2   : > { %v3423_v52 = vrot.slane %v6067_v31, 5  ;;  %v4848_v17 = vunpack.c.l.b16 %v4749_v11 }
 0x1d3   : > { %v2607_v62 = vpop.f32.mrf.mxu3  ;;  %v4154_v47 = vsel %vm6260_vm12, %v4149_v1, %v4153_v14 }
 0x1d4   : > { %v2659_v0 = vadd.f32 %v2607_v62, %v2373_v27  ;;  %v6068_v27 = vld [vmem:[#allocation2 + $0x40] sm:$0xf]  ;;  %v4156_v62 = vshrl.u32 %v4023_v32, 16  ;;  %v4877_v35 = vpack.c.b16 %v4848_v17, %v4847_v5  ;;  %v4451_v17 = vunpack.c.l.b16 %v4144_v22 }
 0x1d5   : > { %v1976_v12 = vpop.f32.mrf.mxu1  ;;  %v3420_v37 = vrot.slane %v6068_v27, 5  ;;  %v4754_v27 = vrot.slane %v4752_v51, 4  ;;  %v4452_v43 = vunpack.c.l.b16 %v4154_v47  ;;  %v5994_v47 = vld [vmem:[#allocation2 + $0x48] sm:$0xff] }
 0x1d6   : > { %v3261_v53 = vpop.f32.mrf.mxu0  ;;  %v4158_v5 = vrot.slane %v4156_v62, 4 }
 0x1d7   : > { %v7008_v63 = vadd.f32 %v3261_v53, %v2659_v0  ;;  %v3422_v34 = vrot.slane %v3420_v37, 4  ;;  %v4159_v0 = vshll.u32 %v4023_v32, 16 }
 0x1d8   : > { %v2326_v40 = vpop.f32.mrf.mxu2  ;;  %5807 = vmatmul.msk.bf16.gmra.mxu1 %vm1639_vm13, %v3539_v13  ;;  %5904 = vmatmul.msk.bf16.gmra.mxu3 %vm1639_vm13, %v4479_v44  ;;  %v3421_v13 = vsel %vm6535_vm1, %v5791_v46, %v3420_v37  ;;  %v4165_v44 = vshll.u32 %v7011_v24, 16  ;;  %v4755_v37 = vrot.slane %v6998_v15, 5 }
 0x1d9   : > { %v2375_v10 = vadd.f32 %v2326_v40, %v1974_v33  ;;  %v3424_v50 = vsel %vm6535_vm1, %v3422_v34, %v3423_v52  ;;  %v4169_v33 = vshrl.u32 %v7011_v24, 16  ;;  %v1977_v40 = vadd.f32 %v1976_v12, %v6716_v2 }
 0x1da   : > { %v3512_v52 = vunpack.c.l.b16 %v3421_v13  ;;  %v3513_v53 = vunpack.c.l.b16 %v3424_v50  ;;  %v4167_v32 = vrot.slane %v4165_v44, 5  ;;  %v4753_v34 = vsel %vm6535_vm1, %v5921_v30, %v4752_v51  ;;  %v6069_v44 = vld [vmem:[#allocation2 + $0x50] sm:$0x1]  ;;  %v6070_v30 = vld [vmem:[#allocation2 + $0x4c] sm:$0xf] }
 0x1db   : > { %v2610_v39 = vpop.f32.mrf.mxu3  ;;  %v4171_v2 = vrot.slane %v4169_v33, 4  ;;  %v4756_v15 = vsel %vm6535_vm1, %v4754_v27, %v4755_v37  ;;  %v4175_v50 = vshll.u32 %v7030_v8, 16  ;;  %v3430_v33 = vrot.slane %v6069_v44, 5  ;;  %v3331_v27 = vld [vmem:[#allocation2 + $0x48] sm:$0xe] }
 0x1dc   : > { %v2660_v11 = vadd.f32 %v2610_v39, %v2374_v18  ;;  %v4161_v18 = vrot.slane %v4159_v0, 5  ;;  %v3540_v46 = vpack.c.b16 %v3513_v53, %v3512_v52  ;;  %v4480_v39 = vpack.c.b16 %v4452_v43, %v4451_v17  ;;  %v4026_v37 = vld [vmem:[#allocation2 + $0x54] sm:$0xf]  ;;  %v7048_v17 = vld [vmem:[#allocation2 + $0x58] sm:$0xf] }
 0x1dd   : > { %5888 = vmatmul.msk.bf16.gmra.mxu2 %vm1639_vm13, %v5993_v57  ;;  %v1978_v7 = vpop.f32.mrf.mxu1  ;;  %v4172_v13 = vor.u32 %v4171_v2, %v4167_v32  ;;  %v4849_v51 = vunpack.c.l.b16 %v4753_v34 }
 0x1de   : > { %v3264_v57 = vpop.f32.mrf.mxu0  ;;  %v4162_v4 = vor.u32 %v4161_v18, %v4158_v5  ;;  %v1979_v0 = vadd.f32 %v1978_v7, %v6729_v41  ;;  %v5792_v41 = vrot.slane %v3331_v27, 9 }
 0x1df   : > { %v7028_v12 = vadd.f32 %v3264_v57, %v2660_v11  ;;  %v4173_v53 = vrot.slane %v4172_v13, 4  ;;  %v4177_v57 = vrot.slane %v4175_v50, 5  ;;  %v4669_v50 = vld [vmem:[#allocation2 + $0x48] sm:$0xe] }
 0x1e0   : > { %v2329_v31 = vpop.f32.mrf.mxu2  ;;  %v4163_v52 = vrot.slane %v4162_v4, 4 }
 0x1e1   : > { %v2376_v23 = vadd.f32 %v2329_v31, %v1977_v40  ;;  %5937 = vmatmul.msk.bf16.gmra.mxu0 %vm1639_vm13, %v4877_v35  ;;  %v4850_v40 = vunpack.c.l.b16 %v4756_v15  ;;  %v3427_v31 = vrot.slane %v6070_v30, 5  ;;  %v4759_v15 = vrot.slane %v7011_v24, 5 }
 0x1e2   : > { %v4168_v34 = vsel %vm6260_vm12, %v4163_v52, %v4167_v32 }
 0x1e3   : > { %v2612_v14 = vpop.f32.mrf.mxu3  ;;  %v3429_v7 = vrot.slane %v3427_v31, 4  ;;  %v3428_v18 = vsel %vm6535_vm1, %v5792_v41, %v3427_v31  ;;  %v4878_v43 = vpack.c.b16 %v4850_v40, %v4849_v51  ;;  %v4453_v40 = vunpack.c.l.b16 %v4168_v34  ;;  %v7064_v41 = vld [vmem:[#allocation2 + $0x5c] sm:$0x1] }
 0x1e4   : > { %v2661_v62 = vadd.f32 %v2612_v14, %v2375_v10  ;;  %v4178_v14 = vsel %vm6260_vm12, %v4173_v53, %v4177_v57  ;;  %v3514_v44 = vunpack.c.l.b16 %v3428_v18 }
 0x1e5   : > { %v1981_v1 = vpop.f32.mrf.mxu1  ;;  %v3431_v2 = vsel %vm6535_vm1, %v3429_v7, %v3430_v33  ;;  %v4454_v24 = vunpack.c.l.b16 %v4178_v14 }
 0x1e6   : > { %v3266_v11 = vpop.f32.mrf.mxu0  ;;  %v1982_v13 = vadd.f32 %v1981_v1, %v6640_v26  ;;  %v3515_v33 = vunpack.c.l.b16 %v3431_v2  ;;  %v4762_v1 = vrot.slane %v7030_v8, 5 }
 0x1e7   : > { %v7040_v10 = vadd.f32 %v3266_v11, %v2661_v62  ;;  %v4180_v62 = vshrl.u32 %v4026_v37, 16  ;;  %v4193_v11 = vshrl.u32 %v7048_v17, 16  ;;  %v4481_v2 = vpack.c.b16 %v4454_v24, %v4453_v40 }
 0x1e8   : > { %v2331_v35 = vpop.f32.mrf.mxu2  ;;  %5808 = vmatmul.msk.bf16.gmra.mxu1 %vm1639_vm13, %v3540_v46  ;;  %5905 = vmatmul.msk.bf16.gmra.mxu3 %vm1639_vm13, %v4480_v39  ;;  %v4183_v39 = vshll.u32 %v4026_v37, 16  ;;  %v3541_v52 = vpack.c.b16 %v3515_v33, %v3514_v44 }
 0x1e9   : > { %v2377_v22 = vadd.f32 %v2331_v35, %v1979_v0  ;;  %v4189_v35 = vshll.u32 %v7048_v17, 16  ;;  %v4182_v31 = vrot.slane %v4180_v62, 4  ;;  %v4195_v57 = vrot.slane %v4193_v11, 4 }
 0x1ea   : > { %v4185_v26 = vrot.slane %v4183_v39, 5 }
 0x1eb   : > { %v2615_v46 = vpop.f32.mrf.mxu3  ;;  %v7062_v53 = vrot.slane %v4189_v35, 5 }
 0x1ec   : > { %v2662_v4 = vadd.f32 %v2615_v46, %v2376_v23  ;;  %v4761_v23 = vrot.slane %v4759_v15, 4  ;;  %v4186_v34 = vor.u32 %v4185_v26, %v4182_v31  ;;  %v4670_v31 = vld [vmem:[#allocation2 + $0x54] sm:$0xe]  ;;  %v4766_v26 = vrot.slane %v7048_v17, 5 }
 0x1ed   : > { %5889 = vmatmul.msk.bf16.gmra.mxu2 %vm1639_vm13, %v5994_v47  ;;  %v1983_v5 = vpop.f32.mrf.mxu1  ;;  %v5922_v47 = vrot.slane %v4669_v50, 9  ;;  %v4196_v14 = vor.u32 %v4195_v57, %v7062_v53 }
 0x1ee   : > { %v3269_v51 = vpop.f32.mrf.mxu0  ;;  %v1984_v46 = vadd.f32 %v1983_v5, %v6659_v56  ;;  %v3332_v56 = vld [vmem:[#allocation2 + $0x54] sm:$0xe]  ;;  %v4029_v5 = vld [vmem:[#allocation2 + $0x60] sm:$0xf]  ;;  %v4187_v11 = vrot.slane %v4186_v34, 4 }
 0x1ef   : > { %v7058_v30 = vadd.f32 %v3269_v51, %v2662_v4  ;;  %v4760_v37 = vsel %vm6535_vm1, %v5922_v47, %v4759_v15  ;;  %v4199_v4 = vshll.u32 %v7064_v41, 16  ;;  %v5995_v15 = vld [vmem:[#allocation2 + $0x54] sm:$0xff]  ;;  %v5793_v51 = vrot.slane %v3332_v56, 9  ;;  %v7077_v47 = vld [vmem:[#allocation2 + $0x64] sm:$0xf] }
 0x1f0   : > { %v2334_v0 = vpop.f32.mrf.mxu2  ;;  %v4851_v44 = vunpack.c.l.b16 %v4760_v37  ;;  %v4197_v24 = vrot.slane %v4196_v14, 4  ;;  %v4192_v17 = vsel %vm6260_vm12, %v4187_v11, %v7062_v53  ;;  %v7096_v11 = vld [vmem:[#allocation2 + $0x68] sm:$0x1] }
 0x1f1   : > { %v2378_v32 = vadd.f32 %v2334_v0, %v1982_v13  ;;  %5938 = vmatmul.msk.bf16.gmra.mxu0 %vm1639_vm13, %v4878_v43  ;;  %v4763_v43 = vsel %vm6535_vm1, %v4761_v23, %v4762_v1  ;;  %v6071_v13 = vld [vmem:[#allocation2 + $0x5c] sm:$0x1]  ;;  %v4201_v23 = vrot.slane %v4199_v4, 5  ;;  %v5923_v4 = vrot.slane %v4670_v31, 9 }
 0x1f2   : > { %v3437_v50 = vrot.slane %v6071_v13, 5  ;;  %v4852_v35 = vunpack.c.l.b16 %v4763_v43 }
 0x1f3   : > { %v2617_v7 = vpop.f32.mrf.mxu3  ;;  %v4202_v14 = vsel %vm6260_vm12, %v4197_v24, %v4201_v23 }
 0x1f4   : > { %v2663_v18 = vadd.f32 %v2617_v7, %v2377_v22  ;;  %v6072_v22 = vld [vmem:[#allocation2 + $0x58] sm:$0xf]  ;;  %v4204_v7 = vshrl.u32 %v4029_v5, 16  ;;  %v4879_v34 = vpack.c.b16 %v4852_v35, %v4851_v44  ;;  %v4455_v35 = vunpack.c.l.b16 %v4192_v17 }
 0x1f5   : > { %v1986_v27 = vpop.f32.mrf.mxu1  ;;  %v3434_v0 = vrot.slane %v6072_v22, 5  ;;  %v4768_v22 = vrot.slane %v4766_v26, 4  ;;  %v4456_v53 = vunpack.c.l.b16 %v4202_v14  ;;  %v5996_v14 = vld [vmem:[#allocation2 + $0x60] sm:$0xff] }
 0x1f6   : > { %v3271_v62 = vpop.f32.mrf.mxu0  ;;  %v4206_v44 = vrot.slane %v4204_v7, 4 }
 0x1f7   : > { %v7074_v33 = vadd.f32 %v3271_v62, %v2663_v18  ;;  %v3436_v40 = vrot.slane %v3434_v0, 4  ;;  %v4207_v18 = vshll.u32 %v4029_v5, 16 }
 0x1f8   : > { %v2336_v8 = vpop.f32.mrf.mxu2  ;;  %5809 = vmatmul.msk.bf16.gmra.mxu1 %vm1639_vm13, %v3541_v52  ;;  %5906 = vmatmul.msk.bf16.gmra.mxu3 %vm1639_vm13, %v4481_v2  ;;  %v3435_v52 = vsel %vm6535_vm1, %v5793_v51, %v3434_v0  ;;  %v4213_v2 = vshll.u32 %v7077_v47, 16  ;;  %v4769_v0 = vrot.slane %v7064_v41, 5 }
 0x1f9   : > { %v2379_v39 = vadd.f32 %v2336_v8, %v1984_v46  ;;  %v3438_v57 = vsel %vm6535_vm1, %v3436_v40, %v3437_v50  ;;  %v4217_v46 = vshrl.u32 %v7077_v47, 16  ;;  %v1987_v8 = vadd.f32 %v1986_v27, %v6673_v29 }
 0x1fa   : > { %v3516_v50 = vunpack.c.l.b16 %v3435_v52  ;;  %v3517_v62 = vunpack.c.l.b16 %v3438_v57  ;;  %v4215_v5 = vrot.slane %v4213_v2, 5  ;;  %v4767_v40 = vsel %vm6535_vm1, %v5923_v4, %v4766_v26  ;;  %v6073_v2 = vld [vmem:[#allocation2 + $0x68] sm:$0x1]  ;;  %v6074_v4 = vld [vmem:[#allocation2 + $0x64] sm:$0xf] }
 0x1fb   : > { %v2620_v37 = vpop.f32.mrf.mxu3  ;;  %v4219_v29 = vrot.slane %v4217_v46, 4  ;;  %v4770_v41 = vsel %vm6535_vm1, %v4768_v22, %v4769_v0  ;;  %v4223_v57 = vshll.u32 %v7096_v11, 16  ;;  %v3444_v46 = vrot.slane %v6073_v2, 5  ;;  %v3333_v22 = vld [vmem:[#allocation2 + $0x60] sm:$0xe] }
 0x1fc   : > { %v2664_v43 = vadd.f32 %v2620_v37, %v2378_v32  ;;  %v4209_v32 = vrot.slane %v4207_v18, 5  ;;  %v3542_v51 = vpack.c.b16 %v3517_v62, %v3516_v50  ;;  %v4482_v37 = vpack.c.b16 %v4456_v53, %v4455_v35  ;;  %v4032_v0 = vld [vmem:[#allocation2 + $0x6c] sm:$0xf]  ;;  %v7114_v35 = vld [vmem:[#allocation2 + $0x70] sm:$0xf] }
 0x1fd   : > { %5890 = vmatmul.msk.bf16.gmra.mxu2 %vm1639_vm13, %v5995_v15  ;;  %v1988_v1 = vpop.f32.mrf.mxu1  ;;  %v4220_v52 = vor.u32 %v4219_v29, %v4215_v5  ;;  %v4853_v26 = vunpack.c.l.b16 %v4767_v40 }
 0x1fe   : > { %v3274_v15 = vpop.f32.mrf.mxu0  ;;  %v4210_v31 = vor.u32 %v4209_v32, %v4206_v44  ;;  %v1989_v18 = vadd.f32 %v1988_v1, %v6690_v60  ;;  %v5794_v60 = vrot.slane %v3333_v22, 9 }
 0x1ff   : > { %v7094_v27 = vadd.f32 %v3274_v15, %v2664_v43  ;;  %v4221_v62 = vrot.slane %v4220_v52, 4  ;;  %v4225_v15 = vrot.slane %v4223_v57, 5  ;;  %v4671_v57 = vld [vmem:[#allocation2 + $0x60] sm:$0xe] }
 0x200   : > { %v2339_v13 = vpop.f32.mrf.mxu2  ;;  %v4211_v50 = vrot.slane %v4210_v31, 4 }
 0x201   : > { %v2380_v56 = vadd.f32 %v2339_v13, %v1987_v8  ;;  %5939 = vmatmul.msk.bf16.gmra.mxu0 %vm1639_vm13, %v4879_v34  ;;  %v4854_v8 = vunpack.c.l.b16 %v4770_v41  ;;  %v3441_v13 = vrot.slane %v6074_v4, 5  ;;  %v4773_v41 = vrot.slane %v7077_v47, 5 }
 0x202   : > { %v4216_v40 = vsel %vm6260_vm12, %v4211_v50, %v4215_v5  ;;  %v5924_v4 = vrot.slane %v4671_v57, 9 }
 0x203   : > { %v2622_v23 = vpop.f32.mrf.mxu3  ;;  %v3443_v1 = vrot.slane %v3441_v13, 4  ;;  %v3442_v32 = vsel %vm6535_vm1, %v5794_v60, %v3441_v13  ;;  %v4880_v53 = vpack.c.b16 %v4854_v8, %v4853_v26  ;;  %v4457_v8 = vunpack.c.l.b16 %v4216_v40  ;;  %v7130_v60 = vld [vmem:[#allocation2 + $0x74] sm:$0x1] }
 0x204   : > { %v2665_v7 = vadd.f32 %v2622_v23, %v2379_v39  ;;  %v4226_v23 = vsel %vm6260_vm12, %v4221_v62, %v4225_v15  ;;  %v3518_v2 = vunpack.c.l.b16 %v3442_v32  ;;  %v4775_v47 = vrot.slane %v4773_v41, 4 }
 0x205   : > { %v1991_v24 = vpop.f32.mrf.mxu1  ;;  %v3445_v29 = vsel %vm6535_vm1, %v3443_v1, %v3444_v46  ;;  %v4774_v32 = vsel %vm6535_vm1, %v5924_v4, %v4773_v41 }
 0x206   : > { %v3276_v43 = vpop.f32.mrf.mxu0  ;;  %v1992_v52 = vadd.f32 %v1991_v24, %v6708_v38  ;;  %v3519_v46 = vunpack.c.l.b16 %v3445_v29  ;;  %v4776_v38 = vrot.slane %v7096_v11, 5  ;;  %v4855_v41 = vunpack.c.l.b16 %v4774_v32 }
 0x207   : > { %v7106_v39 = vadd.f32 %v3276_v43, %v2665_v7  ;;  %v4228_v7 = vshrl.u32 %v4032_v0, 16  ;;  %v4241_v43 = vshrl.u32 %v7114_v35, 16 }
 0x208   : > { %v2341_v34 = vpop.f32.mrf.mxu2  ;;  %5810 = vmatmul.msk.bf16.gmra.mxu1 %vm1639_vm13, %v3542_v51  ;;  %5907 = vmatmul.msk.bf16.gmra.mxu3 %vm1639_vm13, %v4482_v37  ;;  %v4231_v37 = vshll.u32 %v4032_v0, 16  ;;  %v3543_v50 = vpack.c.b16 %v3519_v46, %v3518_v2  ;;  %v4777_v11 = vsel %vm6535_vm1, %v4775_v47, %v4776_v38  ;;  %v3334_v2 = vld [vmem:[#allocation2 + $0x6c] sm:$0xe]  ;;  %v4035_v46 = vld [vmem:[#allocation2 + $0x78] sm:$0xf]  ;;  %v4780_v38 = vrot.slane %v7114_v35, 5 }
 0x209   : > { %v2381_v17 = vadd.f32 %v2341_v34, %v1989_v18  ;;  %v4237_v34 = vshll.u32 %v7114_v35, 16  ;;  %v4243_v15 = vrot.slane %v4241_v43, 4  ;;  %v7717_v35 = vld [vmem:[#allocation3_spill] sm:$0xff] }
 0x20a   : > { %v4233_v24 = vrot.slane %v4231_v37, 5  ;;  %v6075_v37 = vld [vmem:[#allocation2 + $0x70] sm:$0xf] }
 0x20b   : > { %v2625_v51 = vpop.f32.mrf.mxu3  ;;  %v7128_v62 = vrot.slane %v4237_v34, 5 }
 0x20c   : > { %v2666_v31 = vadd.f32 %v2625_v51, %v2380_v56  ;;  %v4230_v56 = vrot.slane %v4228_v7, 4  ;;  %v5997_v7 = vld [vmem:[#allocation2 + $0x6c] sm:$0xff] }
 0x20d   : > { %5891 = vmatmul.msk.bf16.gmra.mxu2 %vm1639_vm13, %v5996_v14  ;;  %v1993_v44 = vpop.f32.mrf.mxu1  ;;  %v4458_v14 = vunpack.c.l.b16 %v4226_v23  ;;  %v4244_v23 = vor.u32 %v4243_v15, %v7128_v62 }
 0x20e   : > { %v3279_v26 = vpop.f32.mrf.mxu0  ;;  %v1994_v51 = vadd.f32 %v1993_v44, %v6723_v55  ;;  %v4234_v40 = vor.u32 %v4233_v24, %v4230_v56  ;;  %v5795_v44 = vrot.slane %v3334_v2, 9  ;;  %v4672_v56 = vld [vmem:[#allocation2 + $0x6c] sm:$0xe] }
 0x20f   : > { %v7124_v13 = vadd.f32 %v3279_v26, %v2666_v31  ;;  %v4483_v0 = vpack.c.b16 %v4458_v14, %v4457_v8  ;;  %v4247_v31 = vshll.u32 %v7130_v60, 16  ;;  %v6076_v26 = vld [vmem:[#allocation2 + $0x74] sm:$0x1]  ;;  %v7143_v14 = vld [vmem:[#allocation2 + $0x7c] sm:$0xf]  ;;  %v4245_v4 = vrot.slane %v4244_v23, 4 }
 0x210   : > { %v2344_v18 = vpop.f32.mrf.mxu2  ;;  %v4235_v55 = vrot.slane %v4234_v40, 4  ;;  %v3451_v8 = vrot.slane %v6076_v26, 5 }
 0x211   : > { %v2382_v5 = vadd.f32 %v2344_v18, %v1992_v52  ;;  %7715 = vst [vmem:[#allocation11_spill] sm:$0xff] %v7124_v13  ;;  %5940 = vmatmul.msk.bf16.gmra.mxu0 %vm1639_vm13, %v4880_v53  ;;  %v3448_v18 = vrot.slane %v6075_v37, 5  ;;  %v4249_v47 = vrot.slane %v4247_v31, 5  ;;  %v7726_v13 = vld [vmem:[#allocation8_spill] sm:$0xff] }
 0x212   : > { %v4240_v23 = vsel %vm6260_vm12, %v4235_v55, %v7128_v62 }
 0x213   : > { %v2627_v1 = vpop.f32.mrf.mxu3  ;;  %v3450_v43 = vrot.slane %v3448_v18, 4  ;;  %v4250_v31 = vsel %vm6260_vm12, %v4245_v4, %v4249_v47  ;;  %v4459_v62 = vunpack.c.l.b16 %v4240_v23 }
 0x214   : > { %v2667_v29 = vadd.f32 %v2627_v1, %v2381_v17  ;;  %v4856_v17 = vunpack.c.l.b16 %v4777_v11  ;;  %v4252_v1 = vshrl.u32 %v4035_v46, 16  ;;  %v4265_v11 = vshrl.u32 %v7143_v14, 16 }
 0x215   : > { %v1996_v22 = vpop.f32.mrf.mxu1  ;;  %v3452_v15 = vsel %vm6535_vm1, %v3450_v43, %v3451_v8  ;;  %v4460_v55 = vunpack.c.l.b16 %v4250_v31  ;;  %v7164_v8 = vld [vmem:[#allocation2 + $0x80] sm:$0x1] }
 0x216   : > { %v3281_v52 = vpop.f32.mrf.mxu0  ;;  %v4254_v43 = vrot.slane %v4252_v1, 4 }
 0x217   : > { %v7140_v34 = vadd.f32 %v3281_v52, %v2667_v29  ;;  %v4261_v29 = vshll.u32 %v7143_v14, 16  ;;  %v5925_v52 = vrot.slane %v4672_v56, 9 }
 0x218   : > { %v2346_v53 = vpop.f32.mrf.mxu2  ;;  %5811 = vmatmul.msk.bf16.gmra.mxu1 %vm1639_vm13, %v3543_v50  ;;  %5908 = vmatmul.msk.bf16.gmra.mxu3 %vm1639_vm13, %v4483_v0  ;;  %v3449_v50 = vsel %vm6535_vm1, %v5795_v44, %v3448_v18  ;;  %v4255_v0 = vshll.u32 %v4035_v46, 16  ;;  %v3521_v18 = vunpack.c.l.b16 %v3452_v15  ;;  %v4782_v46 = vrot.slane %v4780_v38, 4 }
 0x219   : > { %v2383_v57 = vadd.f32 %v2346_v53, %v1994_v51  ;;  %7716 = vst [vmem:[#allocation12_spill] sm:$0xff] %v7140_v34  ;;  %v4881_v51 = vpack.c.b16 %v4856_v17, %v4855_v41  ;;  %v1997_v53 = vadd.f32 %v1996_v22, %v7717_v35  ;;  %v3520_v37 = vunpack.c.l.b16 %v3449_v50 }
 0x21a   : > { %v4257_v26 = vrot.slane %v4255_v0, 5  ;;  %v7160_v41 = vrot.slane %v4261_v29, 5  ;;  %v4267_v22 = vrot.slane %v4265_v11, 4  ;;  %v4781_v47 = vsel %vm6535_vm1, %v5925_v52, %v4780_v38  ;;  %v7719_v11 = vld [vmem:[#allocation4_spill] sm:$0xff]  ;;  %v5998_v52 = vld [vmem:[#allocation2 + $0x78] sm:$0xff] }
 0x21b   : > { %v2630_v32 = vpop.f32.mrf.mxu3  ;;  %v3544_v4 = vpack.c.b16 %v3521_v18, %v3520_v37  ;;  %v4271_v0 = vshll.u32 %v7164_v8, 16  ;;  %v4484_v29 = vpack.c.b16 %v4460_v55, %v4459_v62  ;;  %v4857_v35 = vunpack.c.l.b16 %v4781_v47  ;;  %v6077_v37 = vld [vmem:[#allocation2 + $0x7c] sm:$0xf]  ;;  %v6078_v62 = vld [vmem:[#allocation2 + $0x80] sm:$0x1] }
 0x21c   : > { %v2668_v40 = vadd.f32 %v2630_v32, %v2382_v5  ;;  %v4783_v5 = vrot.slane %v7130_v60, 5  ;;  %v4258_v50 = vor.u32 %v4257_v26, %v4254_v43  ;;  %v4268_v1 = vor.u32 %v4267_v22, %v7160_v41 }
 0x21d   : > { %5892 = vmatmul.msk.bf16.gmra.mxu2 %vm1639_vm13, %v5997_v7  ;;  %v1998_v24 = vpop.f32.mrf.mxu1  ;;  %v3455_v18 = vrot.slane %v6077_v37, 5  ;;  %v4273_v43 = vrot.slane %v4271_v0, 5  ;;  %v3458_v55 = vrot.slane %v6078_v62, 5 }
 0x21e   : > { %v3284_v2 = vpop.f32.mrf.mxu0  ;;  %v4784_v60 = vsel %vm6535_vm1, %v4782_v46, %v4783_v5  ;;  %v4269_v46 = vrot.slane %v4268_v1, 4 }
 0x21f   : > { %v7162_v17 = vadd.f32 %v3284_v2, %v2668_v40  ;;  %v1999_v40 = vadd.f32 %v1998_v24, %v7719_v11  ;;  %v4858_v23 = vunpack.c.l.b16 %v4784_v60  ;;  %v7177_v2 = vld [vmem:[#allocation2 + $0x88] sm:$0xf]  ;;  %v3457_v22 = vrot.slane %v3455_v18, 4 }
 0x220   : > { %v2349_v7 = vpop.f32.mrf.mxu2  ;;  %v4285_v47 = vshll.u32 %v7177_v2, 16  ;;  %v4787_v11 = vrot.slane %v7143_v14, 5  ;;  %v4790_v14 = vrot.slane %v7164_v8, 5 }
 0x221   : > { %v2384_v44 = vadd.f32 %v2349_v7, %v1997_v53  ;;  %7718 = vst [vmem:[#allocation3_spill] sm:$0xff] %v7162_v17  ;;  %5941 = vmatmul.msk.bf16.gmra.mxu0 %vm1639_vm13, %v4881_v51  ;;  %v4038_v51 = vld [vmem:[#allocation2 + $0x84] sm:$0xf]  ;;  %v4259_v7 = vrot.slane %v4258_v50, 4  ;;  %v4289_v50 = vshrl.u32 %v7177_v2, 16  ;;  %v3459_v1 = vsel %vm6535_vm1, %v3457_v22, %v3458_v55 }
 0x222   : > { %v4276_v26 = vshrl.u32 %v4038_v51, 16  ;;  %v4882_v0 = vpack.c.b16 %v4858_v23, %v4857_v35  ;;  %v7199_v22 = vld [vmem:[#allocation2 + $0x8c] sm:$0x1] }
 0x223   : > { %v2632_v15 = vpop.f32.mrf.mxu3  ;;  %v4291_v35 = vrot.slane %v4289_v50, 4 }
 0x224   : > { %v2669_v32 = vadd.f32 %v2632_v15, %v2383_v57  ;;  %v3335_v57 = vld [vmem:[#allocation2 + $0x78] sm:$0xe] }
 0x225   : > { %v7169_v56 = vpop.f32.mrf.mxu1  ;;  %v5796_v24 = vrot.slane %v3335_v57, 9  ;;  %v3523_v57 = vunpack.c.l.b16 %v3459_v1 }
 0x226   : > { %v3286_v38 = vpop.f32.mrf.mxu0 }
 0x227   : > { %v7179_v5 = vadd.f32 %v3286_v38, %v2669_v32  ;;  %v3456_v60 = vsel %vm6535_vm1, %v5796_v24, %v3455_v18  ;;  %v4278_v38 = vrot.slane %v4276_v26, 4  ;;  %v7197_v24 = vrot.slane %v4285_v47, 5 }
 0x228   : > { %v2351_v53 = vpop.f32.mrf.mxu2  ;;  %5812 = vmatmul.msk.bf16.gmra.mxu1 %vm1639_vm13, %v3544_v4  ;;  %5909 = vmatmul.msk.bf16.gmra.mxu3 %vm1639_vm13, %v4484_v29  ;;  %v4279_v4 = vshll.u32 %v4038_v51, 16  ;;  %v4264_v29 = vsel %vm6260_vm12, %v4259_v7, %v7160_v41  ;;  %v4274_v51 = vsel %vm6260_vm12, %v4269_v46, %v4273_v43  ;;  %v3522_v18 = vunpack.c.l.b16 %v3456_v60 }
 0x229   : > { %v2385_v31 = vadd.f32 %v2351_v53, %v1999_v40  ;;  %7720 = vst [vmem:[#allocation4_spill] sm:$0xff] %v7179_v5  ;;  %v4673_v53 = vld [vmem:[#allocation2 + $0x78] sm:$0xe]  ;;  %v4789_v41 = vrot.slane %v4787_v11, 4  ;;  %v4461_v7 = vunpack.c.l.b16 %v4264_v29  ;;  %v4462_v46 = vunpack.c.l.b16 %v4274_v51  ;;  %v4041_v29 = vld [vmem:[#allocation2 + $0x90] sm:$0xf] }
 0x22a   : > { %v5926_v62 = vrot.slane %v4673_v53, 9  ;;  %v3545_v43 = vpack.c.b16 %v3523_v57, %v3522_v18  ;;  %v4292_v55 = vor.u32 %v4291_v35, %v7197_v24  ;;  %v5999_v35 = vld [vmem:[#allocation2 + $0x84] sm:$0xff]  ;;  %v7724_v5 = vld [vmem:[#allocation6_spill] sm:$0xff] }
 0x22b   : > { %v2635_v32 = vpop.f32.mrf.mxu3  ;;  %v4791_v8 = vsel %vm6535_vm1, %v4789_v41, %v4790_v14  ;;  %v7216_v41 = vld [vmem:[#allocation2 + $0x94] sm:$0xf]  ;;  %v3336_v14 = vld [vmem:[#allocation2 + $0x84] sm:$0xe] }
 0x22c   : > { %v2670_v40 = vadd.f32 %v2635_v32, %v2384_v44  ;;  %v4788_v60 = vsel %vm6535_vm1, %v5926_v62, %v4787_v11  ;;  %v4485_v32 = vpack.c.b16 %v4462_v46, %v4461_v7  ;;  %v4293_v51 = vrot.slane %v4292_v55, 4  ;;  %v4674_v11 = vld [vmem:[#allocation2 + $0x84] sm:$0xe] }
 0x22d   : > { %5893 = vmatmul.msk.bf16.gmra.mxu2 %vm1639_vm13, %v5998_v52  ;;  %v7185_v15 = vpop.f32.mrf.mxu1  ;;  %v4281_v52 = vrot.slane %v4279_v4, 5  ;;  %v4295_v4 = vshll.u32 %v7199_v22, 16  ;;  %v4859_v18 = vunpack.c.l.b16 %v4788_v60  ;;  %v4860_v57 = vunpack.c.l.b16 %v4791_v8 }
 0x22e   : > { %v3289_v23 = vpop.f32.mrf.mxu0  ;;  %v4300_v7 = vshrl.u32 %v4041_v29, 16  ;;  %v4303_v46 = vshll.u32 %v4041_v29, 16  ;;  %v5797_v55 = vrot.slane %v3336_v14, 9  ;;  %v4313_v60 = vshrl.u32 %v7216_v41, 16 }
 0x22f   : > { %v7202_v44 = vadd.f32 %v3289_v23, %v2670_v40  ;;  %v4282_v26 = vor.u32 %v4281_v52, %v4278_v38  ;;  %v4297_v53 = vrot.slane %v4295_v4, 5  ;;  %v3692_v52 = vadd.f32 %v7169_v56, %v6763_v42  ;;  %v6079_v23 = vld [vmem:[#allocation2 + $0x88] sm:$0xf]  ;;  %v6080_v56 = vld [vmem:[#allocation2 + $0x8c] sm:$0x1] }
 0x230   : > { %v3899_v37 = vpop.f32.mrf.mxu2  ;;  %v3462_v62 = vrot.slane %v6079_v23, 5  ;;  %v3465_v4 = vrot.slane %v6080_v56, 5  ;;  %v5927_v8 = vrot.slane %v4674_v11, 9  ;;  %v4305_v23 = vrot.slane %v4303_v46, 5 }
 0x231   : > { %7721 = vst [vmem:[#allocation13_spill] sm:$0xff] %v7202_v44  ;;  %5942 = vmatmul.msk.bf16.gmra.mxu0 %vm1639_vm13, %v4882_v0  ;;  %v4283_v0 = vrot.slane %v4282_v26, 4  ;;  %v3979_v26 = vadd.f32 %v3899_v37, %v3692_v52  ;;  %v4302_v52 = vrot.slane %v4300_v7, 4  ;;  %v4883_v14 = vpack.c.b16 %v4860_v57, %v4859_v18 }
 0x232   : > { %v3464_v42 = vrot.slane %v3462_v62, 4  ;;  %v4298_v11 = vsel %vm6260_vm12, %v4293_v51, %v4297_v53  ;;  %v4315_v7 = vrot.slane %v4313_v60, 4  ;;  %v3693_v57 = vadd.f32 %v7185_v15, %v6773_v28 }
 0x233   : > { %v2637_v50 = vpop.f32.mrf.mxu3  ;;  %v4306_v46 = vor.u32 %v4305_v23, %v4302_v52 }
 0x234   : > { %v2671_v1 = vadd.f32 %v2637_v50, %v2385_v31  ;;  %v4794_v31 = vrot.slane %v7177_v2, 5  ;;  %v4309_v50 = vshll.u32 %v7216_v41, 16 }
 0x235   : > { %v7207_v47 = vpop.f32.mrf.mxu1 }
 0x236   : > { %v3291_v38 = vpop.f32.mrf.mxu0  ;;  %v4796_v29 = vrot.slane %v4794_v31, 4  ;;  %v4795_v51 = vsel %vm6535_vm1, %v5927_v8, %v4794_v31 }
 0x238   : > { %v3901_v40 = vpop.f32.mrf.mxu2  ;;  %5813 = vmatmul.msk.bf16.gmra.mxu1 %vm1639_vm13, %v3545_v43  ;;  %v7219_v43 = vadd.f32 %v3291_v38, %v2671_v1  ;;  %5910 = vmatmul.msk.bf16.gmra.mxu3 %vm1639_vm13, %v4485_v32  ;;  %v3463_v1 = vsel %vm6535_vm1, %v5797_v55, %v3462_v62  ;;  %v3466_v32 = vsel %vm6535_vm1, %v3464_v42, %v3465_v4  ;;  %v4797_v38 = vrot.slane %v7199_v22, 5  ;;  %v7240_v62 = vld [vmem:[%s7691_s4] ss:$0 sm:$0xff] }
 0x239   : > { %v3524_v42 = vunpack.c.l.b16 %v3463_v1  ;;  %v3525_v4 = vunpack.c.l.b16 %v3466_v32  ;;  %v7242_v22 = vrot.slane %v4309_v50, 5  ;;  %v4464_v50 = vunpack.c.l.b16 %v4298_v11 }
 0x23a   : > { %7722 = vst [vmem:[#allocation14_spill] sm:$0xff] %v7219_v43  ;;  %v4798_v53 = vsel %vm6535_vm1, %v4796_v29, %v4797_v38  ;;  %v4307_v38 = vrot.slane %v4306_v46, 4 }
 0x23b   : > { %v4553_v37 = vpop.f32.mrf.mxu3  ;;  %v3546_v32 = vpack.c.b16 %v3525_v4, %v3524_v42  ;;  %v4316_v28 = vor.u32 %v4315_v7, %v7242_v22  ;;  %v4862_v31 = vunpack.c.l.b16 %v4798_v53  ;;  %v6081_v53 = vld [vmem:[#allocation2 + $0x94] sm:$0xf] }
 0x23c   : > { %v4633_v56 = vadd.f32 %v4553_v37, %v3979_v26  ;;  %v3980_v26 = vadd.f32 %v3901_v40, %v3693_v57  ;;  %v4861_v40 = vunpack.c.l.b16 %v4795_v51  ;;  %v6000_v57 = vld [vmem:[#allocation2 + $0x90] sm:$0xff]  ;;  %v4801_v51 = vrot.slane %v7216_v41, 5 }
 0x23d   : > { %5894 = vmatmul.msk.bf16.gmra.mxu2 %vm1639_vm13, %v5999_v35  ;;  %v7225_v2 = vpop.f32.mrf.mxu1  ;;  %v4288_v35 = vsel %vm6260_vm12, %v4283_v0, %v7197_v24  ;;  %v7246_v24 = vld [vmem:[#allocation2 + $0x98] sm:$0x1]  ;;  %v4317_v42 = vrot.slane %v4316_v28, 4  ;;  %v3469_v46 = vrot.slane %v6081_v53, 5 }
 0x23e   : > { %v4951_v18 = vpop.f32.mrf.mxu0  ;;  %v4463_v1 = vunpack.c.l.b16 %v4288_v35  ;;  %v4319_v15 = vshll.u32 %v7246_v24, 16 }
 0x23f   : > { %v5031_v0 = vadd.f32 %v4951_v18, %v4633_v56  ;;  %v7723_v56 = vld [vmem:[#allocation5_spill] sm:$0xff]  ;;  %v4884_v18 = vpack.c.b16 %v4862_v31, %v4861_v40  ;;  %v6082_v40 = vld [vmem:[#allocation2 + $0x98] sm:$0x1] }
 0x240   : > { %v3904_v55 = vpop.f32.mrf.mxu2  ;;  %v4486_v23 = vpack.c.b16 %v4464_v50, %v4463_v1  ;;  %v3694_v35 = vadd.f32 %v7207_v47, %v7723_v56  ;;  %v4321_v4 = vrot.slane %v4319_v15, 5  ;;  %v4312_v47 = vsel %vm6260_vm12, %v4307_v38, %v7242_v22  ;;  %v3337_v50 = vld [vmem:[#allocation2 + $0x90] sm:$0xe] }
 0x241   : > { %5943 = vmatmul.msk.bf16.gmra.mxu0 %vm1639_vm13, %v4883_v14  ;;  %v5067_v60 = vadd.f32 %v7240_v62, %v5031_v0  ;;  %v4044_v14 = vld [vmem:[#allocation2 + $0x9c] sm:$0xf]  ;;  %v4675_v0 = vld [vmem:[#allocation2 + $0x90] sm:$0xe]  ;;  %v5798_v28 = vrot.slane %v3337_v50, 9  ;;  %v3471_v15 = vrot.slane %v3469_v46, 4  ;;  %v4465_v17 = vunpack.c.l.b16 %v4312_v47 }
 0x242   : > { %v3981_v1 = vadd.f32 %v3904_v55, %v3694_v35  ;;  %v3472_v31 = vrot.slane %v6082_v40, 5  ;;  %v4322_v55 = vsel %vm6260_vm12, %v4317_v42, %v4321_v4 }
 0x243   : > { %v5099_v37 = vpack.c.bf16 %v5067_v60, %v5067_v60  ;;  %v4555_v29 = vpop.f32.mrf.mxu3  ;;  %v5236_v41 = vmul.f32 %v5067_v60, %v5067_v60  ;;  %v5165_v22 = vsel %vm5164_vm2, %v5067_v60, 0.0  ;;  %v4466_v34 = vunpack.c.l.b16 %v4322_v55 }
 0x244   : > { %v4634_v52 = vadd.f32 %v4555_v29, %v3980_v26  ;;  %v4327_v29 = vshll.u32 %v4044_v14, 16 }
 0x245   : > { %v7263_v8 = vpop.f32.mrf.mxu1  ;;  %5132 = vst.msk [vmem:[%s7261_s9] sm:$0xf] %vm5131_vm0, %v5099_v37  ;;  %v7274_v37 = vld [vmem:[#allocation2 + $0xa0] sm:$0xf]  ;;  %v5268_v40 = vsel %vm5164_vm2, %v5236_v41, 0.0 }
 0x246   : > { %v4953_v7 = vpop.f32.mrf.mxu0  ;;  %v4333_v35 = vshll.u32 %v7274_v37, 16  ;;  %v4337_v60 = vshrl.u32 %v7274_v37, 16  ;;  %v4329_v50 = vrot.slane %v4327_v29, 5 }
 0x247   : > { %v5032_v26 = vadd.f32 %v4953_v7, %v4634_v52  ;;  %v5928_v52 = vrot.slane %v4675_v0, 9 }
 0x248   : > { %v3906_v11 = vpop.f32.mrf.mxu2  ;;  %5814 = vmatmul.msk.bf16.gmra.mxu1 %vm1639_vm13, %v3546_v32  ;;  %v4324_v32 = vshrl.u32 %v4044_v14, 16  ;;  %5911 = vmatmul.msk.bf16.gmra.mxu3 %vm1639_vm13, %v4486_v23  ;;  %v3470_v23 = vsel %vm6535_vm1, %v5798_v28, %v3469_v46  ;;  %v3473_v14 = vsel %vm6535_vm1, %v3471_v15, %v3472_v31  ;;  %v7303_v29 = vrot.slane %v4333_v35, 5 }
 0x249   : > { %v5068_v56 = vadd.f32 %v7240_v62, %v5032_v26  ;;  %v3526_v15 = vunpack.c.l.b16 %v3470_v23  ;;  %v3527_v31 = vunpack.c.l.b16 %v3473_v14  ;;  %v4339_v41 = vrot.slane %v4337_v60, 4 }
 0x24a   : > { %v4803_v23 = vrot.slane %v4801_v51, 4  ;;  %v4804_v14 = vrot.slane %v7246_v24, 5 }
 0x24b   : > { %v5100_v7 = vpack.c.bf16 %v5068_v56, %v5068_v56  ;;  %v5166_v53 = vsel %vm5164_vm2, %v5068_v56, 0.0  ;;  %v5237_v42 = vmul.f32 %v5068_v56, %v5068_v56  ;;  %v4558_v4 = vpop.f32.mrf.mxu3  ;;  %v3695_v56 = vadd.f32 %v7225_v2, %v7724_v5 }
 0x24c   : > { %v5167_v0 = vadd.f32 %v5166_v53, %v5165_v22  ;;  %v4635_v26 = vadd.f32 %v4558_v4, %v3981_v1  ;;  %v7299_v1 = vsel %vm6535_vm1, %v5928_v52, %v4801_v51  ;;  %v3547_v2 = vpack.c.b16 %v3527_v31, %v3526_v15  ;;  %v4047_v53 = vld [vmem:[#allocation2 + $0xa8] sm:$0xf] }
 0x24d   : > { %5895 = vmatmul.msk.bf16.gmra.mxu2 %vm1639_vm13, %v6000_v57  ;;  %v7282_v38 = vpop.f32.mrf.mxu1  ;;  %v4326_v57 = vrot.slane %v4324_v32, 4  ;;  %5133 = vst.msk [vmem:[%s7261_s9 + $0x4] sm:$0xf] %vm5131_vm0, %v5100_v7  ;;  %v5269_v46 = vsel %vm5164_vm2, %v5237_v42, 0.0  ;;  %v7301_v32 = vld [vmem:[#allocation2 + $0xa4] sm:$0x1]  ;;  %v3982_v7 = vadd.f32 %v3906_v11, %v3695_v56  ;;  %v4863_v55 = vunpack.c.l.b16 %v7299_v1 }
 0x24e   : > { %v5270_v43 = vadd.f32 %v5269_v46, %v5268_v40  ;;  %v4956_v44 = vpop.f32.mrf.mxu0  ;;  %v4343_v35 = vshll.u32 %v7301_v32, 16  ;;  %v4808_v15 = vrot.slane %v7274_v37, 5  ;;  %v4348_v31 = vshrl.u32 %v4047_v53, 16 }
 0x24f   : > { %v5033_v22 = vadd.f32 %v4956_v44, %v4635_v26  ;;  %v4330_v47 = vor.u32 %v4329_v50, %v4326_v57  ;;  %v4487_v44 = vpack.c.b16 %v4466_v34, %v4465_v17  ;;  %v7725_v26 = vld [vmem:[#allocation7_spill] sm:$0xff]  ;;  %v4805_v34 = vsel %vm6535_vm1, %v4803_v23, %v4804_v14 }
 0x250   : > { %v3909_v28 = vpop.f32.mrf.mxu2  ;;  %v3696_v57 = vadd.f32 %v7263_v8, %v7725_v26  ;;  %v4676_v17 = vld [vmem:[#allocation2 + $0x9c] sm:$0xe]  ;;  %v4345_v1 = vrot.slane %v4343_v35, 5  ;;  %v6083_v8 = vld [vmem:[#allocation2 + $0xa0] sm:$0xf]  ;;  %v4864_v14 = vunpack.c.l.b16 %v4805_v34  ;;  %v4810_v35 = vrot.slane %v4808_v15, 4 }
 0x251   : > { %5944 = vmatmul.msk.bf16.gmra.mxu0 %vm1639_vm13, %v4884_v18  ;;  %v5069_v5 = vadd.f32 %v7240_v62, %v5033_v22  ;;  %v4340_v18 = vor.u32 %v4339_v41, %v7303_v29  ;;  %v4331_v46 = vrot.slane %v4330_v47, 4  ;;  %v6001_v22 = vld [vmem:[#allocation2 + $0x9c] sm:$0xff]  ;;  %v3476_v41 = vrot.slane %v6083_v8, 5 }
 0x253   : > { %v5101_v42 = vpack.c.bf16 %v5069_v5, %v5069_v5  ;;  %v5168_v11 = vsel %vm5164_vm2, %v5069_v5, 0.0  ;;  %v5238_v51 = vmul.f32 %v5069_v5, %v5069_v5  ;;  %v4560_v24 = vpop.f32.mrf.mxu3  ;;  %v4341_v5 = vrot.slane %v4340_v18, 4 }
 0x254   : > { %v5169_v4 = vadd.f32 %v5168_v11, %v5167_v0  ;;  %v4636_v60 = vadd.f32 %v4560_v24, %v3982_v7  ;;  %v4351_v7 = vshll.u32 %v4047_v53, 16  ;;  %v3338_v11 = vld [vmem:[#allocation2 + $0x9c] sm:$0xe]  ;;  %v3478_v37 = vrot.slane %v3476_v41, 4  ;;  %v6084_v24 = vld [vmem:[#allocation2 + $0xa4] sm:$0x1] }
 0x255   : > { %v7309_v52 = vpop.f32.mrf.mxu1  ;;  %5134 = vst.msk [vmem:[%s7261_s9 + $0x8] sm:$0xf] %vm5131_vm0, %v5101_v42  ;;  %v5271_v50 = vsel %vm5164_vm2, %v5238_v51, 0.0  ;;  %v5929_v42 = vrot.slane %v4676_v17, 9  ;;  %v7323_v51 = vld [vmem:[#allocation2 + $0xac] sm:$0xf] }
 0x256   : > { %v5272_v0 = vadd.f32 %v5271_v50, %v5270_v43  ;;  %v4958_v56 = vpop.f32.mrf.mxu0  ;;  %v5799_v47 = vrot.slane %v3338_v11, 9  ;;  %v3479_v43 = vrot.slane %v6084_v24, 5  ;;  %v4811_v50 = vrot.slane %v7301_v32, 5 }
 0x257   : > { %v5034_v23 = vadd.f32 %v4958_v56, %v4636_v60  ;;  %v4350_v53 = vrot.slane %v4348_v31, 4  ;;  %v4361_v31 = vshrl.u32 %v7323_v51, 16  ;;  %v4346_v11 = vsel %vm6260_vm12, %v4341_v5, %v4345_v1 }
 0x258   : > { %v3911_v40 = vpop.f32.mrf.mxu2  ;;  %5815 = vmatmul.msk.bf16.gmra.mxu1 %vm1639_vm13, %v3547_v2  ;;  %5912 = vmatmul.msk.bf16.gmra.mxu3 %vm1639_vm13, %v4487_v44  ;;  %v3983_v2 = vadd.f32 %v3909_v28, %v3696_v57  ;;  %v3477_v60 = vsel %vm6535_vm1, %v5799_v47, %v3476_v41  ;;  %v3480_v28 = vsel %vm6535_vm1, %v3478_v37, %v3479_v43  ;;  %v4353_v44 = vrot.slane %v4351_v7, 5 }
 0x259   : > { %v5070_v26 = vadd.f32 %v7240_v62, %v5034_v23  ;;  %v4357_v57 = vshll.u32 %v7323_v51, 16  ;;  %v4336_v41 = vsel %vm6260_vm12, %v4331_v46, %v7303_v29  ;;  %v3528_v37 = vunpack.c.l.b16 %v3477_v60 }
 0x25a   : > { %v3529_v24 = vunpack.c.l.b16 %v3480_v28  ;;  %v4812_v46 = vsel %vm6535_vm1, %v4810_v35, %v4811_v50  ;;  %v4363_v1 = vrot.slane %v4361_v31, 4  ;;  %v4467_v60 = vunpack.c.l.b16 %v4336_v41 }
 0x25b   : > { %v5102_v34 = vpack.c.bf16 %v5070_v26, %v5070_v26  ;;  %v5170_v17 = vsel %vm5164_vm2, %v5070_v26, 0.0  ;;  %v5239_v56 = vmul.f32 %v5070_v26, %v5070_v26  ;;  %v4563_v32 = vpop.f32.mrf.mxu3 }
 0x25c   : > { %v5171_v8 = vadd.f32 %v5170_v17, %v5169_v4  ;;  %v4637_v23 = vadd.f32 %v4563_v32, %v3983_v2  ;;  %v4809_v4 = vsel %vm6535_vm1, %v5929_v42, %v4808_v15  ;;  %v7352_v2 = vld [vmem:[#allocation2 + $0xb0] sm:$0x1]  ;;  %v4677_v15 = vld [vmem:[#allocation2 + $0xa8] sm:$0xe] }
 0x25d   : > { %5896 = vmatmul.msk.bf16.gmra.mxu2 %vm1639_vm13, %v6001_v22  ;;  %v7329_v18 = vpop.f32.mrf.mxu1  ;;  %v4885_v22 = vpack.c.b16 %v4864_v14, %v4863_v55  ;;  %5135 = vst.msk [vmem:[%s7261_s9 + $0xc] sm:$0xf] %vm5131_vm0, %v5102_v34  ;;  %v5273_v7 = vsel %vm5164_vm2, %v5239_v56, 0.0  ;;  %v3697_v55 = vadd.f32 %v7282_v38, %v7726_v13  ;;  %v4354_v14 = vor.u32 %v4353_v44, %v4350_v53 }
 0x25e   : > { %v5274_v43 = vadd.f32 %v5273_v7, %v5272_v0  ;;  %v4961_v26 = vpop.f32.mrf.mxu0  ;;  %v7354_v34 = vrot.slane %v4357_v57, 5  ;;  %v4468_v0 = vunpack.c.l.b16 %v4346_v11  ;;  %v3548_v38 = vpack.c.b16 %v3529_v24, %v3528_v37  ;;  %v7727_v7 = vld [vmem:[#allocation9_spill] sm:$0xff] }
 0x25f   : > { %v5035_v29 = vadd.f32 %v4961_v26, %v4637_v23  ;;  %v3984_v5 = vadd.f32 %v3911_v40, %v3697_v55  ;;  %v4865_v42 = vunpack.c.l.b16 %v4809_v4  ;;  %v4866_v53 = vunpack.c.l.b16 %v4812_v46  ;;  %v4050_v26 = vld [vmem:[#allocation2 + $0xb4] sm:$0xf]  ;;  %v6085_v46 = vld [vmem:[#allocation2 + $0xac] sm:$0xf] }
 0x260   : > { %v3914_v47 = vpop.f32.mrf.mxu2  ;;  %v7360_v35 = vrot.slane %v4354_v14, 4  ;;  %v4367_v50 = vshll.u32 %v7352_v2, 16  ;;  %v4364_v56 = vor.u32 %v4363_v1, %v7354_v34  ;;  %v5930_v23 = vrot.slane %v4677_v15, 9  ;;  %v6086_v15 = vld [vmem:[#allocation2 + $0xb0] sm:$0x1] }
 0x261   : > { %5945 = vmatmul.msk.bf16.gmra.mxu0 %vm1639_vm13, %v4885_v22  ;;  %v5071_v13 = vadd.f32 %v7240_v62, %v5035_v29  ;;  %v4488_v22 = vpack.c.b16 %v4468_v0, %v4467_v60  ;;  %v3698_v11 = vadd.f32 %v7309_v52, %v7727_v7  ;;  %v4815_v24 = vrot.slane %v7323_v51, 5 }
 0x262   : > { %v4886_v14 = vpack.c.b16 %v4866_v53, %v4865_v42  ;;  %v4369_v29 = vrot.slane %v4367_v50, 5  ;;  %v3483_v1 = vrot.slane %v6085_v46, 5  ;;  %v4360_v52 = vsel %vm6260_vm12, %v7360_v35, %v7354_v34 }
 0x263   : > { %v5103_v44 = vpack.c.bf16 %v5071_v13, %v5071_v13  ;;  %v5172_v40 = vsel %vm5164_vm2, %v5071_v13, 0.0  ;;  %v5240_v57 = vmul.f32 %v5071_v13, %v5071_v13  ;;  %v4565_v17 = vpop.f32.mrf.mxu3  ;;  %v3985_v60 = vadd.f32 %v3914_v47, %v3698_v11  ;;  %v3339_v13 = vld [vmem:[#allocation2 + $0xa8] sm:$0xe] }
 0x264   : > { %v5173_v32 = vadd.f32 %v5172_v40, %v5171_v8  ;;  %v4638_v31 = vadd.f32 %v4565_v17, %v3984_v5  ;;  %v6002_v8 = vld [vmem:[#allocation2 + $0xa8] sm:$0xff]  ;;  %v4365_v0 = vrot.slane %v4364_v56, 4  ;;  %v5800_v51 = vrot.slane %v3339_v13, 9 }
 0x265   : > { %v7358_v28 = vpop.f32.mrf.mxu1  ;;  %5136 = vst.msk [vmem:[%s7261_s9 + $0x10] sm:$0xf] %vm5131_vm0, %v5103_v44  ;;  %v5275_v41 = vsel %vm5164_vm2, %v5240_v57, 0.0  ;;  %v3486_v42 = vrot.slane %v6086_v15, 5  ;;  %v4372_v53 = vshrl.u32 %v4050_v26, 16  ;;  %v4816_v47 = vsel %vm6535_vm1, %v5930_v23, %v4815_v24 }
 0x266   : > { %v5276_v55 = vadd.f32 %v5275_v41, %v5274_v43  ;;  %v4963_v4 = vpop.f32.mrf.mxu0  ;;  %v3485_v43 = vrot.slane %v3483_v1, 4  ;;  %v4817_v44 = vrot.slane %v4815_v24, 4  ;;  %v4375_v40 = vshll.u32 %v4050_v26, 16 }
 0x267   : > { %v5036_v5 = vadd.f32 %v4963_v4, %v4638_v31  ;;  %v4818_v34 = vrot.slane %v7352_v2, 5  ;;  %v3484_v57 = vsel %vm6535_vm1, %v5800_v51, %v3483_v1  ;;  %v4370_v2 = vsel %vm6260_vm12, %v4365_v0, %v4369_v29  ;;  %v7402_v29 = vld [vmem:[#allocation2 + $0xbc] sm:$0x1] }
 0x268   : > { %v3916_v37 = vpop.f32.mrf.mxu2  ;;  %5816 = vmatmul.msk.bf16.gmra.mxu1 %vm1639_vm13, %v3548_v38  ;;  %v7376_v38 = vld [vmem:[#allocation2 + $0xb8] sm:$0xf]  ;;  %5913 = vmatmul.msk.bf16.gmra.mxu3 %vm1639_vm13, %v4488_v22  ;;  %v3487_v17 = vsel %vm6535_vm1, %v3485_v43, %v3486_v42  ;;  %v4374_v26 = vrot.slane %v4372_v53, 4  ;;  %v3530_v46 = vunpack.c.l.b16 %v3484_v57  ;;  %v7728_v43 = vld [vmem:[#allocation10_spill] sm:$0xff]  ;;  %v4469_v42 = vunpack.c.l.b16 %v4360_v52 }
 0x269   : > { %v5072_v50 = vadd.f32 %v7240_v62, %v5036_v5  ;;  %v4381_v56 = vshll.u32 %v7376_v38, 16  ;;  %v4385_v7 = vshrl.u32 %v7376_v38, 16  ;;  %v3531_v1 = vunpack.c.l.b16 %v3487_v17 }
 0x26a   : > { %v4377_v5 = vrot.slane %v4375_v40, 5  ;;  %v3699_v15 = vadd.f32 %v7329_v18, %v7728_v43  ;;  %v4470_v57 = vunpack.c.l.b16 %v4370_v2  ;;  %v4867_v17 = vunpack.c.l.b16 %v4816_v47 }
 0x26b   : > { %v5104_v31 = vpack.c.bf16 %v5072_v50, %v5072_v50  ;;  %v5174_v22 = vsel %vm5164_vm2, %v5072_v50, 0.0  ;;  %v5241_v23 = vmul.f32 %v5072_v50, %v5072_v50  ;;  %v4568_v41 = vpop.f32.mrf.mxu3  ;;  %v7404_v0 = vrot.slane %v4381_v56, 5  ;;  %v535_v50 = vld [vmem:[#allocation2 + $0xcc] sm:$0x1] }
 0x26c   : > { %v5175_v11 = vadd.f32 %v5174_v22, %v5173_v32  ;;  %v4639_v24 = vadd.f32 %v4568_v41, %v3985_v60  ;;  %v4819_v32 = vsel %vm6535_vm1, %v4817_v44, %v4818_v34  ;;  %v4387_v53 = vrot.slane %v4385_v7, 4  ;;  %v7415_v7 = vld [vmem:[#allocation2 + $0xb4] sm:$0xe] }
 0x26d   : > { %5897 = vmatmul.msk.bf16.gmra.mxu2 %vm1639_vm13, %v6002_v8  ;;  %v7384_v35 = vpop.f32.mrf.mxu1  ;;  %5137 = vst.msk [vmem:[%s7261_s9 + $0x14] sm:$0xf] %vm5131_vm0, %v5104_v31  ;;  %v5277_v4 = vsel %vm5164_vm2, %v5241_v23, 0.0  ;;  %v3986_v31 = vadd.f32 %v3916_v37, %v3699_v15  ;;  %v4868_v44 = vunpack.c.l.b16 %v4819_v32  ;;  %v3549_v40 = vpack.c.b16 %v3531_v1, %v3530_v46  ;;  %v6003_v32 = vld [vmem:[#allocation2 + $0xb4] sm:$0xff] }
 0x26e   : > { %v5278_v13 = vadd.f32 %v5277_v4, %v5276_v55  ;;  %v4966_v51 = vpop.f32.mrf.mxu0  ;;  %v536_v55 = vsel %vm6182_vm3, 0, %v535_v50  ;;  %v4378_v52 = vor.u32 %v4377_v5, %v4374_v26  ;;  %v4391_v56 = vshll.u32 %v7402_v29, 16 }
 0x26f   : > { %v5037_v60 = vadd.f32 %v4966_v51, %v4639_v24  ;;  %537 = vst [vmem:[#allocation2 + $0xcc] sm:$0x1] %v536_v55  ;;  %v4388_v41 = vor.u32 %v4387_v53, %v7404_v0  ;;  %v4489_v2 = vpack.c.b16 %v4470_v57, %v4469_v42  ;;  %v3700_v4 = vadd.f32 %v7358_v28, %v6846_v9  ;;  %v4053_v51 = vld [vmem:[#allocation2 + $0xc0] sm:$0xf]  ;;  %v6087_v42 = vld [vmem:[#allocation2 + $0xb8] sm:$0xf] }
 0x270   : > { %v3919_v8 = vpop.f32.mrf.mxu2  ;;  %v7422_v46 = vpack.c.b16 %v4868_v44, %v4867_v17  ;;  %v4379_v5 = vrot.slane %v4378_v52, 4  ;;  %v3490_v53 = vrot.slane %v6087_v42, 5  ;;  %v4822_v9 = vrot.slane %v7376_v38, 5  ;;  %v3340_v28 = vld [vmem:[#allocation2 + $0xb4] sm:$0xe] }
 0x271   : > { %5946 = vmatmul.msk.bf16.gmra.mxu0 %vm1639_vm13, %v4886_v14  ;;  %v5073_v18 = vadd.f32 %v7240_v62, %v5037_v60  ;;  %v5931_v60 = vrot.slane %v7415_v7, 9  ;;  %v4389_v57 = vrot.slane %v4388_v41, 4  ;;  %v7427_v17 = vld [vmem:[#allocation2 + $0xc4] sm:$0xf]  ;;  %v5801_v55 = vrot.slane %v3340_v28, 9 }
 0x272   : > { %v4399_v38 = vshll.u32 %v4053_v51, 16 }
 0x273   : > { %v5105_v22 = vpack.c.bf16 %v5073_v18, %v5073_v18  ;;  %v5176_v37 = vsel %vm5164_vm2, %v5073_v18, 0.0  ;;  %v5242_v47 = vmul.f32 %v5073_v18, %v5073_v18  ;;  %v4570_v23 = vpop.f32.mrf.mxu3  ;;  %v3492_v18 = vrot.slane %v3490_v53, 4 }
 0x274   : > { %v5177_v14 = vadd.f32 %v5176_v37, %v5175_v11  ;;  %v4640_v24 = vadd.f32 %v4570_v23, %v3986_v31  ;;  %v4393_v11 = vrot.slane %v4391_v56, 5  ;;  %v3987_v31 = vadd.f32 %v3919_v8, %v3700_v4 }
 0x275   : > { %v7410_v34 = vpop.f32.mrf.mxu1  ;;  %5138 = vst.msk [vmem:[%s7261_s9 + $0x18] sm:$0xf] %vm5131_vm0, %v5105_v22  ;;  %v5279_v26 = vsel %vm5164_vm2, %v5242_v47, 0.0  ;;  %v3701_v56 = vadd.f32 %v7384_v35, %v6859_v58  ;;  %v4384_v8 = vsel %vm6260_vm12, %v4379_v5, %v7404_v0  ;;  %v3491_v37 = vsel %vm6535_vm1, %v5801_v55, %v3490_v53 }
 0x276   : > { %v5280_v43 = vadd.f32 %v5279_v26, %v5278_v13  ;;  %v4968_v15 = vpop.f32.mrf.mxu0  ;;  %v6088_v13 = vld [vmem:[#allocation2 + $0xbc] sm:$0x1]  ;;  %v4405_v23 = vshll.u32 %v7427_v17, 16  ;;  %v4409_v58 = vshrl.u32 %v7427_v17, 16  ;;  %v4394_v4 = vsel %vm6260_vm12, %v4389_v57, %v4393_v11  ;;  %v7454_v57 = vld [vmem:[#allocation2 + $0xc8] sm:$0x1] }
 0x277   : > { %v5038_v50 = vadd.f32 %v4968_v15, %v4640_v24  ;;  %v3493_v44 = vrot.slane %v6088_v13, 5  ;;  %v4824_v24 = vrot.slane %v4822_v9, 4  ;;  %v4401_v53 = vrot.slane %v4399_v38, 5 }
 0x278   : > { %v3921_v1 = vpop.f32.mrf.mxu2  ;;  %5817 = vmatmul.msk.bf16.gmra.mxu1 %vm1639_vm13, %v3549_v40  ;;  %5914 = vmatmul.msk.bf16.gmra.mxu3 %vm1639_vm13, %v4489_v2  ;;  %v4396_v40 = vshrl.u32 %v4053_v51, 16  ;;  %v7452_v13 = vrot.slane %v4405_v23, 5  ;;  %v4471_v11 = vunpack.c.l.b16 %v4384_v8 }
 0x279   : > { %v5074_v52 = vadd.f32 %v7240_v62, %v5038_v50  ;;  %v3494_v47 = vsel %vm6535_vm1, %v3492_v18, %v3493_v44  ;;  %v1112_v50 = vld [vmem:[#allocation2 + $0xcc] sm:$0xf]  ;;  %v4825_v18 = vrot.slane %v7402_v29, 5 }
 0x27a   : > { %v4398_v5 = vrot.slane %v4396_v40, 4  ;;  %v3533_v42 = vunpack.c.l.b16 %v3494_v47  ;;  %v3988_v40 = vadd.f32 %v3921_v1, %v3701_v56  ;;  %v1113_v38 = vsel %vm6219_vm9, 0, %v1112_v50  ;;  %v6089_v50 = vld [vmem:[#allocation2 + $0xc4] sm:$0xf] }
 0x27b   : > { %v5106_v35 = vpack.c.bf16 %v5074_v52, %v5074_v52  ;;  %v5178_v41 = vsel %vm5164_vm2, %v5074_v52, 0.0  ;;  %v5243_v0 = vmul.f32 %v5074_v52, %v5074_v52  ;;  %v4573_v7 = vpop.f32.mrf.mxu3  ;;  %v4472_v52 = vunpack.c.l.b16 %v4394_v4  ;;  %1114 = vst [vmem:[#allocation2 + $0xcc] sm:$0xf] %v1113_v38 }
 0x27c   : > { %v5179_v2 = vadd.f32 %v5178_v41, %v5177_v14  ;;  %v4641_v26 = vadd.f32 %v4573_v7, %v3987_v31  ;;  %v4411_v14 = vrot.slane %v4409_v58, 4  ;;  %v591_v31 = vld [vmem:[#allocation2 + $0xd4] sm:$0x1]  ;;  %v4402_v47 = vor.u32 %v4401_v53, %v4398_v5 }
 0x27d   : > { %5898 = vmatmul.msk.bf16.gmra.mxu2 %vm1639_vm13, %v6003_v32  ;;  %v7437_v22 = vpop.f32.mrf.mxu1  ;;  %5139 = vst.msk [vmem:[%s7261_s9 + $0x1c] sm:$0xf] %vm5131_vm0, %v5106_v35  ;;  %v5281_v51 = vsel %vm5164_vm2, %v5243_v0, 0.0  ;;  %v3532_v32 = vunpack.c.l.b16 %v3491_v37  ;;  %v4823_v37 = vsel %vm6535_vm1, %v5931_v60, %v4822_v9  ;;  %v592_v8 = vsel %vm6189_vm5, 0, %v591_v31 }
 0x27e   : > { %v5282_v28 = vadd.f32 %v5281_v51, %v5280_v43  ;;  %v4971_v55 = vpop.f32.mrf.mxu0  ;;  %v4826_v1 = vsel %vm6535_vm1, %v4824_v24, %v4825_v18  ;;  %v4412_v25 = vor.u32 %v4411_v14, %v7452_v13  ;;  %v4415_v60 = vshll.u32 %v7454_v57, 16  ;;  %593 = vst [vmem:[#allocation2 + $0xd4] sm:$0x1] %v592_v8  ;;  %v3341_v14 = vld [vmem:[#allocation2 + $0xc0] sm:$0xe] }
 0x27f   : > { %v5039_v44 = vadd.f32 %v4971_v55, %v4641_v26  ;;  %v3550_v43 = vpack.c.b16 %v3533_v42, %v3532_v32  ;;  %v4490_v0 = vpack.c.b16 %v4472_v52, %v4471_v11  ;;  %v4869_v6 = vunpack.c.l.b16 %v4823_v37  ;;  %v6004_v42 = vld [vmem:[#allocation2 + $0xc0] sm:$0xff] }
 0x280   : > { %v3924_v15 = vpop.f32.mrf.mxu2  ;;  %v3702_v24 = vadd.f32 %v7410_v34, %v6870_v59  ;;  %v4870_v26 = vunpack.c.l.b16 %v4826_v1  ;;  %v4403_v5 = vrot.slane %v4402_v47, 4  ;;  %v4413_v53 = vrot.slane %v4412_v25, 4  ;;  %v6090_v59 = vld [vmem:[#allocation2 + $0xc8] sm:$0x1] }
 0x281   : > { %5947 = vmatmul.msk.bf16.gmra.mxu0 %vm1639_vm13, %v7422_v46  ;;  %v5075_v29 = vadd.f32 %v7240_v62, %v5039_v44  ;;  %v3497_v55 = vrot.slane %v6089_v50, 5  ;;  %v5802_v44 = vrot.slane %v3341_v14, 9  ;;  %v3500_v34 = vrot.slane %v6090_v59, 5 }
 0x282   : > { %v3989_v31 = vadd.f32 %v3924_v15, %v3702_v24  ;;  %v4408_v37 = vsel %vm6260_vm12, %v4403_v5, %v7452_v13  ;;  %v4829_v38 = vrot.slane %v7427_v17, 5 }
 0x283   : > { %v5107_v46 = vpack.c.bf16 %v5075_v29, %v5075_v29  ;;  %v5180_v9 = vsel %vm5164_vm2, %v5075_v29, 0.0  ;;  %v5244_v23 = vmul.f32 %v5075_v29, %v5075_v29  ;;  %v4575_v58 = vpop.f32.mrf.mxu3  ;;  %v3499_v11 = vrot.slane %v3497_v55, 4 }
 0x284   : > { %v5181_v35 = vadd.f32 %v5180_v9, %v5179_v2  ;;  %v4642_v41 = vadd.f32 %v4575_v58, %v3988_v40  ;;  %v4417_v2 = vrot.slane %v4415_v60, 5  ;;  %v7479_v40 = vld [vmem:[#allocation2 + $0xd0] sm:$0xf]  ;;  %v3498_v8 = vsel %vm6535_vm1, %v5802_v44, %v3497_v55  ;;  %v4679_v9 = vld [vmem:[#allocation2 + $0xc0] sm:$0xe] }
 0x285   : > { %v7467_v56 = vpop.f32.mrf.mxu1  ;;  %5140 = vst.msk [vmem:[%s7261_s9 + $0x20] sm:$0xf] %vm5131_vm0, %v5107_v46  ;;  %v5283_v7 = vsel %vm5164_vm2, %v5244_v23, 0.0  ;;  %v1116_v29 = vld [vmem:[#allocation2 + $0xd4] sm:$0x1]  ;;  %v3501_v1 = vsel %vm6535_vm1, %v3499_v11, %v3500_v34  ;;  %v4429_v23 = vshll.u32 %v7479_v40, 16  ;;  %v3534_v24 = vunpack.c.l.b16 %v3498_v8 }
 0x286   : > { %v5284_v51 = vadd.f32 %v5283_v7, %v5282_v28  ;;  %v4973_v32 = vpop.f32.mrf.mxu0  ;;  %v4888_v28 = vpack.c.b16 %v4870_v26, %v4869_v6  ;;  %v4418_v15 = vsel %vm6260_vm12, %v4413_v53, %v4417_v2  ;;  %v1117_v13 = vsel %vm6182_vm3, 0, %v1116_v29 }
 0x287   : > { %v5040_v18 = vadd.f32 %v4973_v32, %v4642_v41  ;;  %1118 = vst [vmem:[#allocation2 + $0xd4] sm:$0x1] %v1117_v13  ;;  %v4433_v6 = vshrl.u32 %v7479_v40, 16  ;;  %v3535_v26 = vunpack.c.l.b16 %v3501_v1  ;;  %v3703_v53 = vadd.f32 %v7437_v22, %v6881_v45 }
 0x288   : > { %v3926_v4 = vpop.f32.mrf.mxu2  ;;  %5818 = vmatmul.msk.bf16.gmra.mxu1 %vm1639_vm13, %v3550_v43  ;;  %5915 = vmatmul.msk.bf16.gmra.mxu3 %vm1639_vm13, %v4490_v0  ;;  %v4056_v43 = vld [vmem:[#allocation2 + $0xcc] sm:$0xf]  ;;  %v5932_v2 = vrot.slane %v4679_v9, 9  ;;  %v4831_v55 = vrot.slane %v4829_v38, 4  ;;  %v4431_v44 = vrot.slane %v4429_v23, 5  ;;  %vm5234_vm3 = vcmask 57344  }
 0x289   : > { %v5076_v52 = vadd.f32 %v7240_v62, %v5040_v18  ;;  %v4420_v0 = vshrl.u32 %v4056_v43, 16  ;;  %v4423_v5 = vshll.u32 %v4056_v43, 16  ;;  %v4832_v18 = vrot.slane %v7454_v57, 5 }
 0x28a   : > { %v3990_v14 = vadd.f32 %v3926_v4, %v3703_v53  ;;  %v4435_v11 = vrot.slane %v4433_v6, 4  ;;  %v4830_v43 = vsel %vm6535_vm1, %v5932_v2, %v4829_v38  ;;  %v3704_v38 = vadd.f32 %v7467_v56, %v6895_v54 }
 0x28b   : > { %v5108_v17 = vpack.c.bf16 %v5076_v52, %v5076_v52  ;;  %v5182_v25 = vsel %vm5164_vm2, %v5076_v52, 0.0  ;;  %v5245_v60 = vmul.f32 %v5076_v52, %v5076_v52  ;;  %v4578_v46 = vpop.f32.mrf.mxu3  ;;  %v4422_v34 = vrot.slane %v4420_v0, 4 }
 0x28c   : > { %v5183_v58 = vadd.f32 %v5182_v25, %v5181_v35  ;;  %v4643_v41 = vadd.f32 %v4578_v46, %v3989_v31  ;;  %v4473_v35 = vunpack.c.l.b16 %v4408_v37  ;;  %v4474_v31 = vunpack.c.l.b16 %v4418_v15 }
 0x28d   : > { %5899 = vmatmul.msk.bf16.gmra.mxu2 %vm1639_vm13, %v6004_v42  ;;  %v7489_v47 = vpop.f32.mrf.mxu1  ;;  %5141 = vst.msk [vmem:[%s7261_s9 + $0x24] sm:$0xf] %vm5131_vm0, %v5108_v17  ;;  %v5285_v7 = vsel %vm5164_vm2, %v5245_v60, 0.0  ;;  %v4425_v52 = vrot.slane %v4423_v5, 5  ;;  %v4833_v1 = vsel %vm6535_vm1, %v4831_v55, %v4832_v18  ;;  %v4436_v60 = vor.u32 %v4435_v11, %v4431_v44 }
 0x28e   : > { %v5286_v32 = vadd.f32 %v5285_v7, %v5284_v51  ;;  %v4976_v42 = vpop.f32.mrf.mxu0  ;;  %v3551_v51 = vpack.c.b16 %v3535_v26, %v3534_v24  ;;  %v7510_v45 = vld [vmem:[#allocation2 + $0xd4] sm:$0x1]  ;;  %v4491_v8 = vpack.c.b16 %v4474_v31, %v4473_v35  ;;  %v4871_v0 = vunpack.c.l.b16 %v4830_v43 }
 0x28f   : > { %v5041_v50 = vadd.f32 %v4976_v42, %v4643_v41  ;;  %v4426_v25 = vor.u32 %v4425_v52, %v4422_v34  ;;  %v4439_v46 = vshll.u32 %v7510_v45, 16  ;;  %v4872_v6 = vunpack.c.l.b16 %v4833_v1 }
 0x290   : > { %v3929_v3 = vpop.f32.mrf.mxu2  ;;  %v4437_v5 = vrot.slane %v4436_v60, 4  ;;  %v4836_v34 = vrot.slane %v7479_v40, 5 }
 0x291   : > { %5948 = vmatmul.msk.bf16.gmra.mxu0 %vm1639_vm13, %v4888_v28  ;;  %v5077_v59 = vadd.f32 %v7240_v62, %v5041_v50  ;;  %v3991_v7 = vadd.f32 %v3929_v3, %v3704_v38  ;;  %v4427_v26 = vrot.slane %v4426_v25, 4  ;;  %v4441_v42 = vrot.slane %v4439_v46, 5 }
 0x292   : > { %v4889_v3 = vpack.c.b16 %v4872_v6, %v4871_v0  ;;  %v4838_v43 = vrot.slane %v4836_v34, 4 }
 0x293   : > { %v5109_v22 = vpack.c.bf16 %v5077_v59, %v5077_v59  ;;  %v5184_v37 = vsel %vm5164_vm2, %v5077_v59, 0.0  ;;  %v5246_v57 = vmul.f32 %v5077_v59, %v5077_v59  ;;  %v4580_v4 = vpop.f32.mrf.mxu3  ;;  %v4432_v18 = vsel %vm6260_vm12, %v4427_v26, %v4431_v44 }
 0x294   : > { %v5185_v15 = vadd.f32 %v5184_v37, %v5183_v58  ;;  %v4644_v28 = vadd.f32 %v4580_v4, %v3990_v14  ;;  %v6005_v58 = vld [vmem:[#allocation2 + $0xcc] sm:$0xff]  ;;  %v4442_v14 = vsel %vm6260_vm12, %v4437_v5, %v4441_v42 }
 0x295   : > { %v7508_v29 = vpop.f32.mrf.mxu1  ;;  %5142 = vst.msk [vmem:[%s7261_s9 + $0x28] sm:$0xf] %vm5131_vm0, %v5109_v22  ;;  %v5287_v13 = vsel %vm5164_vm2, %v5246_v57, 0.0  ;;  %v4680_v22 = vld [vmem:[#allocation2 + $0xcc] sm:$0xe]  ;;  %v4475_v57 = vunpack.c.l.b16 %v4432_v18  ;;  %v4476_v4 = vunpack.c.l.b16 %v4442_v14 }
 0x296   : > { %v5288_v9 = vadd.f32 %v5287_v13, %v5286_v32  ;;  %v4978_v23 = vpop.f32.mrf.mxu0  ;;  %v5933_v36 = vrot.slane %v4680_v22, 9 }
 0x297   : > { %v5042_v41 = vadd.f32 %v4978_v23, %v4644_v28  ;;  %v3706_v23 = vadd.f32 %v7508_v29, %v6926_v16 }
 0x298   : > { %v3931_v17 = vpop.f32.mrf.mxu2  ;;  %5819 = vmatmul.msk.bf16.gmra.mxu1 %vm1639_vm13, %v3551_v51  ;;  %5916 = vmatmul.msk.bf16.gmra.mxu3 %vm1639_vm13, %v4491_v8  ;;  %v3705_v51 = vadd.f32 %v7489_v47, %v6908_v19 }
 0x299   : > { %v5078_v24 = vadd.f32 %v7240_v62, %v5042_v41 }
 0x29a   : > { %v3992_v37 = vadd.f32 %v3931_v17, %v3705_v51  ;;  %v4492_v17 = vpack.c.b16 %v4476_v4, %v4475_v57 }
 0x29b   : > { %v5110_v53 = vpack.c.bf16 %v5078_v24, %v5078_v24  ;;  %v5186_v2 = vsel %vm5164_vm2, %v5078_v24, 0.0  ;;  %v5247_v54 = vmul.f32 %v5078_v24, %v5078_v24  ;;  %v4583_v56 = vpop.f32.mrf.mxu3 }
 0x29c   : > { %v5187_v50 = vadd.f32 %v5186_v2, %v5185_v15  ;;  %v4645_v35 = vadd.f32 %v4583_v56, %v3991_v7  ;;  %v4839_v15 = vrot.slane %v7510_v45, 5  ;;  %v4837_v45 = vsel %vm6535_vm1, %v5933_v36, %v4836_v34 }
 0x29d   : > { %5900 = vmatmul.msk.bf16.gmra.mxu2 %vm1639_vm13, %v6005_v58  ;;  %v3649_v32 = vpop.f32.mrf.mxu1  ;;  %5143 = vst.msk [vmem:[%s7261_s9 + $0x2c] sm:$0xf] %vm5131_vm0, %v5110_v53  ;;  %v5289_v55 = vsel %vm5164_vm2, %v5247_v54, 0.0  ;;  %v4873_v6 = vunpack.c.l.b16 %v4837_v45 }
 0x29e   : > { %v5290_v11 = vadd.f32 %v5289_v55, %v5288_v9  ;;  %v4981_v59 = vpop.f32.mrf.mxu0  ;;  %v4840_v38 = vsel %vm6535_vm1, %v4838_v43, %v4839_v15 }
 0x29f   : > { %v5043_v52 = vadd.f32 %v4981_v59, %v4645_v35  ;;  %v4874_v7 = vunpack.c.l.b16 %v4840_v38 }
 0x2a0   : > { %v3934_v31 = vpop.f32.mrf.mxu2 }
 0x2a1   : > { %5949 = vmatmul.msk.bf16.gmra.mxu0 %vm1639_vm13, %v4889_v3  ;;  %v5079_v44 = vadd.f32 %v7240_v62, %v5043_v52  ;;  %v3993_v41 = vadd.f32 %v3934_v31, %v3706_v23  ;;  %v4890_v2 = vpack.c.b16 %v4874_v7, %v4873_v6  ;;  %v7562_v3 = vld [vmem:[%s7691_s4] ss:$0 sm:$0xff] }
 0x2a3   : > { %v5111_v8 = vpack.c.bf16 %v5079_v44, %v5079_v44  ;;  %v5188_v19 = vsel %vm5164_vm2, %v5079_v44, 0.0  ;;  %v5248_v47 = vmul.f32 %v5079_v44, %v5079_v44  ;;  %v4585_v40 = vpop.f32.mrf.mxu3 }
 0x2a4   : > { %v5189_v1 = vadd.f32 %v5188_v19, %v5187_v50  ;;  %v4646_v13 = vadd.f32 %v4585_v40, %v3992_v37 }
 0x2a5   : > { %v3652_v28 = vpop.f32.mrf.mxu1  ;;  %5144 = vst.msk [vmem:[%s7261_s9 + $0x30] sm:$0xf] %vm5131_vm0, %v5111_v8  ;;  %v5291_v25 = vsel %vm5164_vm2, %v5248_v47, 0.0 }
 0x2a6   : > { %v5292_v46 = vadd.f32 %v5291_v25, %v5290_v11  ;;  %v4983_v9 = vpop.f32.mrf.mxu0  ;;  %v3708_v57 = vadd.f32 %v3652_v28, %v6962_v61 }
 0x2a7   : > { %v5044_v58 = vadd.f32 %v4983_v9, %v4646_v13 }
 0x2a8   : > { %v3936_v60 = vpop.f32.mrf.mxu2  ;;  %5917 = vmatmul.msk.bf16.gmra.mxu3 %vm1639_vm13, %v4492_v17 }
 0x2a9   : > { %v5080_v0 = vadd.f32 %v7240_v62, %v5044_v58  ;;  %v3707_v62 = vadd.f32 %v3649_v32, %v6942_v49 }
 0x2ab   : > { %v5112_v26 = vpack.c.bf16 %v5080_v0, %v5080_v0  ;;  %v5190_v5 = vsel %vm5164_vm2, %v5080_v0, 0.0  ;;  %v5249_v16 = vmul.f32 %v5080_v0, %v5080_v0  ;;  %v4588_v29 = vpop.f32.mrf.mxu3  ;;  %v3994_v55 = vadd.f32 %v3936_v60, %v3707_v62 }
 0x2ac   : > { %v5191_v42 = vadd.f32 %v5190_v5, %v5189_v1  ;;  %v4647_v53 = vadd.f32 %v4588_v29, %v3993_v41 }
 0x2ad   : > { %v3654_v24 = vpop.f32.mrf.mxu1  ;;  %5145 = vst.msk [vmem:[%s7261_s9 + $0x34] sm:$0xf] %vm5131_vm0, %v5112_v26  ;;  %v5293_v21 = vsel %vm5164_vm2, %v5249_v16, 0.0 }
 0x2ae   : > { %v5294_v56 = vadd.f32 %v5293_v21, %v5292_v46  ;;  %v4986_v50 = vpop.f32.mrf.mxu0  ;;  %v3709_v28 = vadd.f32 %v3654_v24, %v6974_v48 }
 0x2af   : > { %v5045_v35 = vadd.f32 %v4986_v50, %v4647_v53 }
 0x2b0   : > { %v3939_v54 = vpop.f32.mrf.mxu2 }
 0x2b1   : > { %5950 = vmatmul.msk.bf16.gmra.mxu0 %vm1639_vm13, %v4890_v2  ;;  %v5081_v18 = vadd.f32 %v7562_v3, %v5045_v35  ;;  %v3995_v44 = vadd.f32 %v3939_v54, %v3708_v57 }
 0x2b3   : > { %v5113_v31 = vpack.c.bf16 %v5081_v18, %v5081_v18  ;;  %v5192_v11 = vsel %vm5164_vm2, %v5081_v18, 0.0  ;;  %v5250_v59 = vmul.f32 %v5081_v18, %v5081_v18  ;;  %v4590_v51 = vpop.f32.mrf.mxu3 }
 0x2b4   : > { %v5193_v34 = vadd.f32 %v5192_v11, %v5191_v42  ;;  %v4648_v52 = vadd.f32 %v4590_v51, %v3994_v55 }
 0x2b5   : > { %v3657_v14 = vpop.f32.mrf.mxu1  ;;  %5146 = vst.msk [vmem:[%s7261_s9 + $0x38] sm:$0xf] %vm5131_vm0, %v5113_v31  ;;  %v5295_v49 = vsel %vm5164_vm2, %v5250_v59, 0.0 }
 0x2b6   : > { %v5296_v22 = vadd.f32 %v5295_v49, %v5294_v56  ;;  %v4988_v37 = vpop.f32.mrf.mxu0  ;;  %v3710_v24 = vadd.f32 %v3657_v14, %v6992_v20 }
 0x2b7   : > { %v5046_v4 = vadd.f32 %v4988_v37, %v4648_v52 }
 0x2b8   : > { %v3941_v32 = vpop.f32.mrf.mxu2 }
 0x2b9   : > { %v5082_v36 = vadd.f32 %v7562_v3, %v5046_v4  ;;  %v3996_v46 = vadd.f32 %v3941_v32, %v3709_v28 }
 0x2bb   : > { %v5114_v15 = vpack.c.bf16 %v5082_v36, %v5082_v36  ;;  %v5194_v8 = vsel %vm5164_vm2, %v5082_v36, 0.0  ;;  %v5251_v19 = vmul.f32 %v5082_v36, %v5082_v36  ;;  %v4593_v47 = vpop.f32.mrf.mxu3 }
 0x2bc   : > { %v5195_v40 = vadd.f32 %v5194_v8, %v5193_v34  ;;  %v4649_v1 = vadd.f32 %v4593_v47, %v3995_v44 }
 0x2bd   : > { %v3659_v43 = vpop.f32.mrf.mxu1  ;;  %5147 = vst.msk [vmem:[%s7261_s9 + $0x3c] sm:$0xf] %vm5131_vm0, %v5114_v15  ;;  %v5297_v13 = vsel %vm5164_vm2, %v5251_v19, 0.0 }
 0x2be   : > { %v5298_v25 = vadd.f32 %v5297_v13, %v5296_v22  ;;  %v4991_v61 = vpop.f32.mrf.mxu0  ;;  %v3711_v14 = vadd.f32 %v3659_v43, %v7008_v63 }
 0x2bf   : > { %v5047_v60 = vadd.f32 %v4991_v61, %v4649_v1 }
 0x2c0   : > { %v3944_v17 = vpop.f32.mrf.mxu2 }
 0x2c1   : > { %v5083_v9 = vadd.f32 %v7562_v3, %v5047_v60  ;;  %v3997_v29 = vadd.f32 %v3944_v17, %v3710_v24 }
 0x2c3   : > { %v5115_v45 = vpack.c.bf16 %v5083_v9, %v5083_v9  ;;  %v5196_v38 = vsel %vm5164_vm2, %v5083_v9, 0.0  ;;  %v5252_v58 = vmul.f32 %v5083_v9, %v5083_v9  ;;  %v4595_v41 = vpop.f32.mrf.mxu3 }
 0x2c4   : > { %v5197_v0 = vadd.f32 %v5196_v38, %v5195_v40  ;;  %v4650_v6 = vadd.f32 %v4595_v41, %v3996_v46 }
 0x2c5   : > { %v3662_v23 = vpop.f32.mrf.mxu1  ;;  %5148 = vst.msk [vmem:[%s7261_s9 + $0x40] sm:$0xf] %vm5131_vm0, %v5115_v45  ;;  %v5299_v7 = vsel %vm5164_vm2, %v5252_v58, 0.0 }
 0x2c6   : > { %v5300_v5 = vadd.f32 %v5299_v7, %v5298_v25  ;;  %v4993_v48 = vpop.f32.mrf.mxu0  ;;  %v3712_v36 = vadd.f32 %v3662_v23, %v7028_v12 }
 0x2c7   : > { %v5048_v16 = vadd.f32 %v4993_v48, %v4650_v6 }
 0x2c8   : > { %v3946_v26 = vpop.f32.mrf.mxu2 }
 0x2c9   : > { %v5084_v42 = vadd.f32 %v7562_v3, %v5048_v16  ;;  %v3998_v11 = vadd.f32 %v3946_v26, %v3711_v14 }
 0x2cb   : > { %v5116_v21 = vpack.c.bf16 %v5084_v42, %v5084_v42  ;;  %v5198_v2 = vsel %vm5164_vm2, %v5084_v42, 0.0  ;;  %v5253_v54 = vmul.f32 %v5084_v42, %v5084_v42  ;;  %v4598_v56 = vpop.f32.mrf.mxu3 }
 0x2cc   : > { %v5199_v50 = vadd.f32 %v5198_v2, %v5197_v0  ;;  %v4651_v62 = vadd.f32 %v4598_v56, %v3997_v29 }
 0x2cd   : > { %v3664_v53 = vpop.f32.mrf.mxu1  ;;  %5149 = vst.msk [vmem:[%s7261_s9 + $0x44] sm:$0xf] %vm5131_vm0, %v5116_v21  ;;  %v5301_v35 = vsel %vm5164_vm2, %v5253_v54, 0.0 }
 0x2ce   : > { %v5302_v18 = vadd.f32 %v5301_v35, %v5300_v5  ;;  %v4996_v20 = vpop.f32.mrf.mxu0  ;;  %v3713_v46 = vadd.f32 %v3664_v53, %v7040_v10 }
 0x2cf   : > { %v5049_v31 = vadd.f32 %v4996_v20, %v4651_v62 }
 0x2d0   : > { %v3949_v55 = vpop.f32.mrf.mxu2 }
 0x2d1   : > { %v5085_v59 = vadd.f32 %v7562_v3, %v5049_v31  ;;  %v3999_v15 = vadd.f32 %v3949_v55, %v3712_v36 }
 0x2d3   : > { %v5117_v34 = vpack.c.bf16 %v5085_v59, %v5085_v59  ;;  %v5200_v52 = vsel %vm5164_vm2, %v5085_v59, 0.0  ;;  %v5254_v49 = vmul.f32 %v5085_v59, %v5085_v59  ;;  %v4600_v32 = vpop.f32.mrf.mxu3 }
 0x2d4   : > { %v5201_v22 = vadd.f32 %v5200_v52, %v5199_v50  ;;  %v4652_v37 = vadd.f32 %v4600_v32, %v3998_v11 }
 0x2d5   : > { %v3667_v51 = vpop.f32.mrf.mxu1  ;;  %5150 = vst.msk [vmem:[%s7261_s9 + $0x48] sm:$0xf] %vm5131_vm0, %v5117_v34  ;;  %v5303_v57 = vsel %vm5164_vm2, %v5254_v49, 0.0 }
 0x2d6   : > { %v5304_v44 = vadd.f32 %v5303_v57, %v5302_v18  ;;  %v4998_v63 = vpop.f32.mrf.mxu0  ;;  %v3714_v16 = vadd.f32 %v3667_v51, %v7058_v30 }
 0x2d7   : > { %v5050_v43 = vadd.f32 %v4998_v63, %v4652_v37 }
 0x2d8   : > { %v3951_v4 = vpop.f32.mrf.mxu2 }
 0x2d9   : > { %v5086_v8 = vadd.f32 %v7562_v3, %v5050_v43  ;;  %v4000_v23 = vadd.f32 %v3951_v4, %v3713_v46 }
 0x2db   : > { %v5118_v19 = vpack.c.bf16 %v5086_v8, %v5086_v8  ;;  %v5202_v47 = vsel %vm5164_vm2, %v5086_v8, 0.0  ;;  %v5255_v40 = vmul.f32 %v5086_v8, %v5086_v8  ;;  %v4603_v1 = vpop.f32.mrf.mxu3 }
 0x2dc   : > { %v5203_v17 = vadd.f32 %v5202_v47, %v5201_v22  ;;  %v4653_v25 = vadd.f32 %v4603_v1, %v3999_v15 }
 0x2dd   : > { %v3669_v13 = vpop.f32.mrf.mxu1  ;;  %5151 = vst.msk [vmem:[%s7261_s9 + $0x4c] sm:$0xf] %vm5131_vm0, %v5118_v19  ;;  %v5305_v61 = vsel %vm5164_vm2, %v5255_v40, 0.0 }
 0x2de   : > { %v5306_v60 = vadd.f32 %v5305_v61, %v5304_v44  ;;  %v5001_v12 = vpop.f32.mrf.mxu0  ;;  %v3715_v30 = vadd.f32 %v3669_v13, %v7074_v33 }
 0x2df   : > { %v5051_v9 = vadd.f32 %v5001_v12, %v4653_v25 }
 0x2e0   : > { %v3954_v28 = vpop.f32.mrf.mxu2 }
 0x2e1   : > { %v5087_v45 = vadd.f32 %v7562_v3, %v5051_v9  ;;  %v4001_v42 = vadd.f32 %v3954_v28, %v3714_v16 }
 0x2e3   : > { %v5119_v38 = vpack.c.bf16 %v5087_v45, %v5087_v45  ;;  %v5204_v58 = vsel %vm5164_vm2, %v5087_v45, 0.0  ;;  %v5256_v41 = vmul.f32 %v5087_v45, %v5087_v45  ;;  %v4605_v0 = vpop.f32.mrf.mxu3 }
 0x2e4   : > { %v5205_v6 = vadd.f32 %v5204_v58, %v5203_v17  ;;  %v4654_v7 = vadd.f32 %v4605_v0, %v4000_v23 }
 0x2e5   : > { %5152 = vst.msk [vmem:[%s7261_s9 + $0x50] sm:$0xf] %vm5131_vm0, %v5119_v38  ;;  %v5307_v26 = vsel %vm5164_vm2, %v5256_v41, 0.0  ;;  %v3672_v48 = vpop.f32.mrf.mxu1 }
 0x2e6   : > { %v5308_v24 = vadd.f32 %v5307_v26, %v5306_v60  ;;  %v5003_v10 = vpop.f32.mrf.mxu0  ;;  %v3716_v44 = vadd.f32 %v3672_v48, %v7094_v27 }
 0x2e7   : > { %v5052_v29 = vadd.f32 %v5003_v10, %v4654_v7 }
 0x2e8   : > { %v3956_v5 = vpop.f32.mrf.mxu2 }
 0x2e9   : > { %v5088_v53 = vadd.f32 %v7562_v3, %v5052_v29  ;;  %v4002_v11 = vadd.f32 %v3956_v5, %v3715_v30  ;;  %v7729_v5 = vld [vmem:[#allocation11_spill] sm:$0xff] }
 0x2eb   : > { %v5120_v21 = vpack.c.bf16 %v5088_v53, %v5088_v53  ;;  %v5206_v2 = vsel %vm5164_vm2, %v5088_v53, 0.0  ;;  %v5257_v54 = vmul.f32 %v5088_v53, %v5088_v53  ;;  %v4608_v56 = vpop.f32.mrf.mxu3 }
 0x2ec   : > { %v5207_v50 = vadd.f32 %v5206_v2, %v5205_v6  ;;  %v4655_v62 = vadd.f32 %v4608_v56, %v4001_v42 }
 0x2ed   : > { %5153 = vst.msk [vmem:[%s7261_s9 + $0x54] sm:$0xf] %vm5131_vm0, %v5120_v21  ;;  %v5309_v35 = vsel %vm5164_vm2, %v5257_v54, 0.0  ;;  %v3674_v31 = vpop.f32.mrf.mxu1 }
 0x2ee   : > { %v5310_v18 = vadd.f32 %v5309_v35, %v5308_v24  ;;  %v5006_v20 = vpop.f32.mrf.mxu0  ;;  %v3717_v28 = vadd.f32 %v3674_v31, %v7106_v39 }
 0x2ef   : > { %v5053_v14 = vadd.f32 %v5006_v20, %v4655_v62 }
 0x2f0   : > { %v3959_v55 = vpop.f32.mrf.mxu2 }
 0x2f1   : > { %v5089_v59 = vadd.f32 %v7562_v3, %v5053_v14  ;;  %v4003_v36 = vadd.f32 %v3959_v55, %v3716_v44  ;;  %v7730_v55 = vld [vmem:[#allocation12_spill] sm:$0xff] }
 0x2f3   : > { %v5121_v51 = vpack.c.bf16 %v5089_v59, %v5089_v59  ;;  %v5208_v34 = vsel %vm5164_vm2, %v5089_v59, 0.0  ;;  %v5258_v52 = vmul.f32 %v5089_v59, %v5089_v59  ;;  %v4610_v49 = vpop.f32.mrf.mxu3 }
 0x2f4   : > { %v5209_v32 = vadd.f32 %v5208_v34, %v5207_v50  ;;  %v4656_v22 = vadd.f32 %v4610_v49, %v4002_v11 }
 0x2f5   : > { %5154 = vst.msk [vmem:[%s7261_s9 + $0x58] sm:$0xf] %vm5131_vm0, %v5121_v51  ;;  %v5311_v37 = vsel %vm5164_vm2, %v5258_v52, 0.0  ;;  %v3677_v15 = vpop.f32.mrf.mxu1 }
 0x2f6   : > { %v5312_v4 = vadd.f32 %v5311_v37, %v5310_v18  ;;  %v5008_v33 = vpop.f32.mrf.mxu0  ;;  %v3718_v48 = vadd.f32 %v3677_v15, %v7729_v5 }
 0x2f7   : > { %v5054_v63 = vadd.f32 %v5008_v33, %v4656_v22 }
 0x2f8   : > { %v3961_v57 = vpop.f32.mrf.mxu2 }
 0x2f9   : > { %v5090_v43 = vadd.f32 %v7562_v3, %v5054_v63  ;;  %v4004_v12 = vadd.f32 %v3961_v57, %v3717_v28  ;;  %v7731_v57 = vld [vmem:[#allocation3_spill] sm:$0xff] }
 0x2fb   : > { %v5122_v8 = vpack.c.bf16 %v5090_v43, %v5090_v43  ;;  %v5210_v19 = vsel %vm5164_vm2, %v5090_v43, 0.0  ;;  %v5259_v47 = vmul.f32 %v5090_v43, %v5090_v43  ;;  %v4613_v40 = vpop.f32.mrf.mxu3 }
 0x2fc   : > { %v5211_v1 = vadd.f32 %v5210_v19, %v5209_v32  ;;  %v4657_v13 = vadd.f32 %v4613_v40, %v4003_v36 }
 0x2fd   : > { %5155 = vst.msk [vmem:[%s7261_s9 + $0x5c] sm:$0xf] %vm5131_vm0, %v5122_v8  ;;  %v5313_v17 = vsel %vm5164_vm2, %v5259_v47, 0.0  ;;  %v3679_v58 = vpop.f32.mrf.mxu1 }
 0x2fe   : > { %v5314_v61 = vadd.f32 %v5313_v17, %v5312_v4  ;;  %v5011_v27 = vpop.f32.mrf.mxu0  ;;  %v3719_v18 = vadd.f32 %v3679_v58, %v7730_v55  ;;  %v7734_v55 = vld [vmem:[#allocation14_spill] sm:$0xff] }
 0x2ff   : > { %v5055_v60 = vadd.f32 %v5011_v27, %v4657_v13 }
 0x300   : > { %v3964_v25 = vpop.f32.mrf.mxu2 }
 0x301   : > { %v5091_v46 = vadd.f32 %v7562_v3, %v5055_v60  ;;  %v4005_v10 = vadd.f32 %v3964_v25, %v3718_v48 }
 0x303   : > { %v5123_v9 = vpack.c.bf16 %v5091_v46, %v5091_v46  ;;  %v5212_v23 = vsel %vm5164_vm2, %v5091_v46, 0.0  ;;  %v5260_v45 = vmul.f32 %v5091_v46, %v5091_v46  ;;  %v4615_v38 = vpop.f32.mrf.mxu3 }
 0x304   : > { %v5213_v41 = vadd.f32 %v5212_v23, %v5211_v1  ;;  %v4658_v0 = vadd.f32 %v4615_v38, %v4004_v12 }
 0x305   : > { %5156 = vst.msk [vmem:[%s7261_s9 + $0x60] sm:$0xf] %vm5131_vm0, %v5123_v9  ;;  %v5315_v6 = vsel %vm5164_vm2, %v5260_v45, 0.0  ;;  %v3682_v50 = vpop.f32.mrf.mxu1 }
 0x306   : > { %v5316_v26 = vadd.f32 %v5315_v6, %v5314_v61  ;;  %v5013_v39 = vpop.f32.mrf.mxu0  ;;  %v3720_v4 = vadd.f32 %v3682_v50, %v7731_v57  ;;  %v7732_v61 = vld [vmem:[#allocation4_spill] sm:$0xff] }
 0x307   : > { %v5056_v24 = vadd.f32 %v5013_v39, %v4658_v0  ;;  %v7733_v39 = vld [vmem:[#allocation13_spill] sm:$0xff] }
 0x308   : > { %v3966_v7 = vpop.f32.mrf.mxu2 }
 0x309   : > { %v5092_v16 = vadd.f32 %v7562_v3, %v5056_v24  ;;  %v4006_v14 = vadd.f32 %v3966_v7, %v3719_v18 }
 0x30b   : > { %v5124_v29 = vpack.c.bf16 %v5092_v16, %v5092_v16  ;;  %v5214_v42 = vsel %vm5164_vm2, %v5092_v16, 0.0  ;;  %v5261_v53 = vmul.f32 %v5092_v16, %v5092_v16  ;;  %v4618_v21 = vpop.f32.mrf.mxu3 }
 0x30c   : > { %v5215_v2 = vadd.f32 %v5214_v42, %v5213_v41  ;;  %v4659_v54 = vadd.f32 %v4618_v21, %v4005_v10 }
 0x30d   : > { %5157 = vst.msk [vmem:[%s7261_s9 + $0x64] sm:$0xf] %vm5131_vm0, %v5124_v29  ;;  %v5317_v56 = vsel %vm5164_vm2, %v5261_v53, 0.0  ;;  %v3684_v44 = vpop.f32.mrf.mxu1 }
 0x30e   : > { %v5318_v62 = vadd.f32 %v5317_v56, %v5316_v26  ;;  %v5016_v35 = vpop.f32.mrf.mxu0  ;;  %v3721_v27 = vadd.f32 %v3684_v44, %v7732_v61 }
 0x30f   : > { %v5057_v20 = vadd.f32 %v5016_v35, %v4659_v54 }
 0x310   : > { %v3969_v30 = vpop.f32.mrf.mxu2 }
 0x311   : > { %v5093_v31 = vadd.f32 %v7562_v3, %v5057_v20  ;;  %v4007_v63 = vadd.f32 %v3969_v30, %v3720_v4 }
 0x313   : > { %v5125_v11 = vpack.c.bf16 %v5093_v31, %v5093_v31  ;;  %v5216_v59 = vsel %vm5164_vm2, %v5093_v31, 0.0  ;;  %v5262_v51 = vmul.f32 %v5093_v31, %v5093_v31  ;;  %v4620_v34 = vpop.f32.mrf.mxu3 }
 0x314   : > { %v5217_v52 = vadd.f32 %v5216_v59, %v5215_v2  ;;  %v4660_v49 = vadd.f32 %v4620_v34, %v4006_v14 }
 0x315   : > { %5158 = vst.msk [vmem:[%s7261_s9 + $0x68] sm:$0xf] %vm5131_vm0, %v5125_v11  ;;  %v5319_v32 = vsel %vm5164_vm2, %v5262_v51, 0.0  ;;  %v3687_v46 = vpop.f32.mrf.mxu1 }
 0x316   : > { %v5320_v22 = vadd.f32 %v5319_v32, %v5318_v62  ;;  %v5018_v37 = vpop.f32.mrf.mxu0  ;;  %v3722_v5 = vadd.f32 %v3687_v46, %v7733_v39 }
 0x317   : > { %v5058_v33 = vadd.f32 %v5018_v37, %v4660_v49 }
 0x318   : > { %v3971_v43 = vpop.f32.mrf.mxu2 }
 0x319   : > { %v5094_v36 = vadd.f32 %v7562_v3, %v5058_v33  ;;  %v4008_v60 = vadd.f32 %v3971_v43, %v3721_v27 }
 0x31b   : > { %v5126_v15 = vpack.c.bf16 %v5094_v36, %v5094_v36  ;;  %v5218_v8 = vsel %vm5164_vm2, %v5094_v36, 0.0  ;;  %v5263_v19 = vmul.f32 %v5094_v36, %v5094_v36  ;;  %v4623_v47 = vpop.f32.mrf.mxu3 }
 0x31c   : > { %v5219_v40 = vadd.f32 %v5218_v8, %v5217_v52  ;;  %v4661_v1 = vadd.f32 %v4623_v47, %v4007_v63 }
 0x31d   : > { %5159 = vst.msk [vmem:[%s7261_s9 + $0x6c] sm:$0xf] %vm5131_vm0, %v5126_v15  ;;  %v5321_v13 = vsel %vm5164_vm2, %v5263_v19, 0.0  ;;  %v3689_v21 = vpop.f32.mrf.mxu1 }
 0x31e   : > { %v5322_v17 = vadd.f32 %v5321_v13, %v5320_v22  ;;  %v5021_v25 = vpop.f32.mrf.mxu0  ;;  %v3723_v18 = vadd.f32 %v3689_v21, %v7734_v55 }
 0x31f   : > { %v5059_v28 = vadd.f32 %v5021_v25, %v4661_v1 }
 0x320   : > { %v3974_v58 = vpop.f32.mrf.mxu2 }
 0x321   : > { %v5095_v12 = vadd.f32 %v7562_v3, %v5059_v28  ;;  %v4009_v24 = vadd.f32 %v3974_v58, %v3722_v5 }
 0x323   : > { %v5127_v9 = vpack.c.bf16 %v5095_v12, %v5095_v12  ;;  %v5220_v23 = vsel %vm5164_vm2, %v5095_v12, 0.0  ;;  %v5264_v45 = vmul.f32 %v5095_v12, %v5095_v12  ;;  %v4625_v38 = vpop.f32.mrf.mxu3 }
 0x324   : > { %v5221_v41 = vadd.f32 %v5220_v23, %v5219_v40  ;;  %v4662_v0 = vadd.f32 %v4625_v38, %v4008_v60 }
 0x325   : > { %5160 = vst.msk [vmem:[%s7261_s9 + $0x70] sm:$0xf] %vm5131_vm0, %v5127_v9  ;;  %v5323_v6 = vsel %vm5164_vm2, %v5264_v45, 0.0 }
 0x326   : > { %v5324_v7 = vadd.f32 %v5323_v6, %v5322_v17  ;;  %v5023_v26 = vpop.f32.mrf.mxu0 }
 0x327   : > { %v5060_v48 = vadd.f32 %v5023_v26, %v4662_v0 }
 0x328   : > { %v3976_v50 = vpop.f32.mrf.mxu2 }
 0x329   : > { %v5096_v10 = vadd.f32 %v7562_v3, %v5060_v48  ;;  %v4010_v30 = vadd.f32 %v3976_v50, %v3723_v18 }
 0x32b   : > { %v5128_v16 = vpack.c.bf16 %v5096_v10, %v5096_v10  ;;  %v5222_v29 = vsel %vm5164_vm2, %v5096_v10, 0.0  ;;  %v5265_v42 = vmul.f32 %v5096_v10, %v5096_v10  ;;  %v4628_v53 = vpop.f32.mrf.mxu3 }
 0x32c   : > { %v5223_v2 = vadd.f32 %v5222_v29, %v5221_v41  ;;  %v4663_v54 = vadd.f32 %v4628_v53, %v4009_v24 }
 0x32d   : > { %5161 = vst.msk [vmem:[%s7261_s9 + $0x74] sm:$0xf] %vm5131_vm0, %v5128_v16  ;;  %v5325_v56 = vsel %vm5164_vm2, %v5265_v42, 0.0 }
 0x32e   : > { %v5326_v62 = vadd.f32 %v5325_v56, %v5324_v7  ;;  %v5026_v35 = vpop.f32.mrf.mxu0 }
 0x32f   : > { %v5061_v20 = vadd.f32 %v5026_v35, %v4663_v54 }
 0x331   : > { %v5097_v14 = vadd.f32 %v7562_v3, %v5061_v20 }
 0x333   : > { %v5129_v31 = vpack.c.bf16 %v5097_v14, %v5097_v14  ;;  %v5224_v11 = vsel %vm5164_vm2, %v5097_v14, 0.0  ;;  %v5266_v59 = vmul.f32 %v5097_v14, %v5097_v14  ;;  %v4630_v51 = vpop.f32.mrf.mxu3 }
 0x334   : > { %v5225_v34 = vadd.f32 %v5224_v11, %v5223_v2  ;;  %v4664_v52 = vadd.f32 %v4630_v51, %v4010_v30 }
 0x335   : > { %5162 = vst.msk [vmem:[%s7261_s9 + $0x78] sm:$0xf] %vm5131_vm0, %v5129_v31  ;;  %v5327_v49 = vsel %vm5164_vm2, %v5266_v59, 0.0 }
 0x336   : > { %v5328_v32 = vadd.f32 %v5327_v49, %v5326_v62  ;;  %v5028_v22 = vpop.f32.mrf.mxu0 }
 0x337   : > { %v5062_v37 = vadd.f32 %v5028_v22, %v4664_v52 }
 0x339   : > { %v5098_v57 = vadd.f32 %v7562_v3, %v5062_v37 }
 0x33b   : > { %v5130_v4 = vpack.c.bf16 %v5098_v57, %v5098_v57  ;;  %v5226_v33 = vsel %vm5164_vm2, %v5098_v57, 0.0  ;;  %v5267_v44 = vmul.f32 %v5098_v57, %v5098_v57 }
 0x33c   : > { %v5227_v63 = vadd.f32 %v5226_v33, %v5225_v34 }
 0x33d   : > { %5163 = vst.msk [vmem:[%s7261_s9 + $0x7c] sm:$0xf] %vm5131_vm0, %v5130_v4  ;;  %v5329_v36 = vsel %vm5164_vm2, %v5267_v44, 0.0 }
 0x33e   : > { %v5228_v43 = vrot.slane %v5227_v63, 4  ;;  %v5330_v15 = vadd.f32 %v5329_v36, %v5328_v32 }
 0x340   : > { %v5229_v8 = vadd.f32 %v5228_v43, %v5227_v63  ;;  %v5331_v19 = vrot.slane %v5330_v15, 4 }
 0x342   : > { %v5230_v47 = vrot.slane %v5229_v8, 2  ;;  %v5332_v40 = vadd.f32 %v5331_v19, %v5330_v15 }
 0x344   : > { %v5231_v1 = vadd.f32 %v5230_v47, %v5229_v8  ;;  %v5333_v13 = vrot.slane %v5332_v40, 2 }
 0x346   : > { %v5232_v3 = vrot.slane %v5231_v1, 1  ;;  %v5334_v17 = vadd.f32 %v5333_v13, %v5332_v40 }
 0x348   : > { %v5233_v25 = vadd.f32 %v5232_v3, %v5231_v1  ;;  %v5335_v61 = vrot.slane %v5334_v17, 1 }
 0x34a   : > { %5235 = vst.msk [vmem:[%s473_s13] sm:$0x1] %vm5234_vm3, %v5233_v25  ;;  %v5336_v27 = vadd.f32 %v5335_v61, %v5334_v17 }
 0x34c   : > { %5337 = vst.msk [vmem:[%s479_s16] sm:$0x1] %vm5234_vm3, %v5336_v27 }
 0x34d PF: > { %s18_s2 = sadd.s32 1, %s6114_s2   ;;  %s7735_s23 = smov %s6110_s24 }
 0x34e   : > { %p15_p5 = scmp.ge.s32.totalorder %s18_s2, 4   ;;  %s7736_s24 = smov %s7738_s25 }
 0x350   :  { %17 = sbr.rel (!%p15_p5) target bundleno = 2 (0x2), region = 128 }

// kernel: double_conv.4
= control target key start
LH: loop header
LB: loop body
LE: loop exit
PB: predicated region body
PF: predicated region fallthrough
CT: control target
= control target key end

     0   :  { %s6508_s28 = smov 0   ;;  %s6510_s29 = smov 0   ;;  %s8267_s0 = inlined_call_operand.vmem [shape: bf16[2,16,16,8], index: 0, kind: input, shape index: {}, may-alias: {0,1,2}]   ;;  %s8268_s1 = inlined_call_operand.vmem [shape: bf16[2,16,16,8], index: 1, kind: input, shape index: {}, may-alias: {0,1,2}]   ;;  %s8269_s2 = inlined_call_operand.vmem [shape: bf16[2,16,16,8], index: 2, kind: input, shape index: {}, may-alias: {0,1,2}]   ;;  %s8270_s3 = inlined_call_operand.vmem [shape: f32[1,8], index: 3, kind: input, shape index: {}]   ;;  %s8271_s4 = inlined_call_operand.vmem [shape: f32[1,8], index: 4, kind: input, shape index: {}]   ;;  %s8272_s5 = inlined_call_operand.vmem [shape: bf16[9,8,8], index: 5, kind: input, shape index: {}]   ;;  %s8273_s6 = inlined_call_operand.vmem [shape: f32[1,8], index: 6, kind: input, shape index: {}]   ;;  %s8274_s7 = inlined_call_operand.vmem [shape: bf16[2,16,16,8], index: 7, kind: output, shape index: {0}]   ;;  %s8275_s8 = inlined_call_operand.vmem [shape: f32[2,1,1,8], index: 8, kind: output, shape index: {1}]   ;;  %s8276_s9 = inlined_call_operand.vmem [shape: f32[2,1,1,8], index: 9, kind: output, shape index: {2}]  }
   0x1   :  { %s6512_s30 = smov 0  }
   0x2 LB: > { %s32_s10 = sadd.s32 1, %s6451_s29  ;;  %p5806_p0 = scmp.ge.s32.totalorder %s6455_s30, 1  ;;  %s6455_s30 = sphi %s6512_s30, %s20_s30   ;;  %s6451_s29 = sphi %s6510_s29, %s8320_s29   ;;  %s6447_s28 = sphi %s6508_s28, %s8319_s28  }
   0x3   : > { %p34_p1 = scmp.ge.s32.totalorder %s32_s10, 2  ;;  %p382_p2 = scmp.lt.s32.totalorder %s6455_s30, 3 }
   0x5   : > { %s8322_s10 = smov (%p34_p1, %s32_s10), 0  ;;  %p383_p3 = pnand %p5806_p0, %p382_p2 }
   0x7   : > { %386 = sbr.rel (%p383_p3) target bundleno = 876 (0x36c), region = 48 }
   0xc   : > { %v5815_v0 = vld [vmem:[%s8272_s5 + $0x4] sm:$0xf]  ;;  %vm1946_vm0 = vcmask 1043456   ;;  %p484_p4 = scmp.lt.s32.totalorder %s6447_s28, 1  ;;  %vm535_vm1 = vcmask 57344   ;;  %vm1171_vm6 = vcmask 60416  }
   0xd   : > { %v1948_v1 = vsel %vm1946_vm0, %v5815_v0, 0  ;;  %vm536_vm2 = vsmask.f32 256  ;;  %v550_v2 = vld [vmem:[#allocation2 + $0x30] sm:$0x1]  ;;  %v6457_v54 = vmov 0  }
   0xe   : > { %6341 = vmatpush.bf16.msra.mxu1 %v1948_v1  ;;  %6342 = vmatpush.bf16.msra.mxu2 %v1948_v1  ;;  %s8324_s28 = smov (!%p484_p4, %s6447_s28), 1  ;;  %vm6534_vm3 = vmand %vm535_vm1, %vm536_vm2  ;;  %vm592_vm4 = vsmask.f32 7938  ;;  %v606_v4 = vld [vmem:[#allocation2 + $0x38] sm:$0x1]  ;;  %vm1897_vm12 = vcmask 64512  }
   0xf   : > { %6343 = vmatpush.bf16.msra.mxu3 %v1948_v1  ;;  %1957 = vmatpush.bf16.msra.mxu0 %v1948_v1  ;;  %v551_v5 = vsel %vm6534_vm3, 0, %v550_v2  ;;  %vm6542_vm5 = vmand %vm535_vm1, %vm592_vm4  ;;  %s6210_s13 = sshll.u32 %s8324_s28, 7  ;;  %v6559_v8 = vld [vmem:[%s8270_s3] ss:$0 sm:$0xff]  ;;  %v618_v15 = vld [vmem:[#allocation2 + $0x68] sm:$0x1]  ;;  %s527_s18 = scalar_lea.vmem %s8275_s8, %s8324_s28 }
  0x10   : > { %552 = vst [vmem:[#allocation2 + $0x30] sm:$0x1] %v551_v5  ;;  %v607_v7 = vsel %vm6542_vm5, 0, %v606_v4  ;;  %s6554_s16 = scalar_lea.vmem %s8268_s1, %s6210_s13  ;;  %v6566_v13 = vld [vmem:[%s8271_s4] ss:$0 sm:$0xff]  ;;  %v619_v19 = vsel %vm6542_vm5, 0, %v618_v15  ;;  %vm6601_vm8 = vmand %vm1171_vm6, %vm592_vm4  ;;  %s7827_s12 = scalar_lea.vmem %s8274_s7, %s6210_s13 }
  0x11   : > { %608 = vst [vmem:[#allocation2 + $0x38] sm:$0x1] %v607_v7  ;;  %v6328_v9 = vld [vmem:[%s6554_s16 + $0x18] sm:$0xff]   ;;  %v562_v14 = vld [vmem:[#allocation2 + $0x60] sm:$0x1]  ;;  %vm2307_vm14 = vcmask 1042432   ;;  %s533_s21 = scalar_lea.vmem %s8276_s9, %s8324_s28 }
  0x12   : > { %v6332_v10 = vld [vmem:[%s6554_s16 + $0x38] sm:$0xff]   ;;  %v6276_v11 = vunpack.c.l.bf16 %v6328_v9  ;;  %v6277_v12 = vunpack.c.h.bf16 %v6328_v9  ;;  %v563_v18 = vsel %vm6534_vm3, 0, %v562_v14  ;;  %v574_v20 = vld [vmem:[#allocation2 + $0x90] sm:$0x1]  ;;  %v538_v27 = vld [vmem:[#allocation2] sm:$0x1] }
  0x13   : > { %v6292_v16 = vunpack.c.l.bf16 %v6332_v10  ;;  %v6293_v17 = vunpack.c.h.bf16 %v6332_v10  ;;  %v630_v21 = vld [vmem:[#allocation2 + $0x98] sm:$0x1]  ;;  %564 = vst [vmem:[#allocation2 + $0x60] sm:$0x1] %v563_v18  ;;  %v575_v28 = vsel %vm6534_vm3, 0, %v574_v20  ;;  %v539_v39 = vsel %vm6534_vm3, 0, %v538_v27 }
  0x14   : > { %v722_v22 = vmul.f32 %v6559_v8, %v6276_v11  ;;  %v723_v23 = vmul.f32 %v6559_v8, %v6277_v12  ;;  %v6336_v26 = vld [vmem:[%s6554_s16 + $0x58] sm:$0xff]   ;;  %620 = vst [vmem:[#allocation2 + $0x68] sm:$0x1] %v619_v19  ;;  %v631_v29 = vsel %vm6542_vm5, 0, %v630_v21  ;;  %v594_v36 = vld [vmem:[#allocation2 + $0x8] sm:$0x1] }
  0x15   : > { %v730_v24 = vmul.f32 %v6559_v8, %v6292_v16  ;;  %v731_v25 = vmul.f32 %v6559_v8, %v6293_v17  ;;  %v6308_v30 = vunpack.c.l.bf16 %v6336_v26  ;;  %v6309_v31 = vunpack.c.h.bf16 %v6336_v26  ;;  %576 = vst [vmem:[#allocation2 + $0x90] sm:$0x1] %v575_v28  ;;  %v6590_v40 = vld [vmem:[%s6554_s16 + $0x20] sm:$0xff]   ;;  %v553_v55 = vld [vmem:[#allocation2 + $0x3c] sm:$0x1] }
  0x16   : > { %v758_v32 = vadd.f32 %v6566_v13, %v722_v22  ;;  %v759_v33 = vadd.f32 %v6566_v13, %v723_v23  ;;  %vm848_vm7 = vsmask.f32 4368  ;;  %632 = vst [vmem:[#allocation2 + $0x98] sm:$0x1] %v631_v29  ;;  %v595_v47 = vsel %vm6542_vm5, 0, %v594_v36 }
  0x17   : > { %v766_v34 = vadd.f32 %v6566_v13, %v730_v24  ;;  %v767_v35 = vadd.f32 %v6566_v13, %v731_v25  ;;  %v738_v37 = vmul.f32 %v6559_v8, %v6308_v30  ;;  %v739_v38 = vmul.f32 %v6559_v8, %v6309_v31  ;;  %540 = vst [vmem:[#allocation2] sm:$0x1] %v539_v39  ;;  %v609_v62 = vld [vmem:[#allocation2 + $0x44] sm:$0x1]  ;;  %v1195_v63 = vld [vmem:[#allocation2 + $0x30] sm:$0xf]  ;;  %vm6608_vm9 = vmor %vm536_vm2, %vm848_vm7 }
  0x18   : > { %v790_v41 = vmax.f32 %v758_v32, 0.0  ;;  %v791_v42 = vmax.f32 %v759_v33, 0.0  ;;  %596 = vst [vmem:[#allocation2 + $0x8] sm:$0x1] %v595_v47  ;;  %v6280_v56 = vunpack.c.l.bf16 %v6590_v40  ;;  %v6281_v57 = vunpack.c.h.bf16 %v6590_v40  ;;  %v1199_v10 = vld [vmem:[#allocation2 + $0x38] sm:$0x1] }
  0x19   : > { %v798_v43 = vmax.f32 %v766_v34, 0.0  ;;  %v799_v44 = vmax.f32 %v767_v35, 0.0  ;;  %v774_v45 = vadd.f32 %v6566_v13, %v738_v37  ;;  %v775_v46 = vadd.f32 %v6566_v13, %v739_v38  ;;  %1293 = vst.msk [vmem:[#allocation2 + $0x4] sm:$0xf] %vm1171_vm6, %v6457_v54  ;;  %v6635_v47 = vld [vmem:[#allocation2 + $0x6c] sm:$0x1] }
  0x1a   : > { %v822_v48 = vpack.c.bf16 %v790_v41, %v790_v41  ;;  %v823_v49 = vpack.c.bf16 %v791_v42, %v791_v42  ;;  %1355 = vst.msk [vmem:[#allocation2 + $0xd0] sm:$0xf] %vm1171_vm6, %v6457_v54  ;;  %v1223_v17 = vld [vmem:[#allocation2 + $0x60] sm:$0xf]  ;;  %v554_v18 = vsel %vm6534_vm3, 0, %v553_v55  ;;  %v610_v19 = vsel %vm6542_vm5, 0, %v609_v62 }
  0x1b   : > { %v830_v50 = vpack.c.bf16 %v798_v43, %v798_v43  ;;  %v831_v51 = vpack.c.bf16 %v799_v44, %v799_v44  ;;  %v806_v52 = vmax.f32 %v774_v45, 0.0  ;;  %v807_v53 = vmax.f32 %v775_v46, 0.0  ;;  %v1227_v24 = vld [vmem:[#allocation2 + $0x68] sm:$0x1]  ;;  %555 = vst [vmem:[#allocation2 + $0x3c] sm:$0x1] %v554_v18 }
  0x1c   : > { %v902_v58 = vshrl.u32 %v822_v48, 16  ;;  %v905_v59 = vshll.u32 %v822_v48, 16  ;;  %v910_v60 = vshrl.u32 %v823_v49, 16  ;;  %v913_v61 = vshll.u32 %v823_v49, 16  ;;  %611 = vst [vmem:[#allocation2 + $0x44] sm:$0x1] %v610_v19 }
  0x1d   : > { %v970_v0 = vshrl.u32 %v830_v50, 16  ;;  %v973_v1 = vshll.u32 %v830_v50, 16  ;;  %v978_v2 = vshrl.u32 %v831_v51, 16  ;;  %v981_v4 = vshll.u32 %v831_v51, 16  ;;  %v1251_v41 = vld [vmem:[#allocation2 + $0x90] sm:$0xf] }
  0x1e   : > { %v904_v5 = vrot.slane %v902_v58, 7  ;;  %v912_v7 = vrot.slane %v910_v60, 7  ;;  %v838_v11 = vpack.c.bf16 %v806_v52, %v806_v52  ;;  %v839_v12 = vpack.c.bf16 %v807_v53, %v807_v53  ;;  %v1290_v29 = vld [vmem:[#allocation2] sm:$0xf]  ;;  %v5928_v42 = vld [vmem:[%s8272_s5 + $0x8] sm:$0xf] }
  0x1f   : > { %v972_v15 = vrot.slane %v970_v0, 7  ;;  %v980_v16 = vrot.slane %v978_v2, 7  ;;  %v6622_v34 = vld [vmem:[#allocation2 + $0x8] sm:$0x1]  ;;  %v2521_v46 = vsel %vm1946_vm0, %v5928_v42, 0  ;;  %v1291_v49 = vsel %vm6601_vm8, 0, %v1290_v29 }
  0x20   : > { %v907_v20 = vor.u32 %v905_v59, %v904_v5  ;;  %v908_v21 = vrot.slane %v904_v5, 4  ;;  %v915_v22 = vor.u32 %v913_v61, %v912_v7  ;;  %v917_v23 = vrot.slane %v912_v7, 4  ;;  %v1412_v35 = vld [vmem:[#allocation2 + $0x4] sm:$0xf]  ;;  %v1255_v48 = vld [vmem:[#allocation2 + $0x98] sm:$0x1]  ;;  %2530 = vmatpush.bf16.msrb.mxu2 %v2521_v46 }
  0x21   : > { %v975_v25 = vor.u32 %v973_v1, %v972_v15  ;;  %v976_v26 = vrot.slane %v972_v15, 4  ;;  %v983_v27 = vor.u32 %v981_v4, %v980_v16  ;;  %v985_v28 = vrot.slane %v980_v16, 4  ;;  %v5945_v58 = vld [vmem:[%s8272_s5 + $0xc] sm:$0xf]  ;;  %v6664_v5 = vld [vmem:[%s6554_s16 + $0x40] sm:$0xff]  }
  0x22   : > { %v916_v30 = vsel %vm6608_vm9, %v908_v21, %v915_v22  ;;  %v1196_v31 = vsel %vm6601_vm8, %v907_v20, %v1195_v63  ;;  %v1200_v32 = vsel %vm6534_vm3, %v917_v23, %v1199_v10  ;;  %v1038_v33 = vshrl.u32 %v838_v11, 16  ;;  %1292 = vst [vmem:[#allocation2] sm:$0xf] %v1291_v49 }
  0x23   : > { %1197 = vst [vmem:[#allocation2 + $0x30] sm:$0xf] %v1196_v31  ;;  %v984_v36 = vsel %vm6608_vm9, %v976_v26, %v983_v27  ;;  %v1224_v37 = vsel %vm6601_vm8, %v975_v25, %v1223_v17  ;;  %v1228_v38 = vsel %vm6534_vm3, %v985_v28, %v1227_v24  ;;  %v1041_v39 = vshll.u32 %v838_v11, 16 }
  0x24   : > { %1198 = vst.msk [vmem:[#allocation2 + $0x34] sm:$0xf] %vm1171_vm6, %v916_v30  ;;  %v1040_v43 = vrot.slane %v1038_v33, 7  ;;  %v1046_v44 = vshrl.u32 %v839_v12, 16  ;;  %v1049_v45 = vshll.u32 %v839_v12, 16  ;;  %v1295_v50 = vsel %vm6534_vm3, 0, %v6622_v34 }
  0x25   : > { %1201 = vst [vmem:[#allocation2 + $0x38] sm:$0x1] %v1200_v32  ;;  %vm1460_vm10 = vsmask.f32 3328  ;;  %vm1461_vm11 = vsmask.f32 7440  ;;  %v724_v59 = vmul.f32 %v6559_v8, %v6280_v56  ;;  %v725_v63 = vmul.f32 %v6559_v8, %v6281_v57 }
  0x26   : > { %v1473_v51 = vshll.u32 %v1412_v35, 16  ;;  %v1477_v52 = vshrl.u32 %v1412_v35, 16  ;;  %1225 = vst [vmem:[#allocation2 + $0x60] sm:$0xf] %v1224_v37  ;;  %v1043_v53 = vor.u32 %v1041_v39, %v1040_v43  ;;  %v1044_v54 = vrot.slane %v1040_v43, 4  ;;  %vm6688_vm13 = vmor %vm1460_vm10, %vm1461_vm11 }
  0x27   : > { %v1048_v55 = vrot.slane %v1046_v44, 7  ;;  %1226 = vst.msk [vmem:[#allocation2 + $0x64] sm:$0xf] %vm1171_vm6, %v984_v36  ;;  %v2807_v62 = vsel %vm1946_vm0, %v5945_v58, 0  ;;  %v1443_v56 = vld [vmem:[%s8272_s5] sm:$0xf]  ;;  %v760_v4 = vadd.f32 %v6566_v13, %v724_v59  ;;  %v6682_v24 = vadd.f32 %v6566_v13, %v725_v63 }
  0x28   : > { %v6649_v60 = vrot.slane %v1473_v51, 5  ;;  %v6651_v61 = vrot.slane %v1477_v52, 4  ;;  %1229 = vst [vmem:[#allocation2 + $0x68] sm:$0x1] %v1228_v38  ;;  %v1252_v2 = vsel %vm6601_vm8, %v1043_v53, %v1251_v41  ;;  %2816 = vmatpush.bf16.msrb.mxu3 %v2807_v62  ;;  %v2168_v40 = vsel %vm1946_vm0, %v1443_v56, 0 }
  0x29   : > { %v1051_v0 = vor.u32 %v1049_v45, %v1048_v55  ;;  %v1053_v1 = vrot.slane %v1048_v55, 4  ;;  %1253 = vst [vmem:[#allocation2 + $0x90] sm:$0xf] %v1252_v2  ;;  %v6026_v57 = vld [vmem:[%s8272_s5 + $0x10] sm:$0xf]  ;;  %v566_v7 = vsel %vm6534_vm3, 0, %v6635_v47  ;;  %2177 = vmatpush.bf16.msrb.mxu1 %v2168_v40  ;;  %v6296_v25 = vunpack.c.l.bf16 %v6664_v5 }
  0x2a   : > { %v1419_v10 = vld [vmem:[#allocation2 + $0x30] sm:$0xf]  ;;  %v3461_v15 = vsel %vm1946_vm0, %v6026_v57, 0  ;;  %v792_v16 = vmax.f32 %v760_v4, 0.0  ;;  %v1480_v20 = vor.u32 %v6651_v61, %v6649_v60  ;;  %v6297_v30 = vunpack.c.h.bf16 %v6664_v5  ;;  %1296 = vst [vmem:[#allocation2 + $0x8] sm:$0x1] %v1295_v50 }
  0x2b   : > { %v1052_v11 = vsel %vm6608_vm9, %v1044_v54, %v1051_v0  ;;  %v1256_v12 = vsel %vm6534_vm3, %v1053_v1, %v1255_v48  ;;  %v1420_v17 = vld [vmem:[#allocation2 + $0x34] sm:$0xf]  ;;  %v1560_v18 = vshrl.u32 %v1419_v10, 16  ;;  %v1563_v19 = vshll.u32 %v1419_v10, 16  ;;  %3470 = vmatpush.bf16.msrb.mxu0 %v3461_v15  ;;  %v6699_v0 = vld [vmem:[%s6554_s16 + $0x60] sm:$0xff]  }
  0x2c   : > { %1254 = vst.msk [vmem:[#allocation2 + $0x94] sm:$0xf] %vm1171_vm6, %v1052_v11  ;;  %v1448_v21 = vld [vmem:[#allocation2 + $0x38] sm:$0x1]  ;;  %v1569_v22 = vshll.u32 %v1420_v17, 16  ;;  %v1573_v23 = vshrl.u32 %v1420_v17, 16  ;;  %v6696_v54 = vpack.c.bf16 %v792_v16, %v792_v16  ;;  %v6312_v17 = vunpack.c.l.bf16 %v6699_v0 }
  0x2d   : > { %1257 = vst [vmem:[#allocation2 + $0x98] sm:$0x1] %v1256_v12  ;;  %v1562_v26 = vrot.slane %v1560_v18, 4  ;;  %v1565_v27 = vrot.slane %v1563_v19, 5  ;;  %v1579_v28 = vshll.u32 %v1448_v21, 16  ;;  %v1481_v47 = vrot.slane %v1480_v20, 4 }
  0x2e   : > { %v1427_v29 = vld [vmem:[#allocation2 + $0x60] sm:$0xf]  ;;  %v1571_v31 = vrot.slane %v1569_v22, 5  ;;  %v1575_v32 = vrot.slane %v1573_v23, 4  ;;  %v1428_v33 = vld [vmem:[#allocation2 + $0x64] sm:$0xf] }
  0x2f   : > { %v1656_v35 = vshrl.u32 %v1427_v29, 16  ;;  %v1659_v36 = vshll.u32 %v1427_v29, 16  ;;  %v1566_v37 = vor.u32 %v1565_v27, %v1562_v26  ;;  %v1581_v38 = vrot.slane %v1579_v28, 5  ;;  %v1452_v39 = vld [vmem:[#allocation2 + $0x68] sm:$0x1] }
  0x30   : > { %v1665_v41 = vshll.u32 %v1428_v33, 16  ;;  %v1669_v42 = vshrl.u32 %v1428_v33, 16  ;;  %v1576_v44 = vor.u32 %v1575_v32, %v1571_v31  ;;  %v1675_v48 = vshll.u32 %v1452_v39, 16  ;;  %v1435_v49 = vld [vmem:[#allocation2 + $0x90] sm:$0xf] }
  0x31   : > { %v1658_v45 = vrot.slane %v1656_v35, 4  ;;  %v1661_v46 = vrot.slane %v1659_v36, 5  ;;  %v1567_v51 = vrot.slane %v1566_v37, 4  ;;  %v1752_v63 = vshrl.u32 %v1435_v49, 16  ;;  %v1411_v16 = vld [vmem:[#allocation2] sm:$0xf] }
  0x32   : > { %v1667_v52 = vrot.slane %v1665_v41, 5  ;;  %v1671_v53 = vrot.slane %v1669_v42, 4  ;;  %v1577_v55 = vrot.slane %v1576_v44, 4  ;;  %v1677_v59 = vrot.slane %v1675_v48, 5  ;;  %567 = vst [vmem:[#allocation2 + $0x6c] sm:$0x1] %v566_v7 }
  0x33   : > { %v1662_v58 = vor.u32 %v1661_v46, %v1658_v45  ;;  %v1436_v62 = vld [vmem:[#allocation2 + $0x94] sm:$0xf]  ;;  %v1572_v1 = vsel %vm6688_vm13, %v1567_v51, %v1571_v31  ;;  %v1755_v4 = vshll.u32 %v1435_v49, 16  ;;  %v1754_v10 = vrot.slane %v1752_v63, 4  ;;  %v1444_v32 = vld [vmem:[#allocation2 + $0x8] sm:$0x1] }
  0x34   : > { %v1672_v2 = vor.u32 %v1671_v53, %v1667_v52  ;;  %v1456_v56 = vld [vmem:[#allocation2 + $0x98] sm:$0x1]  ;;  %v1761_v40 = vshll.u32 %v1436_v62, 16  ;;  %v1582_v34 = vsel %vm6688_vm13, %v1577_v55, %v1581_v38  ;;  %v1857_v50 = vunpack.c.l.b16 %v1572_v1  ;;  %v621_v44 = vld [vmem:[#allocation2 + $0x74] sm:$0x1] }
  0x35   : > { %v1663_v57 = vrot.slane %v1662_v58, 4  ;;  %v1858_v11 = vunpack.c.l.b16 %v1582_v34  ;;  %v1757_v15 = vrot.slane %v1755_v4, 5  ;;  %v1765_v21 = vshrl.u32 %v1436_v62, 16  ;;  %v1202_v58 = vld [vmem:[#allocation2 + $0x3c] sm:$0xf] }
  0x36   : > { %v1673_v12 = vrot.slane %v1672_v2, 4  ;;  %v1763_v19 = vrot.slane %v1761_v40, 5  ;;  %v1771_v22 = vshll.u32 %v1456_v56, 16  ;;  %v1464_v33 = vshrl.u32 %v1411_v16, 16  ;;  %v577_v62 = vld [vmem:[#allocation2 + $0x9c] sm:$0x1] }
  0x37   : > { %v1668_v18 = vsel %vm6688_vm13, %v1663_v57, %v1667_v52  ;;  %v1885_v23 = vpack.c.b16 %v1858_v11, %v1857_v50  ;;  %v1758_v28 = vor.u32 %v1757_v15, %v1754_v10  ;;  %v1767_v31 = vrot.slane %v1765_v21, 4  ;;  %v633_v4 = vld [vmem:[#allocation2 + $0xa4] sm:$0x1]  ;;  %v541_v15 = vld [vmem:[#allocation2 + $0xc] sm:$0x1] }
  0x38   : > { %v1678_v26 = vsel %vm6688_vm13, %v1673_v12, %v1677_v59  ;;  %v1865_v27 = vunpack.c.l.b16 %v1668_v18  ;;  %v1773_v35 = vrot.slane %v1771_v22, 5  ;;  %v1467_v36 = vshll.u32 %v1411_v16, 16  ;;  %v1206_v21 = vld [vmem:[#allocation2 + $0x44] sm:$0x1] }
  0x39   : > { %v1866_v29 = vunpack.c.l.b16 %v1678_v26  ;;  %5820 = vmatmul.msk.bf16.vlgmr.msra.gmra.mxu1 %vm1897_vm12, %v1885_v23  ;;  %v1759_v7 = vrot.slane %v1758_v28, 4  ;;  %v1483_v37 = vshll.u32 %v1444_v32, 16  ;;  %v1768_v39 = vor.u32 %v1767_v31, %v1763_v19  ;;  %v597_v26 = vld [vmem:[#allocation2 + $0x14] sm:$0x1]  ;;  %v6263_v31 = vld [vmem:[%s6554_s16] sm:$0xff]  }
  0x3a   : > { %v1466_v41 = vrot.slane %v1464_v33, 4  ;;  %v793_v42 = vmax.f32 %v6682_v24, 0.0  ;;  %v1469_v46 = vrot.slane %v1467_v36, 5  ;;  %v919_v61 = vshrl.u32 %v6696_v54, 16 }
  0x3b   : > { %v1889_v38 = vpack.c.b16 %v1866_v29, %v1865_v27  ;;  %v1764_v45 = vsel %vm6688_vm13, %v1759_v7, %v1763_v19  ;;  %v1485_v48 = vrot.slane %v1483_v37, 5  ;;  %v1769_v20 = vrot.slane %v1768_v39, 4 }
  0x3c   : > { %v1873_v49 = vunpack.c.l.b16 %v1764_v45  ;;  %v825_v51 = vpack.c.bf16 %v793_v42, %v793_v42  ;;  %v922_v52 = vshll.u32 %v6696_v54, 16  ;;  %v1470_v53 = vor.u32 %v1469_v46, %v1466_v41  ;;  %v556_v41 = vld [vmem:[#allocation2 + $0x48] sm:$0x1] }
  0x3d   : > { %5824 = vmatmul.msk.bf16.vlgmr.msra.gmra.mxu2 %vm1897_vm12, %v1889_v38  ;;  %v1486_v55 = vsel %vm6688_vm13, %v1481_v47, %v1485_v48  ;;  %v921_v24 = vrot.slane %v919_v61, 7  ;;  %v622_v59 = vsel %vm6542_vm5, 0, %v621_v44  ;;  %v1774_v63 = vsel %vm6688_vm13, %v1769_v20, %v1773_v35 }
  0x3e   : > { %v1850_v1 = vunpack.c.l.b16 %v1486_v55  ;;  %v927_v2 = vshrl.u32 %v825_v51, 16  ;;  %v930_v56 = vshll.u32 %v825_v51, 16  ;;  %623 = vst [vmem:[#allocation2 + $0x74] sm:$0x1] %v622_v59  ;;  %v1874_v40 = vunpack.c.l.b16 %v1774_v63  ;;  %v1230_v63 = vld [vmem:[#allocation2 + $0x6c] sm:$0xf] }
  0x3f   : > { %v1471_v54 = vrot.slane %v1470_v53, 4  ;;  %v924_v34 = vor.u32 %v922_v52, %v921_v24  ;;  %v925_v50 = vrot.slane %v921_v24, 4  ;;  %v732_v10 = vmul.f32 %v6559_v8, %v6296_v25 }
  0x40   : > { %v929_v57 = vrot.slane %v927_v2, 7  ;;  %v733_v11 = vmul.f32 %v6559_v8, %v6297_v30  ;;  %v578_v12 = vsel %vm6534_vm3, 0, %v577_v62  ;;  %v1893_v16 = vpack.c.b16 %v1874_v40, %v1873_v49 }
  0x41   : > { %v1476_v18 = vsel %vm6688_vm13, %v1471_v54, %v6649_v60  ;;  %v1203_v19 = vsel %vm6601_vm8, %v924_v34, %v1202_v58  ;;  %579 = vst [vmem:[#allocation2 + $0x9c] sm:$0x1] %v578_v12  ;;  %v634_v5 = vsel %vm6542_vm5, 0, %v633_v4  ;;  %v768_v23 = vadd.f32 %v6566_v13, %v732_v10 }
  0x42   : > { %v1849_v25 = vunpack.c.l.b16 %v1476_v18  ;;  %v932_v30 = vor.u32 %v930_v56, %v929_v57  ;;  %v934_v22 = vrot.slane %v929_v57, 4  ;;  %1204 = vst [vmem:[#allocation2 + $0x3c] sm:$0xf] %v1203_v19  ;;  %5828 = vmatmul.msk.bf16.vlgmr.msra.gmra.mxu3 %vm1897_vm12, %v1893_v16  ;;  %v769_v60 = vadd.f32 %v6566_v13, %v733_v11 }
  0x43   : > { %635 = vst [vmem:[#allocation2 + $0xa4] sm:$0x1] %v634_v5  ;;  %v6313_v27 = vunpack.c.h.bf16 %v6699_v0  ;;  %v740_v28 = vmul.f32 %v6559_v8, %v6312_v17  ;;  %v542_v29 = vsel %vm6534_vm3, 0, %v541_v15  ;;  %v800_v7 = vmax.f32 %v768_v23, 0.0 }
  0x44   : > { %v1881_v32 = vpack.c.b16 %v1850_v1, %v1849_v25  ;;  %v933_v33 = vsel %vm6608_vm9, %v925_v50, %v932_v30  ;;  %v1207_v47 = vsel %vm6534_vm3, %v934_v22, %v1206_v21  ;;  %543 = vst [vmem:[#allocation2 + $0xc] sm:$0x1] %v542_v29  ;;  %v801_v35 = vmax.f32 %v769_v60, 0.0  ;;  %v6330_v21 = vld [vmem:[%s6554_s16 + $0x28] sm:$0xff]   ;;  %v612_v29 = vld [vmem:[#allocation2 + $0x50] sm:$0x1] }
  0x45   : > { %1205 = vst.msk [vmem:[#allocation2 + $0x40] sm:$0xf] %vm1171_vm6, %v933_v33  ;;  %v741_v0 = vmul.f32 %v6559_v8, %v6313_v27  ;;  %v776_v17 = vadd.f32 %v6566_v13, %v740_v28  ;;  %v598_v36 = vsel %vm6542_vm5, 0, %v597_v26  ;;  %v832_v37 = vpack.c.bf16 %v800_v7, %v800_v7  ;;  %v1234_v56 = vld [vmem:[#allocation2 + $0x74] sm:$0x1] }
  0x46   : > { %5816 = vmatmul.msk.bf16.vlgmr.msra.gmra.mxu0 %vm1897_vm12, %v1881_v32  ;;  %1208 = vst [vmem:[#allocation2 + $0x44] sm:$0x1] %v1207_v47  ;;  %v6264_v38 = vunpack.c.l.bf16 %v6263_v31  ;;  %v6265_v39 = vunpack.c.h.bf16 %v6263_v31  ;;  %v833_v42 = vpack.c.bf16 %v801_v35, %v801_v35  ;;  %v557_v46 = vsel %vm6534_vm3, 0, %v556_v41 }
  0x47   : > { %v777_v44 = vadd.f32 %v6566_v13, %v741_v0  ;;  %v808_v45 = vmax.f32 %v776_v17, 0.0  ;;  %599 = vst [vmem:[#allocation2 + $0x14] sm:$0x1] %v598_v36  ;;  %v987_v48 = vshrl.u32 %v832_v37, 16  ;;  %v990_v61 = vshll.u32 %v832_v37, 16 }
  0x48   : > { %v716_v20 = vmul.f32 %v6559_v8, %v6264_v38  ;;  %v717_v49 = vmul.f32 %v6559_v8, %v6265_v39  ;;  %558 = vst [vmem:[#allocation2 + $0x48] sm:$0x1] %v557_v46  ;;  %v995_v52 = vshrl.u32 %v833_v42, 16  ;;  %v998_v53 = vshll.u32 %v833_v42, 16  ;;  %v1258_v23 = vld [vmem:[#allocation2 + $0x9c] sm:$0xf] }
  0x49   : > { %v1421_v51 = vld [vmem:[#allocation2 + $0x3c] sm:$0xf]  ;;  %v809_v55 = vmax.f32 %v777_v44, 0.0  ;;  %v840_v24 = vpack.c.bf16 %v808_v45, %v808_v45  ;;  %v989_v62 = vrot.slane %v987_v48, 7  ;;  %v6284_v47 = vunpack.c.l.bf16 %v6330_v21  ;;  %v568_v36 = vld [vmem:[#allocation2 + $0x78] sm:$0x1] }
  0x4a   : > { %v1584_v58 = vshrl.u32 %v1421_v51, 16  ;;  %v1587_v59 = vshll.u32 %v1421_v51, 16  ;;  %v752_v1 = vadd.f32 %v6566_v13, %v716_v20  ;;  %v997_v2 = vrot.slane %v995_v52, 7 }
  0x4b   : > { %v841_v4 = vpack.c.bf16 %v809_v55, %v809_v55  ;;  %v1055_v40 = vshrl.u32 %v840_v24, 16  ;;  %v1058_v54 = vshll.u32 %v840_v24, 16  ;;  %v992_v10 = vor.u32 %v990_v61, %v989_v62  ;;  %v1262_v61 = vld [vmem:[#allocation2 + $0xa4] sm:$0x1] }
  0x4c   : > { %v1422_v34 = vld [vmem:[#allocation2 + $0x40] sm:$0xf]  ;;  %v1586_v50 = vrot.slane %v1584_v58, 4  ;;  %v1589_v57 = vrot.slane %v1587_v59, 5  ;;  %v993_v11 = vrot.slane %v989_v62, 4  ;;  %v1000_v18 = vor.u32 %v998_v53, %v997_v2 }
  0x4d   : > { %v1449_v12 = vld [vmem:[#allocation2 + $0x44] sm:$0x1]  ;;  %v1593_v15 = vshll.u32 %v1422_v34, 16  ;;  %v1597_v16 = vshrl.u32 %v1422_v34, 16  ;;  %v1002_v19 = vrot.slane %v997_v2, 4  ;;  %v1231_v30 = vsel %vm6601_vm8, %v992_v10, %v1230_v63 }
  0x4e   : > { %v1590_v5 = vor.u32 %v1589_v57, %v1586_v50  ;;  %v1603_v25 = vshll.u32 %v1449_v12, 16  ;;  %v1057_v22 = vrot.slane %v1055_v40, 7  ;;  %v1001_v27 = vsel %vm6608_vm9, %v993_v11, %v1000_v18  ;;  %1232 = vst [vmem:[#allocation2 + $0x6c] sm:$0xf] %v1231_v30 }
  0x4f   : > { %v1595_v26 = vrot.slane %v1593_v15, 5  ;;  %v1599_v60 = vrot.slane %v1597_v16, 4  ;;  %v1235_v28 = vsel %vm6534_vm3, %v1002_v19, %v1234_v56  ;;  %1233 = vst.msk [vmem:[#allocation2 + $0x70] sm:$0xf] %vm1171_vm6, %v1001_v27  ;;  %v1063_v35 = vshrl.u32 %v841_v4, 16 }
  0x50   : > { %v1591_v31 = vrot.slane %v1590_v5, 4  ;;  %v1605_v32 = vrot.slane %v1603_v25, 5  ;;  %v1060_v33 = vor.u32 %v1058_v54, %v1057_v22  ;;  %1236 = vst [vmem:[#allocation2 + $0x74] sm:$0x1] %v1235_v28  ;;  %v1066_v0 = vshll.u32 %v841_v4, 16 }
  0x51   : > { %v1600_v7 = vor.u32 %v1599_v60, %v1595_v26  ;;  %v753_v17 = vadd.f32 %v6566_v13, %v717_v49  ;;  %v784_v39 = vmax.f32 %v752_v1, 0.0  ;;  %v613_v41 = vsel %vm6542_vm5, 0, %v612_v29  ;;  %v1173_v27 = vld [vmem:[#allocation2 + $0xc] sm:$0xf] }
  0x52   : > { %v1596_v37 = vsel %vm6688_vm13, %v1591_v31, %v1595_v26  ;;  %v1259_v38 = vsel %vm6601_vm8, %v1060_v33, %v1258_v23  ;;  %v1061_v44 = vrot.slane %v1057_v22, 4  ;;  %v1065_v45 = vrot.slane %v1063_v35, 7  ;;  %614 = vst [vmem:[#allocation2 + $0x50] sm:$0x1] %v613_v41 }
  0x53   : > { %v1601_v42 = vrot.slane %v1600_v7, 4  ;;  %1260 = vst [vmem:[#allocation2 + $0x9c] sm:$0xf] %v1259_v38  ;;  %v785_v46 = vmax.f32 %v753_v17, 0.0  ;;  %v1859_v48 = vunpack.c.l.b16 %v1596_v37  ;;  %v816_v20 = vpack.c.bf16 %v784_v39, %v784_v39  ;;  %v1178_v37 = vld [vmem:[#allocation2 + $0x14] sm:$0x1] }
  0x54   : > { %v6285_v49 = vunpack.c.h.bf16 %v6330_v21  ;;  %v569_v51 = vsel %vm6534_vm3, 0, %v568_v36  ;;  %v1068_v53 = vor.u32 %v1066_v0, %v1065_v45  ;;  %v1070_v55 = vrot.slane %v1065_v45, 4 }
  0x55   : > { %v1606_v52 = vsel %vm6688_vm13, %v1601_v42, %v1605_v32  ;;  %v726_v24 = vmul.f32 %v6559_v8, %v6284_v47  ;;  %570 = vst [vmem:[#allocation2 + $0x78] sm:$0x1] %v569_v51  ;;  %v1429_v59 = vld [vmem:[#allocation2 + $0x6c] sm:$0xf]  ;;  %v817_v62 = vpack.c.bf16 %v785_v46, %v785_v46  ;;  %v851_v63 = vshrl.u32 %v816_v20, 16 }
  0x56   : > { %v1860_v58 = vunpack.c.l.b16 %v1606_v52  ;;  %v854_v1 = vshll.u32 %v816_v20, 16  ;;  %v1430_v2 = vld [vmem:[#allocation2 + $0x70] sm:$0xf]  ;;  %v1680_v56 = vshrl.u32 %v1429_v59, 16  ;;  %v1683_v4 = vshll.u32 %v1429_v59, 16 }
  0x57   : > { %v1069_v40 = vsel %vm6608_vm9, %v1061_v44, %v1068_v53  ;;  %v1263_v54 = vsel %vm6534_vm3, %v1070_v55, %v1262_v61  ;;  %v1453_v50 = vld [vmem:[#allocation2 + $0x74] sm:$0x1]  ;;  %v1689_v57 = vshll.u32 %v1430_v2, 16  ;;  %v1693_v10 = vshrl.u32 %v1430_v2, 16  ;;  %v624_v55 = vld [vmem:[#allocation2 + $0x80] sm:$0x1] }
  0x58   : > { %v1886_v34 = vpack.c.b16 %v1860_v58, %v1859_v48  ;;  %1261 = vst.msk [vmem:[#allocation2 + $0xa0] sm:$0xf] %vm1171_vm6, %v1069_v40  ;;  %v727_v11 = vmul.f32 %v6559_v8, %v6285_v49  ;;  %v1682_v12 = vrot.slane %v1680_v56, 4  ;;  %v1685_v15 = vrot.slane %v1683_v4, 5  ;;  %v580_v40 = vld [vmem:[#allocation2 + $0xa8] sm:$0x1] }
  0x59   : > { %v1699_v16 = vshll.u32 %v1453_v50, 16  ;;  %1264 = vst [vmem:[#allocation2 + $0xa4] sm:$0x1] %v1263_v54  ;;  %v762_v18 = vadd.f32 %v6566_v13, %v726_v24  ;;  %v1691_v19 = vrot.slane %v1689_v57, 5  ;;  %v1695_v21 = vrot.slane %v1693_v10, 4  ;;  %v6334_v24 = vld [vmem:[%s6554_s16 + $0x48] sm:$0xff]  }
  0x5a   : > { %5821 = vmatmul.msk.bf16.gmra.mxu1 %vm1897_vm12, %v1886_v34  ;;  %v1437_v5 = vld [vmem:[#allocation2 + $0x9c] sm:$0xf]  ;;  %v853_v25 = vrot.slane %v851_v63, 7  ;;  %v859_v30 = vshrl.u32 %v817_v62, 16  ;;  %v1686_v22 = vor.u32 %v1685_v15, %v1682_v12  ;;  %v862_v35 = vshll.u32 %v817_v62, 16 }
  0x5b   : > { %v1701_v23 = vrot.slane %v1699_v16, 5  ;;  %v1776_v26 = vshrl.u32 %v1437_v5, 16  ;;  %v1779_v60 = vshll.u32 %v1437_v5, 16  ;;  %v1696_v28 = vor.u32 %v1695_v21, %v1691_v19 }
  0x5c   : > { %v856_v29 = vor.u32 %v854_v1, %v853_v25  ;;  %v857_v31 = vrot.slane %v853_v25, 4  ;;  %v861_v32 = vrot.slane %v859_v30, 7  ;;  %v1687_v33 = vrot.slane %v1686_v22, 4 }
  0x5d   : > { %v1778_v47 = vrot.slane %v1776_v26, 4  ;;  %v1781_v7 = vrot.slane %v1779_v60, 5  ;;  %v1697_v0 = vrot.slane %v1696_v28, 4  ;;  %v763_v38 = vadd.f32 %v6566_v13, %v727_v11 }
  0x5e   : > { %v866_v17 = vrot.slane %v861_v32, 4  ;;  %v1174_v36 = vsel %vm6601_vm8, %v856_v29, %v1173_v27  ;;  %v1692_v39 = vsel %vm6688_vm13, %v1687_v33, %v1691_v19  ;;  %v864_v44 = vor.u32 %v862_v35, %v861_v32 }
  0x5f   : > { %v1438_v41 = vld [vmem:[#allocation2 + $0xa0] sm:$0xf]  ;;  %v1782_v42 = vor.u32 %v1781_v7, %v1778_v47  ;;  %1175 = vst [vmem:[#allocation2 + $0xc] sm:$0xf] %v1174_v36  ;;  %v794_v45 = vmax.f32 %v762_v18, 0.0  ;;  %v1702_v46 = vsel %vm6688_vm13, %v1697_v0, %v1701_v23  ;;  %v1867_v48 = vunpack.c.l.b16 %v1692_v39 }
  0x60   : > { %v1457_v61 = vld [vmem:[#allocation2 + $0xa4] sm:$0x1]  ;;  %v1785_v20 = vshll.u32 %v1438_v41, 16  ;;  %v1789_v49 = vshrl.u32 %v1438_v41, 16  ;;  %v1868_v51 = vunpack.c.l.b16 %v1702_v46  ;;  %v865_v62 = vsel %vm6608_vm9, %v857_v31, %v864_v44  ;;  %v1209_v47 = vld [vmem:[#allocation2 + $0x48] sm:$0xf] }
  0x61   : > { %v1783_v52 = vrot.slane %v1782_v42, 4  ;;  %v1795_v53 = vshll.u32 %v1457_v61, 16  ;;  %v1179_v63 = vsel %vm6534_vm3, %v866_v17, %v1178_v37  ;;  %1177 = vst.msk [vmem:[#allocation2 + $0x10] sm:$0xf] %vm1171_vm6, %v865_v62  ;;  %v795_v56 = vmax.f32 %v763_v38, 0.0 }
  0x62   : > { %v1787_v58 = vrot.slane %v1785_v20, 5  ;;  %v1791_v59 = vrot.slane %v1789_v49, 4  ;;  %v1890_v1 = vpack.c.b16 %v1868_v51, %v1867_v48  ;;  %v826_v4 = vpack.c.bf16 %v794_v45, %v794_v45  ;;  %1180 = vst [vmem:[#allocation2 + $0x14] sm:$0x1] %v1179_v63  ;;  %v1213_v42 = vld [vmem:[#allocation2 + $0x50] sm:$0x1] }
  0x63   : > { %v1797_v2 = vrot.slane %v1795_v53, 5  ;;  %v625_v50 = vsel %vm6542_vm5, 0, %v624_v55  ;;  %v6300_v57 = vunpack.c.l.bf16 %v6334_v24  ;;  %v827_v11 = vpack.c.bf16 %v795_v56, %v795_v56  ;;  %v636_v61 = vld [vmem:[#allocation2 + $0xb0] sm:$0x1]  ;;  %v6338_v20 = vld [vmem:[%s6554_s16 + $0x68] sm:$0xff]  }
  0x64   : > { %v1788_v54 = vsel %vm6688_vm13, %v1783_v52, %v1787_v58  ;;  %v1792_v34 = vor.u32 %v1791_v59, %v1787_v58  ;;  %5825 = vmatmul.msk.bf16.gmra.mxu2 %vm1897_vm12, %v1890_v1  ;;  %v936_v12 = vshrl.u32 %v826_v4, 16  ;;  %v939_v15 = vshll.u32 %v826_v4, 16  ;;  %626 = vst [vmem:[#allocation2 + $0x80] sm:$0x1] %v625_v50  ;;  %v544_v59 = vld [vmem:[#allocation2 + $0x18] sm:$0x1] }
  0x65   : > { %v1875_v10 = vunpack.c.l.b16 %v1788_v54  ;;  %v6301_v19 = vunpack.c.h.bf16 %v6334_v24  ;;  %v734_v21 = vmul.f32 %v6559_v8, %v6300_v57  ;;  %v581_v5 = vsel %vm6534_vm3, 0, %v580_v40  ;;  %v600_v56 = vld [vmem:[#allocation2 + $0x20] sm:$0x1]  ;;  %v6846_v50 = vld [vmem:[%s6554_s16 + $0x8] sm:$0xff]  }
  0x66   : > { %v1793_v16 = vrot.slane %v1792_v34, 4  ;;  %v1413_v18 = vld [vmem:[#allocation2 + $0xc] sm:$0xf]  ;;  %v938_v22 = vrot.slane %v936_v12, 7  ;;  %v944_v23 = vshrl.u32 %v827_v11, 16  ;;  %v947_v60 = vshll.u32 %v827_v11, 16 }
  0x67   : > { %v1488_v25 = vshrl.u32 %v1413_v18, 16  ;;  %v1491_v30 = vshll.u32 %v1413_v18, 16  ;;  %582 = vst [vmem:[#allocation2 + $0xa8] sm:$0x1] %v581_v5  ;;  %v735_v27 = vmul.f32 %v6559_v8, %v6301_v19  ;;  %v770_v28 = vadd.f32 %v6566_v13, %v734_v21 }
  0x68   : > { %v1798_v26 = vsel %vm6688_vm13, %v1793_v16, %v1797_v2  ;;  %v941_v33 = vor.u32 %v939_v15, %v938_v22  ;;  %v6824_v7 = vld [vmem:[#allocation2 + $0x10] sm:$0xf]  ;;  %v942_v35 = vrot.slane %v938_v22, 4  ;;  %v946_v0 = vrot.slane %v944_v23, 7  ;;  %v6851_v16 = vld [vmem:[%s8270_s3] ss:$0 sm:$0xff] }
  0x69   : > { %v1876_v29 = vunpack.c.l.b16 %v1798_v26  ;;  %v1490_v31 = vrot.slane %v1488_v25, 4  ;;  %v1493_v32 = vrot.slane %v1491_v30, 5  ;;  %v771_v17 = vadd.f32 %v6566_v13, %v735_v27  ;;  %v6827_v38 = vld [vmem:[#allocation2 + $0x14] sm:$0x1]  ;;  %v1237_v30 = vld [vmem:[#allocation2 + $0x78] sm:$0xf] }
  0x6a   : > { %v802_v36 = vmax.f32 %v770_v28, 0.0  ;;  %v1497_v8 = vshll.u32 %v6824_v7, 16  ;;  %v1501_v41 = vshrl.u32 %v6824_v7, 16  ;;  %v1507_v44 = vshll.u32 %v6827_v38, 16 }
  0x6b   : > { %v1894_v37 = vpack.c.b16 %v1876_v29, %v1875_v10  ;;  %v1494_v39 = vor.u32 %v1493_v32, %v1490_v31  ;;  %v949_v45 = vor.u32 %v947_v60, %v946_v0  ;;  %v951_v46 = vrot.slane %v946_v0, 4  ;;  %v6865_v29 = vld [vmem:[%s8271_s4] ss:$0 sm:$0xff] }
  0x6c   : > { %v1210_v48 = vsel %vm6601_vm8, %v941_v33, %v1209_v47  ;;  %v1499_v49 = vrot.slane %v1497_v8, 5  ;;  %v1503_v51 = vrot.slane %v1501_v41, 4  ;;  %v803_v52 = vmax.f32 %v771_v17, 0.0  ;;  %v1241_v0 = vld [vmem:[#allocation2 + $0x80] sm:$0x1] }
  0x6d   : > { %5829 = vmatmul.msk.bf16.gmra.mxu3 %vm1897_vm12, %v1894_v37  ;;  %v1495_v13 = vrot.slane %v1494_v39, 4  ;;  %1211 = vst [vmem:[#allocation2 + $0x48] sm:$0xf] %v1210_v48  ;;  %v1509_v53 = vrot.slane %v1507_v44, 5  ;;  %v950_v55 = vsel %vm6608_vm9, %v942_v35, %v949_v45  ;;  %v1214_v24 = vsel %vm6534_vm3, %v951_v46, %v1213_v42 }
  0x6e   : > { %v834_v58 = vpack.c.bf16 %v802_v36, %v802_v36  ;;  %v1504_v63 = vor.u32 %v1503_v51, %v1499_v49  ;;  %1212 = vst.msk [vmem:[#allocation2 + $0x4c] sm:$0xf] %vm1171_vm6, %v950_v55  ;;  %v835_v1 = vpack.c.bf16 %v803_v52, %v803_v52  ;;  %v637_v2 = vsel %vm6542_vm5, 0, %v636_v61 }
  0x6f   : > { %v1500_v62 = vsel %vm6688_vm13, %v1495_v13, %v1499_v49  ;;  %1215 = vst [vmem:[#allocation2 + $0x50] sm:$0x1] %v1214_v24  ;;  %v6316_v34 = vunpack.c.l.bf16 %v6338_v20  ;;  %v6317_v12 = vunpack.c.h.bf16 %v6338_v20  ;;  %v545_v19 = vsel %vm6534_vm3, 0, %v544_v59 }
  0x70   : > { %v1851_v4 = vunpack.c.l.b16 %v1500_v62  ;;  %v1004_v40 = vshrl.u32 %v834_v58, 16  ;;  %v1007_v54 = vshll.u32 %v834_v58, 16  ;;  %v1505_v57 = vrot.slane %v1504_v63, 4  ;;  %638 = vst [vmem:[#allocation2 + $0xb0] sm:$0x1] %v637_v2 }
  0x71   : > { %v1012_v10 = vshrl.u32 %v835_v1, 16  ;;  %v1015_v11 = vshll.u32 %v835_v1, 16  ;;  %v742_v18 = vmul.f32 %v6851_v16, %v6316_v34  ;;  %v601_v21 = vsel %vm6542_vm5, 0, %v600_v56  ;;  %546 = vst [vmem:[#allocation2 + $0x18] sm:$0x1] %v545_v19 }
  0x72   : > { %v1006_v15 = vrot.slane %v1004_v40, 7  ;;  %v1510_v5 = vsel %vm6688_vm13, %v1505_v57, %v1509_v53  ;;  %v743_v22 = vmul.f32 %v6851_v16, %v6317_v12  ;;  %v6268_v23 = vunpack.c.l.bf16 %v6846_v50  ;;  %602 = vst [vmem:[#allocation2 + $0x20] sm:$0x1] %v601_v21  ;;  %v559_v62 = vld [vmem:[#allocation2 + $0x54] sm:$0x1] }
  0x73   : > { %v1014_v25 = vrot.slane %v1012_v10, 7  ;;  %v1852_v26 = vunpack.c.l.b16 %v1510_v5  ;;  %v778_v31 = vadd.f32 %v6865_v29, %v742_v18  ;;  %v6269_v58 = vunpack.c.h.bf16 %v6846_v50  ;;  %v615_v57 = vld [vmem:[#allocation2 + $0x5c] sm:$0x1]  ;;  %v1265_v19 = vld [vmem:[#allocation2 + $0xa8] sm:$0xf] }
  0x74   : > { %v1423_v60 = vld [vmem:[#allocation2 + $0x48] sm:$0xf]  ;;  %v1009_v27 = vor.u32 %v1007_v54, %v1006_v15  ;;  %v1010_v28 = vrot.slane %v1006_v15, 4  ;;  %v779_v39 = vadd.f32 %v6865_v29, %v743_v22  ;;  %v718_v59 = vmul.f32 %v6851_v16, %v6268_v23 }
  0x75   : > { %v1608_v32 = vshrl.u32 %v1423_v60, 16  ;;  %v1611_v33 = vshll.u32 %v1423_v60, 16  ;;  %v1017_v47 = vor.u32 %v1015_v11, %v1014_v25  ;;  %v1019_v35 = vrot.slane %v1014_v25, 4  ;;  %v1424_v36 = vld [vmem:[#allocation2 + $0x4c] sm:$0xf] }
  0x76   : > { %v1882_v17 = vpack.c.b16 %v1852_v26, %v1851_v4  ;;  %v1238_v37 = vsel %vm6601_vm8, %v1009_v27, %v1237_v30  ;;  %v810_v8 = vmax.f32 %v778_v31, 0.0  ;;  %v1450_v41 = vld [vmem:[#allocation2 + $0x50] sm:$0x1]  ;;  %v1617_v45 = vshll.u32 %v1424_v36, 16 }
  0x77   : > { %v1610_v42 = vrot.slane %v1608_v32, 4  ;;  %v1613_v44 = vrot.slane %v1611_v33, 5  ;;  %v1621_v46 = vshrl.u32 %v1424_v36, 16  ;;  %v1627_v48 = vshll.u32 %v1450_v41, 16  ;;  %1239 = vst [vmem:[#allocation2 + $0x78] sm:$0xf] %v1238_v37 }
  0x78   : > { %5817 = vmatmul.msk.bf16.gmra.mxu0 %vm1897_vm12, %v1882_v17  ;;  %v1018_v61 = vsel %vm6608_vm9, %v1010_v28, %v1017_v47  ;;  %v1242_v20 = vsel %vm6534_vm3, %v1019_v35, %v1241_v0  ;;  %v811_v13 = vmax.f32 %v779_v39, 0.0  ;;  %v1619_v51 = vrot.slane %v1617_v45, 5  ;;  %v1269_v26 = vld [vmem:[#allocation2 + $0xb0] sm:$0x1] }
  0x79   : > { %v1614_v49 = vor.u32 %v1613_v44, %v1610_v42  ;;  %v1623_v52 = vrot.slane %v1621_v46, 4  ;;  %1240 = vst.msk [vmem:[#allocation2 + $0x7c] sm:$0xf] %vm1171_vm6, %v1018_v61  ;;  %v842_v53 = vpack.c.bf16 %v810_v8, %v810_v8  ;;  %v1629_v55 = vrot.slane %v1627_v48, 5  ;;  %v6331_v42 = vld [vmem:[%s6554_s16 + $0x30] sm:$0xff]  }
  0x7a   : > { %1243 = vst [vmem:[#allocation2 + $0x80] sm:$0x1] %v1242_v20  ;;  %v843_v24 = vpack.c.bf16 %v811_v13, %v811_v13  ;;  %v719_v54 = vmul.f32 %v6851_v16, %v6269_v58  ;;  %v754_v34 = vadd.f32 %v6865_v29, %v718_v59  ;;  %v560_v50 = vsel %vm6534_vm3, 0, %v559_v62  ;;  %v571_v48 = vld [vmem:[#allocation2 + $0x84] sm:$0x1] }
  0x7b   : > { %v1615_v63 = vrot.slane %v1614_v49, 4  ;;  %v1624_v1 = vor.u32 %v1623_v52, %v1619_v51  ;;  %v1072_v2 = vshrl.u32 %v842_v53, 16  ;;  %v1075_v56 = vshll.u32 %v842_v53, 16  ;;  %561 = vst [vmem:[#allocation2 + $0x54] sm:$0x1] %v560_v50 }
  0x7c   : > { %v1080_v4 = vshrl.u32 %v843_v24, 16  ;;  %v1083_v40 = vshll.u32 %v843_v24, 16  ;;  %v755_v21 = vadd.f32 %v6865_v29, %v719_v54  ;;  %v786_v5 = vmax.f32 %v754_v34, 0.0  ;;  %v627_v61 = vld [vmem:[#allocation2 + $0x8c] sm:$0x1] }
  0x7d   : > { %v1620_v10 = vsel %vm6688_vm13, %v1615_v63, %v1619_v51  ;;  %v1625_v11 = vrot.slane %v1624_v1, 4  ;;  %v1074_v12 = vrot.slane %v1072_v2, 7  ;;  %v616_v60 = vsel %vm6542_vm5, 0, %v615_v57 }
  0x7e   : > { %v1861_v15 = vunpack.c.l.b16 %v1620_v10  ;;  %v1082_v18 = vrot.slane %v1080_v4, 7  ;;  %v1431_v30 = vld [vmem:[#allocation2 + $0x78] sm:$0xf]  ;;  %617 = vst [vmem:[#allocation2 + $0x5c] sm:$0x1] %v616_v60  ;;  %v787_v51 = vmax.f32 %v755_v21, 0.0  ;;  %v818_v53 = vpack.c.bf16 %v786_v5, %v786_v5 }
  0x7f   : > { %v1630_v25 = vsel %vm6688_vm13, %v1625_v11, %v1629_v55  ;;  %v1077_v22 = vor.u32 %v1075_v56, %v1074_v12  ;;  %v1078_v23 = vrot.slane %v1074_v12, 4  ;;  %v1704_v31 = vshrl.u32 %v1431_v30, 16 }
  0x80   : > { %v1862_v27 = vunpack.c.l.b16 %v1630_v25  ;;  %v1432_v28 = vld [vmem:[#allocation2 + $0x7c] sm:$0xf]  ;;  %v1707_v32 = vshll.u32 %v1431_v30, 16  ;;  %v1085_v33 = vor.u32 %v1083_v40, %v1082_v18  ;;  %v1087_v17 = vrot.slane %v1082_v18, 4 }
  0x81   : > { %v1454_v47 = vld [vmem:[#allocation2 + $0x80] sm:$0x1]  ;;  %v1713_v35 = vshll.u32 %v1432_v28, 16  ;;  %v1717_v0 = vshrl.u32 %v1432_v28, 16  ;;  %v1266_v36 = vsel %vm6601_vm8, %v1077_v22, %v1265_v19  ;;  %v1706_v39 = vrot.slane %v1704_v31, 4 }
  0x82   : > { %v1887_v37 = vpack.c.b16 %v1862_v27, %v1861_v15  ;;  %v1709_v8 = vrot.slane %v1707_v32, 5  ;;  %v1723_v41 = vshll.u32 %v1454_v47, 16  ;;  %1267 = vst [vmem:[#allocation2 + $0xa8] sm:$0xf] %v1266_v36  ;;  %v1086_v46 = vsel %vm6608_vm9, %v1078_v23, %v1085_v33  ;;  %v1181_v23 = vld [vmem:[#allocation2 + $0x18] sm:$0xf] }
  0x83   : > { %v1715_v44 = vrot.slane %v1713_v35, 5  ;;  %v1719_v45 = vrot.slane %v1717_v0, 4  ;;  %1268 = vst.msk [vmem:[#allocation2 + $0xac] sm:$0xf] %vm1171_vm6, %v1086_v46  ;;  %v1270_v49 = vsel %vm6534_vm3, %v1087_v17, %v1269_v26  ;;  %v6288_v55 = vunpack.c.l.bf16 %v6331_v42  ;;  %v1185_v17 = vld [vmem:[#allocation2 + $0x20] sm:$0x1] }
  0x84   : > { %5822 = vmatmul.msk.bf16.gmra.mxu1 %vm1897_vm12, %v1887_v37  ;;  %v1710_v20 = vor.u32 %v1709_v8, %v1706_v39  ;;  %v1725_v13 = vrot.slane %v1723_v41, 5  ;;  %1271 = vst [vmem:[#allocation2 + $0xb0] sm:$0x1] %v1270_v49  ;;  %v6289_v24 = vunpack.c.h.bf16 %v6331_v42  ;;  %v819_v59 = vpack.c.bf16 %v787_v51, %v787_v51  ;;  %v6335_v36 = vld [vmem:[%s6554_s16 + $0x50] sm:$0xff]  }
  0x85   : > { %v1720_v52 = vor.u32 %v1719_v45, %v1715_v44  ;;  %v572_v62 = vsel %vm6534_vm3, 0, %v571_v48  ;;  %v628_v63 = vsel %vm6542_vm5, 0, %v627_v61  ;;  %v868_v2 = vshrl.u32 %v818_v53, 16  ;;  %v583_v42 = vld [vmem:[#allocation2 + $0xb4] sm:$0x1] }
  0x86   : > { %v1711_v58 = vrot.slane %v1710_v20, 4  ;;  %v871_v56 = vshll.u32 %v818_v53, 16  ;;  %v728_v4 = vmul.f32 %v6851_v16, %v6288_v55  ;;  %v876_v54 = vshrl.u32 %v819_v59, 16  ;;  %573 = vst [vmem:[#allocation2 + $0x84] sm:$0x1] %v572_v62 }
  0x87   : > { %v1721_v1 = vrot.slane %v1720_v52, 4  ;;  %v879_v34 = vshll.u32 %v819_v59, 16  ;;  %v729_v57 = vmul.f32 %v6851_v16, %v6289_v24  ;;  %v870_v50 = vrot.slane %v868_v2, 7  ;;  %629 = vst [vmem:[#allocation2 + $0x8c] sm:$0x1] %v628_v63 }
  0x88   : > { %v1716_v40 = vsel %vm6688_vm13, %v1711_v58, %v1715_v44  ;;  %v764_v15 = vadd.f32 %v6865_v29, %v728_v4  ;;  %v878_v5 = vrot.slane %v876_v54, 7  ;;  %v6304_v49 = vunpack.c.l.bf16 %v6335_v36  ;;  %v639_v24 = vld [vmem:[#allocation2 + $0xbc] sm:$0x1] }
  0x89   : > { %v1726_v10 = vsel %vm6688_vm13, %v1721_v1, %v1725_v13  ;;  %v1869_v11 = vunpack.c.l.b16 %v1716_v40  ;;  %v1439_v12 = vld [vmem:[#allocation2 + $0xa8] sm:$0xf]  ;;  %v873_v30 = vor.u32 %v871_v56, %v870_v50  ;;  %v874_v22 = vrot.slane %v870_v50, 4  ;;  %v6339_v1 = vld [vmem:[%s6554_s16 + $0x70] sm:$0xff]  }
  0x8a   : > { %v1870_v18 = vunpack.c.l.b16 %v1726_v10  ;;  %v1800_v19 = vshrl.u32 %v1439_v12, 16  ;;  %v1803_v21 = vshll.u32 %v1439_v12, 16  ;;  %v1440_v25 = vld [vmem:[#allocation2 + $0xac] sm:$0xf]  ;;  %v765_v26 = vadd.f32 %v6865_v29, %v729_v57  ;;  %v1216_v50 = vld [vmem:[#allocation2 + $0x54] sm:$0xf] }
  0x8b   : > { %v796_v60 = vmax.f32 %v764_v15, 0.0  ;;  %v1458_v28 = vld [vmem:[#allocation2 + $0xb0] sm:$0x1]  ;;  %v1809_v33 = vshll.u32 %v1440_v25, 16  ;;  %v1813_v47 = vshrl.u32 %v1440_v25, 16  ;;  %v881_v0 = vor.u32 %v879_v34, %v878_v5 }
  0x8c   : > { %v1891_v27 = vpack.c.b16 %v1870_v18, %v1869_v11  ;;  %v1802_v31 = vrot.slane %v1800_v19, 4  ;;  %v1805_v32 = vrot.slane %v1803_v21, 5  ;;  %v1819_v35 = vshll.u32 %v1458_v28, 16 }
  0x8d   : > { %v1811_v39 = vrot.slane %v1809_v33, 5  ;;  %v883_v8 = vrot.slane %v878_v5, 4  ;;  %v1182_v41 = vsel %vm6601_vm8, %v873_v30, %v1181_v23  ;;  %v1815_v44 = vrot.slane %v1813_v47, 4  ;;  %v1220_v30 = vld [vmem:[#allocation2 + $0x5c] sm:$0x1] }
  0x8e   : > { %5826 = vmatmul.msk.bf16.gmra.mxu2 %vm1897_vm12, %v1891_v27  ;;  %v1806_v37 = vor.u32 %v1805_v32, %v1802_v31  ;;  %v1821_v45 = vrot.slane %v1819_v35, 5  ;;  %v882_v46 = vsel %vm6608_vm9, %v874_v22, %v881_v0  ;;  %1183 = vst [vmem:[#allocation2 + $0x18] sm:$0xf] %v1182_v41  ;;  %v797_v48 = vmax.f32 %v765_v26, 0.0  ;;  %v547_v31 = vld [vmem:[#allocation2 + $0x24] sm:$0x1] }
  0x8f   : > { %1184 = vst.msk [vmem:[#allocation2 + $0x1c] sm:$0xf] %vm1171_vm6, %v882_v46  ;;  %v1186_v20 = vsel %vm6534_vm3, %v883_v8, %v1185_v17  ;;  %v828_v13 = vpack.c.bf16 %v796_v60, %v796_v60  ;;  %v1816_v51 = vor.u32 %v1815_v44, %v1811_v39  ;;  %v6305_v53 = vunpack.c.h.bf16 %v6335_v36  ;;  %v603_v17 = vld [vmem:[#allocation2 + $0x2c] sm:$0x1] }
  0x90   : > { %v1807_v61 = vrot.slane %v1806_v37, 4  ;;  %1187 = vst [vmem:[#allocation2 + $0x20] sm:$0x1] %v1186_v20  ;;  %v829_v52 = vpack.c.bf16 %v797_v48, %v797_v48  ;;  %v584_v55 = vsel %vm6534_vm3, 0, %v583_v42  ;;  %v736_v63 = vmul.f32 %v6851_v16, %v6304_v49 }
  0x91   : > { %v953_v59 = vshrl.u32 %v828_v13, 16  ;;  %v956_v62 = vshll.u32 %v828_v13, 16  ;;  %585 = vst [vmem:[#allocation2 + $0xb4] sm:$0x1] %v584_v55  ;;  %v1817_v2 = vrot.slane %v1816_v51, 4  ;;  %v737_v34 = vmul.f32 %v6851_v16, %v6305_v53 }
  0x92   : > { %v1812_v58 = vsel %vm6688_vm13, %v1807_v61, %v1811_v39  ;;  %v961_v4 = vshrl.u32 %v829_v52, 16  ;;  %v964_v40 = vshll.u32 %v829_v52, 16  ;;  %v772_v57 = vadd.f32 %v6865_v29, %v736_v63 }
  0x93   : > { %v1877_v56 = vunpack.c.l.b16 %v1812_v58  ;;  %v955_v54 = vrot.slane %v953_v59, 7  ;;  %v640_v10 = vsel %vm6542_vm5, 0, %v639_v24  ;;  %v1822_v11 = vsel %vm6688_vm13, %v1817_v2, %v1821_v45 }
  0x94   : > { %v963_v12 = vrot.slane %v961_v4, 7  ;;  %641 = vst [vmem:[#allocation2 + $0xbc] sm:$0x1] %v640_v10  ;;  %v6320_v15 = vunpack.c.l.bf16 %v6339_v1  ;;  %v6321_v18 = vunpack.c.h.bf16 %v6339_v1  ;;  %v1878_v19 = vunpack.c.l.b16 %v1822_v11  ;;  %v1244_v11 = vld [vmem:[#allocation2 + $0x84] sm:$0xf] }
  0x95   : > { %v1415_v21 = vld [vmem:[#allocation2 + $0x18] sm:$0xf]  ;;  %v958_v5 = vor.u32 %v956_v62, %v955_v54  ;;  %v959_v25 = vrot.slane %v955_v54, 4  ;;  %v773_v22 = vadd.f32 %v6865_v29, %v737_v34  ;;  %v804_v45 = vmax.f32 %v772_v57, 0.0 }
  0x96   : > { %v6933_v23 = vld [vmem:[#allocation2 + $0x1c] sm:$0xf]  ;;  %v1512_v26 = vshrl.u32 %v1415_v21, 16  ;;  %v1515_v60 = vshll.u32 %v1415_v21, 16  ;;  %v966_v27 = vor.u32 %v964_v40, %v963_v12  ;;  %v968_v28 = vrot.slane %v963_v12, 4 }
  0x97   : > { %v1895_v32 = vpack.c.b16 %v1878_v19, %v1877_v56  ;;  %v6935_v33 = vld [vmem:[#allocation2 + $0x20] sm:$0x1]  ;;  %v1521_v47 = vshll.u32 %v6933_v23, 16  ;;  %v1525_v35 = vshrl.u32 %v6933_v23, 16  ;;  %v1217_v0 = vsel %vm6601_vm8, %v958_v5, %v1216_v50 }
  0x98   : > { %v1514_v36 = vrot.slane %v1512_v26, 4  ;;  %v1517_v37 = vrot.slane %v1515_v60, 5  ;;  %v1531_v39 = vshll.u32 %v6935_v33, 16  ;;  %v967_v8 = vsel %vm6608_vm9, %v959_v25, %v966_v27  ;;  %1218 = vst [vmem:[#allocation2 + $0x54] sm:$0xf] %v1217_v0 }
  0x99   : > { %5830 = vmatmul.msk.bf16.gmra.mxu3 %vm1897_vm12, %v1895_v32  ;;  %v1523_v41 = vrot.slane %v1521_v47, 5  ;;  %v1527_v42 = vrot.slane %v1525_v35, 4  ;;  %1219 = vst.msk [vmem:[#allocation2 + $0x58] sm:$0xf] %vm1171_vm6, %v967_v8  ;;  %v1221_v44 = vsel %vm6534_vm3, %v968_v28, %v1220_v30  ;;  %v805_v61 = vmax.f32 %v773_v22, 0.0 }
  0x9a   : > { %v1518_v46 = vor.u32 %v1517_v37, %v1514_v36  ;;  %v1533_v48 = vrot.slane %v1531_v39, 5  ;;  %1222 = vst [vmem:[#allocation2 + $0x5c] sm:$0x1] %v1221_v44  ;;  %v744_v20 = vmul.f32 %v6851_v16, %v6320_v15  ;;  %v836_v49 = vpack.c.bf16 %v804_v45, %v804_v45  ;;  %v1248_v32 = vld [vmem:[#allocation2 + $0x8c] sm:$0x1]  ;;  %v6327_v36 = vld [vmem:[%s6554_s16 + $0x10] sm:$0xff]  }
  0x9b   : > { %v1528_v13 = vor.u32 %v1527_v42, %v1523_v41  ;;  %v745_v51 = vmul.f32 %v6851_v16, %v6321_v18  ;;  %v548_v52 = vsel %vm6534_vm3, 0, %v547_v31  ;;  %v837_v55 = vpack.c.bf16 %v805_v61, %v805_v61 }
  0x9c   : > { %v1519_v53 = vrot.slane %v1518_v46, 4  ;;  %v780_v24 = vadd.f32 %v6865_v29, %v744_v20  ;;  %549 = vst [vmem:[#allocation2 + $0x24] sm:$0x1] %v548_v52  ;;  %v604_v58 = vsel %vm6542_vm5, 0, %v603_v17  ;;  %v1021_v62 = vshrl.u32 %v836_v49, 16 }
  0x9d   : > { %v1529_v59 = vrot.slane %v1528_v13, 4  ;;  %v1024_v63 = vshll.u32 %v836_v49, 16  ;;  %v781_v1 = vadd.f32 %v6865_v29, %v745_v51  ;;  %605 = vst [vmem:[#allocation2 + $0x2c] sm:$0x1] %v604_v58  ;;  %v1029_v56 = vshrl.u32 %v837_v55, 16 }
  0x9e   : > { %v1524_v2 = vsel %vm6688_vm13, %v1519_v53, %v1523_v41  ;;  %v1032_v4 = vshll.u32 %v837_v55, 16  ;;  %v812_v40 = vmax.f32 %v780_v24, 0.0  ;;  %v1023_v10 = vrot.slane %v1021_v62, 7 }
  0x9f   : > { %v1534_v54 = vsel %vm6688_vm13, %v1529_v59, %v1533_v48  ;;  %v1853_v34 = vunpack.c.l.b16 %v1524_v2  ;;  %v1425_v57 = vld [vmem:[#allocation2 + $0x54] sm:$0xf]  ;;  %v813_v12 = vmax.f32 %v781_v1, 0.0  ;;  %v1031_v21 = vrot.slane %v1029_v56, 7 }
  0xa0   : > { %v1854_v50 = vunpack.c.l.b16 %v1534_v54  ;;  %v6960_v15 = vld [vmem:[#allocation2 + $0x58] sm:$0xf]  ;;  %v1632_v18 = vshrl.u32 %v1425_v57, 16  ;;  %v1635_v19 = vshll.u32 %v1425_v57, 16  ;;  %v1026_v22 = vor.u32 %v1024_v63, %v1023_v10  ;;  %v1272_v1 = vld [vmem:[#allocation2 + $0xb4] sm:$0xf] }
  0xa1   : > { %v6962_v5 = vld [vmem:[#allocation2 + $0x5c] sm:$0x1]  ;;  %v1641_v25 = vshll.u32 %v6960_v15, 16  ;;  %v1645_v30 = vshrl.u32 %v6960_v15, 16  ;;  %v1027_v26 = vrot.slane %v1023_v10, 4  ;;  %v1034_v0 = vor.u32 %v1032_v4, %v1031_v21 }
  0xa2   : > { %v1883_v60 = vpack.c.b16 %v1854_v50, %v1853_v34  ;;  %v1634_v27 = vrot.slane %v1632_v18, 4  ;;  %v1637_v28 = vrot.slane %v1635_v19, 5  ;;  %v1651_v31 = vshll.u32 %v6962_v5, 16  ;;  %v1276_v54 = vld [vmem:[#allocation2 + $0xbc] sm:$0x1] }
  0xa3   : > { %v1643_v47 = vrot.slane %v1641_v25, 5  ;;  %v1647_v35 = vrot.slane %v1645_v30, 4  ;;  %v1036_v17 = vrot.slane %v1031_v21, 4  ;;  %v1245_v8 = vsel %vm6601_vm8, %v1026_v22, %v1244_v11 }
  0xa4   : > { %5818 = vmatmul.msk.bf16.gmra.mxu0 %vm1897_vm12, %v1883_v60  ;;  %v1638_v37 = vor.u32 %v1637_v28, %v1634_v27  ;;  %v1653_v39 = vrot.slane %v1651_v31, 5  ;;  %v844_v41 = vpack.c.bf16 %v812_v40, %v812_v40  ;;  %v1035_v44 = vsel %vm6608_vm9, %v1027_v26, %v1034_v0  ;;  %1246 = vst [vmem:[#allocation2 + $0x84] sm:$0xf] %v1245_v8 }
  0xa5   : > { %v1648_v42 = vor.u32 %v1647_v35, %v1643_v47  ;;  %v1249_v45 = vsel %vm6534_vm3, %v1036_v17, %v1248_v32  ;;  %v845_v46 = vpack.c.bf16 %v813_v12, %v813_v12  ;;  %1247 = vst.msk [vmem:[#allocation2 + $0x88] sm:$0xf] %vm1171_vm6, %v1035_v44  ;;  %v6272_v13 = vunpack.c.l.bf16 %v6327_v36 }
  0xa6   : > { %v1639_v48 = vrot.slane %v1638_v37, 4  ;;  %v1089_v61 = vshrl.u32 %v844_v41, 16  ;;  %v1092_v20 = vshll.u32 %v844_v41, 16  ;;  %1250 = vst [vmem:[#allocation2 + $0x8c] sm:$0x1] %v1249_v45  ;;  %v6273_v53 = vunpack.c.h.bf16 %v6327_v36 }
  0xa7   : > { %v1649_v49 = vrot.slane %v1648_v42, 4  ;;  %v1097_v51 = vshrl.u32 %v845_v46, 16  ;;  %v1100_v52 = vshll.u32 %v845_v46, 16  ;;  %v720_v58 = vmul.f32 %v6851_v16, %v6272_v13 }
  0xa8   : > { %v1644_v55 = vsel %vm6688_vm13, %v1639_v48, %v1643_v47  ;;  %v1091_v24 = vrot.slane %v1089_v61, 7  ;;  %v721_v2 = vmul.f32 %v6851_v16, %v6273_v53  ;;  %vm2308_vm15 = vcmask 1046532  }
  0xa9   : > { %v1654_v59 = vsel %vm6688_vm13, %v1649_v49, %v1653_v39  ;;  %v1863_v62 = vunpack.c.l.b16 %v1644_v55  ;;  %v1099_v63 = vrot.slane %v1097_v51, 7  ;;  %v756_v34 = vadd.f32 %v6865_v29, %v720_v58  ;;  %vm7012_vm2 = vmor %vm2307_vm14, %vm2308_vm15 }
  0xaa   : > { %v1864_v56 = vunpack.c.l.b16 %v1654_v59  ;;  %v1094_v4 = vor.u32 %v1092_v20, %v1091_v24  ;;  %v1095_v40 = vrot.slane %v1091_v24, 4  ;;  %v757_v18 = vadd.f32 %v6865_v29, %v721_v2  ;;  %v6374_v20 = vld [vmem:[#allocation2 + $0x4] sm:$0xf] }
  0xab   : > { %v1102_v57 = vor.u32 %v1100_v52, %v1099_v63  ;;  %v1104_v10 = vrot.slane %v1099_v63, 4  ;;  %v1433_v12 = vld [vmem:[#allocation2 + $0x84] sm:$0xf]  ;;  %v788_v19 = vmax.f32 %v756_v34, 0.0  ;;  %v2312_v13 = vrot.slane %v6374_v20, 5 }
  0xac   : > { %v1888_v11 = vpack.c.b16 %v1864_v56, %v1863_v62  ;;  %v1273_v50 = vsel %vm6601_vm8, %v1094_v4, %v1272_v1  ;;  %v1434_v21 = vld [vmem:[#allocation2 + $0x88] sm:$0xf]  ;;  %v1728_v25 = vshrl.u32 %v1433_v12, 16  ;;  %v1731_v30 = vshll.u32 %v1433_v12, 16  ;;  %v1188_v1 = vld [vmem:[#allocation2 + $0x24] sm:$0xf] }
  0xad   : > { %v1103_v16 = vsel %vm6608_vm9, %v1095_v40, %v1102_v57  ;;  %1274 = vst [vmem:[#allocation2 + $0xb4] sm:$0xf] %v1273_v50  ;;  %v1277_v22 = vsel %vm6534_vm3, %v1104_v10, %v1276_v54  ;;  %v1455_v26 = vld [vmem:[#allocation2 + $0x8c] sm:$0x1]  ;;  %v1737_v60 = vshll.u32 %v1434_v21, 16  ;;  %v1741_v27 = vshrl.u32 %v1434_v21, 16 }
  0xae   : > { %5823 = vmatmul.msk.bf16.gmra.mxu1 %vm1897_vm12, %v1888_v11  ;;  %1275 = vst.msk [vmem:[#allocation2 + $0xb8] sm:$0xf] %vm1171_vm6, %v1103_v16  ;;  %v820_v28 = vpack.c.bf16 %v788_v19, %v788_v19  ;;  %v1730_v29 = vrot.slane %v1728_v25, 4  ;;  %v1733_v31 = vrot.slane %v1731_v30, 5  ;;  %v1747_v32 = vshll.u32 %v1455_v26, 16  ;;  %v6214_v26 = vld [vmem:[#allocation2] sm:$0xff] }
  0xaf   : > { %1278 = vst [vmem:[#allocation2 + $0xbc] sm:$0x1] %v1277_v22  ;;  %v1739_v47 = vrot.slane %v1737_v60, 5  ;;  %v1743_v35 = vrot.slane %v1741_v27, 4  ;;  %v789_v0 = vmax.f32 %v757_v18, 0.0 }
  0xb0   : > { %v885_v17 = vshrl.u32 %v820_v28, 16  ;;  %v1734_v36 = vor.u32 %v1733_v31, %v1730_v29  ;;  %v888_v37 = vshll.u32 %v820_v28, 16  ;;  %v1749_v8 = vrot.slane %v1747_v32, 5  ;;  %v2259_v54 = vld [vmem:[#allocation2] sm:$0xe] }
  0xb1   : > { %v1744_v39 = vor.u32 %v1743_v35, %v1739_v47  ;;  %v821_v41 = vpack.c.bf16 %v789_v0, %v789_v0  ;;  %v6076_v12 = vld [vmem:[%s8272_s5 + $0x18] sm:$0xf]  ;;  %v1192_v21 = vld [vmem:[#allocation2 + $0x2c] sm:$0x1]  ;;  %v6375_v60 = vld [vmem:[#allocation2 + $0x8] sm:$0x1] }
  0xb2   : > { %v887_v42 = vrot.slane %v885_v17, 7  ;;  %v1735_v44 = vrot.slane %v1734_v36, 4  ;;  %v2315_v27 = vrot.slane %v6375_v60, 5  ;;  %v5912_v29 = vrot.slane %v2259_v54, 9  ;;  %v2931_v20 = vld [vmem:[#allocation2 + $0x10] sm:$0xf] }
  0xb3   : > { %v1745_v45 = vrot.slane %v1744_v39, 4  ;;  %v893_v61 = vshrl.u32 %v821_v41, 16  ;;  %v896_v55 = vshll.u32 %v821_v41, 16  ;;  %v4146_v31 = vsel %vm1946_vm0, %v6076_v12, 0  ;;  %v2260_v60 = vld [vmem:[#allocation2 + $0xc] sm:$0xe] }
  0xb4   : > { %v1441_v46 = vld [vmem:[#allocation2 + $0xb4] sm:$0xf]  ;;  %v890_v48 = vor.u32 %v888_v37, %v887_v42  ;;  %v1740_v49 = vsel %vm6688_vm13, %v1735_v44, %v1739_v47  ;;  %v891_v10 = vrot.slane %v887_v42, 4  ;;  %v2314_v0 = vrot.slane %v2312_v13, 4  ;;  %4155 = vmatpush.bf16.msra.mxu2 %v4146_v31  ;;  %v2930_v44 = vld [vmem:[#allocation2 + $0xc] sm:$0xf] }
  0xb5   : > { %v1442_v51 = vld [vmem:[#allocation2 + $0xb8] sm:$0xf]  ;;  %v1824_v52 = vshrl.u32 %v1441_v46, 16  ;;  %v1827_v53 = vshll.u32 %v1441_v46, 16  ;;  %v1750_v24 = vsel %vm6688_vm13, %v1745_v45, %v1749_v8  ;;  %v1871_v58 = vunpack.c.l.b16 %v1740_v49  ;;  %v6157_v49 = vld [vmem:[%s8272_s5 + $0x1c] sm:$0xf] }
  0xb6   : > { %v1459_v59 = vld [vmem:[#allocation2 + $0xbc] sm:$0x1]  ;;  %v1833_v62 = vshll.u32 %v1442_v51, 16  ;;  %v1837_v63 = vshrl.u32 %v1442_v51, 16  ;;  %v1872_v2 = vunpack.c.l.b16 %v1750_v24  ;;  %v895_v11 = vrot.slane %v893_v61, 7 }
  0xb7   : > { %v1826_v56 = vrot.slane %v1824_v52, 4  ;;  %v1829_v4 = vrot.slane %v1827_v53, 5  ;;  %v1843_v40 = vshll.u32 %v1459_v59, 16  ;;  %v1189_v19 = vsel %vm6601_vm8, %v890_v48, %v1188_v1 }
  0xb8   : > { %v1835_v34 = vrot.slane %v1833_v62, 5  ;;  %v1839_v57 = vrot.slane %v1837_v63, 4  ;;  %v1892_v50 = vpack.c.b16 %v1872_v2, %v1871_v58  ;;  %v898_v16 = vor.u32 %v896_v55, %v895_v11  ;;  %1190 = vst [vmem:[#allocation2 + $0x24] sm:$0xf] %v1189_v19  ;;  %v6059_v55 = vld [vmem:[%s8272_s5 + $0x14] sm:$0xf] }
  0xb9   : > { %v1830_v18 = vor.u32 %v1829_v4, %v1826_v56  ;;  %v1845_v30 = vrot.slane %v1843_v40, 5  ;;  %v900_v22 = vrot.slane %v895_v11, 4  ;;  %v2313_v41 = vsel %vm7012_vm2, %v5912_v29, %v2312_v13  ;;  %v6215_v29 = vld [vmem:[#allocation2 + $0xc] sm:$0xff] }
  0xba   : > { %v1840_v25 = vor.u32 %v1839_v57, %v1835_v34  ;;  %5827 = vmatmul.msk.bf16.gmra.mxu2 %vm1897_vm12, %v1892_v50  ;;  %v899_v47 = vsel %vm6608_vm9, %v891_v10, %v898_v16  ;;  %v2316_v42 = vsel %vm7012_vm2, %v2314_v0, %v2315_v27  ;;  %v2424_v51 = vunpack.c.l.b16 %v2313_v41  ;;  %v6190_v57 = vld [vmem:[%s8272_s5 + $0x20] sm:$0xf]  ;;  %v6230_v41 = vld [vmem:[#allocation2 + $0xc] sm:$0xff] }
  0xbb   : > { %v1831_v28 = vrot.slane %v1830_v18, 4  ;;  %v1193_v35 = vsel %vm6534_vm3, %v900_v22, %v1192_v21  ;;  %1191 = vst.msk [vmem:[#allocation2 + $0x28] sm:$0xf] %vm1171_vm6, %v899_v47  ;;  %v2425_v52 = vunpack.c.l.b16 %v2316_v42  ;;  %v2979_v53 = vshrl.u32 %v2930_v44, 16 }
  0xbc   : > { %v1841_v32 = vrot.slane %v1840_v25, 4  ;;  %1194 = vst [vmem:[#allocation2 + $0x2c] sm:$0x1] %v1193_v35  ;;  %v4800_v13 = vsel %vm1946_vm0, %v6157_v49, 0  ;;  %v2982_v62 = vshll.u32 %v2930_v44, 16  ;;  %v3859_v63 = vsel %vm1946_vm0, %v6059_v55, 0 }
  0xbd   : > { %v1836_v17 = vsel %vm6688_vm13, %v1831_v28, %v1835_v34  ;;  %4809 = vmatpush.bf16.msra.mxu3 %v4800_v13  ;;  %v2988_v4 = vshll.u32 %v2931_v20, 16  ;;  %v2992_v40 = vshrl.u32 %v2931_v20, 16  ;;  %3868 = vmatpush.bf16.msra.mxu1 %v3859_v63  ;;  %v2456_v12 = vpack.c.b16 %v2425_v52, %v2424_v51  ;;  %v2932_v28 = vld [vmem:[#allocation2 + $0x14] sm:$0x1]  ;;  %v2934_v55 = vld [vmem:[#allocation2 + $0x1c] sm:$0xf] }
  0xbe   : > { %v1846_v37 = vsel %vm6688_vm13, %v1841_v32, %v1845_v30  ;;  %v1879_v39 = vunpack.c.l.b16 %v1836_v17  ;;  %5896 = vmatmul.msk.bf16.vlgmr.msrb.gmra.mxu1 %vm1897_vm12, %v6214_v26  ;;  %v5198_v50 = vsel %vm1946_vm0, %v6190_v57, 0  ;;  %v2981_v19 = vrot.slane %v2979_v53, 4  ;;  %v2933_v53 = vld [vmem:[#allocation2 + $0x18] sm:$0xf] }
  0xbf   : > { %v1880_v8 = vunpack.c.l.b16 %v1846_v37  ;;  %v1417_v46 = vld [vmem:[#allocation2 + $0x24] sm:$0xf]  ;;  %v2984_v21 = vrot.slane %v2982_v62, 5  ;;  %5207 = vmatpush.bf16.msra.mxu0 %v5198_v50  ;;  %v2319_v25 = vrot.slane %v6824_v7, 5  ;;  %v2990_v22 = vrot.slane %v2988_v4, 5 }
  0xc0   : > { %v1536_v48 = vshrl.u32 %v1417_v46, 16  ;;  %v1539_v61 = vshll.u32 %v1417_v46, 16  ;;  %v2994_v26 = vrot.slane %v2992_v40, 4  ;;  %v5913_v47 = vrot.slane %v2260_v60, 9 }
  0xc1   : > { %v1896_v45 = vpack.c.b16 %v1880_v8, %v1879_v39  ;;  %v2321_v35 = vrot.slane %v2319_v25, 4  ;;  %v2322_v0 = vrot.slane %v6827_v38, 5  ;;  %v2985_v17 = vor.u32 %v2984_v21, %v2981_v19 }
  0xc2   : > { %v7031_v24 = vld [vmem:[#allocation2 + $0x28] sm:$0xf]  ;;  %v1538_v58 = vrot.slane %v1536_v48, 4  ;;  %v1541_v59 = vrot.slane %v1539_v61, 5  ;;  %v2995_v37 = vor.u32 %v2994_v26, %v2990_v22  ;;  %v2998_v39 = vshll.u32 %v2932_v28, 16 }
  0xc3   : > { %5831 = vmatmul.msk.bf16.gmra.mxu3 %vm1897_vm12, %v1896_v45  ;;  %v7034_v1 = vld [vmem:[#allocation2 + $0x2c] sm:$0x1]  ;;  %v1545_v2 = vshll.u32 %v7031_v24, 16  ;;  %v1549_v56 = vshrl.u32 %v7031_v24, 16  ;;  %v2320_v44 = vsel %vm7012_vm2, %v5913_v47, %v2319_v25  ;;  %v2323_v45 = vsel %vm7012_vm2, %v2321_v35, %v2322_v0  ;;  %v2261_v61 = vld [vmem:[#allocation2 + $0x18] sm:$0xe] }
  0xc4   : > { %v1542_v54 = vor.u32 %v1541_v59, %v1538_v58  ;;  %v1555_v34 = vshll.u32 %v7034_v1, 16  ;;  %v2986_v46 = vrot.slane %v2985_v17, 4  ;;  %v2996_v48 = vrot.slane %v2995_v37, 4  ;;  %v2935_v25 = vld [vmem:[#allocation2 + $0x20] sm:$0x1] }
  0xc5   : > { %v1547_v10 = vrot.slane %v1545_v2, 5  ;;  %v1551_v11 = vrot.slane %v1549_v56, 4  ;;  %v3000_v38 = vrot.slane %v2998_v39, 5  ;;  %v2326_v20 = vrot.slane %v6933_v23, 5 }
  0xc6   : > { %v1543_v18 = vrot.slane %v1542_v54, 4  ;;  %v1557_v16 = vrot.slane %v1555_v34, 5  ;;  %v2329_v49 = vrot.slane %v6935_v33, 5  ;;  %v2426_v51 = vunpack.c.l.b16 %v2320_v44 }
  0xc7   : > { %v1552_v30 = vor.u32 %v1551_v11, %v1547_v10  ;;  %v2427_v52 = vunpack.c.l.b16 %v2323_v45  ;;  %v5914_v13 = vrot.slane %v2261_v61, 9  ;;  %v2328_v58 = vrot.slane %v2326_v20, 4  ;;  %v2938_v61 = vld [vmem:[#allocation2 + $0x2c] sm:$0x1] }
  0xc8   : > { %v1548_v27 = vsel %vm6688_vm13, %v1543_v18, %v1547_v10  ;;  %v2991_v59 = vsel %vm6688_vm13, %v2986_v46, %v2990_v22  ;;  %v3001_v62 = vsel %vm6688_vm13, %v2996_v48, %v3000_v38  ;;  %v3003_v23 = vshrl.u32 %v2933_v53, 16  ;;  %v6217_v46 = vld [vmem:[#allocation2 + $0x24] sm:$0xff] }
  0xc9   : > { %v1553_v31 = vrot.slane %v1552_v30, 4  ;;  %v1855_v32 = vunpack.c.l.b16 %v1548_v27  ;;  %v2327_v63 = vsel %vm7012_vm2, %v5914_v13, %v2326_v20  ;;  %v3006_v2 = vshll.u32 %v2933_v53, 16 }
  0xca   : > { %5929 = vmatmul.msk.bf16.vlgmr.msrb.gmra.mxu2 %vm1897_vm12, %v2456_v12  ;;  %v2330_v33 = vsel %vm7012_vm2, %v2328_v58, %v2329_v49  ;;  %v2428_v56 = vunpack.c.l.b16 %v2327_v63  ;;  %v2457_v4 = vpack.c.b16 %v2427_v52, %v2426_v51  ;;  %v3012_v40 = vshll.u32 %v2934_v55, 16  ;;  %v6216_v12 = vld [vmem:[#allocation2 + $0x18] sm:$0xff] }
  0xcb   : > { %v1558_v7 = vsel %vm6688_vm13, %v1553_v31, %v1557_v16  ;;  %v3016_v54 = vshrl.u32 %v2934_v55, 16  ;;  %v2429_v34 = vunpack.c.l.b16 %v2330_v33  ;;  %v3364_v10 = vunpack.c.l.b16 %v2991_v59  ;;  %v6231_v16 = vld [vmem:[#allocation2 + $0x18] sm:$0xff]  ;;  %v2936_v31 = vld [vmem:[#allocation2 + $0x24] sm:$0xf]  ;;  %v2939_v33 = vld [vmem:[#allocation2 + $0x30] sm:$0xf] }
  0xcc   : > { %v1856_v8 = vunpack.c.l.b16 %v1558_v7  ;;  %v3365_v11 = vunpack.c.l.b16 %v3001_v62  ;;  %v3005_v50 = vrot.slane %v3003_v23, 4  ;;  %v3008_v18 = vrot.slane %v3006_v2, 5 }
  0xcd   : > { %v2458_v57 = vpack.c.b16 %v2429_v34, %v2428_v56  ;;  %v3014_v19 = vrot.slane %v3012_v40, 5  ;;  %v3018_v21 = vrot.slane %v3016_v54, 4  ;;  %v3022_v60 = vshll.u32 %v2935_v25, 16  ;;  %v2940_v56 = vld [vmem:[#allocation2 + $0x34] sm:$0xf] }
  0xce   : > { %5897 = vmatmul.msk.bf16.gmra.mxu1 %vm1897_vm12, %v6215_v29  ;;  %v1884_v42 = vpack.c.b16 %v1856_v8, %v1855_v32  ;;  %v3396_v30 = vpack.c.b16 %v3365_v11, %v3364_v10  ;;  %v3009_v22 = vor.u32 %v3008_v18, %v3005_v50  ;;  %v2937_v32 = vld [vmem:[#allocation2 + $0x28] sm:$0xf]  ;;  %v3027_v47 = vshrl.u32 %v2936_v31, 16  ;;  %v2262_v8 = vld [vmem:[#allocation2 + $0x24] sm:$0xe]  ;;  %v7089_v18 = vpop.f32.mrf.mxu1 }
  0xcf   : > { %v3019_v26 = vor.u32 %v3018_v21, %v3014_v19  ;;  %v3024_v29 = vrot.slane %v3022_v60, 5  ;;  %v3030_v35 = vshll.u32 %v2936_v31, 16  ;;  %v3036_v17 = vshll.u32 %v2937_v32, 16  ;;  %v6377_v31 = vld [vmem:[#allocation2 + $0x38] sm:$0x1] }
  0xd0   : > { %5819 = vmatmul.msk.bf16.gmra.mxu0 %vm1897_vm12, %v1884_v42  ;;  %v3010_v27 = vrot.slane %v3009_v22, 4  ;;  %v3040_v37 = vshrl.u32 %v2937_v32, 16  ;;  %v2333_v39 = vrot.slane %v7031_v24, 5  ;;  %v3029_v44 = vrot.slane %v3027_v47, 4  ;;  %v6232_v24 = vld [vmem:[#allocation2 + $0x24] sm:$0xff]  ;;  %v6218_v22 = vld [vmem:[#allocation2 + $0x30] sm:$0xff] }
  0xd1   : > { %v3020_v28 = vrot.slane %v3019_v26, 4  ;;  %v3032_v45 = vrot.slane %v3030_v35, 5  ;;  %v3038_v48 = vrot.slane %v3036_v17, 5  ;;  %v5915_v20 = vrot.slane %v2262_v8, 9 }
  0xd2   : > { %v3015_v0 = vsel %vm6688_vm13, %v3010_v27, %v3014_v19  ;;  %v3042_v38 = vrot.slane %v3040_v37, 4  ;;  %v2335_v49 = vrot.slane %v2333_v39, 4  ;;  %v2336_v51 = vrot.slane %v7034_v1, 5  ;;  %v2263_v19 = vld [vmem:[#allocation2 + $0x30] sm:$0xe] }
  0xd3   : > { %6010 = vmatmul.msk.bf16.vlgmr.msrb.gmra.mxu3 %vm1897_vm12, %v6230_v41  ;;  %v3025_v7 = vsel %vm6688_vm13, %v3020_v28, %v3024_v29  ;;  %v3366_v41 = vunpack.c.l.b16 %v3015_v0  ;;  %v3033_v53 = vor.u32 %v3032_v45, %v3029_v44  ;;  %v3046_v55 = vshll.u32 %v2938_v61, 16  ;;  %v2941_v27 = vld [vmem:[#allocation2 + $0x38] sm:$0x1]  ;;  %v6233_v0 = vld [vmem:[#allocation2 + $0x30] sm:$0xff]  ;;  %v2943_v61 = vld [vmem:[#allocation2 + $0x40] sm:$0xf] }
  0xd4   : > { %v3367_v42 = vunpack.c.l.b16 %v3025_v7  ;;  %v3043_v13 = vor.u32 %v3042_v38, %v3038_v48  ;;  %v2334_v58 = vsel %vm7012_vm2, %v5915_v20, %v2333_v39  ;;  %v2337_v59 = vsel %vm7012_vm2, %v2335_v49, %v2336_v51 }
  0xd5   : > { %v3034_v62 = vrot.slane %v3033_v53, 4  ;;  %v3048_v1 = vrot.slane %v3046_v55, 5  ;;  %v2430_v23 = vunpack.c.l.b16 %v2334_v58  ;;  %v2431_v2 = vunpack.c.l.b16 %v2337_v59  ;;  %v6378_v55 = vld [vmem:[#allocation2 + $0x40] sm:$0xf]  ;;  %v2264_v59 = vld [vmem:[#allocation2 + $0x3c] sm:$0xe] }
  0xd6   : > { %v3397_v52 = vpack.c.b16 %v3367_v42, %v3366_v41  ;;  %v3044_v63 = vrot.slane %v3043_v13, 4  ;;  %v3051_v40 = vshrl.u32 %v2939_v33, 16  ;;  %v3054_v54 = vshll.u32 %v2939_v33, 16  ;;  %v7098_v41 = vpop.f32.mrf.mxu2  ;;  %v7101_v38 = vpop.f32.mrf.mxu1  ;;  %v6219_v33 = vld [vmem:[#allocation2 + $0x3c] sm:$0xff] }
  0xd7   : > { %v3060_v10 = vshll.u32 %v2940_v56, 16  ;;  %v3064_v11 = vshrl.u32 %v2940_v56, 16  ;;  %v5916_v28 = vrot.slane %v2263_v19, 9  ;;  %v2343_v32 = vrot.slane %v6377_v31, 5 }
  0xd8   : > { %v3049_v34 = vsel %vm6688_vm13, %v3044_v63, %v3048_v1  ;;  %v3070_v17 = vshll.u32 %v2941_v27, 16  ;;  %v3088_v13 = vshrl.u32 %v2943_v61, 16  ;;  %v2347_v58 = vrot.slane %v6378_v55, 5 }
  0xd9   : > { %v3369_v25 = vunpack.c.l.b16 %v3049_v34  ;;  %v3062_v26 = vrot.slane %v3060_v10, 5  ;;  %v3066_v60 = vrot.slane %v3064_v11, 4  ;;  %v6379_v11 = vld [vmem:[#allocation2 + $0x44] sm:$0x1] }
  0xda   : > { %5930 = vmatmul.msk.bf16.gmra.mxu2 %vm1897_vm12, %v2457_v4  ;;  %v3039_v4 = vsel %vm6688_vm13, %v3034_v62, %v3038_v48  ;;  %v3072_v44 = vrot.slane %v3070_v17, 5  ;;  %v2942_v48 = vld [vmem:[#allocation2 + $0x3c] sm:$0xf]  ;;  %v2349_v10 = vrot.slane %v2347_v58, 4 }
  0xdb   : > { %v3368_v21 = vunpack.c.l.b16 %v3039_v4  ;;  %v3067_v7 = vor.u32 %v3066_v60, %v3062_v26  ;;  %v3075_v49 = vshrl.u32 %v2942_v48, 16  ;;  %v3078_v51 = vshll.u32 %v2942_v48, 16  ;;  %v7120_v60 = vpop.f32.mrf.mxu0 }
  0xdc   : > { %v3090_v4 = vrot.slane %v3088_v13, 4 }
  0xdd   : > { %v3398_v47 = vpack.c.b16 %v3369_v25, %v3368_v21  ;;  %v3068_v42 = vrot.slane %v3067_v7, 4  ;;  %v3077_v1 = vrot.slane %v3075_v49, 4  ;;  %v6234_v21 = vld [vmem:[#allocation2 + $0x3c] sm:$0xff] }
  0xde   : > { %5898 = vmatmul.msk.bf16.gmra.mxu1 %vm1897_vm12, %v6216_v12  ;;  %v6376_v12 = vld [vmem:[#allocation2 + $0x34] sm:$0xf]  ;;  %v7112_v34 = vpop.f32.mrf.mxu2 }
  0xdf   : > { %v2340_v50 = vrot.slane %v6376_v12, 5  ;;  %v2350_v12 = vrot.slane %v6379_v11, 5 }
  0xe0   : > { %6027 = vmatmul.msk.bf16.vlgmr.msrb.gmra.mxu0 %vm1897_vm12, %v3396_v30  ;;  %v3053_v30 = vrot.slane %v3051_v40, 4  ;;  %v7110_v40 = vpop.f32.mrf.mxu1 }
  0xe1   : > { %v2342_v29 = vrot.slane %v2340_v50, 4  ;;  %v2341_v37 = vsel %vm7012_vm2, %v5916_v28, %v2340_v50 }
  0xe2   : > { %v2432_v45 = vunpack.c.l.b16 %v2341_v37 }
  0xe3   : > { %6011 = vmatmul.msk.bf16.gmra.mxu3 %vm1897_vm12, %v6231_v16  ;;  %v3056_v16 = vrot.slane %v3054_v54, 5  ;;  %v2344_v39 = vsel %vm7012_vm2, %v2342_v29, %v2343_v32  ;;  %v2944_v54 = vld [vmem:[#allocation2 + $0x44] sm:$0x1]  ;;  %v2945_v32 = vld [vmem:[#allocation2 + $0x48] sm:$0xf] }
  0xe4   : > { %v3099_v17 = vshrl.u32 %v2945_v32, 16  ;;  %v3102_v37 = vshll.u32 %v2945_v32, 16 }
  0xe5   : > { %v3057_v35 = vor.u32 %v3056_v16, %v3053_v30  ;;  %v3094_v30 = vshll.u32 %v2944_v54, 16  ;;  %v6235_v54 = vld [vmem:[#allocation2 + $0x48] sm:$0xff] }
  0xe7   : > { %v3058_v8 = vrot.slane %v3057_v35, 4  ;;  %v3096_v28 = vrot.slane %v3094_v30, 5 }
  0xe9   : > { %v3063_v20 = vsel %vm6688_vm13, %v3058_v8, %v3062_v26 }
  0xea   : > { %5931 = vmatmul.msk.bf16.gmra.mxu2 %vm1897_vm12, %v2458_v57  ;;  %v2459_v57 = vpack.c.b16 %v2431_v2, %v2430_v23  ;;  %v3370_v62 = vunpack.c.l.b16 %v3063_v20  ;;  %v3080_v23 = vrot.slane %v3078_v51, 5  ;;  %v7107_v2 = vpop.f32.mrf.mxu3  ;;  %v3101_v51 = vrot.slane %v3099_v17, 4 }
  0xec   : > { %v3081_v19 = vor.u32 %v3080_v23, %v3077_v1  ;;  %v7136_v23 = vpop.f32.mrf.mxu0 }
  0xee   : > { %5899 = vmatmul.msk.bf16.gmra.mxu1 %vm1897_vm12, %v6217_v46  ;;  %v2433_v46 = vunpack.c.l.b16 %v2344_v39  ;;  %v3082_v26 = vrot.slane %v3081_v19, 4  ;;  %v7129_v39 = vpop.f32.mrf.mxu2 }
  0xf0   : > { %6028 = vmatmul.msk.bf16.gmra.mxu0 %vm1897_vm12, %v3397_v52  ;;  %v3073_v52 = vsel %vm6688_vm13, %v3068_v42, %v3072_v44  ;;  %v2460_v53 = vpack.c.b16 %v2433_v46, %v2432_v45  ;;  %v6380_v46 = vld [vmem:[#allocation2 + $0x4c] sm:$0xf] }
  0xf1   : > { %v3371_v63 = vunpack.c.l.b16 %v3073_v52  ;;  %v2354_v48 = vrot.slane %v6380_v46, 5  ;;  %v3104_v52 = vrot.slane %v3102_v37, 5 }
  0xf2   : > { %v7125_v35 = vpop.f32.mrf.mxu3 }
  0xf3   : > { %6012 = vmatmul.msk.bf16.gmra.mxu3 %vm1897_vm12, %v6232_v24  ;;  %v3084_v24 = vshll.u32 %v2943_v61, 16  ;;  %v3399_v50 = vpack.c.b16 %v3371_v63, %v3370_v62  ;;  %v2265_v61 = vld [vmem:[#allocation2 + $0x48] sm:$0xe]  ;;  %v2356_v62 = vrot.slane %v2354_v48, 4  ;;  %v6381_v63 = vld [vmem:[#allocation2 + $0x50] sm:$0x1] }
  0xf4   : > { %v2357_v1 = vrot.slane %v6381_v63, 5  ;;  %v6236_v63 = vld [vmem:[#allocation2 + $0x54] sm:$0xff] }
  0xf5   : > { %v3086_v56 = vrot.slane %v3084_v24, 5  ;;  %v7153_v32 = vpop.f32.mrf.mxu0 }
  0xf6   : > { %v7141_v11 = vpop.f32.mrf.mxu2 }
  0xf7   : > { %v3091_v25 = vor.u32 %v3090_v4, %v3086_v56  ;;  %v3087_v7 = vsel %vm6688_vm13, %v3082_v26, %v3086_v56  ;;  %v3105_v56 = vor.u32 %v3104_v52, %v3101_v51 }
  0xf8   : > { %v3372_v20 = vunpack.c.l.b16 %v3087_v7 }
  0xf9   : > { %v3092_v27 = vrot.slane %v3091_v25, 4  ;;  %v3106_v19 = vrot.slane %v3105_v56, 4 }
  0xfa   : > { %5932 = vmatmul.msk.bf16.gmra.mxu2 %vm1897_vm12, %v2459_v57  ;;  %v5917_v57 = vrot.slane %v2264_v59, 9  ;;  %v5918_v59 = vrot.slane %v2265_v61, 9  ;;  %v7138_v4 = vpop.f32.mrf.mxu3 }
  0xfb   : > { %v3097_v8 = vsel %vm6688_vm13, %v3092_v27, %v3096_v28  ;;  %v2949_v27 = vld [vmem:[#allocation2 + $0x58] sm:$0xf] }
  0xfc   : > { %v2348_v16 = vsel %vm7012_vm2, %v5917_v57, %v2347_v58  ;;  %v3373_v49 = vunpack.c.l.b16 %v3097_v8  ;;  %v2947_v58 = vld [vmem:[#allocation2 + $0x50] sm:$0x1]  ;;  %v3132_v17 = vshll.u32 %v2949_v27, 16  ;;  %v3136_v37 = vshrl.u32 %v2949_v27, 16 }
  0xfd   : > { %v2434_v29 = vunpack.c.l.b16 %v2348_v16 }
  0xfe   : > { %5900 = vmatmul.msk.bf16.gmra.mxu1 %vm1897_vm12, %v6218_v22  ;;  %v2351_v22 = vsel %vm7012_vm2, %v2349_v10, %v2350_v12  ;;  %v3118_v10 = vshll.u32 %v2947_v58, 16  ;;  %v2355_v12 = vsel %vm7012_vm2, %v5918_v59, %v2354_v48  ;;  %v3138_v51 = vrot.slane %v3136_v37, 4  ;;  %v6382_v37 = vld [vmem:[#allocation2 + $0x64] sm:$0xf] }
  0xff   : > { %v2435_v31 = vunpack.c.l.b16 %v2351_v22  ;;  %v2436_v30 = vunpack.c.l.b16 %v2355_v12  ;;  %v2948_v22 = vld [vmem:[#allocation2 + $0x54] sm:$0xf]  ;;  %v2364_v58 = vrot.slane %v6962_v5, 5 }
 0x100   : > { %6029 = vmatmul.msk.bf16.gmra.mxu0 %vm1897_vm12, %v3398_v47  ;;  %v7123_v47 = vpop.f32.mrf.mxu1  ;;  %v3120_v25 = vrot.slane %v3118_v10, 5 }
 0x101   : > { %v2461_v42 = vpack.c.b16 %v2435_v31, %v2434_v29  ;;  %v3123_v29 = vshrl.u32 %v2948_v22, 16  ;;  %v3126_v31 = vshll.u32 %v2948_v22, 16  ;;  %v2952_v22 = vld [vmem:[#allocation2 + $0x64] sm:$0xf] }
 0x102   : > { %v7157_v8 = vpop.f32.mrf.mxu3 }
 0x103   : > { %6013 = vmatmul.msk.bf16.gmra.mxu3 %vm1897_vm12, %v6233_v0  ;;  %v2946_v0 = vld [vmem:[#allocation2 + $0x4c] sm:$0xf]  ;;  %v3125_v48 = vrot.slane %v3123_v29, 4  ;;  %v3128_v61 = vrot.slane %v3126_v31, 5 }
 0x104   : > { %v3108_v44 = vshll.u32 %v2946_v0, 16  ;;  %v3112_v45 = vshrl.u32 %v2946_v0, 16 }
 0x106   : > { %v3110_v24 = vrot.slane %v3108_v44, 5  ;;  %v3114_v13 = vrot.slane %v3112_v45, 4  ;;  %v2266_v44 = vld [vmem:[#allocation2 + $0x54] sm:$0xe] }
 0x108   : > { %v7134_v55 = vpop.f32.mrf.mxu1  ;;  %v3115_v57 = vor.u32 %v3114_v13, %v3110_v24  ;;  %v3111_v28 = vsel %vm6688_vm13, %v3106_v19, %v3110_v24  ;;  %v5919_v24 = vrot.slane %v2266_v44, 9  ;;  %v2267_v44 = vld [vmem:[#allocation2 + $0x60] sm:$0xe] }
 0x109   : > { %v3374_v45 = vunpack.c.l.b16 %v3111_v28 }
 0x10a   : > { %5933 = vmatmul.msk.bf16.gmra.mxu2 %vm1897_vm12, %v2460_v53  ;;  %v6220_v53 = vld [vmem:[#allocation2 + $0x48] sm:$0xff] }
 0x10e   : > { %5901 = vmatmul.msk.bf16.gmra.mxu1 %vm1897_vm12, %v6219_v33  ;;  %v3400_v33 = vpack.c.b16 %v3373_v49, %v3372_v20  ;;  %v3134_v49 = vrot.slane %v3132_v17, 5  ;;  %v3160_v17 = vshrl.u32 %v2952_v22, 16 }
 0x110   : > { %6030 = vmatmul.msk.bf16.gmra.mxu0 %vm1897_vm12, %v3399_v50  ;;  %v2358_v50 = vsel %vm7012_vm2, %v2356_v62, %v2357_v1  ;;  %v7149_v26 = vpop.f32.mrf.mxu1  ;;  %v6221_v62 = vld [vmem:[#allocation2 + $0x54] sm:$0xff]  ;;  %v3139_v1 = vor.u32 %v3138_v51, %v3134_v49 }
 0x111   : > { %v2437_v16 = vunpack.c.l.b16 %v2358_v50  ;;  %v7160_v20 = vpop.f32.mrf.mxu2 }
 0x112   : > { %v3140_v12 = vrot.slane %v3139_v1, 4 }
 0x113   : > { %6014 = vmatmul.msk.bf16.gmra.mxu3 %vm1897_vm12, %v6234_v21  ;;  %v3116_v21 = vrot.slane %v3115_v57, 4  ;;  %v2462_v7 = vpack.c.b16 %v2437_v16, %v2436_v30  ;;  %v7171_v57 = vpop.f32.mrf.mxu0 }
 0x115   : > { %v3121_v0 = vsel %vm6688_vm13, %v3116_v21, %v3120_v25  ;;  %v2951_v25 = vld [vmem:[#allocation2 + $0x60] sm:$0xf] }
 0x116   : > { %v3375_v46 = vunpack.c.l.b16 %v3121_v0  ;;  %v3147_v28 = vshrl.u32 %v2951_v25, 16  ;;  %v3150_v29 = vshll.u32 %v2951_v25, 16 }
 0x118   : > { %v3401_v59 = vpack.c.b16 %v3375_v46, %v3374_v45 }
 0x119   : > { %v7179_v16 = vpop.f32.mrf.mxu2 }
 0x11a   : > { %5934 = vmatmul.msk.bf16.gmra.mxu2 %vm1897_vm12, %v2461_v42  ;;  %v2361_v42 = vrot.slane %v6960_v15, 5  ;;  %v3129_v15 = vor.u32 %v3128_v61, %v3125_v48  ;;  %v3149_v48 = vrot.slane %v3147_v28, 4  ;;  %v3152_v61 = vrot.slane %v3150_v29, 5 }
 0x11c   : > { %v2363_v13 = vrot.slane %v2361_v42, 4  ;;  %v2362_v56 = vsel %vm7012_vm2, %v5919_v24, %v2361_v42  ;;  %v3130_v10 = vrot.slane %v3129_v15, 4  ;;  %v7174_v5 = vpop.f32.mrf.mxu3  ;;  %v2368_v42 = vrot.slane %v6382_v37, 5  ;;  %v2953_v15 = vld [vmem:[#allocation2 + $0x68] sm:$0x1] }
 0x11d   : > { %v2438_v19 = vunpack.c.l.b16 %v2362_v56  ;;  %v3153_v56 = vor.u32 %v3152_v61, %v3149_v48 }
 0x11e   : > { %5902 = vmatmul.msk.bf16.gmra.mxu1 %vm1897_vm12, %v6220_v53  ;;  %v2950_v53 = vld [vmem:[#allocation2 + $0x5c] sm:$0x1]  ;;  %v3135_v27 = vsel %vm6688_vm13, %v3130_v10, %v3134_v49  ;;  %v2370_v1 = vrot.slane %v2368_v42, 4  ;;  %v6222_v10 = vld [vmem:[#allocation2 + $0x60] sm:$0xff] }
 0x11f   : > { %v3376_v45 = vunpack.c.l.b16 %v3135_v27 }
 0x120   : > { %6031 = vmatmul.msk.bf16.gmra.mxu0 %vm1897_vm12, %v3400_v33  ;;  %v3142_v33 = vshll.u32 %v2950_v53, 16  ;;  %v3162_v53 = vrot.slane %v3160_v17, 4 }
 0x121   : > { %v7185_v51 = vpop.f32.mrf.mxu0 }
 0x122   : > { %v3144_v50 = vrot.slane %v3142_v33, 5 }
 0x123   : > { %6015 = vmatmul.msk.bf16.gmra.mxu3 %vm1897_vm12, %v6235_v54  ;;  %v2365_v54 = vsel %vm7012_vm2, %v2363_v13, %v2364_v58  ;;  %v6383_v13 = vld [vmem:[#allocation2 + $0x68] sm:$0x1] }
 0x124   : > { %v2439_v21 = vunpack.c.l.b16 %v2365_v54  ;;  %v3145_v31 = vsel %vm6688_vm13, %v3140_v12, %v3144_v50  ;;  %v2371_v58 = vrot.slane %v6383_v13, 5  ;;  %v6237_v12 = vld [vmem:[#allocation2 + $0x60] sm:$0xff]  ;;  %v6384_v13 = vld [vmem:[#allocation2 + $0x70] sm:$0xf] }
 0x125   : > { %v3377_v46 = vunpack.c.l.b16 %v3145_v31 }
 0x126   : > { %v2463_v0 = vpack.c.b16 %v2439_v21, %v2438_v19  ;;  %v3166_v19 = vshll.u32 %v2953_v15, 16  ;;  %v2372_v25 = vsel %vm7012_vm2, %v2370_v1, %v2371_v58  ;;  %v2375_v58 = vrot.slane %v6384_v13, 5  ;;  %v2268_v1 = vld [vmem:[#allocation2 + $0x6c] sm:$0xe] }
 0x127   : > { %v3402_v33 = vpack.c.b16 %v3377_v46, %v3376_v45  ;;  %v2441_v31 = vunpack.c.l.b16 %v2372_v25 }
 0x128   : > { %v3168_v28 = vrot.slane %v3166_v19, 5 }
 0x129   : > { %v7200_v17 = vpop.f32.mrf.mxu0 }
 0x12a   : > { %5935 = vmatmul.msk.bf16.gmra.mxu2 %vm1897_vm12, %v2462_v7  ;;  %v3156_v7 = vshll.u32 %v2952_v22, 16  ;;  %v2954_v22 = vld [vmem:[#allocation2 + $0x6c] sm:$0xf] }
 0x12b   : > { %v7163_v52 = vpop.f32.mrf.mxu1  ;;  %v3171_v37 = vshrl.u32 %v2954_v22, 16 }
 0x12c   : > { %v3158_v49 = vrot.slane %v3156_v7, 5 }
 0x12d   : > { %v3173_v15 = vrot.slane %v3171_v37, 4 }
 0x12e   : > { %5903 = vmatmul.msk.bf16.gmra.mxu1 %vm1897_vm12, %v6221_v62  ;;  %v3163_v50 = vor.u32 %v3162_v53, %v3158_v49 }
 0x130   : > { %6032 = vmatmul.msk.bf16.gmra.mxu0 %vm1897_vm12, %v3401_v59  ;;  %v7188_v59 = vpop.f32.mrf.mxu3  ;;  %v3164_v27 = vrot.slane %v3163_v50, 4  ;;  %v2956_v50 = vld [vmem:[#allocation2 + $0x74] sm:$0x1] }
 0x132   : > { %v3169_v53 = vsel %vm6688_vm13, %v3164_v27, %v3168_v28 }
 0x133   : > { %6016 = vmatmul.msk.bf16.gmra.mxu3 %vm1897_vm12, %v6236_v63  ;;  %v7177_v30 = vpop.f32.mrf.mxu1  ;;  %v5920_v63 = vrot.slane %v2267_v44, 9  ;;  %v3174_v44 = vshll.u32 %v2954_v22, 16  ;;  %v2377_v22 = vrot.slane %v2375_v58, 4 }
 0x135   : > { %v2369_v21 = vsel %vm7012_vm2, %v5920_v63, %v2368_v42  ;;  %v3176_v63 = vrot.slane %v3174_v44, 5  ;;  %v6223_v44 = vld [vmem:[#allocation2 + $0x6c] sm:$0xff] }
 0x136   : > { %v2440_v29 = vunpack.c.l.b16 %v2369_v21  ;;  %v6385_v21 = vld [vmem:[#allocation2 + $0x74] sm:$0x1] }
 0x137   : > { %v2378_v25 = vrot.slane %v6385_v21, 5  ;;  %v3177_v27 = vor.u32 %v3176_v63, %v3173_v15 }
 0x13a   : > { %5936 = vmatmul.msk.bf16.gmra.mxu2 %vm1897_vm12, %v2463_v0  ;;  %v2955_v0 = vld [vmem:[#allocation2 + $0x70] sm:$0xf] }
 0x13b   : > { %v2179_v24 = vpop.f32.mrf.mxu1  ;;  %v3180_v46 = vshll.u32 %v2955_v0, 16  ;;  %v3184_v48 = vshrl.u32 %v2955_v0, 16  ;;  %v3190_v0 = vshll.u32 %v2956_v50, 16 }
 0x13c   : > { %v2180_v62 = vadd.f32 %v2179_v24, %v7120_v60  ;;  %v3154_v60 = vrot.slane %v3153_v56, 4  ;;  %v2464_v24 = vpack.c.b16 %v2441_v31, %v2440_v29  ;;  %v3379_v56 = vunpack.c.l.b16 %v3169_v53 }
 0x13d   : > { %v7191_v54 = vpop.f32.mrf.mxu2  ;;  %v2379_v53 = vsel %vm7012_vm2, %v2377_v22, %v2378_v25  ;;  %v3192_v15 = vrot.slane %v3190_v0, 5 }
 0x13e   : > { %5904 = vmatmul.msk.bf16.gmra.mxu1 %vm1897_vm12, %v6222_v10  ;;  %v3159_v61 = vsel %vm6688_vm13, %v3154_v60, %v3158_v49  ;;  %v3182_v10 = vrot.slane %v3180_v46, 5  ;;  %v5921_v60 = vrot.slane %v2268_v1, 9  ;;  %v2443_v1 = vunpack.c.l.b16 %v2379_v53 }
 0x140   : > { %6033 = vmatmul.msk.bf16.gmra.mxu0 %vm1897_vm12, %v3402_v33  ;;  %v3378_v33 = vunpack.c.l.b16 %v3159_v61 }
 0x142   : > { %v3403_v28 = vpack.c.b16 %v3379_v56, %v3378_v33  ;;  %v2957_v33 = vld [vmem:[#allocation2 + $0x78] sm:$0xf]  ;;  %v2958_v56 = vld [vmem:[#allocation2 + $0x7c] sm:$0xf] }
 0x143   : > { %6017 = vmatmul.msk.bf16.gmra.mxu3 %vm1897_vm12, %v6237_v12  ;;  %v2181_v7 = vpop.f32.mrf.mxu1  ;;  %v3186_v12 = vrot.slane %v3184_v48, 4  ;;  %v6238_v48 = vld [vmem:[#allocation2 + $0x6c] sm:$0xff]  ;;  %v3195_v25 = vshrl.u32 %v2957_v33, 16  ;;  %v3204_v22 = vshll.u32 %v2958_v56, 16 }
 0x145   : > { %v7204_v45 = vpop.f32.mrf.mxu2  ;;  %v3187_v31 = vor.u32 %v3186_v12, %v3182_v10 }
 0x146   : > { %v7202_v42 = vpop.f32.mrf.mxu3 }
 0x147   : > { %8289 = vst [vmem:[#allocation3_spill] sm:$0xff] %v7202_v42  ;;  %v3188_v13 = vrot.slane %v3187_v31, 4  ;;  %v2959_v42 = vld [vmem:[#allocation2 + $0x80] sm:$0x1] }
 0x149   : > { %v3193_v50 = vsel %vm6688_vm13, %v3188_v13, %v3192_v15 }
 0x14a   : > { %5937 = vmatmul.msk.bf16.gmra.mxu2 %vm1897_vm12, %v2464_v24  ;;  %v3178_v24 = vrot.slane %v3177_v27, 4  ;;  %v3381_v53 = vunpack.c.l.b16 %v3193_v50  ;;  %v6224_v50 = vld [vmem:[#allocation2 + $0x78] sm:$0xff] }
 0x14b   : > { %v2184_v19 = vpop.f32.mrf.mxu1 }
 0x14c   : > { %v7212_v49 = vadd.f32 %v2184_v19, %v7153_v32  ;;  %v2376_v32 = vsel %vm7012_vm2, %v5921_v60, %v2375_v58  ;;  %v3183_v12 = vsel %vm6688_vm13, %v3178_v24, %v3182_v10  ;;  %v2182_v58 = vadd.f32 %v2181_v7, %v7136_v23 }
 0x14d   : > { %v2532_v37 = vpop.f32.mrf.mxu2  ;;  %v7216_v46 = vpop.f32.mrf.mxu0  ;;  %v2442_v63 = vunpack.c.l.b16 %v2376_v32  ;;  %v3198_v60 = vshll.u32 %v2957_v33, 16  ;;  %v2269_v32 = vld [vmem:[#allocation2 + $0x78] sm:$0xe]  ;;  %v3380_v10 = vunpack.c.l.b16 %v3183_v12  ;;  %v3197_v23 = vrot.slane %v3195_v25, 4  ;;  %v6387_v33 = vld [vmem:[#allocation2 + $0x80] sm:$0x1] }
 0x14e   : > { %v7214_v29 = vpop.f32.mrf.mxu3  ;;  %v2612_v61 = vadd.f32 %v2532_v37, %v2180_v62  ;;  %5905 = vmatmul.msk.bf16.gmra.mxu1 %vm1897_vm12, %v6223_v44  ;;  %v3208_v37 = vshrl.u32 %v2958_v56, 16  ;;  %v6386_v44 = vld [vmem:[#allocation2 + $0x7c] sm:$0xf]  ;;  %v3206_v24 = vrot.slane %v3204_v22, 5  ;;  %v3214_v22 = vshll.u32 %v2959_v42, 16 }
 0x14f   : > { %8290 = vst [vmem:[#allocation4_spill] sm:$0xff] %v7214_v29  ;;  %v2465_v0 = vpack.c.b16 %v2443_v1, %v2442_v63  ;;  %v3200_v7 = vrot.slane %v3198_v60, 5  ;;  %v2385_v29 = vrot.slane %v6387_v33, 5  ;;  %v5922_v63 = vrot.slane %v2269_v32, 9  ;;  %v6239_v60 = vld [vmem:[#allocation2 + $0x78] sm:$0xff] }
 0x150   : > { %6034 = vmatmul.msk.bf16.gmra.mxu0 %vm1897_vm12, %v3403_v28  ;;  %v3210_v13 = vrot.slane %v3208_v37, 4  ;;  %v3404_v56 = vpack.c.b16 %v3381_v53, %v3380_v10  ;;  %v2960_v53 = vld [vmem:[#allocation2 + $0x84] sm:$0xf]  ;;  %v3216_v42 = vrot.slane %v3214_v22, 5 }
 0x153   : > { %6018 = vmatmul.msk.bf16.gmra.mxu3 %vm1897_vm12, %v6238_v48  ;;  %v2186_v62 = vpop.f32.mrf.mxu1  ;;  %v2382_v48 = vrot.slane %v6386_v44, 5 }
 0x155   : > { %v2534_v21 = vpop.f32.mrf.mxu2  ;;  %v7230_v27 = vpop.f32.mrf.mxu0  ;;  %v2384_v1 = vrot.slane %v2382_v48, 4 }
 0x156   : > { %v2818_v19 = vpop.f32.mrf.mxu3  ;;  %v2613_v31 = vadd.f32 %v2534_v21, %v2182_v58 }
 0x157   : > { %v2898_v28 = vadd.f32 %v2818_v19, %v2612_v61  ;;  %v3201_v19 = vor.u32 %v3200_v7, %v3197_v23  ;;  %v2386_v44 = vsel %vm7012_vm2, %v2384_v1, %v2385_v29  ;;  %v2961_v7 = vld [vmem:[#allocation2 + $0x88] sm:$0xf]  ;;  %v3219_v29 = vshrl.u32 %v2960_v53, 16 }
 0x159   : > { %v3202_v10 = vrot.slane %v3201_v19, 4 }
 0x15a   : > { %5938 = vmatmul.msk.bf16.gmra.mxu2 %vm1897_vm12, %v2465_v0  ;;  %v3211_v0 = vor.u32 %v3210_v13, %v3206_v24 }
 0x15b   : > { %v2189_v15 = vpop.f32.mrf.mxu1  ;;  %v3207_v33 = vsel %vm6688_vm13, %v3202_v10, %v3206_v24 }
 0x15c   : > { %v7234_v61 = vadd.f32 %v2189_v15, %v7185_v51  ;;  %v2383_v51 = vsel %vm7012_vm2, %v5922_v63, %v2382_v48  ;;  %v2187_v48 = vadd.f32 %v2186_v62, %v7171_v57  ;;  %v3221_v57 = vrot.slane %v3219_v29, 4 }
 0x15d   : > { %v2537_v12 = vpop.f32.mrf.mxu2  ;;  %v3472_v21 = vpop.f32.mrf.mxu0  ;;  %v2444_v23 = vunpack.c.l.b16 %v2383_v51  ;;  %v2270_v51 = vld [vmem:[#allocation2 + $0x84] sm:$0xe] }
 0x15e   : > { %v2820_v58 = vpop.f32.mrf.mxu3  ;;  %v2614_v37 = vadd.f32 %v2537_v12, %v7212_v49  ;;  %5906 = vmatmul.msk.bf16.gmra.mxu1 %vm1897_vm12, %v6224_v50  ;;  %v7242_v32 = vadd.f32 %v3472_v21, %v2898_v28  ;;  %v2445_v49 = vunpack.c.l.b16 %v2386_v44  ;;  %v3222_v28 = vshll.u32 %v2960_v53, 16 }
 0x15f   : > { %v2899_v25 = vadd.f32 %v2820_v58, %v2613_v31  ;;  %v3212_v31 = vrot.slane %v3211_v0, 4  ;;  %v3232_v58 = vshrl.u32 %v2961_v7, 16  ;;  %v3382_v44 = vunpack.c.l.b16 %v3207_v33 }
 0x160   : > { %8291 = vst [vmem:[#allocation5_spill] sm:$0xff] %v7242_v32  ;;  %6035 = vmatmul.msk.bf16.gmra.mxu0 %vm1897_vm12, %v3404_v56  ;;  %v3228_v56 = vshll.u32 %v2961_v7, 16  ;;  %v3224_v62 = vrot.slane %v3222_v28, 5  ;;  %v2962_v7 = vld [vmem:[#allocation2 + $0x8c] sm:$0x1] }
 0x161   : > { %v3217_v12 = vsel %vm6688_vm13, %v3212_v31, %v3216_v42  ;;  %v3234_v53 = vrot.slane %v3232_v58, 4  ;;  %v6389_v32 = vld [vmem:[#allocation2 + $0x8c] sm:$0x1]  ;;  %v5923_v42 = vrot.slane %v2270_v51, 9  ;;  %v3238_v28 = vshll.u32 %v2962_v7, 16  ;;  %v6240_v58 = vld [vmem:[#allocation2 + $0x84] sm:$0xff] }
 0x162   : > { %v3383_v24 = vunpack.c.l.b16 %v3217_v12  ;;  %v3230_v10 = vrot.slane %v3228_v56, 5  ;;  %v2392_v31 = vrot.slane %v6389_v32, 5  ;;  %v2964_v51 = vld [vmem:[#allocation2 + $0x94] sm:$0xf] }
 0x163   : > { %6019 = vmatmul.msk.bf16.gmra.mxu3 %vm1897_vm12, %v6239_v60  ;;  %v2191_v13 = vpop.f32.mrf.mxu1  ;;  %v2466_v60 = vpack.c.b16 %v2445_v49, %v2444_v23 }
 0x164   : > { %v7247_v15 = vadd.f32 %v2191_v13, %v7200_v17  ;;  %v6388_v17 = vld [vmem:[#allocation2 + $0x88] sm:$0xf]  ;;  %v3405_v49 = vpack.c.b16 %v3383_v24, %v3382_v44  ;;  %v3235_v29 = vor.u32 %v3234_v53, %v3230_v10 }
 0x165   : > { %v2539_v1 = vpop.f32.mrf.mxu2  ;;  %v3474_v19 = vpop.f32.mrf.mxu0  ;;  %v2389_v0 = vrot.slane %v6388_v17, 5 }
 0x166   : > { %v2823_v63 = vpop.f32.mrf.mxu3  ;;  %v2615_v21 = vadd.f32 %v2539_v1, %v2187_v48  ;;  %v7254_v22 = vadd.f32 %v3474_v19, %v2899_v25  ;;  %v3225_v25 = vor.u32 %v3224_v62, %v3221_v57  ;;  %v3236_v17 = vrot.slane %v3235_v29, 4 }
 0x167   : > { %v2900_v50 = vadd.f32 %v2823_v63, %v2614_v37  ;;  %v2391_v23 = vrot.slane %v2389_v0, 4  ;;  %v6225_v63 = vld [vmem:[#allocation2 + $0x84] sm:$0xff]  ;;  %v3240_v57 = vrot.slane %v3238_v28, 5  ;;  %v3256_v29 = vshrl.u32 %v2964_v51, 16  ;;  %v6390_v28 = vld [vmem:[#allocation2 + $0x94] sm:$0xf] }
 0x169   : > { %v2393_v32 = vsel %vm7012_vm2, %v2391_v23, %v2392_v31 }
 0x16a   : > { %5939 = vmatmul.msk.bf16.gmra.mxu2 %vm1897_vm12, %v2466_v60  ;;  %v3226_v60 = vrot.slane %v3225_v25, 4  ;;  %v2447_v62 = vunpack.c.l.b16 %v2393_v32 }
 0x16b   : > { %v2194_v13 = vpop.f32.mrf.mxu1 }
 0x16c   : > { %v7258_v37 = vadd.f32 %v2194_v13, %v7216_v46  ;;  %v2390_v46 = vsel %vm7012_vm2, %v5923_v42, %v2389_v0  ;;  %v3231_v0 = vsel %vm6688_vm13, %v3226_v60, %v3230_v10  ;;  %v3252_v42 = vshll.u32 %v2964_v51, 16 }
 0x16d   : > { %v2542_v33 = vpop.f32.mrf.mxu2  ;;  %v3477_v1 = vpop.f32.mrf.mxu0  ;;  %v3384_v10 = vunpack.c.l.b16 %v3231_v0  ;;  %v3258_v60 = vrot.slane %v3256_v29, 4 }
 0x16e   : > { %v2825_v48 = vpop.f32.mrf.mxu3  ;;  %v2616_v19 = vadd.f32 %v2542_v33, %v7234_v61  ;;  %5907 = vmatmul.msk.bf16.gmra.mxu1 %vm1897_vm12, %v6225_v63  ;;  %v7266_v12 = vadd.f32 %v3477_v1, %v2900_v50  ;;  %v2963_v61 = vld [vmem:[#allocation2 + $0x90] sm:$0xf]  ;;  %v3241_v50 = vsel %vm6688_vm13, %v3236_v17, %v3240_v57  ;;  %v3254_v32 = vrot.slane %v3252_v42, 5 }
 0x16f   : > { %v2901_v56 = vadd.f32 %v2825_v48, %v2615_v21  ;;  %v2446_v21 = vunpack.c.l.b16 %v2390_v46  ;;  %v3243_v13 = vshrl.u32 %v2963_v61, 16  ;;  %v3246_v31 = vshll.u32 %v2963_v61, 16  ;;  %v2271_v63 = vld [vmem:[#allocation2 + $0x90] sm:$0xe] }
 0x170   : > { %8292 = vst [vmem:[#allocation6_spill] sm:$0xff] %v7266_v12  ;;  %6036 = vmatmul.msk.bf16.gmra.mxu0 %vm1897_vm12, %v3405_v49  ;;  %v3385_v1 = vunpack.c.l.b16 %v3241_v50 }
 0x171   : > { %v2467_v48 = vpack.c.b16 %v2447_v62, %v2446_v21  ;;  %v3248_v46 = vrot.slane %v3246_v31, 5  ;;  %v5924_v21 = vrot.slane %v2271_v63, 9 }
 0x172   : > { %v3406_v61 = vpack.c.b16 %v3385_v1, %v3384_v10 }
 0x173   : > { %6020 = vmatmul.msk.bf16.gmra.mxu3 %vm1897_vm12, %v6240_v58  ;;  %v2196_v44 = vpop.f32.mrf.mxu1  ;;  %v3245_v58 = vrot.slane %v3243_v13, 4  ;;  %v3259_v13 = vor.u32 %v3258_v60, %v3254_v32 }
 0x174   : > { %v7271_v24 = vadd.f32 %v2196_v44, %v7230_v27  ;;  %v2396_v27 = vrot.slane %v6390_v28, 5  ;;  %v2966_v28 = vld [vmem:[#allocation2 + $0x9c] sm:$0xf] }
 0x175   : > { %v2544_v7 = vpop.f32.mrf.mxu2  ;;  %v3479_v23 = vpop.f32.mrf.mxu0  ;;  %v3260_v10 = vrot.slane %v3259_v13, 4  ;;  %v3267_v60 = vshrl.u32 %v2966_v28, 16  ;;  %v6392_v13 = vld [vmem:[#allocation2 + $0xa0] sm:$0xf] }
 0x176   : > { %v2828_v53 = vpop.f32.mrf.mxu3  ;;  %v2617_v49 = vadd.f32 %v2544_v7, %v7247_v15  ;;  %v7278_v33 = vadd.f32 %v3479_v23, %v2901_v56  ;;  %v2965_v15 = vld [vmem:[#allocation2 + $0x98] sm:$0x1]  ;;  %v2398_v62 = vrot.slane %v2396_v27, 4  ;;  %v3249_v56 = vor.u32 %v3248_v46, %v3245_v58  ;;  %v6241_v7 = vld [vmem:[#allocation2 + $0x90] sm:$0xff] }
 0x177   : > { %v2902_v25 = vadd.f32 %v2828_v53, %v2616_v19  ;;  %v6391_v19 = vld [vmem:[#allocation2 + $0x98] sm:$0x1]  ;;  %v6226_v53 = vld [vmem:[#allocation2 + $0x90] sm:$0xff]  ;;  %v3262_v31 = vshll.u32 %v2965_v15, 16  ;;  %v2397_v23 = vsel %vm7012_vm2, %v5924_v21, %v2396_v27  ;;  %v3270_v27 = vshll.u32 %v2966_v28, 16 }
 0x178   : > { %8293 = vst [vmem:[#allocation7_spill] sm:$0xff] %v7278_v33  ;;  %v2399_v57 = vrot.slane %v6391_v19, 5  ;;  %v3250_v63 = vrot.slane %v3249_v56, 4 }
 0x179   : > { %v3264_v1 = vrot.slane %v3262_v31, 5  ;;  %v2403_v31 = vrot.slane %v6392_v13, 5 }
 0x17a   : > { %5940 = vmatmul.msk.bf16.gmra.mxu2 %vm1897_vm12, %v2467_v48  ;;  %v2400_v48 = vsel %vm7012_vm2, %v2398_v62, %v2399_v57 }
 0x17b   : > { %v7281_v17 = vpop.f32.mrf.mxu1  ;;  %v2449_v58 = vunpack.c.l.b16 %v2400_v48  ;;  %v2968_v48 = vld [vmem:[#allocation2 + $0xa4] sm:$0x1] }
 0x17d   : > { %v2547_v44 = vpop.f32.mrf.mxu2  ;;  %v3482_v0 = vpop.f32.mrf.mxu0 }
 0x17e   : > { %v2830_v51 = vpop.f32.mrf.mxu3  ;;  %v2618_v42 = vadd.f32 %v2547_v44, %v7258_v37  ;;  %5908 = vmatmul.msk.bf16.gmra.mxu1 %vm1897_vm12, %v6226_v53  ;;  %v7289_v29 = vadd.f32 %v3482_v0, %v2902_v25  ;;  %v2448_v37 = vunpack.c.l.b16 %v2397_v23  ;;  %v3255_v25 = vsel %vm6688_vm13, %v3250_v63, %v3254_v32 }
 0x17f   : > { %v2903_v50 = vadd.f32 %v2830_v51, %v2617_v49  ;;  %v2967_v49 = vld [vmem:[#allocation2 + $0xa0] sm:$0xf]  ;;  %v3269_v53 = vrot.slane %v3267_v60, 4  ;;  %v3272_v0 = vrot.slane %v3270_v27, 5  ;;  %v3386_v63 = vunpack.c.l.b16 %v3255_v25 }
 0x180   : > { %8294 = vst [vmem:[#allocation8_spill] sm:$0xff] %v7289_v29  ;;  %6037 = vmatmul.msk.bf16.gmra.mxu0 %vm1897_vm12, %v3406_v61  ;;  %v3276_v19 = vshll.u32 %v2967_v49, 16  ;;  %v3280_v15 = vshrl.u32 %v2967_v49, 16  ;;  %v3265_v61 = vsel %vm6688_vm13, %v3260_v10, %v3264_v1  ;;  %v2468_v44 = vpack.c.b16 %v2449_v58, %v2448_v37  ;;  %v6340_v10 = vld [vmem:[%s6554_s16 + $0x78] sm:$0xff]   ;;  %v6393_v1 = vld [vmem:[#allocation2 + $0xa4] sm:$0x1] }
 0x181   : > { %v3387_v49 = vunpack.c.l.b16 %v3265_v61  ;;  %v2406_v37 = vrot.slane %v6393_v1, 5  ;;  %v3273_v58 = vor.u32 %v3272_v0, %v3269_v53  ;;  %v3286_v60 = vshll.u32 %v2968_v48, 16  ;;  %v6227_v61 = vld [vmem:[#allocation2 + $0x9c] sm:$0xff]  ;;  %v2969_v0 = vld [vmem:[#allocation2 + $0xa8] sm:$0xf] }
 0x182   : > { %v7302_v32 = vrot.slane %v3276_v19, 5  ;;  %v3282_v28 = vrot.slane %v3280_v15, 4  ;;  %v2405_v27 = vrot.slane %v2403_v31, 4  ;;  %v6325_v15 = vunpack.c.h.bf16 %v6340_v10  ;;  %v2970_v1 = vld [vmem:[#allocation2 + $0xac] sm:$0xf] }
 0x183   : > { %6021 = vmatmul.msk.bf16.gmra.mxu3 %vm1897_vm12, %v6241_v7  ;;  %v7293_v46 = vpop.f32.mrf.mxu1  ;;  %v2272_v7 = vld [vmem:[#allocation2 + $0x9c] sm:$0xe]  ;;  %v3407_v25 = vpack.c.b16 %v3387_v49, %v3386_v63  ;;  %v2971_v29 = vld [vmem:[#allocation2 + $0xb0] sm:$0x1] }
 0x184   : > { %v3283_v19 = vor.u32 %v3282_v28, %v7302_v32 }
 0x185   : > { %v2549_v21 = vpop.f32.mrf.mxu2  ;;  %v3484_v62 = vpop.f32.mrf.mxu0 }
 0x186   : > { %v2833_v57 = vpop.f32.mrf.mxu3  ;;  %v2619_v56 = vadd.f32 %v2549_v21, %v7271_v24  ;;  %v7300_v23 = vadd.f32 %v3484_v62, %v2903_v50  ;;  %v5925_v24 = vrot.slane %v2272_v7, 9  ;;  %v2200_v50 = vadd.f32 %v7281_v17, %v7089_v18  ;;  %v6242_v7 = vld [vmem:[#allocation2 + $0x9c] sm:$0xff] }
 0x187   : > { %v2904_v51 = vadd.f32 %v2833_v57, %v2618_v42  ;;  %v6324_v57 = vunpack.c.l.bf16 %v6340_v10  ;;  %v2407_v18 = vsel %vm7012_vm2, %v2405_v27, %v2406_v37  ;;  %v6394_v17 = vld [vmem:[%s8270_s3] ss:$0 sm:$0xff]  ;;  %v3284_v49 = vrot.slane %v3283_v19, 4 }
 0x188   : > { %8295 = vst [vmem:[#allocation9_spill] sm:$0xff] %v7300_v23  ;;  %v2404_v53 = vsel %vm7012_vm2, %v5925_v24, %v2403_v31  ;;  %v747_v28 = vmul.f32 %v6394_v17, %v6325_v15  ;;  %v3288_v10 = vrot.slane %v3286_v60, 5  ;;  %v3291_v31 = vshrl.u32 %v2969_v0, 16  ;;  %v6395_v37 = vld [vmem:[%s8271_s4] ss:$0 sm:$0xff] }
 0x189   : > { %v746_v48 = vmul.f32 %v6394_v17, %v6324_v57  ;;  %v3294_v24 = vshll.u32 %v2969_v0, 16  ;;  %v2450_v57 = vunpack.c.l.b16 %v2404_v53  ;;  %v3300_v60 = vshll.u32 %v2970_v1, 16 }
 0x18a   : > { %5941 = vmatmul.msk.bf16.gmra.mxu2 %vm1897_vm12, %v2468_v44  ;;  %v3304_v19 = vshrl.u32 %v2970_v1, 16  ;;  %v3293_v53 = vrot.slane %v3291_v31, 4 }
 0x18b   : > { %v7305_v42 = vpop.f32.mrf.mxu1  ;;  %v782_v27 = vadd.f32 %v6395_v37, %v746_v48  ;;  %v3296_v0 = vrot.slane %v3294_v24, 5  ;;  %v6397_v24 = vld [vmem:[#allocation2 + $0xb0] sm:$0x1] }
 0x18d   : > { %v2552_v62 = vpop.f32.mrf.mxu2  ;;  %v3487_v44 = vpop.f32.mrf.mxu0 }
 0x18e   : > { %v2835_v21 = vpop.f32.mrf.mxu3  ;;  %v2620_v23 = vadd.f32 %v2552_v62, %v2200_v50  ;;  %5909 = vmatmul.msk.bf16.gmra.mxu1 %vm1897_vm12, %v6227_v61  ;;  %v7321_v63 = vadd.f32 %v3487_v44, %v2904_v51  ;;  %v586_v50 = vld [vmem:[#allocation2 + $0xc0] sm:$0x1]  ;;  %v2451_v51 = vunpack.c.l.b16 %v2407_v18  ;;  %v3289_v62 = vsel %vm6688_vm13, %v3284_v49, %v3288_v10 }
 0x18f   : > { %v7311_v13 = vadd.f32 %v2835_v21, %v2619_v56  ;;  %v3274_v56 = vrot.slane %v3273_v58, 4  ;;  %v783_v21 = vadd.f32 %v6395_v37, %v747_v28  ;;  %v587_v58 = vsel %vm6534_vm3, 0, %v586_v50  ;;  %v6396_v37 = vld [vmem:[#allocation2 + $0xac] sm:$0xf] }
 0x190   : > { %8296 = vst [vmem:[#allocation10_spill] sm:$0xff] %v7321_v63  ;;  %6038 = vmatmul.msk.bf16.gmra.mxu0 %vm1897_vm12, %v3407_v25  ;;  %v2202_v61 = vadd.f32 %v7293_v46, %v7101_v38  ;;  %v814_v18 = vmax.f32 %v782_v27, 0.0  ;;  %v2469_v50 = vpack.c.b16 %v2451_v51, %v2450_v57  ;;  %v7339_v63 = vrot.slane %v3300_v60, 5  ;;  %v642_v51 = vld [vmem:[#allocation2 + $0xc8] sm:$0x1] }
 0x191   : > { %588 = vst [vmem:[#allocation2 + $0xc0] sm:$0x1] %v587_v58  ;;  %v3279_v25 = vsel %vm6688_vm13, %v3274_v56, %v7302_v32  ;;  %v815_v17 = vmax.f32 %v783_v21, 0.0  ;;  %v2410_v58 = vrot.slane %v6396_v37, 5  ;;  %v3306_v32 = vrot.slane %v3304_v19, 4 }
 0x192   : > { %v2273_v56 = vld [vmem:[#allocation2 + $0xa8] sm:$0xe]  ;;  %v846_v49 = vpack.c.bf16 %v814_v18, %v814_v18  ;;  %v3388_v38 = vunpack.c.l.b16 %v3279_v25  ;;  %v3389_v46 = vunpack.c.l.b16 %v3289_v62  ;;  %v2413_v27 = vrot.slane %v6397_v24, 5 }
 0x193   : > { %6022 = vmatmul.msk.bf16.gmra.mxu3 %vm1897_vm12, %v6242_v7  ;;  %v7328_v15 = vpop.f32.mrf.mxu1  ;;  %v847_v10 = vpack.c.bf16 %v815_v17, %v815_v17  ;;  %v5926_v21 = vrot.slane %v2273_v56, 9  ;;  %v2412_v57 = vrot.slane %v2410_v58, 4  ;;  %v3297_v60 = vor.u32 %v3296_v0, %v3293_v53 }
 0x194   : > { %v1106_v33 = vshrl.u32 %v846_v49, 16  ;;  %v3307_v19 = vor.u32 %v3306_v32, %v7339_v63  ;;  %v2205_v25 = vadd.f32 %v7305_v42, %v7110_v40  ;;  %v3408_v17 = vpack.c.b16 %v3389_v46, %v3388_v38 }
 0x195   : > { %v2554_v7 = vpop.f32.mrf.mxu2  ;;  %v3489_v48 = vpop.f32.mrf.mxu0  ;;  %v1114_v31 = vshrl.u32 %v847_v10, 16  ;;  %v1117_v18 = vshll.u32 %v847_v10, 16  ;;  %v643_v56 = vsel %vm6542_vm5, 0, %v642_v51  ;;  %v2411_v40 = vsel %vm7012_vm2, %v5926_v21, %v2410_v58  ;;  %v2972_v58 = vld [vmem:[#allocation2 + $0xb4] sm:$0xf] }
 0x196   : > { %v2838_v44 = vpop.f32.mrf.mxu3  ;;  %v2621_v1 = vadd.f32 %v2554_v7, %v2202_v61  ;;  %v3310_v61 = vshll.u32 %v2971_v29, 16  ;;  %v1108_v62 = vrot.slane %v1106_v33, 7  ;;  %v7350_v12 = vadd.f32 %v3489_v48, %v7311_v13  ;;  %v6243_v29 = vld [vmem:[#allocation2 + $0xa8] sm:$0xff]  ;;  %644 = vst [vmem:[#allocation2 + $0xc8] sm:$0x1] %v643_v56 }
 0x197   : > { %v2906_v28 = vadd.f32 %v2838_v44, %v2620_v23  ;;  %v1109_v44 = vshll.u32 %v846_v49, 16  ;;  %v1116_v7 = vrot.slane %v1114_v31, 7  ;;  %v2414_v33 = vsel %vm7012_vm2, %v2412_v57, %v2413_v27  ;;  %v2973_v57 = vld [vmem:[#allocation2 + $0xb8] sm:$0xf] }
 0x198   : > { %v1279_v42 = vld [vmem:[#allocation2 + $0xc0] sm:$0xf]  ;;  %v1112_v10 = vrot.slane %v1108_v62, 4  ;;  %v3298_v46 = vrot.slane %v3297_v60, 4  ;;  %v3308_v13 = vrot.slane %v3307_v19, 4  ;;  %v3312_v48 = vrot.slane %v3310_v61, 5 }
 0x199   : > { %v1111_v49 = vor.u32 %v1109_v44, %v1108_v62  ;;  %v1119_v38 = vor.u32 %v1117_v18, %v1116_v7  ;;  %v2453_v51 = vunpack.c.l.b16 %v2414_v33  ;;  %v1121_v60 = vrot.slane %v1116_v7, 4  ;;  %v2274_v33 = vld [vmem:[#allocation2 + $0xb4] sm:$0xe] }
 0x19a   : > { %5942 = vmatmul.msk.bf16.gmra.mxu2 %vm1897_vm12, %v2469_v50  ;;  %v6228_v50 = vld [vmem:[#allocation2 + $0xa8] sm:$0xff]  ;;  %v3313_v14 = vsel %vm6688_vm13, %v3308_v13, %v3312_v48  ;;  %v2207_v19 = vadd.f32 %v7328_v15, %v7123_v47  ;;  %v3315_v61 = vshrl.u32 %v2972_v58, 16  ;;  %v3328_v7 = vshrl.u32 %v2973_v57, 16  ;;  %v6399_v48 = vld [vmem:[#allocation2 + $0xbc] sm:$0x1] }
 0x19b   : > { %v7342_v23 = vpop.f32.mrf.mxu1  ;;  %v1120_v27 = vsel %vm6608_vm9, %v1112_v10, %v1119_v38  ;;  %v1280_v21 = vsel %vm6601_vm8, %v1111_v49, %v1279_v42  ;;  %v3391_v15 = vunpack.c.l.b16 %v3313_v14  ;;  %v2974_v49 = vld [vmem:[#allocation2 + $0xbc] sm:$0x1] }
 0x19c   : > { %1281 = vst [vmem:[#allocation2 + $0xc0] sm:$0xf] %v1280_v21  ;;  %v3317_v10 = vrot.slane %v3315_v61, 4  ;;  %v3330_v13 = vrot.slane %v3328_v7, 4 }
 0x19d   : > { %v2557_v24 = vpop.f32.mrf.mxu2  ;;  %v3492_v53 = vpop.f32.mrf.mxu0  ;;  %1282 = vst.msk [vmem:[#allocation2 + $0xc4] sm:$0xf] %vm1171_vm6, %v1120_v27  ;;  %v3334_v27 = vshll.u32 %v2974_v49, 16 }
 0x19e   : > { %v2840_v37 = vpop.f32.mrf.mxu3  ;;  %v2622_v32 = vadd.f32 %v2557_v24, %v2205_v25  ;;  %5910 = vmatmul.msk.bf16.gmra.mxu1 %vm1897_vm12, %v6228_v50  ;;  %v7357_v31 = vadd.f32 %v3492_v53, %v2906_v28  ;;  %v3303_v28 = vsel %vm6688_vm13, %v3298_v46, %v7339_v63  ;;  %v1283_v24 = vld [vmem:[#allocation2 + $0xc8] sm:$0x1] }
 0x19f   : > { %v2907_v0 = vadd.f32 %v2840_v37, %v2621_v1  ;;  %v2452_v1 = vunpack.c.l.b16 %v2411_v40  ;;  %v3324_v37 = vshll.u32 %v2973_v57, 16  ;;  %v1284_v63 = vsel %vm6534_vm3, %v1121_v60, %v1283_v24 }
 0x1a0   : > { %6039 = vmatmul.msk.bf16.gmra.mxu0 %vm1897_vm12, %v3408_v17  ;;  %v3318_v17 = vshll.u32 %v2972_v58, 16  ;;  %1285 = vst [vmem:[#allocation2 + $0xc8] sm:$0x1] %v1284_v63  ;;  %v3390_v47 = vunpack.c.l.b16 %v3303_v28  ;;  %v2210_v58 = vadd.f32 %v7342_v23, %v7134_v55  ;;  %v3336_v24 = vrot.slane %v3334_v27, 5 }
 0x1a1   : > { %v2470_v18 = vpack.c.b16 %v2453_v51, %v2452_v1  ;;  %v7379_v46 = vrot.slane %v3324_v37, 5  ;;  %v5927_v1 = vrot.slane %v2274_v33, 9  ;;  %v6400_v37 = vld [vmem:[#allocation2 + $0x10] sm:$0xf] }
 0x1a2   : > { %v3320_v38 = vrot.slane %v3318_v17, 5  ;;  %v3409_v21 = vpack.c.b16 %v3391_v15, %v3390_v47  ;;  %v3650_v7 = vrot.slane %v6400_v37, 5 }
 0x1a3   : > { %6023 = vmatmul.msk.bf16.gmra.mxu3 %vm1897_vm12, %v6243_v29  ;;  %v7365_v44 = vpop.f32.mrf.mxu1  ;;  %v6398_v29 = vld [vmem:[#allocation2 + $0xb8] sm:$0xf]  ;;  %v3331_v28 = vor.u32 %v3330_v13, %v7379_v46 }
 0x1a4   : > { %v2417_v40 = vrot.slane %v6398_v29, 5  ;;  %v3321_v60 = vor.u32 %v3320_v38, %v3317_v10  ;;  %v2976_v47 = vld [vmem:[#allocation2 + $0xc4] sm:$0xf]  ;;  %v4269_v10 = vld [vmem:[#allocation2 + $0x18] sm:$0xf] }
 0x1a5   : > { %v2559_v62 = vpop.f32.mrf.mxu2  ;;  %v3494_v50 = vpop.f32.mrf.mxu0  ;;  %v3348_v13 = vshll.u32 %v2976_v47, 16 }
 0x1a6   : > { %v2843_v25 = vpop.f32.mrf.mxu3  ;;  %v2623_v53 = vadd.f32 %v2559_v62, %v2207_v19  ;;  %v7377_v42 = vadd.f32 %v3494_v50, %v2907_v0  ;;  %v2419_v51 = vrot.slane %v2417_v40, 4  ;;  %v6229_v19 = vld [vmem:[#allocation2 + $0xb4] sm:$0xff]  ;;  %v2975_v50 = vld [vmem:[#allocation2 + $0xc0] sm:$0xf]  ;;  %v3322_v29 = vrot.slane %v3321_v60, 4 }
 0x1a7   : > { %v2908_v56 = vadd.f32 %v2843_v25, %v2622_v32  ;;  %v2420_v32 = vrot.slane %v6399_v48, 5  ;;  %v6244_v62 = vld [vmem:[#allocation2 + $0xb4] sm:$0xff]  ;;  %v3339_v49 = vshrl.u32 %v2975_v50, 16  ;;  %v3342_v38 = vshll.u32 %v2975_v50, 16 }
 0x1a8   : > { %v3352_v48 = vshrl.u32 %v2976_v47, 16  ;;  %v7411_v50 = vrot.slane %v3348_v13, 5 }
 0x1a9   : > { %v2421_v55 = vsel %vm7012_vm2, %v2419_v51, %v2420_v32  ;;  %v3652_v51 = vrot.slane %v3650_v7, 4 }
 0x1aa   : > { %5943 = vmatmul.msk.bf16.gmra.mxu2 %vm1897_vm12, %v2470_v18  ;;  %v2418_v18 = vsel %vm7012_vm2, %v5927_v1, %v2417_v40  ;;  %v2455_v33 = vunpack.c.l.b16 %v2421_v55  ;;  %v6401_v40 = vld [vmem:[#allocation2 + $0x14] sm:$0x1]  ;;  %v7400_v1 = vld [vmem:[#allocation2 + $0x1c] sm:$0xf] }
 0x1ab   : > { %v7384_v0 = vpop.f32.mrf.mxu1  ;;  %v2454_v63 = vunpack.c.l.b16 %v2418_v18  ;;  %v3653_v15 = vrot.slane %v6401_v40, 5  ;;  %v4327_v18 = vshll.u32 %v7400_v1, 16  ;;  %v4331_v55 = vshrl.u32 %v7400_v1, 16 }
 0x1ac   : > { %v2215_v13 = vadd.f32 %v7384_v0, %v7163_v52 }
 0x1ad   : > { %v2562_v14 = vpop.f32.mrf.mxu2  ;;  %v3497_v61 = vpop.f32.mrf.mxu0  ;;  %v2471_v60 = vpack.c.b16 %v2455_v33, %v2454_v63  ;;  %v2977_v33 = vld [vmem:[#allocation2 + $0xc8] sm:$0x1]  ;;  %v3654_v47 = vsel %vm7012_vm2, %v3652_v51, %v3653_v15 }
 0x1ae   : > { %v2845_v57 = vpop.f32.mrf.mxu3  ;;  %v2624_v17 = vadd.f32 %v2562_v14, %v2210_v58  ;;  %5911 = vmatmul.msk.bf16.gmra.mxu1 %vm1897_vm12, %v6229_v19  ;;  %v7392_v23 = vadd.f32 %v3497_v61, %v2908_v56  ;;  %v2212_v56 = vadd.f32 %v7365_v44, %v7149_v26  ;;  %v3327_v58 = vsel %vm6688_vm13, %v3322_v29, %v7379_v46 }
 0x1af   : > { %v2909_v25 = vadd.f32 %v2845_v57, %v2623_v53  ;;  %v3332_v53 = vrot.slane %v3331_v28, 4  ;;  %v4318_v14 = vshrl.u32 %v4269_v10, 16  ;;  %v4321_v19 = vshll.u32 %v4269_v10, 16 }
 0x1b0   : > { %6040 = vmatmul.msk.bf16.gmra.mxu0 %vm1897_vm12, %v3409_v21  ;;  %v3341_v61 = vrot.slane %v3339_v49, 4  ;;  %v3344_v46 = vrot.slane %v3342_v38, 5  ;;  %v3763_v10 = vunpack.c.l.b16 %v3654_v47  ;;  %v4333_v38 = vrot.slane %v4331_v55, 4 }
 0x1b1   : > { %v3337_v27 = vsel %vm6688_vm13, %v3332_v53, %v3336_v24  ;;  %v3354_v24 = vrot.slane %v3352_v48, 4  ;;  %v3392_v53 = vunpack.c.l.b16 %v3327_v58  ;;  %v4320_v40 = vrot.slane %v4318_v14, 4 }
 0x1b2   : > { %v3393_v63 = vunpack.c.l.b16 %v3337_v27  ;;  %v4323_v49 = vrot.slane %v4321_v19, 5  ;;  %v3345_v48 = vor.u32 %v3344_v46, %v3341_v61  ;;  %v3358_v27 = vshll.u32 %v2977_v33, 16  ;;  %v6245_v19 = vld [vmem:[#allocation2 + $0xc0] sm:$0xff] }
 0x1b3   : > { %6024 = vmatmul.msk.bf16.gmra.mxu3 %vm1897_vm12, %v6244_v62  ;;  %v7398_v32 = vpop.f32.mrf.mxu1  ;;  %v3584_v62 = vld [vmem:[#allocation2 + $0xc] sm:$0xe]  ;;  %v3355_v58 = vor.u32 %v3354_v24, %v7411_v50 }
 0x1b4   : > { %v6043_v29 = vrot.slane %v3584_v62, 9  ;;  %v3346_v55 = vrot.slane %v3345_v48, 4  ;;  %v3360_v24 = vrot.slane %v3358_v27, 5  ;;  %v2217_v47 = vadd.f32 %v7398_v32, %v7177_v30 }
 0x1b5   : > { %v2564_v57 = vpop.f32.mrf.mxu2  ;;  %v3499_v28 = vpop.f32.mrf.mxu0  ;;  %v3356_v46 = vrot.slane %v3355_v58, 4  ;;  %v6402_v58 = vld [vmem:[#allocation2 + $0x20] sm:$0x1] }
 0x1b6   : > { %v2848_v21 = vpop.f32.mrf.mxu3  ;;  %v2625_v44 = vadd.f32 %v2564_v57, %v2212_v56  ;;  %v7409_v37 = vadd.f32 %v3499_v28, %v2909_v25  ;;  %v4329_v56 = vrot.slane %v4327_v18, 5  ;;  %v7423_v57 = vld [vmem:[#allocation2 + $0x20] sm:$0x1]  ;;  %v4324_v18 = vor.u32 %v4323_v49, %v4320_v40 }
 0x1b7   : > { %v2910_v26 = vadd.f32 %v2848_v21, %v2624_v17  ;;  %v3651_v17 = vsel %vm7012_vm2, %v6043_v29, %v3650_v7  ;;  %v3410_v7 = vpack.c.b16 %v3393_v63, %v3392_v53  ;;  %v4337_v0 = vshll.u32 %v7423_v57, 16  ;;  %v4272_v29 = vld [vmem:[#allocation2 + $0x24] sm:$0xf]  ;;  %v7431_v53 = vld [vmem:[#allocation2 + $0x28] sm:$0xf] }
 0x1b8   : > { %v3762_v25 = vunpack.c.l.b16 %v3651_v17  ;;  %v4334_v52 = vor.u32 %v4333_v38, %v4329_v56  ;;  %v3351_v17 = vsel %vm6688_vm13, %v3346_v55, %v7411_v50  ;;  %v4345_v38 = vshll.u32 %v4272_v29, 16 }
 0x1b9   : > { %v4339_v33 = vrot.slane %v4337_v0, 5  ;;  %v4355_v48 = vshrl.u32 %v7431_v53, 16  ;;  %v3660_v27 = vrot.slane %v6402_v58, 5 }
 0x1ba   : > { %5944 = vmatmul.msk.bf16.gmra.mxu2 %vm1897_vm12, %v2471_v60  ;;  %v3794_v51 = vpack.c.b16 %v3763_v10, %v3762_v25  ;;  %v4335_v63 = vrot.slane %v4334_v52, 4  ;;  %v4342_v10 = vshrl.u32 %v4272_v29, 16  ;;  %v3394_v52 = vunpack.c.l.b16 %v3351_v17 }
 0x1bb   : > { %v7421_v21 = vpop.f32.mrf.mxu1  ;;  %v4347_v29 = vrot.slane %v4345_v38, 5 }
 0x1bc   : > { %v4340_v32 = vsel %vm6688_vm13, %v4335_v63, %v4339_v33 }
 0x1bd   : > { %v2567_v15 = vpop.f32.mrf.mxu2  ;;  %v3502_v28 = vpop.f32.mrf.mxu0 }
 0x1be   : > { %v2850_v60 = vpop.f32.mrf.mxu3  ;;  %v2626_v62 = vadd.f32 %v2567_v15, %v2215_v13  ;;  %6060 = vmatmul.msk.bf16.vlgmr.msra.gmra.mxu1 %vm1897_vm12, %v3794_v51  ;;  %v7427_v61 = vadd.f32 %v3502_v28, %v2910_v26  ;;  %v3361_v26 = vsel %vm6688_vm13, %v3356_v46, %v3360_v24  ;;  %v4351_v13 = vshll.u32 %v7431_v53, 16  ;;  %v6246_v15 = vld [vmem:[#allocation2 + $0x18] sm:$0xff] }
 0x1bf   : > { %v2911_v14 = vadd.f32 %v2850_v60, %v2625_v44  ;;  %v4325_v44 = vrot.slane %v4324_v18, 4  ;;  %v6403_v51 = vld [vmem:[#allocation2 + $0x1c] sm:$0xf]  ;;  %v3395_v0 = vunpack.c.l.b16 %v3361_v26  ;;  %v4344_v24 = vrot.slane %v4342_v10, 4 }
 0x1c0   : > { %6041 = vmatmul.msk.bf16.gmra.mxu0 %vm1897_vm12, %v3410_v7  ;;  %v3657_v28 = vrot.slane %v6403_v51, 5  ;;  %v2220_v26 = vadd.f32 %v7421_v21, %v7098_v41  ;;  %v4989_v10 = vrot.slane %v7400_v1, 5  ;;  %v4992_v21 = vrot.slane %v7423_v57, 5 }
 0x1c1   : > { %v4330_v30 = vsel %vm6688_vm13, %v4325_v44, %v4329_v56  ;;  %v7457_v44 = vld [vmem:[#allocation2 + $0x2c] sm:$0x1]  ;;  %v3411_v17 = vpack.c.b16 %v3395_v0, %v3394_v52 }
 0x1c2   : > { %v3659_v46 = vrot.slane %v3657_v28, 4  ;;  %v4991_v1 = vrot.slane %v4989_v10, 4 }
 0x1c3   : > { %6025 = vmatmul.msk.bf16.gmra.mxu3 %vm1897_vm12, %v6245_v19  ;;  %v7440_v40 = vpop.f32.mrf.mxu1  ;;  %v3585_v19 = vld [vmem:[#allocation2 + $0x18] sm:$0xe] }
 0x1c4   : > { %v6044_v55 = vrot.slane %v3585_v19, 9  ;;  %v4993_v57 = vsel %vm7012_vm2, %v4991_v1, %v4992_v21 }
 0x1c5   : > { %v2569_v25 = vpop.f32.mrf.mxu2  ;;  %v3504_v7 = vpop.f32.mrf.mxu0 }
 0x1c6   : > { %v2853_v49 = vpop.f32.mrf.mxu3  ;;  %v2627_v60 = vadd.f32 %v2569_v25, %v2217_v47  ;;  %v7448_v18 = vadd.f32 %v3504_v7, %v2911_v14  ;;  %v4357_v47 = vrot.slane %v4355_v48, 4  ;;  %v4704_v25 = vunpack.c.l.b16 %v4340_v32  ;;  %v4923_v48 = vld [vmem:[#allocation2 + $0x18] sm:$0xe] }
 0x1c7   : > { %v2912_v50 = vadd.f32 %v2853_v49, %v2626_v62  ;;  %v7450_v62 = vrot.slane %v4351_v13, 5  ;;  %v4703_v49 = vunpack.c.l.b16 %v4330_v30  ;;  %v3658_v56 = vsel %vm7012_vm2, %v6044_v55, %v3657_v28 }
 0x1c8   : > { %v3661_v14 = vsel %vm7012_vm2, %v3659_v46, %v3660_v27  ;;  %v3764_v63 = vunpack.c.l.b16 %v3658_v56  ;;  %v4361_v27 = vshll.u32 %v7457_v44, 16  ;;  %v6174_v41 = vrot.slane %v4923_v48, 9 }
 0x1c9   : > { %v3765_v33 = vunpack.c.l.b16 %v3661_v14  ;;  %v4358_v51 = vor.u32 %v4357_v47, %v7450_v62  ;;  %v4735_v32 = vpack.c.b16 %v4704_v25, %v4703_v49  ;;  %v7476_v25 = vld [vmem:[#allocation2 + $0x34] sm:$0xf] }
 0x1ca   : > { %6141 = vmatmul.msk.bf16.vlgmr.msra.gmra.mxu2 %vm1897_vm12, %v6246_v15  ;;  %v4348_v15 = vor.u32 %v4347_v29, %v4344_v24  ;;  %v4363_v46 = vrot.slane %v4361_v27, 5  ;;  %v4275_v24 = vld [vmem:[#allocation2 + $0x30] sm:$0xf]  ;;  %v6404_v29 = vld [vmem:[#allocation2 + $0x2c] sm:$0x1]  ;;  %v4990_v47 = vsel %vm7012_vm2, %v6174_v41, %v4989_v10  ;;  %v5102_v41 = vunpack.c.l.b16 %v4993_v57 }
 0x1cb   : > { %v2224_v38 = vpop.f32.mrf.mxu1  ;;  %v3795_v7 = vpack.c.b16 %v3765_v33, %v3764_v63  ;;  %v4359_v55 = vrot.slane %v4358_v51, 4  ;;  %v4379_v51 = vshrl.u32 %v7476_v25, 16 }
 0x1cc   : > { %v4349_v0 = vrot.slane %v4348_v15, 4  ;;  %v4375_v15 = vshll.u32 %v7476_v25, 16 }
 0x1cd   : > { %v2572_v58 = vpop.f32.mrf.mxu2  ;;  %v3507_v28 = vpop.f32.mrf.mxu0  ;;  %v4364_v33 = vsel %vm6688_vm13, %v4359_v55, %v4363_v46 }
 0x1ce   : > { %v2855_v13 = vpop.f32.mrf.mxu3  ;;  %v2628_v19 = vadd.f32 %v2572_v58, %v2220_v26  ;;  %6061 = vmatmul.msk.bf16.gmra.mxu1 %vm1897_vm12, %v3795_v7  ;;  %v7465_v52 = vadd.f32 %v3507_v28, %v2912_v50  ;;  %v2222_v50 = vadd.f32 %v7440_v40, %v7112_v34  ;;  %v4354_v63 = vsel %vm6688_vm13, %v4349_v0, %v7450_v62  ;;  %v6247_v40 = vld [vmem:[#allocation2 + $0x24] sm:$0xff] }
 0x1cf   : > { %v2913_v30 = vadd.f32 %v2855_v13, %v2627_v60  ;;  %v3667_v60 = vrot.slane %v6404_v29, 5  ;;  %v6405_v13 = vld [vmem:[#allocation2 + $0x28] sm:$0xf]  ;;  %v4369_v58 = vshll.u32 %v4275_v24, 16  ;;  %v3586_v7 = vld [vmem:[#allocation2 + $0x24] sm:$0xe]  ;;  %v4705_v1 = vunpack.c.l.b16 %v4354_v63 }
 0x1d0   : > { %6042 = vmatmul.msk.bf16.gmra.mxu0 %vm1897_vm12, %v3411_v17  ;;  %v4366_v17 = vshrl.u32 %v4275_v24, 16  ;;  %v3664_v48 = vrot.slane %v6405_v13, 5  ;;  %v6045_v28 = vrot.slane %v3586_v7, 9  ;;  %v4706_v21 = vunpack.c.l.b16 %v4364_v33 }
 0x1d1   : > { %v4371_v46 = vrot.slane %v4369_v58, 5 }
 0x1d2   : > { %v3666_v62 = vrot.slane %v3664_v48, 4  ;;  %v4368_v55 = vrot.slane %v4366_v17, 4 }
 0x1d3   : > { %6158 = vmatmul.msk.bf16.vlgmr.msra.gmra.mxu3 %vm1897_vm12, %v4735_v32  ;;  %v7474_v49 = vpop.f32.mrf.mxu1  ;;  %v5101_v32 = vunpack.c.l.b16 %v4990_v47  ;;  %v4996_v47 = vrot.slane %v7431_v53, 5 }
 0x1d4   : > { %v3668_v0 = vsel %vm7012_vm2, %v3666_v62, %v3667_v60  ;;  %v4372_v7 = vor.u32 %v4371_v46, %v4368_v55  ;;  %v4278_v62 = vld [vmem:[#allocation2 + $0x3c] sm:$0xf] }
 0x1d5   : > { %v2574_v14 = vpop.f32.mrf.mxu2  ;;  %v3509_v26 = vpop.f32.mrf.mxu0  ;;  %v3767_v29 = vunpack.c.l.b16 %v3668_v0  ;;  %v5133_v63 = vpack.c.b16 %v5102_v41, %v5101_v32  ;;  %v4390_v46 = vshrl.u32 %v4278_v62, 16 }
 0x1d6   : > { %v2858_v56 = vpop.f32.mrf.mxu3  ;;  %v2629_v34 = vadd.f32 %v2574_v14, %v2222_v50  ;;  %v7487_v27 = vadd.f32 %v3509_v26, %v2913_v30  ;;  %v4377_v30 = vrot.slane %v4375_v15, 5  ;;  %v4381_v50 = vrot.slane %v4379_v51, 4  ;;  %v7498_v14 = vld [vmem:[#allocation2 + $0x38] sm:$0x1]  ;;  %v4924_v26 = vld [vmem:[#allocation2 + $0x24] sm:$0xe] }
 0x1d7   : > { %v2914_v10 = vadd.f32 %v2858_v56, %v2628_v19  ;;  %v3665_v19 = vsel %vm7012_vm2, %v6045_v28, %v3664_v48  ;;  %v2225_v56 = vadd.f32 %v2224_v38, %v7129_v39  ;;  %v4736_v48 = vpack.c.b16 %v4706_v21, %v4705_v1 }
 0x1d8   : > { %v3766_v24 = vunpack.c.l.b16 %v3665_v19  ;;  %v4382_v15 = vor.u32 %v4381_v50, %v4377_v30  ;;  %v4385_v39 = vshll.u32 %v7498_v14, 16  ;;  %v6175_v38 = vrot.slane %v4924_v26, 9 }
 0x1d9   : > { %v4998_v51 = vrot.slane %v4996_v47, 4  ;;  %v4999_v28 = vrot.slane %v7457_v44, 5  ;;  %v4373_v32 = vrot.slane %v4372_v7, 4  ;;  %v2227_v19 = vadd.f32 %v7474_v49, %v7141_v11 }
 0x1da   : > { %6142 = vmatmul.msk.bf16.gmra.mxu2 %vm1897_vm12, %v6247_v40  ;;  %v3796_v13 = vpack.c.b16 %v3767_v29, %v3766_v24  ;;  %v4383_v41 = vrot.slane %v4382_v15, 4  ;;  %v4387_v1 = vrot.slane %v4385_v39, 5  ;;  %v4997_v21 = vsel %vm7012_vm2, %v6175_v38, %v4996_v47 }
 0x1db   : > { %v7496_v57 = vpop.f32.mrf.mxu1  ;;  %v4393_v24 = vshll.u32 %v4278_v62, 16  ;;  %v4378_v11 = vsel %vm6688_vm13, %v4373_v32, %v4377_v30  ;;  %v5103_v15 = vunpack.c.l.b16 %v4997_v21  ;;  %v7532_v32 = vld [vmem:[#allocation2 + $0x44] sm:$0x1] }
 0x1dc   : > { %v4388_v49 = vsel %vm6688_vm13, %v4383_v41, %v4387_v1 }
 0x1dd   : > { %v2577_v40 = vpop.f32.mrf.mxu2  ;;  %v3512_v60 = vpop.f32.mrf.mxu0  ;;  %v4395_v62 = vrot.slane %v4393_v24, 5 }
 0x1de   : > { %v2860_v33 = vpop.f32.mrf.mxu3  ;;  %v2630_v58 = vadd.f32 %v2577_v40, %v2225_v56  ;;  %6062 = vmatmul.msk.bf16.gmra.mxu1 %vm1897_vm12, %v3796_v13  ;;  %v7502_v53 = vadd.f32 %v3512_v60, %v2914_v10  ;;  %v5000_v10 = vsel %vm7012_vm2, %v4998_v51, %v4999_v28  ;;  %v6406_v56 = vld [vmem:[#allocation2 + $0x38] sm:$0x1]  ;;  %v6248_v40 = vld [vmem:[#allocation2 + $0x30] sm:$0xff]  ;;  %v4392_v28 = vrot.slane %v4390_v46, 4 }
 0x1df   : > { %v2915_v17 = vadd.f32 %v2860_v33, %v2629_v34  ;;  %v7507_v34 = vld [vmem:[#allocation2 + $0x40] sm:$0xf]  ;;  %v6407_v13 = vld [vmem:[#allocation2 + $0x34] sm:$0xf]  ;;  %v5104_v39 = vunpack.c.l.b16 %v5000_v10  ;;  %v2230_v10 = vadd.f32 %v7496_v57, %v7160_v20  ;;  %v5003_v46 = vrot.slane %v7476_v25, 5 }
 0x1e0   : > { %6191 = vmatmul.msk.bf16.vlgmr.msra.gmra.mxu0 %vm1897_vm12, %v5133_v63  ;;  %v4399_v29 = vshll.u32 %v7507_v34, 16  ;;  %v4403_v50 = vshrl.u32 %v7507_v34, 16  ;;  %v3674_v63 = vrot.slane %v6406_v56, 5  ;;  %v3671_v60 = vrot.slane %v6407_v13, 5 }
 0x1e1   : > { %v5134_v21 = vpack.c.b16 %v5104_v39, %v5103_v15  ;;  %v5005_v25 = vrot.slane %v5003_v46, 4  ;;  %v5006_v57 = vrot.slane %v7498_v14, 5 }
 0x1e2   : > { %v3673_v51 = vrot.slane %v3671_v60, 4 }
 0x1e3   : > { %6159 = vmatmul.msk.bf16.gmra.mxu3 %vm1897_vm12, %v4736_v48  ;;  %v7515_v44 = vpop.f32.mrf.mxu1  ;;  %v3587_v48 = vld [vmem:[#allocation2 + $0x30] sm:$0xe]  ;;  %v5007_v14 = vsel %vm7012_vm2, %v5005_v25, %v5006_v57 }
 0x1e4   : > { %v6046_v38 = vrot.slane %v3587_v48, 9 }
 0x1e5   : > { %v2579_v55 = vpop.f32.mrf.mxu2  ;;  %v3514_v33 = vpop.f32.mrf.mxu0 }
 0x1e6   : > { %v2863_v0 = vpop.f32.mrf.mxu3  ;;  %v2631_v26 = vadd.f32 %v2579_v55, %v2227_v19  ;;  %v7523_v7 = vadd.f32 %v3514_v33, %v2915_v17  ;;  %v4405_v19 = vrot.slane %v4403_v50, 4  ;;  %v4708_v55 = vunpack.c.l.b16 %v4388_v49  ;;  %v4925_v50 = vld [vmem:[#allocation2 + $0x30] sm:$0xe] }
 0x1e7   : > { %v2916_v47 = vadd.f32 %v2863_v0, %v2630_v58  ;;  %v7525_v58 = vrot.slane %v4399_v29, 5  ;;  %v4707_v0 = vunpack.c.l.b16 %v4378_v11  ;;  %v3672_v30 = vsel %vm7012_vm2, %v6046_v38, %v3671_v60 }
 0x1e8   : > { %v3675_v17 = vsel %vm7012_vm2, %v3673_v51, %v3674_v63  ;;  %v3768_v41 = vunpack.c.l.b16 %v3672_v30  ;;  %v4409_v63 = vshll.u32 %v7532_v32, 16  ;;  %v6176_v20 = vrot.slane %v4925_v50, 9 }
 0x1e9   : > { %v3769_v1 = vunpack.c.l.b16 %v3675_v17  ;;  %v4406_v13 = vor.u32 %v4405_v19, %v7525_v58  ;;  %v4737_v49 = vpack.c.b16 %v4708_v55, %v4707_v0  ;;  %v7551_v55 = vld [vmem:[#allocation2 + $0x4c] sm:$0xf] }
 0x1ea   : > { %6143 = vmatmul.msk.bf16.gmra.mxu2 %vm1897_vm12, %v6248_v40  ;;  %v4396_v40 = vor.u32 %v4395_v62, %v4392_v28  ;;  %v4411_v51 = vrot.slane %v4409_v63, 5  ;;  %v4281_v28 = vld [vmem:[#allocation2 + $0x48] sm:$0xf]  ;;  %v6408_v62 = vld [vmem:[#allocation2 + $0x44] sm:$0x1]  ;;  %v5004_v19 = vsel %vm7012_vm2, %v6176_v20, %v5003_v46  ;;  %v5106_v20 = vunpack.c.l.b16 %v5007_v14 }
 0x1eb   : > { %v2234_v24 = vpop.f32.mrf.mxu1  ;;  %v3797_v33 = vpack.c.b16 %v3769_v1, %v3768_v41  ;;  %v4407_v38 = vrot.slane %v4406_v13, 4  ;;  %v4427_v13 = vshrl.u32 %v7551_v55, 16 }
 0x1ec   : > { %v4397_v39 = vrot.slane %v4396_v40, 4  ;;  %v4423_v40 = vshll.u32 %v7551_v55, 16 }
 0x1ed   : > { %v2582_v56 = vpop.f32.mrf.mxu2  ;;  %v3517_v60 = vpop.f32.mrf.mxu0  ;;  %v4412_v1 = vsel %vm6688_vm13, %v4407_v38, %v4411_v51 }
 0x1ee   : > { %v2865_v29 = vpop.f32.mrf.mxu3  ;;  %v2632_v48 = vadd.f32 %v2582_v56, %v2230_v10  ;;  %6063 = vmatmul.msk.bf16.gmra.mxu1 %vm1897_vm12, %v3797_v33  ;;  %v7540_v15 = vadd.f32 %v3517_v60, %v2916_v47  ;;  %v2232_v47 = vadd.f32 %v7515_v44, %v7179_v16  ;;  %v4402_v41 = vsel %vm6688_vm13, %v4397_v39, %v7525_v58  ;;  %v6249_v44 = vld [vmem:[#allocation2 + $0x3c] sm:$0xff] }
 0x1ef   : > { %v2917_v11 = vadd.f32 %v2865_v29, %v2631_v26  ;;  %v3681_v26 = vrot.slane %v6408_v62, 5  ;;  %v6409_v29 = vld [vmem:[#allocation2 + $0x40] sm:$0xf]  ;;  %v4417_v56 = vshll.u32 %v4281_v28, 16  ;;  %v3588_v33 = vld [vmem:[#allocation2 + $0x3c] sm:$0xe]  ;;  %v4709_v25 = vunpack.c.l.b16 %v4402_v41 }
 0x1f0   : > { %6192 = vmatmul.msk.bf16.gmra.mxu0 %vm1897_vm12, %v5134_v21  ;;  %v4414_v21 = vshrl.u32 %v4281_v28, 16  ;;  %v3678_v50 = vrot.slane %v6409_v29, 5  ;;  %v6047_v60 = vrot.slane %v3588_v33, 9  ;;  %v4710_v57 = vunpack.c.l.b16 %v4412_v1 }
 0x1f1   : > { %v4419_v51 = vrot.slane %v4417_v56, 5 }
 0x1f2   : > { %v3680_v58 = vrot.slane %v3678_v50, 4  ;;  %v4416_v38 = vrot.slane %v4414_v21, 4 }
 0x1f3   : > { %6160 = vmatmul.msk.bf16.gmra.mxu3 %vm1897_vm12, %v4737_v49  ;;  %v7549_v0 = vpop.f32.mrf.mxu1  ;;  %v5105_v49 = vunpack.c.l.b16 %v5004_v19  ;;  %v5010_v19 = vrot.slane %v7507_v34, 5 }
 0x1f4   : > { %v3682_v39 = vsel %vm7012_vm2, %v3680_v58, %v3681_v26  ;;  %v4420_v33 = vor.u32 %v4419_v51, %v4416_v38  ;;  %v4284_v58 = vld [vmem:[#allocation2 + $0x54] sm:$0xf] }
 0x1f5   : > { %v2584_v17 = vpop.f32.mrf.mxu2  ;;  %v3519_v10 = vpop.f32.mrf.mxu0  ;;  %v3771_v62 = vunpack.c.l.b16 %v3682_v39  ;;  %v5135_v41 = vpack.c.b16 %v5106_v20, %v5105_v49  ;;  %v4438_v51 = vshrl.u32 %v4284_v58, 16 }
 0x1f6   : > { %v2868_v30 = vpop.f32.mrf.mxu3  ;;  %v2633_v16 = vadd.f32 %v2584_v17, %v2232_v47  ;;  %v7562_v63 = vadd.f32 %v3519_v10, %v2917_v11  ;;  %v4425_v11 = vrot.slane %v4423_v40, 5  ;;  %v4429_v47 = vrot.slane %v4427_v13, 4  ;;  %v7573_v17 = vld [vmem:[#allocation2 + $0x50] sm:$0x1]  ;;  %v4926_v10 = vld [vmem:[#allocation2 + $0x3c] sm:$0xe] }
 0x1f7   : > { %v2918_v46 = vadd.f32 %v2868_v30, %v2632_v48  ;;  %v3679_v48 = vsel %vm7012_vm2, %v6047_v60, %v3678_v50  ;;  %v2235_v30 = vadd.f32 %v2234_v24, %v7191_v54  ;;  %v4738_v50 = vpack.c.b16 %v4710_v57, %v4709_v25 }
 0x1f8   : > { %v3770_v28 = vunpack.c.l.b16 %v3679_v48  ;;  %v4430_v40 = vor.u32 %v4429_v47, %v4425_v11  ;;  %v4433_v54 = vshll.u32 %v7573_v17, 16  ;;  %v6177_v24 = vrot.slane %v4926_v10, 9 }
 0x1f9   : > { %v5012_v13 = vrot.slane %v5010_v19, 4  ;;  %v5013_v60 = vrot.slane %v7532_v32, 5  ;;  %v4421_v49 = vrot.slane %v4420_v33, 4  ;;  %v2237_v48 = vadd.f32 %v7549_v0, %v7204_v45 }
 0x1fa   : > { %6144 = vmatmul.msk.bf16.gmra.mxu2 %vm1897_vm12, %v6249_v44  ;;  %v3798_v29 = vpack.c.b16 %v3771_v62, %v3770_v28  ;;  %v4431_v20 = vrot.slane %v4430_v40, 4  ;;  %v4435_v25 = vrot.slane %v4433_v54, 5  ;;  %v5011_v57 = vsel %vm7012_vm2, %v6177_v24, %v5010_v19 }
 0x1fb   : > { %v7571_v14 = vpop.f32.mrf.mxu1  ;;  %v4441_v28 = vshll.u32 %v4284_v58, 16  ;;  %v4426_v45 = vsel %vm6688_vm13, %v4421_v49, %v4425_v11  ;;  %v5107_v40 = vunpack.c.l.b16 %v5011_v57  ;;  %v7607_v49 = vld [vmem:[#allocation2 + $0x5c] sm:$0x1] }
 0x1fc   : > { %v4436_v0 = vsel %vm6688_vm13, %v4431_v20, %v4435_v25 }
 0x1fd   : > { %v2587_v44 = vpop.f32.mrf.mxu2  ;;  %v3522_v26 = vpop.f32.mrf.mxu0  ;;  %v4443_v58 = vrot.slane %v4441_v28, 5 }
 0x1fe   : > { %v2870_v1 = vpop.f32.mrf.mxu3  ;;  %v2634_v56 = vadd.f32 %v2587_v44, %v2235_v30  ;;  %6064 = vmatmul.msk.bf16.gmra.mxu1 %vm1897_vm12, %v3798_v29  ;;  %v7577_v34 = vadd.f32 %v3522_v26, %v2918_v46  ;;  %v5014_v46 = vsel %vm7012_vm2, %v5012_v13, %v5013_v60  ;;  %v6410_v30 = vld [vmem:[#allocation2 + $0x50] sm:$0x1]  ;;  %v6250_v44 = vld [vmem:[#allocation2 + $0x48] sm:$0xff]  ;;  %v4440_v60 = vrot.slane %v4438_v51, 4 }
 0x1ff   : > { %v2919_v21 = vadd.f32 %v2870_v1, %v2633_v16  ;;  %v7582_v16 = vld [vmem:[#allocation2 + $0x58] sm:$0xf]  ;;  %v6411_v29 = vld [vmem:[#allocation2 + $0x4c] sm:$0xf]  ;;  %v5108_v54 = vunpack.c.l.b16 %v5014_v46  ;;  %v2240_v46 = vadd.f32 %v7571_v14, %v7107_v2  ;;  %v5017_v51 = vrot.slane %v7551_v55, 5 }
 0x200   : > { %6193 = vmatmul.msk.bf16.gmra.mxu0 %vm1897_vm12, %v5135_v41  ;;  %v4447_v62 = vshll.u32 %v7582_v16, 16  ;;  %v4451_v47 = vshrl.u32 %v7582_v16, 16  ;;  %v3688_v41 = vrot.slane %v6410_v30, 5  ;;  %v3685_v26 = vrot.slane %v6411_v29, 5 }
 0x201   : > { %v5136_v57 = vpack.c.b16 %v5108_v54, %v5107_v40  ;;  %v5019_v55 = vrot.slane %v5017_v51, 4  ;;  %v5020_v14 = vrot.slane %v7573_v17, 5 }
 0x202   : > { %v3687_v13 = vrot.slane %v3685_v26, 4 }
 0x203   : > { %6161 = vmatmul.msk.bf16.gmra.mxu3 %vm1897_vm12, %v4738_v50  ;;  %v7590_v32 = vpop.f32.mrf.mxu1  ;;  %v3589_v50 = vld [vmem:[#allocation2 + $0x48] sm:$0xe]  ;;  %v5021_v17 = vsel %vm7012_vm2, %v5019_v55, %v5020_v14 }
 0x204   : > { %v6048_v24 = vrot.slane %v3589_v50, 9 }
 0x205   : > { %v2589_v38 = vpop.f32.mrf.mxu2  ;;  %v3524_v1 = vpop.f32.mrf.mxu0 }
 0x206   : > { %v2873_v39 = vpop.f32.mrf.mxu3  ;;  %v2635_v10 = vadd.f32 %v2589_v38, %v2237_v48  ;;  %v7598_v33 = vadd.f32 %v3524_v1, %v2919_v21  ;;  %v4453_v48 = vrot.slane %v4451_v47, 4  ;;  %v4712_v38 = vunpack.c.l.b16 %v4436_v0  ;;  %v4927_v47 = vld [vmem:[#allocation2 + $0x48] sm:$0xe] }
 0x207   : > { %v2920_v19 = vadd.f32 %v2873_v39, %v2634_v56  ;;  %v7600_v56 = vrot.slane %v4447_v62, 5  ;;  %v4711_v39 = vunpack.c.l.b16 %v4426_v45  ;;  %v3686_v11 = vsel %vm7012_vm2, %v6048_v24, %v3685_v26 }
 0x208   : > { %v3689_v21 = vsel %vm7012_vm2, %v3687_v13, %v3688_v41  ;;  %v3772_v20 = vunpack.c.l.b16 %v3686_v11  ;;  %v4457_v41 = vshll.u32 %v7607_v49, 16  ;;  %v6178_v2 = vrot.slane %v4927_v47, 9 }
 0x209   : > { %v3773_v25 = vunpack.c.l.b16 %v3689_v21  ;;  %v4454_v29 = vor.u32 %v4453_v48, %v7600_v56  ;;  %v4739_v0 = vpack.c.b16 %v4712_v38, %v4711_v39  ;;  %v7626_v38 = vld [vmem:[#allocation2 + $0x64] sm:$0xf] }
 0x20a   : > { %6145 = vmatmul.msk.bf16.gmra.mxu2 %vm1897_vm12, %v6250_v44  ;;  %v4444_v44 = vor.u32 %v4443_v58, %v4440_v60  ;;  %v4459_v13 = vrot.slane %v4457_v41, 5  ;;  %v4287_v60 = vld [vmem:[#allocation2 + $0x60] sm:$0xf]  ;;  %v6412_v58 = vld [vmem:[#allocation2 + $0x5c] sm:$0x1]  ;;  %v5018_v48 = vsel %vm7012_vm2, %v6178_v2, %v5017_v51  ;;  %v5110_v2 = vunpack.c.l.b16 %v5021_v17 }
 0x20b   : > { %v2244_v28 = vpop.f32.mrf.mxu1  ;;  %v3799_v1 = vpack.c.b16 %v3773_v25, %v3772_v20  ;;  %v4455_v24 = vrot.slane %v4454_v29, 4  ;;  %v4475_v29 = vshrl.u32 %v7626_v38, 16 }
 0x20c   : > { %v4445_v54 = vrot.slane %v4444_v44, 4  ;;  %v4471_v44 = vshll.u32 %v7626_v38, 16 }
 0x20d   : > { %v2592_v30 = vpop.f32.mrf.mxu2  ;;  %v3527_v26 = vpop.f32.mrf.mxu0  ;;  %v4460_v25 = vsel %vm6688_vm13, %v4455_v24, %v4459_v13 }
 0x20e   : > { %v2875_v62 = vpop.f32.mrf.mxu3  ;;  %v2636_v50 = vadd.f32 %v2592_v30, %v2240_v46  ;;  %6065 = vmatmul.msk.bf16.gmra.mxu1 %vm1897_vm12, %v3799_v1  ;;  %v7615_v40 = vadd.f32 %v3527_v26, %v2920_v19  ;;  %v2242_v19 = vadd.f32 %v7590_v32, %v7125_v35  ;;  %v4450_v20 = vsel %vm6688_vm13, %v4445_v54, %v7600_v56  ;;  %v6251_v32 = vld [vmem:[#allocation2 + $0x54] sm:$0xff] }
 0x20f   : > { %v2921_v45 = vadd.f32 %v2875_v62, %v2635_v10  ;;  %v3695_v10 = vrot.slane %v6412_v58, 5  ;;  %v6413_v62 = vld [vmem:[#allocation2 + $0x58] sm:$0xf]  ;;  %v4465_v30 = vshll.u32 %v4287_v60, 16  ;;  %v3590_v1 = vld [vmem:[#allocation2 + $0x54] sm:$0xe]  ;;  %v4713_v55 = vunpack.c.l.b16 %v4450_v20 }
 0x210   : > { %6194 = vmatmul.msk.bf16.gmra.mxu0 %vm1897_vm12, %v5136_v57  ;;  %v4462_v57 = vshrl.u32 %v4287_v60, 16  ;;  %v3692_v47 = vrot.slane %v6413_v62, 5  ;;  %v6049_v26 = vrot.slane %v3590_v1, 9  ;;  %v4714_v14 = vunpack.c.l.b16 %v4460_v25 }
 0x211   : > { %v4467_v13 = vrot.slane %v4465_v30, 5 }
 0x212   : > { %v3694_v56 = vrot.slane %v3692_v47, 4  ;;  %v4464_v24 = vrot.slane %v4462_v57, 4 }
 0x213   : > { %6162 = vmatmul.msk.bf16.gmra.mxu3 %vm1897_vm12, %v4739_v0  ;;  %v7624_v39 = vpop.f32.mrf.mxu1  ;;  %v5109_v0 = vunpack.c.l.b16 %v5018_v48  ;;  %v5024_v48 = vrot.slane %v7582_v16, 5 }
 0x214   : > { %v3696_v54 = vsel %vm7012_vm2, %v3694_v56, %v3695_v10  ;;  %v4468_v1 = vor.u32 %v4467_v13, %v4464_v24  ;;  %v4290_v56 = vld [vmem:[#allocation2 + $0x6c] sm:$0xf] }
 0x215   : > { %v2594_v21 = vpop.f32.mrf.mxu2  ;;  %v3529_v46 = vpop.f32.mrf.mxu0  ;;  %v3775_v58 = vunpack.c.l.b16 %v3696_v54  ;;  %v5137_v20 = vpack.c.b16 %v5110_v2, %v5109_v0  ;;  %v4486_v13 = vshrl.u32 %v4290_v56, 16 }
 0x216   : > { %v2878_v11 = vpop.f32.mrf.mxu3  ;;  %v2637_v35 = vadd.f32 %v2594_v21, %v2242_v19  ;;  %v7637_v41 = vadd.f32 %v3529_v46, %v2921_v45  ;;  %v4473_v45 = vrot.slane %v4471_v44, 5  ;;  %v4477_v19 = vrot.slane %v4475_v29, 4  ;;  %v7648_v21 = vld [vmem:[#allocation2 + $0x68] sm:$0x1]  ;;  %v4928_v46 = vld [vmem:[#allocation2 + $0x54] sm:$0xe] }
 0x217   : > { %v2922_v51 = vadd.f32 %v2878_v11, %v2636_v50  ;;  %v3693_v50 = vsel %vm7012_vm2, %v6049_v26, %v3692_v47  ;;  %v2245_v11 = vadd.f32 %v2244_v28, %v7138_v4  ;;  %v4740_v47 = vpack.c.b16 %v4714_v14, %v4713_v55 }
 0x218   : > { %v3774_v60 = vunpack.c.l.b16 %v3693_v50  ;;  %v4478_v44 = vor.u32 %v4477_v19, %v4473_v45  ;;  %v4481_v4 = vshll.u32 %v7648_v21, 16  ;;  %v6179_v28 = vrot.slane %v4928_v46, 9 }
 0x219   : > { %v5026_v29 = vrot.slane %v5024_v48, 4  ;;  %v5027_v26 = vrot.slane %v7607_v49, 5  ;;  %v4469_v0 = vrot.slane %v4468_v1, 4  ;;  %v2247_v50 = vadd.f32 %v7624_v39, %v7157_v8 }
 0x21a   : > { %6146 = vmatmul.msk.bf16.gmra.mxu2 %vm1897_vm12, %v6251_v32  ;;  %v3800_v62 = vpack.c.b16 %v3775_v58, %v3774_v60  ;;  %v4479_v2 = vrot.slane %v4478_v44, 4  ;;  %v4483_v55 = vrot.slane %v4481_v4, 5  ;;  %v5025_v14 = vsel %vm7012_vm2, %v6179_v28, %v5024_v48 }
 0x21b   : > { %v7646_v17 = vpop.f32.mrf.mxu1  ;;  %v4489_v60 = vshll.u32 %v4290_v56, 16  ;;  %v4474_v8 = vsel %vm6688_vm13, %v4469_v0, %v4473_v45  ;;  %v5111_v44 = vunpack.c.l.b16 %v5025_v14  ;;  %v7682_v0 = vld [vmem:[#allocation2 + $0x74] sm:$0x1] }
 0x21c   : > { %v4484_v39 = vsel %vm6688_vm13, %v4479_v2, %v4483_v55 }
 0x21d   : > { %v2597_v32 = vpop.f32.mrf.mxu2  ;;  %v3532_v10 = vpop.f32.mrf.mxu0  ;;  %v4491_v56 = vrot.slane %v4489_v60, 5 }
 0x21e   : > { %v2880_v25 = vpop.f32.mrf.mxu3  ;;  %v2638_v30 = vadd.f32 %v2597_v32, %v2245_v11  ;;  %6066 = vmatmul.msk.bf16.gmra.mxu1 %vm1897_vm12, %v3800_v62  ;;  %v7652_v16 = vadd.f32 %v3532_v10, %v2922_v51  ;;  %v5028_v51 = vsel %vm7012_vm2, %v5026_v29, %v5027_v26  ;;  %v6414_v11 = vld [vmem:[#allocation2 + $0x68] sm:$0x1]  ;;  %v6252_v32 = vld [vmem:[#allocation2 + $0x60] sm:$0xff]  ;;  %v4488_v26 = vrot.slane %v4486_v13, 4 }
 0x21f   : > { %v2923_v57 = vadd.f32 %v2880_v25, %v2637_v35  ;;  %v7657_v35 = vld [vmem:[#allocation2 + $0x70] sm:$0xf]  ;;  %v6415_v62 = vld [vmem:[#allocation2 + $0x64] sm:$0xf]  ;;  %v5112_v4 = vunpack.c.l.b16 %v5028_v51  ;;  %v2250_v51 = vadd.f32 %v7646_v17, %v7174_v5  ;;  %v5031_v13 = vrot.slane %v7626_v38, 5 }
 0x220   : > { %6195 = vmatmul.msk.bf16.gmra.mxu0 %vm1897_vm12, %v5137_v20  ;;  %v4495_v58 = vshll.u32 %v7657_v35, 16  ;;  %v4499_v19 = vshrl.u32 %v7657_v35, 16  ;;  %v3702_v20 = vrot.slane %v6414_v11, 5  ;;  %v3699_v10 = vrot.slane %v6415_v62, 5 }
 0x221   : > { %v5138_v14 = vpack.c.b16 %v5112_v4, %v5111_v44  ;;  %v5033_v17 = vrot.slane %v5031_v13, 4  ;;  %v5034_v44 = vrot.slane %v7648_v21, 5 }
 0x222   : > { %v3701_v29 = vrot.slane %v3699_v10, 4 }
 0x223   : > { %6163 = vmatmul.msk.bf16.gmra.mxu3 %vm1897_vm12, %v4740_v47  ;;  %v7665_v49 = vpop.f32.mrf.mxu1  ;;  %v3591_v47 = vld [vmem:[#allocation2 + $0x60] sm:$0xe] }
 0x224   : > { %v6050_v28 = vrot.slane %v3591_v47, 9 }
 0x225   : > { %v2599_v24 = vpop.f32.mrf.mxu2  ;;  %v3534_v25 = vpop.f32.mrf.mxu0 }
 0x226   : > { %v2883_v54 = vpop.f32.mrf.mxu3  ;;  %v2639_v46 = vadd.f32 %v2599_v24, %v2247_v50  ;;  %v7673_v1 = vadd.f32 %v3534_v25, %v2923_v57  ;;  %v4501_v50 = vrot.slane %v4499_v19, 4  ;;  %v4716_v24 = vunpack.c.l.b16 %v4484_v39  ;;  %v4929_v19 = vld [vmem:[#allocation2 + $0x60] sm:$0xe] }
 0x227   : > { %v2924_v48 = vadd.f32 %v2883_v54, %v2638_v30  ;;  %v7675_v30 = vrot.slane %v4495_v58, 5  ;;  %v4715_v54 = vunpack.c.l.b16 %v4474_v8  ;;  %v3700_v45 = vsel %vm7012_vm2, %v6050_v28, %v3699_v10 }
 0x228   : > { %8297 = vst [vmem:[#allocation11_spill] sm:$0xff] %v7673_v1  ;;  %v3703_v57 = vsel %vm7012_vm2, %v3701_v29, %v3702_v20  ;;  %v3776_v2 = vunpack.c.l.b16 %v3700_v45  ;;  %v4505_v20 = vshll.u32 %v7682_v0, 16  ;;  %v6180_v38 = vrot.slane %v4929_v19, 9  ;;  %v3592_v19 = vld [vmem:[#allocation2 + $0x6c] sm:$0xe] }
 0x229   : > { %v3777_v55 = vunpack.c.l.b16 %v3703_v57  ;;  %v4502_v62 = vor.u32 %v4501_v50, %v7675_v30  ;;  %v4741_v39 = vpack.c.b16 %v4716_v24, %v4715_v54  ;;  %v7703_v50 = vld [vmem:[#allocation2 + $0x7c] sm:$0xf]  ;;  %v5035_v54 = vsel %vm7012_vm2, %v5033_v17, %v5034_v44 }
 0x22a   : > { %6147 = vmatmul.msk.bf16.gmra.mxu2 %vm1897_vm12, %v6252_v32  ;;  %v4492_v32 = vor.u32 %v4491_v56, %v4488_v26  ;;  %v4507_v29 = vrot.slane %v4505_v20, 5  ;;  %v4293_v26 = vld [vmem:[#allocation2 + $0x78] sm:$0xf]  ;;  %v2252_v56 = vadd.f32 %v7665_v49, %v7188_v59  ;;  %v6253_v49 = vld [vmem:[#allocation2 + $0x6c] sm:$0xff]  ;;  %v5038_v44 = vrot.slane %v7657_v35, 5 }
 0x22b   : > { %v7687_v60 = vpop.f32.mrf.mxu1  ;;  %v3801_v25 = vpack.c.b16 %v3777_v55, %v3776_v2  ;;  %v4503_v28 = vrot.slane %v4502_v62, 4  ;;  %v4510_v2 = vshrl.u32 %v4293_v26, 16  ;;  %v7726_v35 = vld [vmem:[#allocation2 + $0x80] sm:$0x1] }
 0x22c   : > { %v4493_v4 = vrot.slane %v4492_v32, 4 }
 0x22d   : > { %v2602_v11 = vpop.f32.mrf.mxu2  ;;  %v3537_v10 = vpop.f32.mrf.mxu0  ;;  %v4508_v57 = vsel %vm6688_vm13, %v4503_v28, %v4507_v29  ;;  %v4512_v29 = vrot.slane %v4510_v2, 4 }
 0x22e   : > { %v2885_v58 = vpop.f32.mrf.mxu3  ;;  %v2640_v47 = vadd.f32 %v2602_v11, %v2250_v51  ;;  %6067 = vmatmul.msk.bf16.gmra.mxu1 %vm1897_vm12, %v3801_v25  ;;  %v7692_v5 = vadd.f32 %v3537_v10, %v2924_v48  ;;  %v4498_v45 = vsel %vm6688_vm13, %v4493_v4, %v7675_v30  ;;  %v6416_v51 = vld [vmem:[#allocation2 + $0x70] sm:$0xf]  ;;  %v4519_v11 = vshll.u32 %v7703_v50, 16  ;;  %v6417_v10 = vld [vmem:[#allocation2 + $0x74] sm:$0x1] }
 0x22f   : > { %v2925_v8 = vadd.f32 %v2885_v58, %v2639_v46  ;;  %v5032_v46 = vsel %vm7012_vm2, %v6180_v38, %v5031_v13  ;;  %v3706_v13 = vrot.slane %v6416_v51, 5  ;;  %v4513_v58 = vshll.u32 %v4293_v26, 16  ;;  %v4930_v4 = vld [vmem:[#allocation2 + $0x6c] sm:$0xe] }
 0x230   : > { %8298 = vst [vmem:[#allocation12_spill] sm:$0xff] %v7692_v5  ;;  %6196 = vmatmul.msk.bf16.gmra.mxu0 %vm1897_vm12, %v5138_v14  ;;  %v4523_v25 = vshrl.u32 %v7703_v50, 16  ;;  %v5113_v62 = vunpack.c.l.b16 %v5032_v46  ;;  %v6051_v30 = vrot.slane %v3592_v19, 9  ;;  %v5114_v38 = vunpack.c.l.b16 %v5035_v54  ;;  %v8300_v54 = vld [vmem:[#allocation3_spill] sm:$0xff] }
 0x231   : > { %v3708_v20 = vrot.slane %v3706_v13, 4  ;;  %v4717_v17 = vunpack.c.l.b16 %v4498_v45  ;;  %v4515_v26 = vrot.slane %v4513_v58, 5  ;;  %v2255_v45 = vadd.f32 %v7687_v60, %v8300_v54 }
 0x232   : > { %v3707_v28 = vsel %vm7012_vm2, %v6051_v30, %v3706_v13  ;;  %v6181_v51 = vrot.slane %v4930_v4, 9  ;;  %v5040_v13 = vrot.slane %v5038_v44, 4 }
 0x233   : > { %6164 = vmatmul.msk.bf16.gmra.mxu3 %vm1897_vm12, %v4741_v39  ;;  %v7701_v48 = vpop.f32.mrf.mxu1  ;;  %v3709_v39 = vrot.slane %v6417_v10, 5  ;;  %v3778_v46 = vunpack.c.l.b16 %v3707_v28  ;;  %v5041_v10 = vrot.slane %v7682_v0, 5 }
 0x235   : > { %v2604_v24 = vpop.f32.mrf.mxu2  ;;  %v3539_v55 = vpop.f32.mrf.mxu0  ;;  %v5042_v0 = vsel %vm7012_vm2, %v5040_v13, %v5041_v10  ;;  %v3593_v10 = vld [vmem:[#allocation2 + $0x78] sm:$0xe] }
 0x236   : > { %v2888_v21 = vpop.f32.mrf.mxu3  ;;  %v2641_v59 = vadd.f32 %v2604_v24, %v2252_v56  ;;  %v7714_v32 = vadd.f32 %v3539_v55, %v2925_v8  ;;  %v3710_v8 = vsel %vm7012_vm2, %v3708_v20, %v3709_v39  ;;  %v4525_v24 = vrot.slane %v4523_v25, 4 }
 0x237   : > { %v2926_v14 = vadd.f32 %v2888_v21, %v2640_v47  ;;  %v4718_v47 = vunpack.c.l.b16 %v4508_v57  ;;  %v3779_v56 = vunpack.c.l.b16 %v3710_v8  ;;  %v4521_v21 = vrot.slane %v4519_v11, 5 }
 0x238   : > { %8299 = vst [vmem:[#allocation13_spill] sm:$0xff] %v7714_v32  ;;  %v5139_v55 = vpack.c.b16 %v5114_v38, %v5113_v62  ;;  %v4516_v25 = vor.u32 %v4515_v26, %v4512_v29  ;;  %v4529_v39 = vshll.u32 %v7726_v35, 16  ;;  %v4296_v62 = vld [vmem:[#allocation2 + $0x84] sm:$0xf]  ;;  %v7739_v38 = vld [vmem:[#allocation2 + $0x88] sm:$0xf] }
 0x239   : > { %v3802_v30 = vpack.c.b16 %v3779_v56, %v3778_v46  ;;  %v4742_v58 = vpack.c.b16 %v4718_v47, %v4717_v17  ;;  %v4526_v60 = vor.u32 %v4525_v24, %v4521_v21  ;;  %v4534_v8 = vshrl.u32 %v4296_v62, 16  ;;  %v8302_v29 = vld [vmem:[#allocation4_spill] sm:$0xff]  ;;  %v7793_v32 = vld [vmem:[#allocation2 + $0x98] sm:$0x1] }
 0x23a   : > { %6148 = vmatmul.msk.bf16.gmra.mxu2 %vm1897_vm12, %v6253_v49  ;;  %v4517_v17 = vrot.slane %v4516_v25, 4  ;;  %v4531_v4 = vrot.slane %v4529_v39, 5  ;;  %v4537_v46 = vshll.u32 %v4296_v62, 16  ;;  %v6052_v39 = vrot.slane %v3593_v10, 9 }
 0x23b   : > { %v7724_v57 = vpop.f32.mrf.mxu1  ;;  %v4527_v47 = vrot.slane %v4526_v60, 4  ;;  %v4536_v25 = vrot.slane %v4534_v8, 4 }
 0x23d   : > { %v2607_v19 = vpop.f32.mrf.mxu2  ;;  %v3542_v20 = vpop.f32.mrf.mxu0 }
 0x23e   : > { %v2890_v49 = vpop.f32.mrf.mxu3  ;;  %v2642_v11 = vadd.f32 %v2607_v19, %v2255_v45  ;;  %6068 = vmatmul.msk.bf16.gmra.mxu1 %vm1897_vm12, %v3802_v30  ;;  %v7731_v28 = vadd.f32 %v3542_v20, %v2926_v14  ;;  %v2257_v14 = vadd.f32 %v7701_v48, %v8302_v29  ;;  %v4547_v45 = vshrl.u32 %v7739_v38, 16  ;;  %v6254_v19 = vld [vmem:[#allocation2 + $0x78] sm:$0xff] }
 0x23f   : > { %v2927_v2 = vadd.f32 %v2890_v49, %v2641_v59  ;;  %v5039_v59 = vsel %vm7012_vm2, %v6181_v51, %v5038_v44  ;;  %v4543_v44 = vshll.u32 %v7739_v38, 16  ;;  %v5116_v49 = vunpack.c.l.b16 %v5042_v0  ;;  %v6418_v30 = vld [vmem:[#allocation2 + $0x7c] sm:$0xf] }
 0x240   : > { %8301 = vst [vmem:[#allocation3_spill] sm:$0xff] %v7731_v28  ;;  %6197 = vmatmul.msk.bf16.gmra.mxu0 %vm1897_vm12, %v5139_v55  ;;  %v5115_v56 = vunpack.c.l.b16 %v5039_v59  ;;  %v3713_v20 = vrot.slane %v6418_v30, 5  ;;  %v4522_v48 = vsel %vm6688_vm13, %v4517_v17, %v4521_v21  ;;  %v6419_v59 = vld [vmem:[#allocation2 + $0x80] sm:$0x1]  ;;  %v4539_v0 = vrot.slane %v4537_v46, 5 }
 0x241   : > { %v3716_v29 = vrot.slane %v6419_v59, 5  ;;  %v4931_v21 = vld [vmem:[#allocation2 + $0x78] sm:$0xe]  ;;  %v5045_v46 = vrot.slane %v7703_v50, 5  ;;  %v5048_v50 = vrot.slane %v7726_v35, 5  ;;  %v8305_v35 = vld [vmem:[#allocation5_spill] sm:$0xff] }
 0x242   : > { %v3715_v62 = vrot.slane %v3713_v20, 4  ;;  %v3714_v17 = vsel %vm7012_vm2, %v6052_v39, %v3713_v20  ;;  %v6182_v30 = vrot.slane %v4931_v21, 9  ;;  %v4299_v21 = vld [vmem:[#allocation2 + $0x90] sm:$0xf]  ;;  %v3594_v28 = vld [vmem:[#allocation2 + $0x84] sm:$0xe] }
 0x243   : > { %6165 = vmatmul.msk.bf16.gmra.mxu3 %vm1897_vm12, %v4742_v58  ;;  %v7743_v26 = vpop.f32.mrf.mxu1  ;;  %v4532_v58 = vsel %vm6688_vm13, %v4527_v47, %v4531_v4  ;;  %v7760_v47 = vld [vmem:[#allocation2 + $0x8c] sm:$0x1]  ;;  %v3780_v4 = vunpack.c.l.b16 %v3714_v17  ;;  %v7774_v17 = vld [vmem:[#allocation2 + $0x94] sm:$0xf] }
 0x244   : > { %v4553_v20 = vshll.u32 %v7760_v47, 16 }
 0x245   : > { %v2609_v54 = vpop.f32.mrf.mxu2  ;;  %v3544_v55 = vpop.f32.mrf.mxu0 }
 0x246   : > { %v2893_v24 = vpop.f32.mrf.mxu3  ;;  %v2643_v13 = vadd.f32 %v2609_v54, %v2257_v14  ;;  %v7751_v60 = vadd.f32 %v3544_v55, %v2927_v2  ;;  %v4549_v14 = vrot.slane %v4547_v45, 4  ;;  %v4720_v54 = vunpack.c.l.b16 %v4532_v58 }
 0x247   : > { %v2928_v51 = vadd.f32 %v2893_v24, %v2642_v11  ;;  %v7753_v11 = vrot.slane %v4543_v44, 5  ;;  %v4719_v24 = vunpack.c.l.b16 %v4522_v48  ;;  %v3717_v2 = vsel %vm7012_vm2, %v3715_v62, %v3716_v29 }
 0x248   : > { %8303 = vst [vmem:[#allocation4_spill] sm:$0xff] %v7751_v60  ;;  %v3781_v8 = vunpack.c.l.b16 %v3717_v2  ;;  %v5140_v55 = vpack.c.b16 %v5116_v49, %v5115_v56  ;;  %v4540_v45 = vor.u32 %v4539_v0, %v4536_v25  ;;  %v5047_v56 = vrot.slane %v5045_v46, 4 }
 0x249   : > { %v4550_v10 = vor.u32 %v4549_v14, %v7753_v11  ;;  %v4743_v59 = vpack.c.b16 %v4720_v54, %v4719_v24  ;;  %v5046_v25 = vsel %vm7012_vm2, %v6182_v30, %v5045_v46  ;;  %v4555_v14 = vrot.slane %v4553_v20, 5 }
 0x24a   : > { %6149 = vmatmul.msk.bf16.gmra.mxu2 %vm1897_vm12, %v6254_v19  ;;  %v3803_v58 = vpack.c.b16 %v3781_v8, %v3780_v4  ;;  %v4541_v49 = vrot.slane %v4540_v45, 4  ;;  %v4561_v24 = vshll.u32 %v4299_v21, 16  ;;  %v4571_v54 = vshrl.u32 %v7774_v17, 16 }
 0x24b   : > { %v7763_v44 = vpop.f32.mrf.mxu1  ;;  %v4551_v0 = vrot.slane %v4550_v10, 4  ;;  %v3950_v2 = vadd.f32 %v7724_v57, %v8305_v35  ;;  %v5049_v4 = vsel %vm7012_vm2, %v5047_v56, %v5048_v50  ;;  %v5117_v8 = vunpack.c.l.b16 %v5046_v25  ;;  %v6420_v56 = vld [vmem:[#allocation2 + $0x88] sm:$0xf] }
 0x24c   : > { %v4546_v30 = vsel %vm6688_vm13, %v4541_v49, %v7753_v11  ;;  %v4563_v20 = vrot.slane %v4561_v24, 5  ;;  %v3720_v50 = vrot.slane %v6420_v56, 5  ;;  %v5118_v35 = vunpack.c.l.b16 %v5049_v4  ;;  %v6421_v24 = vld [vmem:[#allocation2 + $0x8c] sm:$0x1] }
 0x24d   : > { %v4157_v48 = vpop.f32.mrf.mxu2  ;;  %v3547_v39 = vpop.f32.mrf.mxu0  ;;  %v4556_v57 = vsel %vm6688_vm13, %v4551_v0, %v4555_v14  ;;  %v6053_v49 = vrot.slane %v3594_v28, 9  ;;  %v3723_v5 = vrot.slane %v6421_v24, 5  ;;  %v5055_v14 = vrot.slane %v7760_v47, 5 }
 0x24e   : > { %v2895_v19 = vpop.f32.mrf.mxu3  ;;  %6069 = vmatmul.msk.bf16.gmra.mxu1 %vm1897_vm12, %v3803_v58  ;;  %v7768_v29 = vadd.f32 %v3547_v39, %v2928_v51  ;;  %v4567_v51 = vshll.u32 %v7774_v17, 16  ;;  %v5052_v58 = vrot.slane %v7739_v38, 5  ;;  %v4721_v38 = vunpack.c.l.b16 %v4546_v30 }
 0x24f   : > { %v2929_v62 = vadd.f32 %v2895_v19, %v2643_v13  ;;  %v4558_v13 = vshrl.u32 %v4299_v21, 16  ;;  %v4573_v21 = vrot.slane %v4571_v54, 4  ;;  %v4722_v1 = vunpack.c.l.b16 %v4556_v57  ;;  %v4933_v57 = vld [vmem:[#allocation2 + $0x90] sm:$0xe] }
 0x250   : > { %8304 = vst [vmem:[#allocation14_spill] sm:$0xff] %v7768_v29  ;;  %6198 = vmatmul.msk.bf16.gmra.mxu0 %vm1897_vm12, %v5140_v55  ;;  %v4932_v55 = vld [vmem:[#allocation2 + $0x84] sm:$0xe]  ;;  %v7791_v25 = vrot.slane %v4567_v51, 5  ;;  %v4237_v29 = vadd.f32 %v4157_v48, %v3950_v2  ;;  %v5054_v0 = vrot.slane %v5052_v58, 4  ;;  %v3721_v48 = vsel %vm7012_vm2, %v6053_v49, %v3720_v50 }
 0x251   : > { %v4560_v10 = vrot.slane %v4558_v13, 4  ;;  %v6183_v60 = vrot.slane %v4932_v55, 9  ;;  %v3722_v13 = vrot.slane %v3720_v50, 4  ;;  %v4577_v28 = vshll.u32 %v7793_v32, 16 }
 0x252   : > { %v3782_v4 = vunpack.c.l.b16 %v3721_v48  ;;  %v5141_v30 = vpack.c.b16 %v5118_v35, %v5117_v8  ;;  %v3951_v47 = vadd.f32 %v7743_v26, %v7254_v22  ;;  %v5062_v48 = vrot.slane %v7793_v32, 5 }
 0x253   : > { %6166 = vmatmul.msk.bf16.gmra.mxu3 %vm1897_vm12, %v4743_v59  ;;  %v7783_v46 = vpop.f32.mrf.mxu1  ;;  %v6255_v59 = vld [vmem:[#allocation2 + $0x84] sm:$0xff]  ;;  %v4564_v51 = vor.u32 %v4563_v20, %v4560_v10  ;;  %v3724_v54 = vsel %vm7012_vm2, %v3722_v13, %v3723_v5  ;;  %v7812_v20 = vld [vmem:[%s8273_s6] ss:$0 sm:$0xff]  ;;  %v4744_v5 = vpack.c.b16 %v4722_v1, %v4721_v38  ;;  %v4579_v50 = vrot.slane %v4577_v28, 5  ;;  %v4302_v13 = vld [vmem:[#allocation2 + $0x9c] sm:$0xf] }
 0x254   : > { %v3783_v55 = vunpack.c.l.b16 %v3724_v54  ;;  %v6184_v1 = vrot.slane %v4933_v57, 9  ;;  %v4582_v54 = vshrl.u32 %v4302_v13, 16 }
 0x255   : > { %v4159_v19 = vpop.f32.mrf.mxu2  ;;  %v3549_v39 = vpop.f32.mrf.mxu0  ;;  %v4565_v26 = vrot.slane %v4564_v51, 4 }
 0x256   : > { %v4811_v45 = vpop.f32.mrf.mxu3  ;;  %v7795_v11 = vadd.f32 %v3549_v39, %v2929_v62  ;;  %v4574_v62 = vor.u32 %v4573_v21, %v7791_v25  ;;  %v3804_v8 = vpack.c.b16 %v3783_v55, %v3782_v4  ;;  %v5059_v21 = vrot.slane %v7774_v17, 5 }
 0x257   : > { %v4891_v2 = vadd.f32 %v4811_v45, %v4237_v29  ;;  %v5056_v29 = vsel %vm7012_vm2, %v5054_v0, %v5055_v14  ;;  %v4238_v49 = vadd.f32 %v4159_v19, %v3951_v47  ;;  %v4570_v17 = vsel %vm6688_vm13, %v4565_v26, %v7791_v25  ;;  %v7835_v0 = vld [vmem:[#allocation2 + $0xa0] sm:$0xf]  ;;  %v8308_v47 = vld [vmem:[#allocation7_spill] sm:$0xff]  ;;  %v6422_v26 = vld [vmem:[#allocation2 + $0x94] sm:$0xf] }
 0x258   : > { %8306 = vst [vmem:[#allocation5_spill] sm:$0xff] %v7795_v11  ;;  %v4575_v56 = vrot.slane %v4574_v62, 4  ;;  %v5120_v38 = vunpack.c.l.b16 %v5056_v29  ;;  %v5061_v24 = vrot.slane %v5059_v21, 4  ;;  %v8307_v62 = vld [vmem:[#allocation6_spill] sm:$0xff]  ;;  %v4585_v25 = vshll.u32 %v4302_v13, 16 }
 0x259   : > { %v3952_v28 = vadd.f32 %v7763_v44, %v8307_v62  ;;  %v4591_v32 = vshll.u32 %v7835_v0, 16  ;;  %v4723_v57 = vunpack.c.l.b16 %v4570_v17 }
 0x25a   : > { %6150 = vmatmul.msk.bf16.gmra.mxu2 %vm1897_vm12, %v6255_v59  ;;  %v5053_v59 = vsel %vm7012_vm2, %v6183_v60, %v5052_v58  ;;  %v4580_v19 = vsel %vm6688_vm13, %v4575_v56, %v4579_v50  ;;  %v3727_v56 = vrot.slane %v6422_v26, 5 }
 0x25b   : > { %v7807_v10 = vpop.f32.mrf.mxu1  ;;  %v5119_v58 = vunpack.c.l.b16 %v5053_v59  ;;  %v4595_v59 = vshrl.u32 %v7835_v0, 16  ;;  %v7856_v17 = vrot.slane %v4591_v32, 5  ;;  %v7865_v32 = vld [vmem:[#allocation2 + $0xa4] sm:$0x1] }
 0x25d   : > { %v4162_v45 = vpop.f32.mrf.mxu2  ;;  %v5209_v22 = vpop.f32.mrf.mxu0  ;;  %v5142_v55 = vpack.c.b16 %v5120_v38, %v5119_v58  ;;  %v3729_v58 = vrot.slane %v3727_v56, 4  ;;  %v6423_v38 = vld [vmem:[#allocation2 + $0x98] sm:$0x1] }
 0x25e   : > { %v4813_v39 = vpop.f32.mrf.mxu3  ;;  %v5289_v35 = vadd.f32 %v5209_v22, %v4891_v2  ;;  %6070 = vmatmul.msk.bf16.gmra.mxu1 %vm1897_vm12, %v3804_v8  ;;  %v7842_v2 = vsel %vm7012_vm2, %v6184_v1, %v5059_v21  ;;  %v4239_v29 = vadd.f32 %v4162_v45, %v3952_v28  ;;  %v6256_v8 = vld [vmem:[#allocation2 + $0x90] sm:$0xff]  ;;  %v4724_v22 = vunpack.c.l.b16 %v4580_v19 }
 0x25f   : > { %v4892_v51 = vadd.f32 %v4813_v39, %v4238_v49  ;;  %v3953_v39 = vadd.f32 %v7783_v46, %v8308_v47  ;;  %v5063_v21 = vsel %vm7012_vm2, %v5061_v24, %v5062_v48  ;;  %v3595_v49 = vld [vmem:[#allocation2 + $0x90] sm:$0xe]  ;;  %v4584_v46 = vrot.slane %v4582_v54, 4 }
 0x260   : > { %6199 = vmatmul.msk.bf16.gmra.mxu0 %vm1897_vm12, %v5141_v30  ;;  %v5325_v60 = vadd.f32 %v7812_v20, %v5289_v35  ;;  %v5121_v35 = vunpack.c.l.b16 %v7842_v2  ;;  %v6054_v1 = vrot.slane %v3595_v49, 9  ;;  %v3730_v13 = vrot.slane %v6423_v38, 5 }
 0x261   : > { %v4597_v19 = vrot.slane %v4595_v59, 4 }
 0x262   : > { %v5357_v14 = vpack.c.bf16 %v5325_v60, %v5325_v60  ;;  %v5492_v62 = vmul.f32 %v5325_v60, %v5325_v60  ;;  %v3728_v24 = vsel %vm7012_vm2, %v6054_v1, %v3727_v56  ;;  %v3731_v48 = vsel %vm7012_vm2, %v3729_v58, %v3730_v13 }
 0x263   : > { %6167 = vmatmul.msk.bf16.gmra.mxu3 %vm1897_vm12, %v4744_v5  ;;  %v7844_v4 = vpop.f32.mrf.mxu1  ;;  %v3784_v47 = vunpack.c.l.b16 %v3728_v24  ;;  %v4598_v1 = vor.u32 %v4597_v19, %v7856_v17  ;;  %v4305_v24 = vld [vmem:[#allocation2 + $0xa8] sm:$0xf] }
 0x264   : > { %5389 = vst.msk [vmem:[%s7827_s12] sm:$0xf] %vm1171_vm6, %v5357_v14  ;;  %v4587_v14 = vrot.slane %v4585_v25, 5 }
 0x265   : > { %v4164_v5 = vpop.f32.mrf.mxu2  ;;  %v5211_v44 = vpop.f32.mrf.mxu0 }
 0x266   : > { %v4816_v30 = vpop.f32.mrf.mxu3  ;;  %v5290_v50 = vadd.f32 %v5211_v44, %v4892_v51  ;;  %v5421_v51 = vsel %vm1897_vm12, %v5325_v60, 0.0  ;;  %v4745_v44 = vpack.c.b16 %v4724_v22, %v4723_v57  ;;  %v4240_v13 = vadd.f32 %v4164_v5, %v3953_v39 }
 0x267   : > { %v4893_v28 = vadd.f32 %v4816_v30, %v4239_v29  ;;  %v3785_v30 = vunpack.c.l.b16 %v3731_v48  ;;  %v4588_v29 = vor.u32 %v4587_v14, %v4584_v46  ;;  %v4601_v57 = vshll.u32 %v7865_v32, 16 }
 0x268   : > { %v5326_v45 = vadd.f32 %v7812_v20, %v5290_v50  ;;  %v5122_v50 = vunpack.c.l.b16 %v5063_v21  ;;  %v5066_v48 = vrot.slane %v7835_v0, 5 }
 0x269   : > { %v4589_v46 = vrot.slane %v4588_v29, 4  ;;  %v4603_v5 = vrot.slane %v4601_v57, 5  ;;  %v6424_v57 = vld [vmem:[#allocation2 + $0xa0] sm:$0xf] }
 0x26a   : > { %6151 = vmatmul.msk.bf16.gmra.mxu2 %vm1897_vm12, %v6256_v8  ;;  %v5358_v54 = vpack.c.bf16 %v5326_v45, %v5326_v45  ;;  %v5422_v2 = vsel %vm1897_vm12, %v5326_v45, 0.0  ;;  %v5493_v25 = vmul.f32 %v5326_v45, %v5326_v45  ;;  %v5524_v8 = vsel %vm1897_vm12, %v5492_v62, 0.0  ;;  %v8309_v62 = vld [vmem:[#allocation8_spill] sm:$0xff] }
 0x26b   : > { %v5423_v59 = vadd.f32 %v5422_v2, %v5421_v51  ;;  %v7867_v60 = vpop.f32.mrf.mxu1  ;;  %v3805_v45 = vpack.c.b16 %v3785_v30, %v3784_v47  ;;  %v3954_v21 = vadd.f32 %v7807_v10, %v8309_v62  ;;  %v4599_v51 = vrot.slane %v4598_v1, 4  ;;  %v8310_v30 = vld [vmem:[#allocation9_spill] sm:$0xff] }
 0x26c   : > { %5390 = vst.msk [vmem:[%s7827_s12 + $0x4] sm:$0xf] %vm1171_vm6, %v5358_v54  ;;  %v5525_v26 = vsel %vm1897_vm12, %v5493_v25, 0.0  ;;  %v7881_v39 = vpack.c.b16 %v5122_v50, %v5121_v35  ;;  %v7884_v54 = vld [vmem:[#allocation2 + $0xac] sm:$0xf]  ;;  %v4606_v47 = vshrl.u32 %v4305_v24, 16  ;;  %v3955_v29 = vadd.f32 %v7844_v4, %v8310_v30 }
 0x26d   : > { %v4167_v49 = vpop.f32.mrf.mxu2  ;;  %v5526_v58 = vadd.f32 %v5525_v26, %v5524_v8  ;;  %v5214_v38 = vpop.f32.mrf.mxu0  ;;  %v4594_v35 = vsel %vm6688_vm13, %v4589_v46, %v7856_v17  ;;  %v4609_v8 = vshll.u32 %v4305_v24, 16  ;;  %v4615_v1 = vshll.u32 %v7884_v54, 16  ;;  %v3596_v24 = vld [vmem:[#allocation2 + $0x9c] sm:$0xe] }
 0x26e   : > { %v4818_v56 = vpop.f32.mrf.mxu3  ;;  %v5291_v22 = vadd.f32 %v5214_v38, %v4893_v28  ;;  %6071 = vmatmul.msk.bf16.gmra.mxu1 %vm1897_vm12, %v3805_v45  ;;  %v4934_v28 = vld [vmem:[#allocation2 + $0x9c] sm:$0xe]  ;;  %v4604_v17 = vsel %vm6688_vm13, %v4599_v51, %v4603_v5  ;;  %v5068_v62 = vrot.slane %v5066_v48, 4 }
 0x26f   : > { %v4894_v19 = vadd.f32 %v4818_v56, %v4240_v13  ;;  %v6185_v50 = vrot.slane %v4934_v28, 9  ;;  %v4241_v13 = vadd.f32 %v4167_v49, %v3954_v21  ;;  %v6257_v45 = vld [vmem:[#allocation2 + $0x9c] sm:$0xff]  ;;  %v4611_v11 = vrot.slane %v4609_v8, 5 }
 0x270   : > { %6200 = vmatmul.msk.bf16.gmra.mxu0 %vm1897_vm12, %v5142_v55  ;;  %v5327_v14 = vadd.f32 %v7812_v20, %v5291_v22  ;;  %v3734_v22 = vrot.slane %v6424_v57, 5  ;;  %v5069_v49 = vrot.slane %v7865_v32, 5  ;;  %v7903_v21 = vrot.slane %v4615_v1, 5 }
 0x272   : > { %v5359_v55 = vpack.c.bf16 %v5327_v14, %v5327_v14  ;;  %v5424_v2 = vsel %vm1897_vm12, %v5327_v14, 0.0  ;;  %v5494_v25 = vmul.f32 %v5327_v14, %v5327_v14  ;;  %v4725_v14 = vunpack.c.l.b16 %v4594_v35  ;;  %v7910_v35 = vld [vmem:[#allocation2 + $0xb0] sm:$0x1] }
 0x273   : > { %6168 = vmatmul.msk.bf16.gmra.mxu3 %vm1897_vm12, %v4745_v44  ;;  %v5425_v10 = vadd.f32 %v5424_v2, %v5423_v59  ;;  %v7892_v44 = vpop.f32.mrf.mxu1  ;;  %v4619_v59 = vshrl.u32 %v7884_v54, 16  ;;  %v6055_v2 = vrot.slane %v3596_v24, 9  ;;  %v3736_v28 = vrot.slane %v3734_v22, 4 }
 0x274   : > { %5391 = vst.msk [vmem:[%s7827_s12 + $0x8] sm:$0xf] %vm1171_vm6, %v5359_v55  ;;  %v5527_v0 = vsel %vm1897_vm12, %v5494_v25, 0.0  ;;  %v4608_v55 = vrot.slane %v4606_v47, 4  ;;  %v6425_v25 = vld [vmem:[#allocation2 + $0xa4] sm:$0x1] }
 0x275   : > { %v4169_v56 = vpop.f32.mrf.mxu2  ;;  %v5528_v38 = vadd.f32 %v5527_v0, %v5526_v58  ;;  %v5216_v4 = vpop.f32.mrf.mxu0  ;;  %v3737_v30 = vrot.slane %v6425_v25, 5  ;;  %v4621_v0 = vrot.slane %v4619_v59, 4  ;;  %v3735_v5 = vsel %vm7012_vm2, %v6055_v2, %v3734_v22 }
 0x276   : > { %v4821_v26 = vpop.f32.mrf.mxu3  ;;  %v5292_v46 = vadd.f32 %v5216_v4, %v4894_v19  ;;  %v4726_v19 = vunpack.c.l.b16 %v4604_v17  ;;  %v3786_v1 = vunpack.c.l.b16 %v3735_v5 }
 0x277   : > { %v4895_v51 = vadd.f32 %v4821_v26, %v4241_v13  ;;  %v3738_v47 = vsel %vm7012_vm2, %v3736_v28, %v3737_v30  ;;  %v5067_v26 = vsel %vm7012_vm2, %v6185_v50, %v5066_v48  ;;  %v4622_v2 = vor.u32 %v4621_v0, %v7903_v21 }
 0x278   : > { %v5328_v58 = vadd.f32 %v7812_v20, %v5292_v46  ;;  %v3787_v13 = vunpack.c.l.b16 %v3738_v47  ;;  %v5070_v46 = vsel %vm7012_vm2, %v5068_v62, %v5069_v49  ;;  %v4746_v48 = vpack.c.b16 %v4726_v19, %v4725_v14  ;;  %v4308_v47 = vld [vmem:[#allocation2 + $0xb4] sm:$0xf] }
 0x279   : > { %v4623_v49 = vrot.slane %v4622_v2, 4  ;;  %v8311_v14 = vld [vmem:[#allocation10_spill] sm:$0xff] }
 0x27a   : > { %6152 = vmatmul.msk.bf16.gmra.mxu2 %vm1897_vm12, %v6257_v45  ;;  %v5360_v8 = vpack.c.bf16 %v5328_v58, %v5328_v58  ;;  %v5426_v4 = vsel %vm1897_vm12, %v5328_v58, 0.0  ;;  %v5495_v32 = vmul.f32 %v5328_v58, %v5328_v58  ;;  %v4612_v45 = vor.u32 %v4611_v11, %v4608_v55 }
 0x27b   : > { %v5427_v57 = vadd.f32 %v5426_v4, %v5425_v10  ;;  %v7915_v59 = vpop.f32.mrf.mxu1  ;;  %v4625_v10 = vshll.u32 %v7910_v35, 16  ;;  %v3806_v50 = vpack.c.b16 %v3787_v13, %v3786_v1  ;;  %v4242_v58 = vadd.f32 %v4169_v56, %v3955_v29 }
 0x27c   : > { %5392 = vst.msk [vmem:[%s7827_s12 + $0xc] sm:$0xf] %vm1171_vm6, %v5360_v8  ;;  %v5529_v17 = vsel %vm1897_vm12, %v5495_v32, 0.0  ;;  %v5123_v11 = vunpack.c.l.b16 %v5067_v26  ;;  %v5124_v55 = vunpack.c.l.b16 %v5070_v46  ;;  %v4613_v5 = vrot.slane %v4612_v45, 4 }
 0x27d   : > { %v4172_v24 = vpop.f32.mrf.mxu2  ;;  %v5530_v28 = vadd.f32 %v5529_v17, %v5528_v38  ;;  %v5219_v25 = vpop.f32.mrf.mxu0  ;;  %v4627_v0 = vrot.slane %v4625_v10, 5  ;;  %v7928_v38 = vld [vmem:[#allocation2 + $0xb8] sm:$0xf]  ;;  %v4630_v29 = vshrl.u32 %v4308_v47, 16  ;;  %v4633_v56 = vshll.u32 %v4308_v47, 16 }
 0x27e   : > { %v4823_v22 = vpop.f32.mrf.mxu3  ;;  %v5293_v30 = vadd.f32 %v5219_v25, %v4895_v51  ;;  %6072 = vmatmul.msk.bf16.gmra.mxu1 %vm1897_vm12, %v3806_v50  ;;  %v3956_v51 = vadd.f32 %v7867_v60, %v8311_v14  ;;  %v7934_v1 = vpack.c.b16 %v5124_v55, %v5123_v11  ;;  %v4639_v13 = vshll.u32 %v7928_v38, 16  ;;  %v6258_v25 = vld [vmem:[#allocation2 + $0xa8] sm:$0xff]  ;;  %v6427_v14 = vld [vmem:[#allocation2 + $0xb0] sm:$0x1] }
 0x27f   : > { %v4618_v2 = vsel %vm6688_vm13, %v4613_v5, %v7903_v21  ;;  %v5073_v55 = vrot.slane %v7884_v54, 5  ;;  %v4643_v47 = vshrl.u32 %v7928_v38, 16  ;;  %v4935_v54 = vld [vmem:[#allocation2 + $0xa8] sm:$0xe] }
 0x280   : > { %6201 = vmatmul.msk.bf16.gmra.mxu0 %vm1897_vm12, %v7881_v39  ;;  %v5329_v62 = vadd.f32 %v7812_v20, %v5293_v30  ;;  %v4896_v39 = vadd.f32 %v4823_v22, %v4242_v58  ;;  %v4243_v45 = vadd.f32 %v4172_v24, %v3956_v51  ;;  %v4632_v30 = vrot.slane %v4630_v29, 4 }
 0x281   : > { %v4635_v58 = vrot.slane %v4633_v56, 5  ;;  %v3957_v24 = vadd.f32 %v7892_v44, %v7350_v12  ;;  %v4727_v51 = vunpack.c.l.b16 %v4618_v2  ;;  %v7954_v56 = vld [vmem:[#allocation2 + $0xbc] sm:$0x1] }
 0x282   : > { %v5361_v19 = vpack.c.bf16 %v5329_v62, %v5329_v62  ;;  %v5428_v8 = vsel %vm1897_vm12, %v5329_v62, 0.0  ;;  %v5496_v4 = vmul.f32 %v5329_v62, %v5329_v62  ;;  %v3597_v62 = vld [vmem:[#allocation2 + $0xa8] sm:$0xe] }
 0x283   : > { %6169 = vmatmul.msk.bf16.gmra.mxu3 %vm1897_vm12, %v4746_v48  ;;  %v5429_v32 = vadd.f32 %v5428_v8, %v5427_v57  ;;  %v7936_v26 = vpop.f32.mrf.mxu1  ;;  %v4628_v57 = vsel %vm6688_vm13, %v4623_v49, %v4627_v0  ;;  %v6426_v48 = vld [vmem:[#allocation2 + $0xac] sm:$0xf]  ;;  %v6056_v21 = vrot.slane %v3597_v62, 9  ;;  %v3744_v49 = vrot.slane %v6427_v14, 5 }
 0x284   : > { %5393 = vst.msk [vmem:[%s7827_s12 + $0x10] sm:$0xf] %vm1171_vm6, %v5361_v19  ;;  %v5531_v60 = vsel %vm1897_vm12, %v5496_v4, 0.0  ;;  %v3741_v50 = vrot.slane %v6426_v48, 5  ;;  %v4728_v29 = vunpack.c.l.b16 %v4628_v57  ;;  %v4645_v19 = vrot.slane %v4643_v47, 4 }
 0x285   : > { %v4174_v46 = vpop.f32.mrf.mxu2  ;;  %v5532_v22 = vadd.f32 %v5531_v60, %v5530_v28  ;;  %v5221_v10 = vpop.f32.mrf.mxu0  ;;  %v7951_v28 = vrot.slane %v4639_v13, 5  ;;  %v4636_v4 = vor.u32 %v4635_v58, %v4632_v30  ;;  %v5075_v30 = vrot.slane %v5073_v55, 4 }
 0x286   : > { %v4826_v17 = vpop.f32.mrf.mxu3  ;;  %v5294_v11 = vadd.f32 %v5221_v10, %v4896_v39  ;;  %v3743_v5 = vrot.slane %v3741_v50, 4  ;;  %v3742_v44 = vsel %vm7012_vm2, %v6056_v21, %v3741_v50  ;;  %v5076_v58 = vrot.slane %v7910_v35, 5 }
 0x287   : > { %v4897_v12 = vadd.f32 %v4826_v17, %v4243_v45  ;;  %v3788_v2 = vunpack.c.l.b16 %v3742_v44  ;;  %v4646_v45 = vor.u32 %v4645_v19, %v7951_v28  ;;  %v4649_v17 = vshll.u32 %v7954_v56, 16 }
 0x288   : > { %v5330_v0 = vadd.f32 %v7812_v20, %v5294_v11  ;;  %v3745_v8 = vsel %vm7012_vm2, %v3743_v5, %v3744_v49  ;;  %v6186_v11 = vrot.slane %v4935_v54, 9  ;;  %v4244_v49 = vadd.f32 %v4174_v46, %v3957_v24  ;;  %v4311_v24 = vld [vmem:[#allocation2 + $0xc0] sm:$0xf] }
 0x289   : > { %v3789_v48 = vunpack.c.l.b16 %v3745_v8  ;;  %v4637_v19 = vrot.slane %v4636_v4, 4  ;;  %v4647_v44 = vrot.slane %v4646_v45, 4  ;;  %v4651_v8 = vrot.slane %v4649_v17, 5  ;;  %v7992_v45 = vld [vmem:[#allocation2 + $0xb4] sm:$0xe] }
 0x28a   : > { %6153 = vmatmul.msk.bf16.gmra.mxu2 %vm1897_vm12, %v6258_v25  ;;  %v5362_v39 = vpack.c.bf16 %v5330_v0, %v5330_v0  ;;  %v5430_v13 = vsel %vm1897_vm12, %v5330_v0, 0.0  ;;  %v5497_v60 = vmul.f32 %v5330_v0, %v5330_v0  ;;  %v589_v0 = vld [vmem:[#allocation2 + $0xcc] sm:$0x1]  ;;  %v7982_v46 = vsel %vm7012_vm2, %v5075_v30, %v5076_v58 }
 0x28b   : > { %v5431_v57 = vadd.f32 %v5430_v13, %v5429_v32  ;;  %v7962_v10 = vpop.f32.mrf.mxu1  ;;  %v4747_v32 = vpack.c.b16 %v4728_v29, %v4727_v51  ;;  %v3807_v5 = vpack.c.b16 %v3789_v48, %v3788_v2  ;;  %v7984_v51 = vld [vmem:[#allocation2 + $0xc4] sm:$0xf]  ;;  %v3958_v29 = vadd.f32 %v7915_v59, %v7357_v31 }
 0x28c   : > { %5394 = vst.msk [vmem:[%s7827_s12 + $0x14] sm:$0xf] %vm1171_vm6, %v5362_v39  ;;  %v5533_v25 = vsel %vm1897_vm12, %v5497_v60, 0.0  ;;  %v590_v39 = vsel %vm6534_vm3, 0, %v589_v0  ;;  %v5126_v48 = vunpack.c.l.b16 %v7982_v46  ;;  %v4663_v31 = vshll.u32 %v7984_v51, 16 }
 0x28d   : > { %v4177_v62 = vpop.f32.mrf.mxu2  ;;  %v5534_v47 = vadd.f32 %v5533_v25, %v5532_v22  ;;  %v5224_v21 = vpop.f32.mrf.mxu0  ;;  %v7978_v22 = vsel %vm7012_vm2, %v6186_v11, %v5073_v55  ;;  %591 = vst [vmem:[#allocation2 + $0xcc] sm:$0x1] %v590_v39  ;;  %v4667_v46 = vshrl.u32 %v7984_v51, 16  ;;  %v5087_v3 = vrot.slane %v7984_v51, 5 }
 0x28e   : > { %v4828_v50 = vpop.f32.mrf.mxu3  ;;  %v5295_v14 = vadd.f32 %v5224_v21, %v4897_v12  ;;  %6073 = vmatmul.msk.bf16.gmra.mxu1 %vm1897_vm12, %v3807_v5  ;;  %v4657_v12 = vshll.u32 %v4311_v24, 16  ;;  %v5125_v2 = vunpack.c.l.b16 %v7978_v22  ;;  %v4245_v25 = vadd.f32 %v4177_v62, %v3958_v29  ;;  %v6428_v5 = vld [vmem:[#allocation2 + $0xb8] sm:$0xf]  ;;  %v3598_v22 = vld [vmem:[#allocation2 + $0xb4] sm:$0xe] }
 0x28f   : > { %v4898_v13 = vadd.f32 %v4828_v50, %v4244_v49  ;;  %v4652_v50 = vsel %vm6688_vm13, %v4647_v44, %v4651_v8  ;;  %v5080_v62 = vrot.slane %v7928_v38, 5  ;;  %v8008_v44 = vrot.slane %v4663_v31, 5 }
 0x290   : > { %6202 = vmatmul.msk.bf16.gmra.mxu0 %vm1897_vm12, %v7934_v1  ;;  %v5331_v35 = vadd.f32 %v7812_v20, %v5295_v14  ;;  %v4654_v1 = vshrl.u32 %v4311_v24, 16  ;;  %v3748_v14 = vrot.slane %v6428_v5, 5  ;;  %v4659_v0 = vrot.slane %v4657_v12, 5 }
 0x291   : > { %v6057_v24 = vrot.slane %v3598_v22, 9  ;;  %v4669_v12 = vrot.slane %v4667_v46, 4  ;;  %v5082_v22 = vrot.slane %v5080_v62, 4 }
 0x292   : > { %v5363_v54 = vpack.c.bf16 %v5331_v35, %v5331_v35  ;;  %v5432_v55 = vsel %vm1897_vm12, %v5331_v35, 0.0  ;;  %v5498_v4 = vmul.f32 %v5331_v35, %v5331_v35  ;;  %v4656_v49 = vrot.slane %v4654_v1, 4  ;;  %v8011_v1 = vld [vmem:[#allocation2 + $0xc8] sm:$0x1] }
 0x293   : > { %6170 = vmatmul.msk.bf16.gmra.mxu3 %vm1897_vm12, %v4747_v32  ;;  %v5433_v60 = vadd.f32 %v5432_v55, %v5431_v57  ;;  %v7994_v17 = vpop.f32.mrf.mxu1  ;;  %v4642_v57 = vsel %vm6688_vm13, %v4637_v19, %v7951_v28  ;;  %v6259_v32 = vld [vmem:[#allocation2 + $0xb4] sm:$0xff]  ;;  %v6187_v35 = vrot.slane %v7992_v45, 9  ;;  %v3750_v28 = vrot.slane %v3748_v14, 4  ;;  %v6429_v19 = vld [vmem:[#allocation2 + $0xbc] sm:$0x1] }
 0x294   : > { %5395 = vst.msk [vmem:[%s7827_s12 + $0x18] sm:$0xf] %vm1171_vm6, %v5363_v54  ;;  %v5535_v59 = vsel %vm1897_vm12, %v5498_v4, 0.0  ;;  %v3751_v29 = vrot.slane %v6429_v19, 5  ;;  %v4729_v8 = vunpack.c.l.b16 %v4642_v57  ;;  %v4730_v54 = vunpack.c.l.b16 %v4652_v50 }
 0x295   : > { %v4179_v30 = vpop.f32.mrf.mxu2  ;;  %v5536_v58 = vadd.f32 %v5535_v59, %v5534_v47  ;;  %v5226_v21 = vpop.f32.mrf.mxu0  ;;  %v3749_v38 = vsel %vm7012_vm2, %v6057_v24, %v3748_v14  ;;  %v5081_v9 = vsel %vm7012_vm2, %v6187_v35, %v5080_v62 }
 0x296   : > { %v4831_v11 = vpop.f32.mrf.mxu3  ;;  %v5296_v39 = vadd.f32 %v5226_v21, %v4898_v13  ;;  %v3752_v4 = vsel %vm7012_vm2, %v3750_v28, %v3751_v29  ;;  %v4660_v13 = vor.u32 %v4659_v0, %v4656_v49  ;;  %v3790_v57 = vunpack.c.l.b16 %v3749_v38 }
 0x297   : > { %v4899_v55 = vadd.f32 %v4831_v11, %v4245_v25  ;;  %v3791_v5 = vunpack.c.l.b16 %v3752_v4  ;;  %v4670_v25 = vor.u32 %v4669_v12, %v8008_v44  ;;  %v4673_v11 = vshll.u32 %v8011_v1, 16 }
 0x298   : > { %v5332_v47 = vadd.f32 %v7812_v20, %v5296_v39  ;;  %v5145_v39 = vpack.c.b16 %v5126_v48, %v5125_v2  ;;  %v3959_v49 = vadd.f32 %v7936_v26, %v7377_v42  ;;  %v4748_v19 = vpack.c.b16 %v4730_v54, %v4729_v8 }
 0x299   : > { %v5083_v29 = vrot.slane %v7954_v56, 5  ;;  %v4661_v4 = vrot.slane %v4660_v13, 4  ;;  %v4675_v2 = vrot.slane %v4673_v11, 5  ;;  %v8036_v56 = vld [vmem:[#allocation2 + $0xd0] sm:$0xf] }
 0x29a   : > { %6154 = vmatmul.msk.bf16.gmra.mxu2 %vm1897_vm12, %v6259_v32  ;;  %v5364_v45 = vpack.c.bf16 %v5332_v47, %v5332_v47  ;;  %v5434_v31 = vsel %vm1897_vm12, %v5332_v47, 0.0  ;;  %v5499_v59 = vmul.f32 %v5332_v47, %v5332_v47  ;;  %v645_v32 = vld [vmem:[#allocation2 + $0xd4] sm:$0x1]  ;;  %v3808_v47 = vpack.c.b16 %v3791_v5, %v3790_v57 }
 0x29b   : > { %v5435_v50 = vadd.f32 %v5434_v31, %v5433_v60  ;;  %v8019_v21 = vpop.f32.mrf.mxu1  ;;  %v1352_v60 = vld [vmem:[#allocation2 + $0xcc] sm:$0xf]  ;;  %v4246_v38 = vadd.f32 %v4179_v30, %v3959_v49  ;;  %v646_v26 = vsel %vm6542_vm5, 0, %v645_v32  ;;  %v3960_v30 = vadd.f32 %v7962_v10, %v7392_v23 }
 0x29c   : > { %5396 = vst.msk [vmem:[%s7827_s12 + $0x1c] sm:$0xf] %vm1171_vm6, %v5364_v45  ;;  %v5537_v14 = vsel %vm1897_vm12, %v5499_v59, 0.0  ;;  %v4671_v45 = vrot.slane %v4670_v25, 4  ;;  %v1353_v42 = vsel %vm6601_vm8, 0, %v1352_v60  ;;  %v5084_v6 = vsel %vm7012_vm2, %v5082_v22, %v5083_v29 }
 0x29d   : > { %v4182_v46 = vpop.f32.mrf.mxu2  ;;  %v5538_v24 = vadd.f32 %v5537_v14, %v5536_v58  ;;  %v5229_v28 = vpop.f32.mrf.mxu0  ;;  %1354 = vst [vmem:[#allocation2 + $0xcc] sm:$0xf] %v1353_v42  ;;  %v4666_v31 = vsel %vm6688_vm13, %v4661_v4, %v8008_v44  ;;  %v4687_v35 = vshll.u32 %v8036_v56, 16  ;;  %v5127_v59 = vunpack.c.l.b16 %v5081_v9  ;;  %v6260_v14 = vld [vmem:[#allocation2 + $0xc0] sm:$0xff] }
 0x29e   : > { %v4833_v0 = vpop.f32.mrf.mxu3  ;;  %v5297_v12 = vadd.f32 %v5229_v28, %v4899_v55  ;;  %6074 = vmatmul.msk.bf16.gmra.mxu1 %vm1897_vm12, %v3808_v47  ;;  %647 = vst [vmem:[#allocation2 + $0xd4] sm:$0x1] %v646_v26  ;;  %v4676_v23 = vsel %vm6688_vm13, %v4671_v45, %v4675_v2  ;;  %v5128_v32 = vunpack.c.l.b16 %v5084_v6  ;;  %v4247_v44 = vadd.f32 %v4182_v46, %v3960_v30 }
 0x29f   : > { %v4900_v55 = vadd.f32 %v4833_v0, %v4246_v38  ;;  %v3961_v22 = vadd.f32 %v7994_v17, %v7409_v37  ;;  %v4731_v60 = vunpack.c.l.b16 %v4666_v31  ;;  %v4732_v28 = vunpack.c.l.b16 %v4676_v23 }
 0x2a0   : > { %6203 = vmatmul.msk.bf16.gmra.mxu0 %vm1897_vm12, %v5145_v39  ;;  %v5333_v48 = vadd.f32 %v7812_v20, %v5297_v12  ;;  %v6430_v39 = vld [vmem:[#allocation2 + $0xc4] sm:$0xf]  ;;  %v6431_v12 = vld [vmem:[#allocation2 + $0xc8] sm:$0x1]  ;;  %v8060_v45 = vrot.slane %v4687_v35, 5 }
 0x2a1   : > { %v3755_v49 = vrot.slane %v6430_v39, 5  ;;  %v3758_v38 = vrot.slane %v6431_v12, 5 }
 0x2a2   : > { %v5365_v58 = vpack.c.bf16 %v5333_v48, %v5333_v48  ;;  %v5436_v8 = vsel %vm1897_vm12, %v5333_v48, 0.0  ;;  %v5500_v54 = vmul.f32 %v5333_v48, %v5333_v48 }
 0x2a3   : > { %6171 = vmatmul.msk.bf16.gmra.mxu3 %vm1897_vm12, %v4748_v19  ;;  %v5437_v13 = vadd.f32 %v5436_v8, %v5435_v50  ;;  %v8051_v10 = vpop.f32.mrf.mxu1  ;;  %v4691_v50 = vshrl.u32 %v8036_v56, 16  ;;  %v3599_v19 = vld [vmem:[#allocation2 + $0xc0] sm:$0xe]  ;;  %v3757_v47 = vrot.slane %v3755_v49, 4 }
 0x2a4   : > { %5397 = vst.msk [vmem:[%s7827_s12 + $0x20] sm:$0xf] %vm1171_vm6, %v5365_v58  ;;  %v5539_v62 = vsel %vm1897_vm12, %v5500_v54, 0.0  ;;  %v6058_v29 = vrot.slane %v3599_v19, 9  ;;  %v4314_v4 = vld [vmem:[#allocation2 + $0xcc] sm:$0xf] }
 0x2a5   : > { %v4184_v5 = vpop.f32.mrf.mxu2  ;;  %v5540_v25 = vadd.f32 %v5539_v62, %v5538_v24  ;;  %v5231_v11 = vpop.f32.mrf.mxu0  ;;  %v1356_v46 = vld [vmem:[#allocation2 + $0xd4] sm:$0x1]  ;;  %v4678_v2 = vshrl.u32 %v4314_v4, 16  ;;  %v4681_v42 = vshll.u32 %v4314_v4, 16  ;;  %v4693_v26 = vrot.slane %v4691_v50, 4 }
 0x2a6   : > { %v4836_v57 = vpop.f32.mrf.mxu3  ;;  %v5298_v0 = vadd.f32 %v5231_v11, %v4900_v55  ;;  %v3756_v37 = vsel %vm7012_vm2, %v6058_v29, %v3755_v49  ;;  %v3759_v17 = vsel %vm7012_vm2, %v3757_v47, %v3758_v38  ;;  %v1357_v30 = vsel %vm6534_vm3, 0, %v1356_v46  ;;  %v4937_v19 = vld [vmem:[#allocation2 + $0xc0] sm:$0xe] }
 0x2a7   : > { %v4901_v48 = vadd.f32 %v4836_v57, %v4247_v44  ;;  %v3792_v8 = vunpack.c.l.b16 %v3756_v37  ;;  %1358 = vst [vmem:[#allocation2 + $0xd4] sm:$0x1] %v1357_v30  ;;  %v3793_v31 = vunpack.c.l.b16 %v3759_v17  ;;  %v4680_v23 = vrot.slane %v4678_v2, 4 }
 0x2a8   : > { %v5334_v24 = vadd.f32 %v7812_v20, %v5298_v0  ;;  %v4683_v35 = vrot.slane %v4681_v42, 5  ;;  %v5146_v57 = vpack.c.b16 %v5128_v32, %v5127_v59  ;;  %v4248_v39 = vadd.f32 %v4184_v5, %v3961_v22 }
 0x2a9   : > { %v4749_v49 = vpack.c.b16 %v4732_v28, %v4731_v60  ;;  %v3809_v0 = vpack.c.b16 %v3793_v31, %v3792_v8  ;;  %v4694_v47 = vor.u32 %v4693_v26, %v8060_v45  ;;  %v6188_v51 = vrot.slane %v4937_v19, 9 }
 0x2aa   : > { %6155 = vmatmul.msk.bf16.gmra.mxu2 %vm1897_vm12, %v6260_v14  ;;  %v5366_v9 = vpack.c.bf16 %v5334_v24, %v5334_v24  ;;  %v5438_v6 = vsel %vm1897_vm12, %v5334_v24, 0.0  ;;  %v5501_v58 = vmul.f32 %v5334_v24, %v5334_v24  ;;  %v4684_v29 = vor.u32 %v4683_v35, %v4680_v23 }
 0x2ab   : > { %v5439_v54 = vadd.f32 %v5438_v6, %v5437_v13  ;;  %v8071_v55 = vpop.f32.mrf.mxu1  ;;  %v5090_v5 = vrot.slane %v8011_v1, 5  ;;  %v4695_v24 = vrot.slane %v4694_v47, 4  ;;  %v3962_v1 = vadd.f32 %v8019_v21, %v7427_v61  ;;  %v6261_v6 = vld [vmem:[#allocation2 + $0xcc] sm:$0xff] }
 0x2ac   : > { %5398 = vst.msk [vmem:[%s7827_s12 + $0x24] sm:$0xf] %vm1171_vm6, %v5366_v9  ;;  %v5541_v62 = vsel %vm1897_vm12, %v5501_v58, 0.0  ;;  %v4685_v38 = vrot.slane %v4684_v29, 4  ;;  %v5088_v30 = vsel %vm7012_vm2, %v6188_v51, %v5087_v3 }
 0x2ad   : > { %v4187_v11 = vpop.f32.mrf.mxu2  ;;  %v5542_v44 = vadd.f32 %v5541_v62, %v5540_v25  ;;  %v5234_v14 = vpop.f32.mrf.mxu0  ;;  %v5089_v25 = vrot.slane %v5087_v3, 4  ;;  %v5129_v23 = vunpack.c.l.b16 %v5088_v30 }
 0x2ae   : > { %v4838_v50 = vpop.f32.mrf.mxu3  ;;  %v5299_v13 = vadd.f32 %v5234_v14, %v4901_v48  ;;  %6075 = vmatmul.msk.bf16.gmra.mxu1 %vm1897_vm12, %v3809_v0  ;;  %v8083_v22 = vld [vmem:[#allocation2 + $0xd4] sm:$0x1]  ;;  %v4690_v31 = vsel %vm6688_vm13, %v4685_v38, %v8060_v45 }
 0x2af   : > { %v4902_v32 = vadd.f32 %v4838_v50, %v4248_v39  ;;  %v4697_v46 = vshll.u32 %v8083_v22, 16  ;;  %v5091_v9 = vsel %vm7012_vm2, %v5089_v25, %v5090_v5  ;;  %v4733_v62 = vunpack.c.l.b16 %v4690_v31  ;;  %v4938_v25 = vld [vmem:[#allocation2 + $0xcc] sm:$0xe] }
 0x2b0   : > { %6204 = vmatmul.msk.bf16.gmra.mxu0 %vm1897_vm12, %v5146_v57  ;;  %v5335_v59 = vadd.f32 %v7812_v20, %v5299_v13  ;;  %v5130_v35 = vunpack.c.l.b16 %v5091_v9 }
 0x2b1   : > { %v4699_v58 = vrot.slane %v4697_v46, 5 }
 0x2b2   : > { %v5367_v60 = vpack.c.bf16 %v5335_v59, %v5335_v59  ;;  %v5440_v28 = vsel %vm1897_vm12, %v5335_v59, 0.0  ;;  %v5502_v12 = vmul.f32 %v5335_v59, %v5335_v59  ;;  %v5147_v45 = vpack.c.b16 %v5130_v35, %v5129_v23 }
 0x2b3   : > { %6172 = vmatmul.msk.bf16.gmra.mxu3 %vm1897_vm12, %v4749_v49  ;;  %v5441_v4 = vadd.f32 %v5440_v28, %v5439_v54  ;;  %v8087_v2 = vpop.f32.mrf.mxu1  ;;  %v4249_v54 = vadd.f32 %v4187_v11, %v3962_v1  ;;  %v4700_v61 = vsel %vm6688_vm13, %v4695_v24, %v4699_v58  ;;  %v3963_v49 = vadd.f32 %v8051_v10, %v7448_v18 }
 0x2b4   : > { %5399 = vst.msk [vmem:[%s7827_s12 + $0x28] sm:$0xf] %vm1171_vm6, %v5367_v60  ;;  %v5543_v42 = vsel %vm1897_vm12, %v5502_v12, 0.0  ;;  %v4734_v57 = vunpack.c.l.b16 %v4700_v61  ;;  %v5094_v59 = vrot.slane %v8036_v56, 5  ;;  %v6189_v60 = vrot.slane %v4938_v25, 9 }
 0x2b5   : > { %v4189_v48 = vpop.f32.mrf.mxu2  ;;  %v5544_v37 = vadd.f32 %v5543_v42, %v5542_v44  ;;  %v5236_v17 = vpop.f32.mrf.mxu0  ;;  %v5097_v18 = vrot.slane %v8083_v22, 5  ;;  %v3964_v42 = vadd.f32 %v8071_v55, %v7465_v52  ;;  %v3965_v36 = vadd.f32 %v8087_v2, %v7487_v27  ;;  %v8146_v25 = vld [vmem:[%s8273_s6] ss:$0 sm:$0xff] }
 0x2b6   : > { %v4841_v26 = vpop.f32.mrf.mxu3  ;;  %v5300_v8 = vadd.f32 %v5236_v17, %v4902_v32  ;;  %v4750_v47 = vpack.c.b16 %v4734_v57, %v4733_v62  ;;  %v4250_v51 = vadd.f32 %v4189_v48, %v3963_v49  ;;  %v5096_v28 = vrot.slane %v5094_v59, 4 }
 0x2b7   : > { %v4903_v11 = vadd.f32 %v4841_v26, %v4249_v54  ;;  %v5095_v22 = vsel %vm7012_vm2, %v6189_v60, %v5094_v59 }
 0x2b8   : > { %v5336_v21 = vadd.f32 %v7812_v20, %v5300_v8  ;;  %v5098_v17 = vsel %vm7012_vm2, %v5096_v28, %v5097_v18  ;;  %v5131_v58 = vunpack.c.l.b16 %v5095_v22 }
 0x2b9   : > { %v5132_v8 = vunpack.c.l.b16 %v5098_v17 }
 0x2ba   : > { %6156 = vmatmul.msk.bf16.gmra.mxu2 %vm1897_vm12, %v6261_v6  ;;  %v5368_v50 = vpack.c.bf16 %v5336_v21, %v5336_v21  ;;  %v5442_v3 = vsel %vm1897_vm12, %v5336_v21, 0.0  ;;  %v5503_v44 = vmul.f32 %v5336_v21, %v5336_v21 }
 0x2bb   : > { %v5443_v14 = vadd.f32 %v5442_v3, %v5441_v4  ;;  %v8106_v39 = vpop.f32.mrf.mxu1  ;;  %v5148_v35 = vpack.c.b16 %v5132_v8, %v5131_v58 }
 0x2bc   : > { %5400 = vst.msk [vmem:[%s7827_s12 + $0x2c] sm:$0xf] %vm1171_vm6, %v5368_v50  ;;  %v5545_v43 = vsel %vm1897_vm12, %v5503_v44, 0.0  ;;  %v3966_v2 = vadd.f32 %v8106_v39, %v7502_v53 }
 0x2bd   : > { %v4192_v13 = vpop.f32.mrf.mxu2  ;;  %v5546_v19 = vadd.f32 %v5545_v43, %v5544_v37  ;;  %v5239_v29 = vpop.f32.mrf.mxu0 }
 0x2be   : > { %v4843_v0 = vpop.f32.mrf.mxu3  ;;  %v5301_v32 = vadd.f32 %v5239_v29, %v4903_v11  ;;  %v4251_v9 = vadd.f32 %v4192_v13, %v3964_v42 }
 0x2bf   : > { %v4904_v4 = vadd.f32 %v4843_v0, %v4250_v51 }
 0x2c0   : > { %6205 = vmatmul.msk.bf16.gmra.mxu0 %vm1897_vm12, %v5147_v45  ;;  %v5337_v5 = vadd.f32 %v7812_v20, %v5301_v32 }
 0x2c2   : > { %v5369_v10 = vpack.c.bf16 %v5337_v5, %v5337_v5  ;;  %v5444_v12 = vsel %vm1897_vm12, %v5337_v5, 0.0  ;;  %v5504_v38 = vmul.f32 %v5337_v5, %v5337_v5 }
 0x2c3   : > { %6173 = vmatmul.msk.bf16.gmra.mxu3 %vm1897_vm12, %v4750_v47  ;;  %v5445_v56 = vadd.f32 %v5444_v12, %v5443_v14  ;;  %v3912_v24 = vpop.f32.mrf.mxu1 }
 0x2c4   : > { %5401 = vst.msk [vmem:[%s7827_s12 + $0x30] sm:$0xf] %vm1171_vm6, %v5369_v10  ;;  %v5547_v46 = vsel %vm1897_vm12, %v5504_v38, 0.0  ;;  %v3967_v38 = vadd.f32 %v3912_v24, %v7523_v7 }
 0x2c5   : > { %v4194_v26 = vpop.f32.mrf.mxu2  ;;  %v5548_v48 = vadd.f32 %v5547_v46, %v5546_v19  ;;  %v5241_v37 = vpop.f32.mrf.mxu0 }
 0x2c6   : > { %v4846_v1 = vpop.f32.mrf.mxu3  ;;  %v5302_v30 = vadd.f32 %v5241_v37, %v4904_v4  ;;  %v4252_v11 = vadd.f32 %v4194_v26, %v3965_v36 }
 0x2c7   : > { %v4905_v31 = vadd.f32 %v4846_v1, %v4251_v9 }
 0x2c8   : > { %v5338_v6 = vadd.f32 %v7812_v20, %v5302_v30 }
 0x2ca   : > { %v5370_v54 = vpack.c.bf16 %v5338_v6, %v5338_v6  ;;  %v5446_v52 = vsel %vm1897_vm12, %v5338_v6, 0.0  ;;  %v5505_v55 = vmul.f32 %v5338_v6, %v5338_v6 }
 0x2cb   : > { %v5447_v61 = vadd.f32 %v5446_v52, %v5445_v56  ;;  %v3915_v21 = vpop.f32.mrf.mxu1 }
 0x2cc   : > { %5402 = vst.msk [vmem:[%s7827_s12 + $0x34] sm:$0xf] %vm1171_vm6, %v5370_v54  ;;  %v5549_v23 = vsel %vm1897_vm12, %v5505_v55, 0.0  ;;  %v3968_v7 = vadd.f32 %v3915_v21, %v7540_v15 }
 0x2cd   : > { %v4197_v57 = vpop.f32.mrf.mxu2  ;;  %v5550_v50 = vadd.f32 %v5549_v23, %v5548_v48  ;;  %v5244_v3 = vpop.f32.mrf.mxu0 }
 0x2ce   : > { %v4848_v62 = vpop.f32.mrf.mxu3  ;;  %v5303_v44 = vadd.f32 %v5244_v3, %v4905_v31  ;;  %v4253_v51 = vadd.f32 %v4197_v57, %v3966_v2 }
 0x2cf   : > { %v4906_v0 = vadd.f32 %v4848_v62, %v4252_v11 }
 0x2d0   : > { %6206 = vmatmul.msk.bf16.gmra.mxu0 %vm1897_vm12, %v5148_v35  ;;  %v5339_v14 = vadd.f32 %v7812_v20, %v5303_v44 }
 0x2d2   : > { %v5371_v43 = vpack.c.bf16 %v5339_v14, %v5339_v14  ;;  %v5448_v45 = vsel %vm1897_vm12, %v5339_v14, 0.0  ;;  %v5506_v49 = vmul.f32 %v5339_v14, %v5339_v14 }
 0x2d3   : > { %v5449_v13 = vadd.f32 %v5448_v45, %v5447_v61  ;;  %v3917_v19 = vpop.f32.mrf.mxu1 }
 0x2d4   : > { %5403 = vst.msk [vmem:[%s7827_s12 + $0x38] sm:$0xf] %vm1171_vm6, %v5371_v43  ;;  %v5551_v27 = vsel %vm1897_vm12, %v5506_v49, 0.0  ;;  %v3969_v21 = vadd.f32 %v3917_v19, %v7562_v63 }
 0x2d5   : > { %v4199_v47 = vpop.f32.mrf.mxu2  ;;  %v5552_v59 = vadd.f32 %v5551_v27, %v5550_v50  ;;  %v5246_v32 = vpop.f32.mrf.mxu0 }
 0x2d6   : > { %v4851_v29 = vpop.f32.mrf.mxu3  ;;  %v5304_v20 = vadd.f32 %v5246_v32, %v4906_v0  ;;  %v4254_v26 = vadd.f32 %v4199_v47, %v3967_v38 }
 0x2d7   : > { %v4907_v10 = vadd.f32 %v4851_v29, %v4253_v51 }
 0x2d8   : > { %v5340_v5 = vadd.f32 %v8146_v25, %v5304_v20 }
 0x2da   : > { %v5372_v60 = vpack.c.bf16 %v5340_v5, %v5340_v5  ;;  %v5450_v28 = vsel %vm1897_vm12, %v5340_v5, 0.0  ;;  %v5507_v18 = vmul.f32 %v5340_v5, %v5340_v5 }
 0x2db   : > { %v5451_v12 = vadd.f32 %v5450_v28, %v5449_v13  ;;  %v3920_v53 = vpop.f32.mrf.mxu1 }
 0x2dc   : > { %5404 = vst.msk [vmem:[%s7827_s12 + $0x3c] sm:$0xf] %vm1171_vm6, %v5372_v60  ;;  %v5553_v39 = vsel %vm1897_vm12, %v5507_v18, 0.0  ;;  %v3970_v19 = vadd.f32 %v3920_v53, %v7577_v34 }
 0x2dd   : > { %v4202_v56 = vpop.f32.mrf.mxu2  ;;  %v5554_v46 = vadd.f32 %v5553_v39, %v5552_v59  ;;  %v5249_v42 = vpop.f32.mrf.mxu0 }
 0x2de   : > { %v4853_v4 = vpop.f32.mrf.mxu3  ;;  %v5305_v1 = vadd.f32 %v5249_v42, %v4907_v10  ;;  %v4255_v31 = vadd.f32 %v4202_v56, %v3968_v7 }
 0x2df   : > { %v4908_v30 = vadd.f32 %v4853_v4, %v4254_v26 }
 0x2e0   : > { %v5341_v48 = vadd.f32 %v8146_v25, %v5305_v1 }
 0x2e2   : > { %v5373_v37 = vpack.c.bf16 %v5341_v48, %v5341_v48  ;;  %v5452_v22 = vsel %vm1897_vm12, %v5341_v48, 0.0  ;;  %v5508_v17 = vmul.f32 %v5341_v48, %v5341_v48 }
 0x2e3   : > { %v5453_v9 = vadd.f32 %v5452_v22, %v5451_v12  ;;  %v3922_v52 = vpop.f32.mrf.mxu1 }
 0x2e4   : > { %5405 = vst.msk [vmem:[%s7827_s12 + $0x40] sm:$0xf] %vm1171_vm6, %v5373_v37  ;;  %v5555_v6 = vsel %vm1897_vm12, %v5508_v17, 0.0  ;;  %v3971_v53 = vadd.f32 %v3922_v52, %v7598_v33 }
 0x2e5   : > { %v4204_v58 = vpop.f32.mrf.mxu2  ;;  %v5556_v8 = vadd.f32 %v5555_v6, %v5554_v46  ;;  %v5251_v54 = vpop.f32.mrf.mxu0 }
 0x2e6   : > { %v4856_v24 = vpop.f32.mrf.mxu3  ;;  %v5306_v55 = vadd.f32 %v5251_v54, %v4908_v30  ;;  %v4256_v43 = vadd.f32 %v4204_v58, %v3969_v21 }
 0x2e7   : > { %v4909_v62 = vadd.f32 %v4856_v24, %v4255_v31 }
 0x2e8   : > { %v5342_v61 = vadd.f32 %v8146_v25, %v5306_v55 }
 0x2ea   : > { %v5374_v23 = vpack.c.bf16 %v5342_v61, %v5342_v61  ;;  %v5454_v35 = vsel %vm1897_vm12, %v5342_v61, 0.0  ;;  %v5509_v36 = vmul.f32 %v5342_v61, %v5342_v61 }
 0x2eb   : > { %v5455_v57 = vadd.f32 %v5454_v35, %v5453_v9  ;;  %v3925_v45 = vpop.f32.mrf.mxu1 }
 0x2ec   : > { %5406 = vst.msk [vmem:[%s7827_s12 + $0x44] sm:$0xf] %vm1171_vm6, %v5374_v23  ;;  %v5557_v15 = vsel %vm1897_vm12, %v5509_v36, 0.0  ;;  %v3972_v7 = vadd.f32 %v3925_v45, %v7615_v40 }
 0x2ed   : > { %v4207_v3 = vpop.f32.mrf.mxu2  ;;  %v5558_v44 = vadd.f32 %v5557_v15, %v5556_v8  ;;  %v5254_v11 = vpop.f32.mrf.mxu0 }
 0x2ee   : > { %v4858_v50 = vpop.f32.mrf.mxu3  ;;  %v5307_v14 = vadd.f32 %v5254_v11, %v4909_v62  ;;  %v4257_v5 = vadd.f32 %v4207_v3, %v3970_v19 }
 0x2ef   : > { %v4910_v2 = vadd.f32 %v4858_v50, %v4256_v43 }
 0x2f0   : > { %v5343_v49 = vadd.f32 %v8146_v25, %v5307_v14 }
 0x2f2   : > { %v5375_v0 = vpack.c.bf16 %v5343_v49, %v5343_v49  ;;  %v5456_v13 = vsel %vm1897_vm12, %v5343_v49, 0.0  ;;  %v5510_v27 = vmul.f32 %v5343_v49, %v5343_v49 }
 0x2f3   : > { %v5457_v29 = vadd.f32 %v5456_v13, %v5455_v57  ;;  %v3927_v28 = vpop.f32.mrf.mxu1 }
 0x2f4   : > { %5407 = vst.msk [vmem:[%s7827_s12 + $0x48] sm:$0xf] %vm1171_vm6, %v5375_v0  ;;  %v5559_v63 = vsel %vm1897_vm12, %v5510_v27, 0.0  ;;  %v3973_v40 = vadd.f32 %v3927_v28, %v7637_v41 }
 0x2f5   : > { %v4209_v59 = vpop.f32.mrf.mxu2  ;;  %v5560_v32 = vadd.f32 %v5559_v63, %v5558_v44  ;;  %v5256_v20 = vpop.f32.mrf.mxu0 }
 0x2f6   : > { %v4861_v47 = vpop.f32.mrf.mxu3  ;;  %v5308_v51 = vadd.f32 %v5256_v20, %v4910_v2  ;;  %v4258_v26 = vadd.f32 %v4209_v59, %v3971_v53 }
 0x2f7   : > { %v4911_v39 = vadd.f32 %v4861_v47, %v4257_v5 }
 0x2f8   : > { %v5344_v60 = vadd.f32 %v8146_v25, %v5308_v51 }
 0x2fa   : > { %v5376_v18 = vpack.c.bf16 %v5344_v60, %v5344_v60  ;;  %v5458_v10 = vsel %vm1897_vm12, %v5344_v60, 0.0  ;;  %v5511_v12 = vmul.f32 %v5344_v60, %v5344_v60 }
 0x2fb   : > { %v5459_v38 = vadd.f32 %v5458_v10, %v5457_v29  ;;  %v3930_v6 = vpop.f32.mrf.mxu1 }
 0x2fc   : > { %5408 = vst.msk [vmem:[%s7827_s12 + $0x4c] sm:$0xf] %vm1171_vm6, %v5376_v18  ;;  %v5561_v34 = vsel %vm1897_vm12, %v5511_v12, 0.0  ;;  %v3974_v2 = vadd.f32 %v3930_v6, %v7652_v16  ;;  %v8312_v12 = vld [vmem:[#allocation11_spill] sm:$0xff] }
 0x2fd   : > { %v4212_v56 = vpop.f32.mrf.mxu2  ;;  %v5562_v46 = vadd.f32 %v5561_v34, %v5560_v32  ;;  %v5259_v42 = vpop.f32.mrf.mxu0 }
 0x2fe   : > { %v4863_v4 = vpop.f32.mrf.mxu3  ;;  %v5309_v1 = vadd.f32 %v5259_v42, %v4911_v39  ;;  %v4259_v55 = vadd.f32 %v4212_v56, %v3972_v7 }
 0x2ff   : > { %v4912_v30 = vadd.f32 %v4863_v4, %v4258_v26 }
 0x300   : > { %v5345_v48 = vadd.f32 %v8146_v25, %v5309_v1 }
 0x302   : > { %v5377_v37 = vpack.c.bf16 %v5345_v48, %v5345_v48  ;;  %v5460_v22 = vsel %vm1897_vm12, %v5345_v48, 0.0  ;;  %v5512_v17 = vmul.f32 %v5345_v48, %v5345_v48 }
 0x303   : > { %v5461_v9 = vadd.f32 %v5460_v22, %v5459_v38  ;;  %v3932_v44 = vpop.f32.mrf.mxu1 }
 0x304   : > { %5409 = vst.msk [vmem:[%s7827_s12 + $0x50] sm:$0xf] %vm1171_vm6, %v5377_v37  ;;  %v5563_v33 = vsel %vm1897_vm12, %v5512_v17, 0.0  ;;  %v3975_v39 = vadd.f32 %v3932_v44, %v8312_v12  ;;  %v8316_v12 = vld [vmem:[#allocation4_spill] sm:$0xff] }
 0x305   : > { %v4214_v58 = vpop.f32.mrf.mxu2  ;;  %v5564_v8 = vadd.f32 %v5563_v33, %v5562_v46  ;;  %v5261_v54 = vpop.f32.mrf.mxu0 }
 0x306   : > { %v4866_v24 = vpop.f32.mrf.mxu3  ;;  %v5310_v52 = vadd.f32 %v5261_v54, %v4912_v30  ;;  %v4260_v14 = vadd.f32 %v4214_v58, %v3973_v40 }
 0x307   : > { %v4913_v36 = vadd.f32 %v4866_v24, %v4259_v55 }
 0x308   : > { %v5346_v31 = vadd.f32 %v8146_v25, %v5310_v52 }
 0x30a   : > { %v5378_v61 = vpack.c.bf16 %v5346_v31, %v5346_v31  ;;  %v5462_v23 = vsel %vm1897_vm12, %v5346_v31, 0.0  ;;  %v5513_v35 = vmul.f32 %v5346_v31, %v5346_v31 }
 0x30b   : > { %v5463_v62 = vadd.f32 %v5462_v23, %v5461_v9  ;;  %v3935_v20 = vpop.f32.mrf.mxu1  ;;  %v8313_v9 = vld [vmem:[#allocation12_spill] sm:$0xff] }
 0x30c   : > { %5410 = vst.msk [vmem:[%s7827_s12 + $0x54] sm:$0xf] %vm1171_vm6, %v5378_v61  ;;  %v5565_v57 = vsel %vm1897_vm12, %v5513_v35, 0.0  ;;  %v3976_v6 = vadd.f32 %v3935_v20, %v8313_v9  ;;  %v8317_v9 = vld [vmem:[#allocation14_spill] sm:$0xff] }
 0x30d   : > { %v4217_v21 = vpop.f32.mrf.mxu2  ;;  %v5566_v50 = vadd.f32 %v5565_v57, %v5564_v8  ;;  %v5264_v3 = vpop.f32.mrf.mxu0  ;;  %v8314_v57 = vld [vmem:[#allocation13_spill] sm:$0xff] }
 0x30e   : > { %v4868_v15 = vpop.f32.mrf.mxu3  ;;  %v5311_v11 = vadd.f32 %v5264_v3, %v4913_v36  ;;  %v4261_v32 = vadd.f32 %v4217_v21, %v3974_v2 }
 0x30f   : > { %v4914_v13 = vadd.f32 %v4868_v15, %v4260_v14 }
 0x310   : > { %v5347_v43 = vadd.f32 %v8146_v25, %v5311_v11 }
 0x312   : > { %v5379_v45 = vpack.c.bf16 %v5347_v43, %v5347_v43  ;;  %v5464_v49 = vsel %vm1897_vm12, %v5347_v43, 0.0  ;;  %v5514_v0 = vmul.f32 %v5347_v43, %v5347_v43 }
 0x313   : > { %v5465_v27 = vadd.f32 %v5464_v49, %v5463_v62  ;;  %v3937_v1 = vpop.f32.mrf.mxu1 }
 0x314   : > { %5411 = vst.msk [vmem:[%s7827_s12 + $0x58] sm:$0xf] %vm1171_vm6, %v5379_v45  ;;  %v5567_v41 = vsel %vm1897_vm12, %v5514_v0, 0.0  ;;  %v3977_v40 = vadd.f32 %v3937_v1, %v8314_v57  ;;  %v8318_v57 = vld [vmem:[#allocation5_spill] sm:$0xff] }
 0x315   : > { %v4219_v63 = vpop.f32.mrf.mxu2  ;;  %v5568_v19 = vadd.f32 %v5567_v41, %v5566_v50  ;;  %v5266_v47 = vpop.f32.mrf.mxu0  ;;  %v8315_v41 = vld [vmem:[#allocation3_spill] sm:$0xff] }
 0x316   : > { %v4871_v29 = vpop.f32.mrf.mxu3  ;;  %v5312_v59 = vadd.f32 %v5266_v47, %v4914_v13  ;;  %v4262_v46 = vadd.f32 %v4219_v63, %v3975_v39 }
 0x317   : > { %v4915_v18 = vadd.f32 %v4871_v29, %v4261_v32 }
 0x318   : > { %v5348_v51 = vadd.f32 %v8146_v25, %v5312_v59 }
 0x31a   : > { %v5380_v5 = vpack.c.bf16 %v5348_v51, %v5348_v51  ;;  %v5466_v60 = vsel %vm1897_vm12, %v5348_v51, 0.0  ;;  %v5515_v28 = vmul.f32 %v5348_v51, %v5348_v51 }
 0x31b   : > { %v5467_v10 = vadd.f32 %v5466_v60, %v5465_v27  ;;  %v3940_v36 = vpop.f32.mrf.mxu1 }
 0x31c   : > { %5412 = vst.msk [vmem:[%s7827_s12 + $0x5c] sm:$0xf] %vm1171_vm6, %v5380_v5  ;;  %v5569_v16 = vsel %vm1897_vm12, %v5515_v28, 0.0  ;;  %v3978_v2 = vadd.f32 %v3940_v36, %v8315_v41 }
 0x31d   : > { %v4222_v34 = vpop.f32.mrf.mxu2  ;;  %v5570_v53 = vadd.f32 %v5569_v16, %v5568_v19  ;;  %v5269_v4 = vpop.f32.mrf.mxu0 }
 0x31e   : > { %v4873_v38 = vpop.f32.mrf.mxu3  ;;  %v5313_v56 = vadd.f32 %v5269_v4, %v4915_v18  ;;  %v4263_v54 = vadd.f32 %v4222_v34, %v3976_v6 }
 0x31f   : > { %v4916_v22 = vadd.f32 %v4873_v38, %v4262_v46 }
 0x320   : > { %v5349_v42 = vadd.f32 %v8146_v25, %v5313_v56 }
 0x322   : > { %v5381_v26 = vpack.c.bf16 %v5349_v42, %v5349_v42  ;;  %v5468_v48 = vsel %vm1897_vm12, %v5349_v42, 0.0  ;;  %v5516_v37 = vmul.f32 %v5349_v42, %v5349_v42 }
 0x323   : > { %v5469_v17 = vadd.f32 %v5468_v48, %v5467_v10  ;;  %v3942_v47 = vpop.f32.mrf.mxu1 }
 0x324   : > { %5413 = vst.msk [vmem:[%s7827_s12 + $0x60] sm:$0xf] %vm1171_vm6, %v5381_v26  ;;  %v5571_v30 = vsel %vm1897_vm12, %v5516_v37, 0.0  ;;  %v3979_v39 = vadd.f32 %v3942_v47, %v8316_v12 }
 0x325   : > { %v4224_v7 = vpop.f32.mrf.mxu2  ;;  %v5572_v24 = vadd.f32 %v5571_v30, %v5570_v53  ;;  %v5271_v58 = vpop.f32.mrf.mxu0 }
 0x326   : > { %v4876_v33 = vpop.f32.mrf.mxu3  ;;  %v5314_v8 = vadd.f32 %v5271_v58, %v4916_v22  ;;  %v4264_v11 = vadd.f32 %v4224_v7, %v3977_v40 }
 0x327   : > { %v4917_v23 = vadd.f32 %v4876_v33, %v4263_v54 }
 0x328   : > { %v5350_v52 = vadd.f32 %v8146_v25, %v5314_v8 }
 0x32a   : > { %v5382_v55 = vpack.c.bf16 %v5350_v52, %v5350_v52  ;;  %v5470_v31 = vsel %vm1897_vm12, %v5350_v52, 0.0  ;;  %v5517_v61 = vmul.f32 %v5350_v52, %v5350_v52 }
 0x32b   : > { %v5471_v35 = vadd.f32 %v5470_v31, %v5469_v17  ;;  %v3945_v46 = vpop.f32.mrf.mxu1 }
 0x32c   : > { %5414 = vst.msk [vmem:[%s7827_s12 + $0x64] sm:$0xf] %vm1171_vm6, %v5382_v55  ;;  %v5573_v62 = vsel %vm1897_vm12, %v5517_v61, 0.0  ;;  %v3980_v6 = vadd.f32 %v3945_v46, %v8317_v9 }
 0x32d   : > { %v5574_v21 = vadd.f32 %v5573_v62, %v5572_v24  ;;  %v5274_v50 = vpop.f32.mrf.mxu0  ;;  %v4227_v3 = vpop.f32.mrf.mxu2 }
 0x32e   : > { %v4878_v15 = vpop.f32.mrf.mxu3  ;;  %v5315_v44 = vadd.f32 %v5274_v50, %v4917_v23  ;;  %v4265_v32 = vadd.f32 %v4227_v3, %v3978_v2 }
 0x32f   : > { %v4918_v0 = vadd.f32 %v4878_v15, %v4264_v11 }
 0x330   : > { %v5351_v14 = vadd.f32 %v8146_v25, %v5315_v44 }
 0x332   : > { %v5383_v43 = vpack.c.bf16 %v5351_v14, %v5351_v14  ;;  %v5472_v45 = vsel %vm1897_vm12, %v5351_v14, 0.0  ;;  %v5518_v49 = vmul.f32 %v5351_v14, %v5351_v14 }
 0x333   : > { %v5473_v13 = vadd.f32 %v5472_v45, %v5471_v35  ;;  %v3947_v52 = vpop.f32.mrf.mxu1 }
 0x334   : > { %5415 = vst.msk [vmem:[%s7827_s12 + $0x68] sm:$0xf] %vm1171_vm6, %v5383_v43  ;;  %v5575_v27 = vsel %vm1897_vm12, %v5518_v49, 0.0  ;;  %v3981_v40 = vadd.f32 %v3947_v52, %v8318_v57 }
 0x335   : > { %v5576_v63 = vadd.f32 %v5575_v27, %v5574_v21  ;;  %v5276_v19 = vpop.f32.mrf.mxu0  ;;  %v4229_v20 = vpop.f32.mrf.mxu2 }
 0x336   : > { %v4881_v29 = vpop.f32.mrf.mxu3  ;;  %v5316_v59 = vadd.f32 %v5276_v19, %v4918_v0  ;;  %v4266_v56 = vadd.f32 %v4229_v20, %v3979_v39 }
 0x337   : > { %v4919_v18 = vadd.f32 %v4881_v29, %v4265_v32 }
 0x338   : > { %v5352_v51 = vadd.f32 %v8146_v25, %v5316_v59 }
 0x33a   : > { %v5384_v5 = vpack.c.bf16 %v5352_v51, %v5352_v51  ;;  %v5474_v60 = vsel %vm1897_vm12, %v5352_v51, 0.0  ;;  %v5519_v28 = vmul.f32 %v5352_v51, %v5352_v51 }
 0x33b   : > { %v5475_v10 = vadd.f32 %v5474_v60, %v5473_v13 }
 0x33c   : > { %5416 = vst.msk [vmem:[%s7827_s12 + $0x6c] sm:$0xf] %vm1171_vm6, %v5384_v5  ;;  %v5577_v16 = vsel %vm1897_vm12, %v5519_v28, 0.0 }
 0x33d   : > { %v5578_v38 = vadd.f32 %v5577_v16, %v5576_v63  ;;  %v5279_v34 = vpop.f32.mrf.mxu0  ;;  %v4232_v1 = vpop.f32.mrf.mxu2 }
 0x33e   : > { %v4883_v53 = vpop.f32.mrf.mxu3  ;;  %v5317_v4 = vadd.f32 %v5279_v34, %v4919_v18  ;;  %v4267_v58 = vadd.f32 %v4232_v1, %v3980_v6 }
 0x33f   : > { %v4920_v22 = vadd.f32 %v4883_v53, %v4266_v56 }
 0x340   : > { %v5353_v42 = vadd.f32 %v8146_v25, %v5317_v4 }
 0x342   : > { %v5385_v26 = vpack.c.bf16 %v5353_v42, %v5353_v42  ;;  %v5476_v48 = vsel %vm1897_vm12, %v5353_v42, 0.0  ;;  %v5520_v37 = vmul.f32 %v5353_v42, %v5353_v42 }
 0x343   : > { %v5477_v17 = vadd.f32 %v5476_v48, %v5475_v10 }
 0x344   : > { %5417 = vst.msk [vmem:[%s7827_s12 + $0x70] sm:$0xf] %vm1171_vm6, %v5385_v26  ;;  %v5579_v30 = vsel %vm1897_vm12, %v5520_v37, 0.0 }
 0x345   : > { %v5580_v33 = vadd.f32 %v5579_v30, %v5578_v38  ;;  %v5281_v7 = vpop.f32.mrf.mxu0  ;;  %v4234_v36 = vpop.f32.mrf.mxu2 }
 0x346   : > { %v5318_v24 = vadd.f32 %v5281_v7, %v4920_v22  ;;  %v4886_v8 = vpop.f32.mrf.mxu3  ;;  %v4268_v3 = vadd.f32 %v4234_v36, %v3981_v40 }
 0x347   : > { %v4921_v23 = vadd.f32 %v4886_v8, %v4267_v58 }
 0x348   : > { %v5354_v54 = vadd.f32 %v8146_v25, %v5318_v24 }
 0x34a   : > { %v5386_v55 = vpack.c.bf16 %v5354_v54, %v5354_v54  ;;  %v5478_v31 = vsel %vm1897_vm12, %v5354_v54, 0.0  ;;  %v5521_v61 = vmul.f32 %v5354_v54, %v5354_v54 }
 0x34b   : > { %v5479_v35 = vadd.f32 %v5478_v31, %v5477_v17 }
 0x34c   : > { %5418 = vst.msk [vmem:[%s7827_s12 + $0x74] sm:$0xf] %vm1171_vm6, %v5386_v55  ;;  %v5581_v62 = vsel %vm1897_vm12, %v5521_v61, 0.0 }
 0x34d   : > { %v5582_v15 = vadd.f32 %v5581_v62, %v5580_v33  ;;  %v5284_v21 = vpop.f32.mrf.mxu0 }
 0x34e   : > { %v5319_v50 = vadd.f32 %v5284_v21, %v4921_v23  ;;  %v4888_v11 = vpop.f32.mrf.mxu3 }
 0x34f   : > { %v4922_v49 = vadd.f32 %v4888_v11, %v4268_v3 }
 0x350   : > { %v5355_v44 = vadd.f32 %v8146_v25, %v5319_v50 }
 0x352   : > { %v5387_v14 = vpack.c.bf16 %v5355_v44, %v5355_v44  ;;  %v5480_v43 = vsel %vm1897_vm12, %v5355_v44, 0.0  ;;  %v5522_v45 = vmul.f32 %v5355_v44, %v5355_v44 }
 0x353   : > { %v5481_v0 = vadd.f32 %v5480_v43, %v5479_v35 }
 0x354   : > { %5419 = vst.msk [vmem:[%s7827_s12 + $0x78] sm:$0xf] %vm1171_vm6, %v5387_v14  ;;  %v5583_v13 = vsel %vm1897_vm12, %v5522_v45, 0.0 }
 0x355   : > { %v5584_v27 = vadd.f32 %v5583_v13, %v5582_v15  ;;  %v5286_v41 = vpop.f32.mrf.mxu0 }
 0x356   : > { %v5320_v2 = vadd.f32 %v5286_v41, %v4922_v49 }
 0x358   : > { %v5356_v29 = vadd.f32 %v8146_v25, %v5320_v2 }
 0x35a   : > { %v5388_v63 = vpack.c.bf16 %v5356_v29, %v5356_v29  ;;  %v5482_v19 = vsel %vm1897_vm12, %v5356_v29, 0.0  ;;  %v5523_v47 = vmul.f32 %v5356_v29, %v5356_v29 }
 0x35b   : > { %v5483_v59 = vadd.f32 %v5482_v19, %v5481_v0 }
 0x35c   : > { %5420 = vst.msk [vmem:[%s7827_s12 + $0x7c] sm:$0xf] %vm1171_vm6, %v5388_v63  ;;  %v5585_v32 = vsel %vm1897_vm12, %v5523_v47, 0.0 }
 0x35d   : > { %v5484_v20 = vrot.slane %v5483_v59, 4  ;;  %v5586_v51 = vadd.f32 %v5585_v32, %v5584_v27 }
 0x35f   : > { %v5485_v5 = vadd.f32 %v5484_v20, %v5483_v59  ;;  %v5587_v60 = vrot.slane %v5586_v51, 4 }
 0x361   : > { %v5486_v28 = vrot.slane %v5485_v5, 2  ;;  %v5588_v18 = vadd.f32 %v5587_v60, %v5586_v51 }
 0x363   : > { %v5487_v10 = vadd.f32 %v5486_v28, %v5485_v5  ;;  %v5589_v16 = vrot.slane %v5588_v18, 2 }
 0x365   : > { %v5488_v25 = vrot.slane %v5487_v10, 1  ;;  %v5590_v12 = vadd.f32 %v5589_v16, %v5588_v18 }
 0x367   : > { %v5489_v39 = vadd.f32 %v5488_v25, %v5487_v10  ;;  %v5591_v38 = vrot.slane %v5590_v12, 1 }
 0x369   : > { %5491 = vst.msk [vmem:[%s527_s18] sm:$0x1] %vm535_vm1, %v5489_v39  ;;  %v5592_v34 = vadd.f32 %v5591_v38, %v5590_v12 }
 0x36b   : > { %5593 = vst.msk [vmem:[%s533_s21] sm:$0x1] %vm535_vm1, %v5592_v34 }
 0x36c PF: > { %s20_s30 = sadd.s32 1, %s6455_s30   ;;  %s8319_s28 = smov %s6451_s29 }
 0x36d   : > { %p17_p5 = scmp.ge.s32.totalorder %s20_s30, 4   ;;  %s8320_s29 = smov %s8322_s10 }
 0x36f   :  { %19 = sbr.rel (!%p17_p5) target bundleno = 2 (0x2), region = 136 }

</bundles_post_ra>
